<compile_context>
chip_gen: v5e
topology: v5e:2x2
jax: 0.10.0
libtpu: 0.0.40
codegen_flags: <defaults>
</compile_context>

<pallas_src>
import functools
import math

import jax
import jax.numpy as jnp
import numpy as np
from jax import lax
from jax.experimental import pallas as pl
from jax.experimental.pallas import tpu as pltpu


def _round_up(v: int, m: int) -> int:
    return ((v + m - 1) // m) * m


# ---------------------------------------------------------------------------
# Parameter init (matches the PyTorch __init__: xavier_uniform weights, zero
# biases) and packing into padded, transposed, gate-reordered kernel operands.
# ---------------------------------------------------------------------------
def init_lstm_regressor_params(key, input_size, hidden_size, num_layers,
                               output_size=1):
    params = {"layers": [], "fc_w": None, "fc_b": None}
    for l in range(num_layers):
        in_l = input_size if l == 0 else hidden_size
        key, k1, k2 = jax.random.split(key, 3)
        b_ih = math.sqrt(6.0 / (in_l + 4 * hidden_size))
        w_ih = jax.random.uniform(k1, (4 * hidden_size, in_l),
                                  jnp.float32, -b_ih, b_ih)
        b_hh = math.sqrt(6.0 / (hidden_size + 4 * hidden_size))
        w_hh = jax.random.uniform(k2, (4 * hidden_size, hidden_size),
                                  jnp.float32, -b_hh, b_hh)
        bias_ih = jnp.zeros((4 * hidden_size,), jnp.float32)
        bias_hh = jnp.zeros((4 * hidden_size,), jnp.float32)
        params["layers"].append((w_ih, w_hh, bias_ih, bias_hh))
    key, kf = jax.random.split(key)
    b_fc = math.sqrt(6.0 / (hidden_size + output_size))
    params["fc_w"] = jax.random.uniform(kf, (output_size, hidden_size),
                                        jnp.float32, -b_fc, b_fc)
    params["fc_b"] = jnp.zeros((output_size,), jnp.float32)
    return params


def _pack_params(params, input_size, hidden_size, num_layers, output_size,
                 weight_dtype):
    """Transpose to [in, 4H], reorder gates (i,f,g,o)->(i,f,o,g), zero-pad to
    lane-aligned shapes."""
    H = hidden_size
    Hp = _round_up(H, 128)
    Ip = _round_up(input_size, 128)
    Op = _round_up(output_size, 128)
    perm = np.array([0, 1, 3, 2])  # i, f, o, g

    flat = []
    for l, (w_ih, w_hh, b_ih, b_hh) in enumerate(params["layers"]):
        in_l = input_size if l == 0 else H
        in_p = Ip if l == 0 else Hp

        w = w_ih.reshape(4, H, in_l)[perm]
        w = jnp.pad(w, ((0, 0), (0, Hp - H), (0, in_p - in_l)))
        w_ih_t = jnp.transpose(w.reshape(4 * Hp, in_p)).astype(weight_dtype)

        w = w_hh.reshape(4, H, H)[perm]
        w = jnp.pad(w, ((0, 0), (0, Hp - H), (0, Hp - H)))
        w_hh_t = jnp.transpose(w.reshape(4 * Hp, Hp)).astype(weight_dtype)

        b = (b_ih + b_hh).reshape(4, H)[perm]
        b = jnp.pad(b, ((0, 0), (0, Hp - H))).reshape(1, 4 * Hp)

        flat += [w_ih_t, w_hh_t, b.astype(jnp.float32)]

    fc_w = jnp.pad(params["fc_w"],
                   ((0, Op - output_size), (0, Hp - H)))
    flat.append(jnp.transpose(fc_w).astype(weight_dtype))          # [Hp, Op]
    fc_b = jnp.pad(params["fc_b"], (0, Op - output_size)).reshape(1, Op)
    flat.append(fc_b.astype(jnp.float32))                          # [1, Op]
    return flat, Ip, Hp, Op


# ---------------------------------------------------------------------------
# Kernel
# ---------------------------------------------------------------------------
def _make_lstm_kernel(num_layers, seq_len, bb, ip, hp, weight_dtype):
    L, T, G = num_layers, seq_len, 4 * hp

    def _cast(v):
        return v.astype(weight_dtype) if v.dtype != weight_dtype else v

    def kernel(*refs):
        x_ref = refs[0]
        layer_refs = refs[1:1 + 3 * L]
        fc_w_ref = refs[1 + 3 * L]
        fc_b_ref = refs[2 + 3 * L]
        out_ref = refs[3 + 3 * L]
        seq_buf, gin_buf, h_buf, c_buf = refs[4 + 3 * L:]

        for l in range(L):
            w_ih_ref = layer_refs[3 * l]
            w_hh_ref = layer_refs[3 * l + 1]
            bias_ref = layer_refs[3 * l + 2]

            # Input path of the whole layer as ONE big MXU matmul.
            if l == 0:
                xin = x_ref[...].reshape(T * bb, ip)
            else:
                xin = seq_buf[...].reshape(T * bb, hp)
            gin = jnp.dot(_cast(xin), w_ih_ref[...],
                          preferred_element_type=jnp.float32) + bias_ref[...]
            gin_buf[...] = gin.reshape(T, bb, G)

            h_buf[...] = jnp.zeros_like(h_buf)
            c_buf[...] = jnp.zeros_like(c_buf)
            write_seq = l < L - 1   # top layer: skip dead hidden-seq stores

            def step(t, carry, w_hh_ref=w_hh_ref, write_seq=write_seq):
                gates = gin_buf[t] + jnp.dot(
                    _cast(h_buf[...]), w_hh_ref[...],
                    preferred_element_type=jnp.float32)          # [bb, 4Hp]
                sig = jax.nn.sigmoid(gates[:, :3 * hp])          # i | f | o
                i_g = sig[:, 0 * hp:1 * hp]
                f_g = sig[:, 1 * hp:2 * hp]
                o_g = sig[:, 2 * hp:3 * hp]
                g_g = jnp.tanh(gates[:, 3 * hp:])
                c_new = f_g * c_buf[...] + i_g * g_g
                h_new = o_g * jnp.tanh(c_new)
                c_buf[...] = c_new
                h_buf[...] = h_new
                if write_seq:
                    seq_buf[t] = h_new
                return carry

            lax.fori_loop(0, T, step, 0, unroll=(T <= 16))

        # fc on the last hidden state of the top layer (lane-padded output).
        out_ref[...] = (
            jnp.dot(_cast(h_buf[...]), fc_w_ref[...],
                    preferred_element_type=jnp.float32) + fc_b_ref[...])

    return kernel


# ---------------------------------------------------------------------------
# Wrapper
# ---------------------------------------------------------------------------
def lstm_regressor_forward(x, params, hidden_size, num_layers, output_size=1,
                           weight_dtype=jnp.float32):
    """x: [B, T, I] or [B, I] -> [B] (output_size == 1) or [B, O]."""
    if x.ndim == 2:
        x = x[:, None, :]                       # matches torch unsqueeze(1)
    x = x.astype(jnp.float32)
    B, T, I = x.shape
    H, O = hidden_size, output_size

    Bp = _round_up(B, 8)
    flat, Ip, Hp, Op = _pack_params(params, I, H, num_layers, O, weight_dtype)

    # time-major, zero-padded [T, Bp, Ip]
    xt = jnp.transpose(x, (1, 0, 2))
    xt = jnp.pad(xt, ((0, 0), (0, Bp - B), (0, Ip - I)))

    BB = 8                                      # batch block (f32 sublane)
    grid = (Bp // BB,)
    seq_T = T if num_layers > 1 else 1

    kernel = _make_lstm_kernel(num_layers, T, BB, Ip, Hp, weight_dtype)

    in_specs = [pl.BlockSpec((T, BB, Ip), lambda b: (0, b, 0))]
    for p in flat:
        in_specs.append(pl.BlockSpec(p.shape, lambda b: (0, 0)))
    out_specs = pl.BlockSpec((BB, Op), lambda b: (b, 0))

    scratch_shapes = [
        pltpu.VMEM((seq_T, BB, Hp), jnp.float32),    # layer->layer hidden seq
        pltpu.VMEM((T, BB, 4 * Hp), jnp.float32),    # precomputed input gates
        pltpu.VMEM((BB, Hp), jnp.float32),           # h_t
        pltpu.VMEM((BB, Hp), jnp.float32),           # c_t
    ]

    # VMEM budget: pipelined inputs/outputs are double-buffered.
    io_bytes = int(xt.size) * 4 + BB * Op * 4
    io_bytes += sum(int(np.prod(p.shape)) * p.dtype.itemsize for p in flat)
    scratch_bytes = (seq_T * BB * Hp + T * BB * 4 * Hp + 2 * BB * Hp) * 4
    vmem_limit = int(min(64 << 20,
                         max(32 << 20, 2 * io_bytes + scratch_bytes + (4 << 20))))

    out = pl.pallas_call(
        kernel,
        out_shape=jax.ShapeDtypeStruct((Bp, Op), jnp.float32),
        grid=grid,
        in_specs=in_specs,
        out_specs=out_specs,
        scratch_shapes=scratch_shapes,
        compiler_params=pltpu.CompilerParams(
            dimension_semantics=("parallel",),
            vmem_limit_bytes=vmem_limit,
        ),
    )(xt, *flat)

    out = out[:B, :O]
    if O == 1:
        out = out[:, 0]
    return out


# ---------------------------------------------------------------------------
# Pure-JAX reference (same math, lax.scan) for the correctness check.
# ---------------------------------------------------------------------------
def _reference_forward(x, params, hidden_size, num_layers, output_size=1):
    if x.ndim == 2:
        x = x[:, None, :]
    B, T, _ = x.shape
    H = hidden_size
    seq = x.astype(jnp.float32)
    for l in range(num_layers):
        w_ih, w_hh, b_ih, b_hh = params["layers"][l]

        def cell(carry, x_t, w_ih=w_ih, w_hh=w_hh, b=b_ih + b_hh):
            h, c = carry
            g = x_t @ w_ih.T + h @ w_hh.T + b
            i = jax.nn.sigmoid(g[:, 0 * H:1 * H])
            f = jax.nn.sigmoid(g[:, 1 * H:2 * H])
            gg = jnp.tanh(g[:, 2 * H:3 * H])
            o = jax.nn.sigmoid(g[:, 3 * H:4 * H])
            c = f * c + i * gg
            h = o * jnp.tanh(c)
            return (h, c), h

        h0 = jnp.zeros((B, H), jnp.float32)
        c0 = jnp.zeros((B, H), jnp.float32)
        (_, _), hs = lax.scan(cell, (h0, c0), jnp.transpose(seq, (1, 0, 2)))
        seq = jnp.transpose(hs, (1, 0, 2))
    out = seq[:, -1, :] @ params["fc_w"].T + params["fc_b"]
    if output_size == 1:
        out = out[:, 0]
    return out


if __name__ == "__main__":
    B, T = 2, 8
    input_size, hidden_size, num_layers, output_size = 16, 32, 2, 1

    key = jax.random.PRNGKey(0)
    kx, kp = jax.random.split(key)
    x = jax.random.normal(kx, (B, T, input_size), jnp.float32)
    params = init_lstm_regressor_params(kp, input_size, hidden_size,
                                        num_layers, output_size)

    out = lstm_regressor_forward(x, params, hidden_size, num_layers,
                                 output_size)
    out = jax.block_until_ready(out)

    ref = _reference_forward(x, params, hidden_size, num_layers, output_size)
    np.testing.assert_allclose(np.asarray(out), np.asarray(ref),
                               rtol=1e-3, atol=1e-3)

    print("KERNEL_OK")
</pallas_src>

<mosaic_0001>
module attributes {stable_mosaic.version = 11 : i64} {
  func.func @kernel(%arg0: i32, %arg1: memref<8x8x128xf32, #tpu.memory_space<vmem>>, %arg2: memref<128x512xf32, #tpu.memory_space<vmem>>, %arg3: memref<128x512xf32, #tpu.memory_space<vmem>>, %arg4: memref<1x512xf32, #tpu.memory_space<vmem>>, %arg5: memref<128x512xf32, #tpu.memory_space<vmem>>, %arg6: memref<128x512xf32, #tpu.memory_space<vmem>>, %arg7: memref<1x512xf32, #tpu.memory_space<vmem>>, %arg8: memref<128x128xf32, #tpu.memory_space<vmem>>, %arg9: memref<1x128xf32, #tpu.memory_space<vmem>>, %arg10: memref<8x128xf32, #tpu.memory_space<vmem>>, %arg11: memref<8x8x128xf32, #tpu.memory_space<vmem>>, %arg12: memref<8x8x512xf32, #tpu.memory_space<vmem>>, %arg13: memref<8x128xf32, #tpu.memory_space<vmem>>, %arg14: memref<8x128xf32, #tpu.memory_space<vmem>>) attributes {dimension_semantics = [#tpu.dimension_semantics<parallel>], iteration_bounds = array<i64: 1>, scalar_prefetch = 0 : i64, scratch_operands = 4 : i64, tpu.core_type = #tpu.core_type<tc>, window_params = [{transform_indices = @transform_0, window_bounds = array<i64: 8, 8, 128>}, {pipeline_mode = #tpu.pipeline_mode<synchronous>, transform_indices = @transform_1, window_bounds = array<i64: 128, 512>}, {pipeline_mode = #tpu.pipeline_mode<synchronous>, transform_indices = @transform_2, window_bounds = array<i64: 128, 512>}, {pipeline_mode = #tpu.pipeline_mode<synchronous>, transform_indices = @transform_3, window_bounds = array<i64: 1, 512>}, {pipeline_mode = #tpu.pipeline_mode<synchronous>, transform_indices = @transform_4, window_bounds = array<i64: 128, 512>}, {pipeline_mode = #tpu.pipeline_mode<synchronous>, transform_indices = @transform_5, window_bounds = array<i64: 128, 512>}, {pipeline_mode = #tpu.pipeline_mode<synchronous>, transform_indices = @transform_6, window_bounds = array<i64: 1, 512>}, {pipeline_mode = #tpu.pipeline_mode<synchronous>, transform_indices = @transform_7, window_bounds = array<i64: 128, 128>}, {pipeline_mode = #tpu.pipeline_mode<synchronous>, transform_indices = @transform_8, window_bounds = array<i64: 1, 128>}, {transform_indices = @transform_9, window_bounds = array<i64: 8, 128>}]} {
    %c0 = arith.constant 0 : index
    %c0_0 = arith.constant 0 : index
    %c0_1 = arith.constant 0 : index
    %0 = vector.load %arg1[%c0, %c0_0, %c0_1] : memref<8x8x128xf32, #tpu.memory_space<vmem>>, vector<8x8x128xf32>
    %1 = vector.shape_cast %0 : vector<8x8x128xf32> to vector<64x128xf32>
    %c0_2 = arith.constant 0 : index
    %c0_3 = arith.constant 0 : index
    %2 = vector.load %arg2[%c0_2, %c0_3] : memref<128x512xf32, #tpu.memory_space<vmem>>, vector<128x512xf32>
    %cst = arith.constant dense<0.000000e+00> : vector<64x512xf32>
    %3 = tpu.matmul %1, %2, %cst {dimension_numbers = #tpu.dot_dimension_numbers<[1], [0], [0], [1], [0, 0, 1, 1], [], []>} : vector<64x128xf32>, vector<128x512xf32>, vector<64x512xf32> -> vector<64x512xf32>
    %c0_4 = arith.constant 0 : index
    %c0_5 = arith.constant 0 : index
    %4 = vector.load %arg4[%c0_4, %c0_5] : memref<1x512xf32, #tpu.memory_space<vmem>>, vector<1x512xf32>
    %5 = vector.broadcast %4 : vector<1x512xf32> to vector<64x512xf32>
    %6 = arith.addf %3, %5 : vector<64x512xf32>
    %7 = vector.shape_cast %6 : vector<64x512xf32> to vector<8x8x512xf32>
    %c0_6 = arith.constant 0 : index
    %c0_7 = arith.constant 0 : index
    %c0_8 = arith.constant 0 : index
    %8 = vector.load %arg12[%c0_6, %c0_7, %c0_8] : memref<8x8x512xf32, #tpu.memory_space<vmem>>, vector<8x8x512xf32>
    tpu.vector_store %arg12[%c0_6, %c0_7, %c0_8], %7 {strides = array<i32>} : memref<8x8x512xf32, #tpu.memory_space<vmem>>, vector<8x8x512xf32>,
    %cst_9 = arith.constant 0.000000e+00 : f32
    %9 = vector.broadcast %cst_9 : f32 to vector<8x128xf32>
    %c0_10 = arith.constant 0 : index
    %c0_11 = arith.constant 0 : index
    %10 = vector.load %arg13[%c0_10, %c0_11] : memref<8x128xf32, #tpu.memory_space<vmem>>, vector<8x128xf32>
    tpu.vector_store %arg13[%c0_10, %c0_11], %9 {strides = array<i32>} : memref<8x128xf32, #tpu.memory_space<vmem>>, vector<8x128xf32>,
    %cst_12 = arith.constant 0.000000e+00 : f32
    %11 = vector.broadcast %cst_12 : f32 to vector<8x128xf32>
    %c0_13 = arith.constant 0 : index
    %c0_14 = arith.constant 0 : index
    %12 = vector.load %arg14[%c0_13, %c0_14] : memref<8x128xf32, #tpu.memory_space<vmem>>, vector<8x128xf32>
    tpu.vector_store %arg14[%c0_13, %c0_14], %11 {strides = array<i32>} : memref<8x128xf32, #tpu.memory_space<vmem>>, vector<8x128xf32>,
    %c0_i32 = arith.constant 0 : i32
    %13 = arith.index_cast %c0_i32 : i32 to index
    %c0_15 = arith.constant 0 : index
    %c0_16 = arith.constant 0 : index
    %14 = vector.load %arg12[%13, %c0_15, %c0_16] : memref<8x8x512xf32, #tpu.memory_space<vmem>>, vector<1x8x512xf32>
    %15 = vector.shape_cast %14 : vector<1x8x512xf32> to vector<8x512xf32>
    %c0_17 = arith.constant 0 : index
    %c0_18 = arith.constant 0 : index
    %16 = vector.load %arg13[%c0_17, %c0_18] : memref<8x128xf32, #tpu.memory_space<vmem>>, vector<8x128xf32>
    %c0_19 = arith.constant 0 : index
    %c0_20 = arith.constant 0 : index
    %17 = vector.load %arg3[%c0_19, %c0_20] : memref<128x512xf32, #tpu.memory_space<vmem>>, vector<128x512xf32>
    %cst_21 = arith.constant dense<0.000000e+00> : vector<8x512xf32>
    %18 = tpu.matmul %16, %17, %cst_21 {dimension_numbers = #tpu.dot_dimension_numbers<[1], [0], [0], [1], [0, 0, 1, 1], [], []>} : vector<8x128xf32>, vector<128x512xf32>, vector<8x512xf32> -> vector<8x512xf32>
    %19 = arith.addf %15, %18 : vector<8x512xf32>
    %20 = vector.extract_strided_slice %19 {offsets = [0, 0], sizes = [8, 384], strides = [1, 1]} : vector<8x512xf32> to vector<8x384xf32>
    %21 = arith.negf %20 : vector<8x384xf32>
    %22 = math.exp %21 : vector<8x384xf32>
    %cst_22 = arith.constant 1.000000e+00 : f32
    %23 = vector.broadcast %cst_22 : f32 to vector<8x384xf32>
    %24 = arith.addf %23, %22 : vector<8x384xf32>
    %25 = arith.divf %23, %24 : vector<8x384xf32>
    %26 = vector.extract_strided_slice %25 {offsets = [0, 0], sizes = [8, 128], strides = [1, 1]} : vector<8x384xf32> to vector<8x128xf32>
    %27 = vector.extract_strided_slice %25 {offsets = [0, 128], sizes = [8, 128], strides = [1, 1]} : vector<8x384xf32> to vector<8x128xf32>
    %28 = vector.extract_strided_slice %25 {offsets = [0, 256], sizes = [8, 128], strides = [1, 1]} : vector<8x384xf32> to vector<8x128xf32>
    %29 = vector.extract_strided_slice %19 {offsets = [0, 384], sizes = [8, 128], strides = [1, 1]} : vector<8x512xf32> to vector<8x128xf32>
    %30 = math.tanh %29 : vector<8x128xf32>
    %c0_23 = arith.constant 0 : index
    %c0_24 = arith.constant 0 : index
    %31 = vector.load %arg14[%c0_23, %c0_24] : memref<8x128xf32, #tpu.memory_space<vmem>>, vector<8x128xf32>
    %32 = arith.mulf %27, %31 : vector<8x128xf32>
    %33 = arith.mulf %26, %30 : vector<8x128xf32>
    %34 = arith.addf %32, %33 : vector<8x128xf32>
    %35 = math.tanh %34 : vector<8x128xf32>
    %36 = arith.mulf %28, %35 : vector<8x128xf32>
    %c0_25 = arith.constant 0 : index
    %c0_26 = arith.constant 0 : index
    %37 = vector.load %arg14[%c0_25, %c0_26] : memref<8x128xf32, #tpu.memory_space<vmem>>, vector<8x128xf32>
    tpu.vector_store %arg14[%c0_25, %c0_26], %34 {strides = array<i32>} : memref<8x128xf32, #tpu.memory_space<vmem>>, vector<8x128xf32>,
    %c0_27 = arith.constant 0 : index
    %c0_28 = arith.constant 0 : index
    %38 = vector.load %arg13[%c0_27, %c0_28] : memref<8x128xf32, #tpu.memory_space<vmem>>, vector<8x128xf32>
    tpu.vector_store %arg13[%c0_27, %c0_28], %36 {strides = array<i32>} : memref<8x128xf32, #tpu.memory_space<vmem>>, vector<8x128xf32>,
    %39 = arith.index_cast %c0_i32 : i32 to index
    %c0_29 = arith.constant 0 : index
    %c0_30 = arith.constant 0 : index
    %40 = vector.load %arg11[%39, %c0_29, %c0_30] : memref<8x8x128xf32, #tpu.memory_space<vmem>>, vector<1x8x128xf32>
    %41 = vector.shape_cast %40 : vector<1x8x128xf32> to vector<8x128xf32>
    %42 = vector.shape_cast %36 : vector<8x128xf32> to vector<1x8x128xf32>
    tpu.vector_store %arg11[%39, %c0_29, %c0_30], %42 {strides = array<i32>} : memref<8x8x128xf32, #tpu.memory_space<vmem>>, vector<1x8x128xf32>,
    %c1_i32 = arith.constant 1 : i32
    %43 = arith.index_cast %c1_i32 : i32 to index
    %c0_31 = arith.constant 0 : index
    %c0_32 = arith.constant 0 : index
    %44 = vector.load %arg12[%43, %c0_31, %c0_32] : memref<8x8x512xf32, #tpu.memory_space<vmem>>, vector<1x8x512xf32>
    %45 = vector.shape_cast %44 : vector<1x8x512xf32> to vector<8x512xf32>
    %c0_33 = arith.constant 0 : index
    %c0_34 = arith.constant 0 : index
    %46 = vector.load %arg13[%c0_33, %c0_34] : memref<8x128xf32, #tpu.memory_space<vmem>>, vector<8x128xf32>
    %c0_35 = arith.constant 0 : index
    %c0_36 = arith.constant 0 : index
    %47 = vector.load %arg3[%c0_35, %c0_36] : memref<128x512xf32, #tpu.memory_space<vmem>>, vector<128x512xf32>
    %cst_37 = arith.constant dense<0.000000e+00> : vector<8x512xf32>
    %48 = tpu.matmul %46, %47, %cst_37 {dimension_numbers = #tpu.dot_dimension_numbers<[1], [0], [0], [1], [0, 0, 1, 1], [], []>} : vector<8x128xf32>, vector<128x512xf32>, vector<8x512xf32> -> vector<8x512xf32>
    %49 = arith.addf %45, %48 : vector<8x512xf32>
    %50 = vector.extract_strided_slice %49 {offsets = [0, 0], sizes = [8, 384], strides = [1, 1]} : vector<8x512xf32> to vector<8x384xf32>
    %51 = arith.negf %50 : vector<8x384xf32>
    %52 = math.exp %51 : vector<8x384xf32>
    %cst_38 = arith.constant 1.000000e+00 : f32
    %53 = vector.broadcast %cst_38 : f32 to vector<8x384xf32>
    %54 = arith.addf %53, %52 : vector<8x384xf32>
    %55 = arith.divf %53, %54 : vector<8x384xf32>
    %56 = vector.extract_strided_slice %55 {offsets = [0, 0], sizes = [8, 128], strides = [1, 1]} : vector<8x384xf32> to vector<8x128xf32>
    %57 = vector.extract_strided_slice %55 {offsets = [0, 128], sizes = [8, 128], strides = [1, 1]} : vector<8x384xf32> to vector<8x128xf32>
    %58 = vector.extract_strided_slice %55 {offsets = [0, 256], sizes = [8, 128], strides = [1, 1]} : vector<8x384xf32> to vector<8x128xf32>
    %59 = vector.extract_strided_slice %49 {offsets = [0, 384], sizes = [8, 128], strides = [1, 1]} : vector<8x512xf32> to vector<8x128xf32>
    %60 = math.tanh %59 : vector<8x128xf32>
    %c0_39 = arith.constant 0 : index
    %c0_40 = arith.constant 0 : index
    %61 = vector.load %arg14[%c0_39, %c0_40] : memref<8x128xf32, #tpu.memory_space<vmem>>, vector<8x128xf32>
    %62 = arith.mulf %57, %61 : vector<8x128xf32>
    %63 = arith.mulf %56, %60 : vector<8x128xf32>
    %64 = arith.addf %62, %63 : vector<8x128xf32>
    %65 = math.tanh %64 : vector<8x128xf32>
    %66 = arith.mulf %58, %65 : vector<8x128xf32>
    %c0_41 = arith.constant 0 : index
    %c0_42 = arith.constant 0 : index
    %67 = vector.load %arg14[%c0_41, %c0_42] : memref<8x128xf32, #tpu.memory_space<vmem>>, vector<8x128xf32>
    tpu.vector_store %arg14[%c0_41, %c0_42], %64 {strides = array<i32>} : memref<8x128xf32, #tpu.memory_space<vmem>>, vector<8x128xf32>,
    %c0_43 = arith.constant 0 : index
    %c0_44 = arith.constant 0 : index
    %68 = vector.load %arg13[%c0_43, %c0_44] : memref<8x128xf32, #tpu.memory_space<vmem>>, vector<8x128xf32>
    tpu.vector_store %arg13[%c0_43, %c0_44], %66 {strides = array<i32>} : memref<8x128xf32, #tpu.memory_space<vmem>>, vector<8x128xf32>,
    %69 = arith.index_cast %c1_i32 : i32 to index
    %c0_45 = arith.constant 0 : index
    %c0_46 = arith.constant 0 : index
    %70 = vector.load %arg11[%69, %c0_45, %c0_46] : memref<8x8x128xf32, #tpu.memory_space<vmem>>, vector<1x8x128xf32>
    %71 = vector.shape_cast %70 : vector<1x8x128xf32> to vector<8x128xf32>
    %72 = vector.shape_cast %66 : vector<8x128xf32> to vector<1x8x128xf32>
    tpu.vector_store %arg11[%69, %c0_45, %c0_46], %72 {strides = array<i32>} : memref<8x8x128xf32, #tpu.memory_space<vmem>>, vector<1x8x128xf32>,
    %c2_i32 = arith.constant 2 : i32
    %73 = arith.index_cast %c2_i32 : i32 to index
    %c0_47 = arith.constant 0 : index
    %c0_48 = arith.constant 0 : index
    %74 = vector.load %arg12[%73, %c0_47, %c0_48] : memref<8x8x512xf32, #tpu.memory_space<vmem>>, vector<1x8x512xf32>
    %75 = vector.shape_cast %74 : vector<1x8x512xf32> to vector<8x512xf32>
    %c0_49 = arith.constant 0 : index
    %c0_50 = arith.constant 0 : index
    %76 = vector.load %arg13[%c0_49, %c0_50] : memref<8x128xf32, #tpu.memory_space<vmem>>, vector<8x128xf32>
    %c0_51 = arith.constant 0 : index
    %c0_52 = arith.constant 0 : index
    %77 = vector.load %arg3[%c0_51, %c0_52] : memref<128x512xf32, #tpu.memory_space<vmem>>, vector<128x512xf32>
    %cst_53 = arith.constant dense<0.000000e+00> : vector<8x512xf32>
    %78 = tpu.matmul %76, %77, %cst_53 {dimension_numbers = #tpu.dot_dimension_numbers<[1], [0], [0], [1], [0, 0, 1, 1], [], []>} : vector<8x128xf32>, vector<128x512xf32>, vector<8x512xf32> -> vector<8x512xf32>
    %79 = arith.addf %75, %78 : vector<8x512xf32>
    %80 = vector.extract_strided_slice %79 {offsets = [0, 0], sizes = [8, 384], strides = [1, 1]} : vector<8x512xf32> to vector<8x384xf32>
    %81 = arith.negf %80 : vector<8x384xf32>
    %82 = math.exp %81 : vector<8x384xf32>
    %cst_54 = arith.constant 1.000000e+00 : f32
    %83 = vector.broadcast %cst_54 : f32 to vector<8x384xf32>
    %84 = arith.addf %83, %82 : vector<8x384xf32>
    %85 = arith.divf %83, %84 : vector<8x384xf32>
    %86 = vector.extract_strided_slice %85 {offsets = [0, 0], sizes = [8, 128], strides = [1, 1]} : vector<8x384xf32> to vector<8x128xf32>
    %87 = vector.extract_strided_slice %85 {offsets = [0, 128], sizes = [8, 128], strides = [1, 1]} : vector<8x384xf32> to vector<8x128xf32>
    %88 = vector.extract_strided_slice %85 {offsets = [0, 256], sizes = [8, 128], strides = [1, 1]} : vector<8x384xf32> to vector<8x128xf32>
    %89 = vector.extract_strided_slice %79 {offsets = [0, 384], sizes = [8, 128], strides = [1, 1]} : vector<8x512xf32> to vector<8x128xf32>
    %90 = math.tanh %89 : vector<8x128xf32>
    %c0_55 = arith.constant 0 : index
    %c0_56 = arith.constant 0 : index
    %91 = vector.load %arg14[%c0_55, %c0_56] : memref<8x128xf32, #tpu.memory_space<vmem>>, vector<8x128xf32>
    %92 = arith.mulf %87, %91 : vector<8x128xf32>
    %93 = arith.mulf %86, %90 : vector<8x128xf32>
    %94 = arith.addf %92, %93 : vector<8x128xf32>
    %95 = math.tanh %94 : vector<8x128xf32>
    %96 = arith.mulf %88, %95 : vector<8x128xf32>
    %c0_57 = arith.constant 0 : index
    %c0_58 = arith.constant 0 : index
    %97 = vector.load %arg14[%c0_57, %c0_58] : memref<8x128xf32, #tpu.memory_space<vmem>>, vector<8x128xf32>
    tpu.vector_store %arg14[%c0_57, %c0_58], %94 {strides = array<i32>} : memref<8x128xf32, #tpu.memory_space<vmem>>, vector<8x128xf32>,
    %c0_59 = arith.constant 0 : index
    %c0_60 = arith.constant 0 : index
    %98 = vector.load %arg13[%c0_59, %c0_60] : memref<8x128xf32, #tpu.memory_space<vmem>>, vector<8x128xf32>
    tpu.vector_store %arg13[%c0_59, %c0_60], %96 {strides = array<i32>} : memref<8x128xf32, #tpu.memory_space<vmem>>, vector<8x128xf32>,
    %99 = arith.index_cast %c2_i32 : i32 to index
    %c0_61 = arith.constant 0 : index
    %c0_62 = arith.constant 0 : index
    %100 = vector.load %arg11[%99, %c0_61, %c0_62] : memref<8x8x128xf32, #tpu.memory_space<vmem>>, vector<1x8x128xf32>
    %101 = vector.shape_cast %100 : vector<1x8x128xf32> to vector<8x128xf32>
    %102 = vector.shape_cast %96 : vector<8x128xf32> to vector<1x8x128xf32>
    tpu.vector_store %arg11[%99, %c0_61, %c0_62], %102 {strides = array<i32>} : memref<8x8x128xf32, #tpu.memory_space<vmem>>, vector<1x8x128xf32>,
    %c3_i32 = arith.constant 3 : i32
    %103 = arith.index_cast %c3_i32 : i32 to index
    %c0_63 = arith.constant 0 : index
    %c0_64 = arith.constant 0 : index
    %104 = vector.load %arg12[%103, %c0_63, %c0_64] : memref<8x8x512xf32, #tpu.memory_space<vmem>>, vector<1x8x512xf32>
    %105 = vector.shape_cast %104 : vector<1x8x512xf32> to vector<8x512xf32>
    %c0_65 = arith.constant 0 : index
    %c0_66 = arith.constant 0 : index
    %106 = vector.load %arg13[%c0_65, %c0_66] : memref<8x128xf32, #tpu.memory_space<vmem>>, vector<8x128xf32>
    %c0_67 = arith.constant 0 : index
    %c0_68 = arith.constant 0 : index
    %107 = vector.load %arg3[%c0_67, %c0_68] : memref<128x512xf32, #tpu.memory_space<vmem>>, vector<128x512xf32>
    %cst_69 = arith.constant dense<0.000000e+00> : vector<8x512xf32>
    %108 = tpu.matmul %106, %107, %cst_69 {dimension_numbers = #tpu.dot_dimension_numbers<[1], [0], [0], [1], [0, 0, 1, 1], [], []>} : vector<8x128xf32>, vector<128x512xf32>, vector<8x512xf32> -> vector<8x512xf32>
    %109 = arith.addf %105, %108 : vector<8x512xf32>
    %110 = vector.extract_strided_slice %109 {offsets = [0, 0], sizes = [8, 384], strides = [1, 1]} : vector<8x512xf32> to vector<8x384xf32>
    %111 = arith.negf %110 : vector<8x384xf32>
    %112 = math.exp %111 : vector<8x384xf32>
    %cst_70 = arith.constant 1.000000e+00 : f32
    %113 = vector.broadcast %cst_70 : f32 to vector<8x384xf32>
    %114 = arith.addf %113, %112 : vector<8x384xf32>
    %115 = arith.divf %113, %114 : vector<8x384xf32>
    %116 = vector.extract_strided_slice %115 {offsets = [0, 0], sizes = [8, 128], strides = [1, 1]} : vector<8x384xf32> to vector<8x128xf32>
    %117 = vector.extract_strided_slice %115 {offsets = [0, 128], sizes = [8, 128], strides = [1, 1]} : vector<8x384xf32> to vector<8x128xf32>
    %118 = vector.extract_strided_slice %115 {offsets = [0, 256], sizes = [8, 128], strides = [1, 1]} : vector<8x384xf32> to vector<8x128xf32>
    %119 = vector.extract_strided_slice %109 {offsets = [0, 384], sizes = [8, 128], strides = [1, 1]} : vector<8x512xf32> to vector<8x128xf32>
    %120 = math.tanh %119 : vector<8x128xf32>
    %c0_71 = arith.constant 0 : index
    %c0_72 = arith.constant 0 : index
    %121 = vector.load %arg14[%c0_71, %c0_72] : memref<8x128xf32, #tpu.memory_space<vmem>>, vector<8x128xf32>
    %122 = arith.mulf %117, %121 : vector<8x128xf32>
    %123 = arith.mulf %116, %120 : vector<8x128xf32>
    %124 = arith.addf %122, %123 : vector<8x128xf32>
    %125 = math.tanh %124 : vector<8x128xf32>
    %126 = arith.mulf %118, %125 : vector<8x128xf32>
    %c0_73 = arith.constant 0 : index
    %c0_74 = arith.constant 0 : index
    %127 = vector.load %arg14[%c0_73, %c0_74] : memref<8x128xf32, #tpu.memory_space<vmem>>, vector<8x128xf32>
    tpu.vector_store %arg14[%c0_73, %c0_74], %124 {strides = array<i32>} : memref<8x128xf32, #tpu.memory_space<vmem>>, vector<8x128xf32>,
    %c0_75 = arith.constant 0 : index
    %c0_76 = arith.constant 0 : index
    %128 = vector.load %arg13[%c0_75, %c0_76] : memref<8x128xf32, #tpu.memory_space<vmem>>, vector<8x128xf32>
    tpu.vector_store %arg13[%c0_75, %c0_76], %126 {strides = array<i32>} : memref<8x128xf32, #tpu.memory_space<vmem>>, vector<8x128xf32>,
    %129 = arith.index_cast %c3_i32 : i32 to index
    %c0_77 = arith.constant 0 : index
    %c0_78 = arith.constant 0 : index
    %130 = vector.load %arg11[%129, %c0_77, %c0_78] : memref<8x8x128xf32, #tpu.memory_space<vmem>>, vector<1x8x128xf32>
    %131 = vector.shape_cast %130 : vector<1x8x128xf32> to vector<8x128xf32>
    %132 = vector.shape_cast %126 : vector<8x128xf32> to vector<1x8x128xf32>
    tpu.vector_store %arg11[%129, %c0_77, %c0_78], %132 {strides = array<i32>} : memref<8x8x128xf32, #tpu.memory_space<vmem>>, vector<1x8x128xf32>,
    %c4_i32 = arith.constant 4 : i32
    %133 = arith.index_cast %c4_i32 : i32 to index
    %c0_79 = arith.constant 0 : index
    %c0_80 = arith.constant 0 : index
    %134 = vector.load %arg12[%133, %c0_79, %c0_80] : memref<8x8x512xf32, #tpu.memory_space<vmem>>, vector<1x8x512xf32>
    %135 = vector.shape_cast %134 : vector<1x8x512xf32> to vector<8x512xf32>
    %c0_81 = arith.constant 0 : index
    %c0_82 = arith.constant 0 : index
    %136 = vector.load %arg13[%c0_81, %c0_82] : memref<8x128xf32, #tpu.memory_space<vmem>>, vector<8x128xf32>
    %c0_83 = arith.constant 0 : index
    %c0_84 = arith.constant 0 : index
    %137 = vector.load %arg3[%c0_83, %c0_84] : memref<128x512xf32, #tpu.memory_space<vmem>>, vector<128x512xf32>
    %cst_85 = arith.constant dense<0.000000e+00> : vector<8x512xf32>
    %138 = tpu.matmul %136, %137, %cst_85 {dimension_numbers = #tpu.dot_dimension_numbers<[1], [0], [0], [1], [0, 0, 1, 1], [], []>} : vector<8x128xf32>, vector<128x512xf32>, vector<8x512xf32> -> vector<8x512xf32>
    %139 = arith.addf %135, %138 : vector<8x512xf32>
    %140 = vector.extract_strided_slice %139 {offsets = [0, 0], sizes = [8, 384], strides = [1, 1]} : vector<8x512xf32> to vector<8x384xf32>
    %141 = arith.negf %140 : vector<8x384xf32>
    %142 = math.exp %141 : vector<8x384xf32>
    %cst_86 = arith.constant 1.000000e+00 : f32
    %143 = vector.broadcast %cst_86 : f32 to vector<8x384xf32>
    %144 = arith.addf %143, %142 : vector<8x384xf32>
    %145 = arith.divf %143, %144 : vector<8x384xf32>
    %146 = vector.extract_strided_slice %145 {offsets = [0, 0], sizes = [8, 128], strides = [1, 1]} : vector<8x384xf32> to vector<8x128xf32>
    %147 = vector.extract_strided_slice %145 {offsets = [0, 128], sizes = [8, 128], strides = [1, 1]} : vector<8x384xf32> to vector<8x128xf32>
    %148 = vector.extract_strided_slice %145 {offsets = [0, 256], sizes = [8, 128], strides = [1, 1]} : vector<8x384xf32> to vector<8x128xf32>
    %149 = vector.extract_strided_slice %139 {offsets = [0, 384], sizes = [8, 128], strides = [1, 1]} : vector<8x512xf32> to vector<8x128xf32>
    %150 = math.tanh %149 : vector<8x128xf32>
    %c0_87 = arith.constant 0 : index
    %c0_88 = arith.constant 0 : index
    %151 = vector.load %arg14[%c0_87, %c0_88] : memref<8x128xf32, #tpu.memory_space<vmem>>, vector<8x128xf32>
    %152 = arith.mulf %147, %151 : vector<8x128xf32>
    %153 = arith.mulf %146, %150 : vector<8x128xf32>
    %154 = arith.addf %152, %153 : vector<8x128xf32>
    %155 = math.tanh %154 : vector<8x128xf32>
    %156 = arith.mulf %148, %155 : vector<8x128xf32>
    %c0_89 = arith.constant 0 : index
    %c0_90 = arith.constant 0 : index
    %157 = vector.load %arg14[%c0_89, %c0_90] : memref<8x128xf32, #tpu.memory_space<vmem>>, vector<8x128xf32>
    tpu.vector_store %arg14[%c0_89, %c0_90], %154 {strides = array<i32>} : memref<8x128xf32, #tpu.memory_space<vmem>>, vector<8x128xf32>,
    %c0_91 = arith.constant 0 : index
    %c0_92 = arith.constant 0 : index
    %158 = vector.load %arg13[%c0_91, %c0_92] : memref<8x128xf32, #tpu.memory_space<vmem>>, vector<8x128xf32>
    tpu.vector_store %arg13[%c0_91, %c0_92], %156 {strides = array<i32>} : memref<8x128xf32, #tpu.memory_space<vmem>>, vector<8x128xf32>,
    %159 = arith.index_cast %c4_i32 : i32 to index
    %c0_93 = arith.constant 0 : index
    %c0_94 = arith.constant 0 : index
    %160 = vector.load %arg11[%159, %c0_93, %c0_94] : memref<8x8x128xf32, #tpu.memory_space<vmem>>, vector<1x8x128xf32>
    %161 = vector.shape_cast %160 : vector<1x8x128xf32> to vector<8x128xf32>
    %162 = vector.shape_cast %156 : vector<8x128xf32> to vector<1x8x128xf32>
    tpu.vector_store %arg11[%159, %c0_93, %c0_94], %162 {strides = array<i32>} : memref<8x8x128xf32, #tpu.memory_space<vmem>>, vector<1x8x128xf32>,
    %c5_i32 = arith.constant 5 : i32
    %163 = arith.index_cast %c5_i32 : i32 to index
    %c0_95 = arith.constant 0 : index
    %c0_96 = arith.constant 0 : index
    %164 = vector.load %arg12[%163, %c0_95, %c0_96] : memref<8x8x512xf32, #tpu.memory_space<vmem>>, vector<1x8x512xf32>
    %165 = vector.shape_cast %164 : vector<1x8x512xf32> to vector<8x512xf32>
    %c0_97 = arith.constant 0 : index
    %c0_98 = arith.constant 0 : index
    %166 = vector.load %arg13[%c0_97, %c0_98] : memref<8x128xf32, #tpu.memory_space<vmem>>, vector<8x128xf32>
    %c0_99 = arith.constant 0 : index
    %c0_100 = arith.constant 0 : index
    %167 = vector.load %arg3[%c0_99, %c0_100] : memref<128x512xf32, #tpu.memory_space<vmem>>, vector<128x512xf32>
    %cst_101 = arith.constant dense<0.000000e+00> : vector<8x512xf32>
    %168 = tpu.matmul %166, %167, %cst_101 {dimension_numbers = #tpu.dot_dimension_numbers<[1], [0], [0], [1], [0, 0, 1, 1], [], []>} : vector<8x128xf32>, vector<128x512xf32>, vector<8x512xf32> -> vector<8x512xf32>
    %169 = arith.addf %165, %168 : vector<8x512xf32>
    %170 = vector.extract_strided_slice %169 {offsets = [0, 0], sizes = [8, 384], strides = [1, 1]} : vector<8x512xf32> to vector<8x384xf32>
    %171 = arith.negf %170 : vector<8x384xf32>
    %172 = math.exp %171 : vector<8x384xf32>
    %cst_102 = arith.constant 1.000000e+00 : f32
    %173 = vector.broadcast %cst_102 : f32 to vector<8x384xf32>
    %174 = arith.addf %173, %172 : vector<8x384xf32>
    %175 = arith.divf %173, %174 : vector<8x384xf32>
    %176 = vector.extract_strided_slice %175 {offsets = [0, 0], sizes = [8, 128], strides = [1, 1]} : vector<8x384xf32> to vector<8x128xf32>
    %177 = vector.extract_strided_slice %175 {offsets = [0, 128], sizes = [8, 128], strides = [1, 1]} : vector<8x384xf32> to vector<8x128xf32>
    %178 = vector.extract_strided_slice %175 {offsets = [0, 256], sizes = [8, 128], strides = [1, 1]} : vector<8x384xf32> to vector<8x128xf32>
    %179 = vector.extract_strided_slice %169 {offsets = [0, 384], sizes = [8, 128], strides = [1, 1]} : vector<8x512xf32> to vector<8x128xf32>
    %180 = math.tanh %179 : vector<8x128xf32>
    %c0_103 = arith.constant 0 : index
    %c0_104 = arith.constant 0 : index
    %181 = vector.load %arg14[%c0_103, %c0_104] : memref<8x128xf32, #tpu.memory_space<vmem>>, vector<8x128xf32>
    %182 = arith.mulf %177, %181 : vector<8x128xf32>
    %183 = arith.mulf %176, %180 : vector<8x128xf32>
    %184 = arith.addf %182, %183 : vector<8x128xf32>
    %185 = math.tanh %184 : vector<8x128xf32>
    %186 = arith.mulf %178, %185 : vector<8x128xf32>
    %c0_105 = arith.constant 0 : index
    %c0_106 = arith.constant 0 : index
    %187 = vector.load %arg14[%c0_105, %c0_106] : memref<8x128xf32, #tpu.memory_space<vmem>>, vector<8x128xf32>
    tpu.vector_store %arg14[%c0_105, %c0_106], %184 {strides = array<i32>} : memref<8x128xf32, #tpu.memory_space<vmem>>, vector<8x128xf32>,
    %c0_107 = arith.constant 0 : index
    %c0_108 = arith.constant 0 : index
    %188 = vector.load %arg13[%c0_107, %c0_108] : memref<8x128xf32, #tpu.memory_space<vmem>>, vector<8x128xf32>
    tpu.vector_store %arg13[%c0_107, %c0_108], %186 {strides = array<i32>} : memref<8x128xf32, #tpu.memory_space<vmem>>, vector<8x128xf32>,
    %189 = arith.index_cast %c5_i32 : i32 to index
    %c0_109 = arith.constant 0 : index
    %c0_110 = arith.constant 0 : index
    %190 = vector.load %arg11[%189, %c0_109, %c0_110] : memref<8x8x128xf32, #tpu.memory_space<vmem>>, vector<1x8x128xf32>
    %191 = vector.shape_cast %190 : vector<1x8x128xf32> to vector<8x128xf32>
    %192 = vector.shape_cast %186 : vector<8x128xf32> to vector<1x8x128xf32>
    tpu.vector_store %arg11[%189, %c0_109, %c0_110], %192 {strides = array<i32>} : memref<8x8x128xf32, #tpu.memory_space<vmem>>, vector<1x8x128xf32>,
    %c6_i32 = arith.constant 6 : i32
    %193 = arith.index_cast %c6_i32 : i32 to index
    %c0_111 = arith.constant 0 : index
    %c0_112 = arith.constant 0 : index
    %194 = vector.load %arg12[%193, %c0_111, %c0_112] : memref<8x8x512xf32, #tpu.memory_space<vmem>>, vector<1x8x512xf32>
    %195 = vector.shape_cast %194 : vector<1x8x512xf32> to vector<8x512xf32>
    %c0_113 = arith.constant 0 : index
    %c0_114 = arith.constant 0 : index
    %196 = vector.load %arg13[%c0_113, %c0_114] : memref<8x128xf32, #tpu.memory_space<vmem>>, vector<8x128xf32>
    %c0_115 = arith.constant 0 : index
    %c0_116 = arith.constant 0 : index
    %197 = vector.load %arg3[%c0_115, %c0_116] : memref<128x512xf32, #tpu.memory_space<vmem>>, vector<128x512xf32>
    %cst_117 = arith.constant dense<0.000000e+00> : vector<8x512xf32>
    %198 = tpu.matmul %196, %197, %cst_117 {dimension_numbers = #tpu.dot_dimension_numbers<[1], [0], [0], [1], [0, 0, 1, 1], [], []>} : vector<8x128xf32>, vector<128x512xf32>, vector<8x512xf32> -> vector<8x512xf32>
    %199 = arith.addf %195, %198 : vector<8x512xf32>
    %200 = vector.extract_strided_slice %199 {offsets = [0, 0], sizes = [8, 384], strides = [1, 1]} : vector<8x512xf32> to vector<8x384xf32>
    %201 = arith.negf %200 : vector<8x384xf32>
    %202 = math.exp %201 : vector<8x384xf32>
    %cst_118 = arith.constant 1.000000e+00 : f32
    %203 = vector.broadcast %cst_118 : f32 to vector<8x384xf32>
    %204 = arith.addf %203, %202 : vector<8x384xf32>
    %205 = arith.divf %203, %204 : vector<8x384xf32>
    %206 = vector.extract_strided_slice %205 {offsets = [0, 0], sizes = [8, 128], strides = [1, 1]} : vector<8x384xf32> to vector<8x128xf32>
    %207 = vector.extract_strided_slice %205 {offsets = [0, 128], sizes = [8, 128], strides = [1, 1]} : vector<8x384xf32> to vector<8x128xf32>
    %208 = vector.extract_strided_slice %205 {offsets = [0, 256], sizes = [8, 128], strides = [1, 1]} : vector<8x384xf32> to vector<8x128xf32>
    %209 = vector.extract_strided_slice %199 {offsets = [0, 384], sizes = [8, 128], strides = [1, 1]} : vector<8x512xf32> to vector<8x128xf32>
    %210 = math.tanh %209 : vector<8x128xf32>
    %c0_119 = arith.constant 0 : index
    %c0_120 = arith.constant 0 : index
    %211 = vector.load %arg14[%c0_119, %c0_120] : memref<8x128xf32, #tpu.memory_space<vmem>>, vector<8x128xf32>
    %212 = arith.mulf %207, %211 : vector<8x128xf32>
    %213 = arith.mulf %206, %210 : vector<8x128xf32>
    %214 = arith.addf %212, %213 : vector<8x128xf32>
    %215 = math.tanh %214 : vector<8x128xf32>
    %216 = arith.mulf %208, %215 : vector<8x128xf32>
    %c0_121 = arith.constant 0 : index
    %c0_122 = arith.constant 0 : index
    %217 = vector.load %arg14[%c0_121, %c0_122] : memref<8x128xf32, #tpu.memory_space<vmem>>, vector<8x128xf32>
    tpu.vector_store %arg14[%c0_121, %c0_122], %214 {strides = array<i32>} : memref<8x128xf32, #tpu.memory_space<vmem>>, vector<8x128xf32>,
    %c0_123 = arith.constant 0 : index
    %c0_124 = arith.constant 0 : index
    %218 = vector.load %arg13[%c0_123, %c0_124] : memref<8x128xf32, #tpu.memory_space<vmem>>, vector<8x128xf32>
    tpu.vector_store %arg13[%c0_123, %c0_124], %216 {strides = array<i32>} : memref<8x128xf32, #tpu.memory_space<vmem>>, vector<8x128xf32>,
    %219 = arith.index_cast %c6_i32 : i32 to index
    %c0_125 = arith.constant 0 : index
    %c0_126 = arith.constant 0 : index
    %220 = vector.load %arg11[%219, %c0_125, %c0_126] : memref<8x8x128xf32, #tpu.memory_space<vmem>>, vector<1x8x128xf32>
    %221 = vector.shape_cast %220 : vector<1x8x128xf32> to vector<8x128xf32>
    %222 = vector.shape_cast %216 : vector<8x128xf32> to vector<1x8x128xf32>
    tpu.vector_store %arg11[%219, %c0_125, %c0_126], %222 {strides = array<i32>} : memref<8x8x128xf32, #tpu.memory_space<vmem>>, vector<1x8x128xf32>,
    %c7_i32 = arith.constant 7 : i32
    %223 = arith.index_cast %c7_i32 : i32 to index
    %c0_127 = arith.constant 0 : index
    %c0_128 = arith.constant 0 : index
    %224 = vector.load %arg12[%223, %c0_127, %c0_128] : memref<8x8x512xf32, #tpu.memory_space<vmem>>, vector<1x8x512xf32>
    %225 = vector.shape_cast %224 : vector<1x8x512xf32> to vector<8x512xf32>
    %c0_129 = arith.constant 0 : index
    %c0_130 = arith.constant 0 : index
    %226 = vector.load %arg13[%c0_129, %c0_130] : memref<8x128xf32, #tpu.memory_space<vmem>>, vector<8x128xf32>
    %c0_131 = arith.constant 0 : index
    %c0_132 = arith.constant 0 : index
    %227 = vector.load %arg3[%c0_131, %c0_132] : memref<128x512xf32, #tpu.memory_space<vmem>>, vector<128x512xf32>
    %cst_133 = arith.constant dense<0.000000e+00> : vector<8x512xf32>
    %228 = tpu.matmul %226, %227, %cst_133 {dimension_numbers = #tpu.dot_dimension_numbers<[1], [0], [0], [1], [0, 0, 1, 1], [], []>} : vector<8x128xf32>, vector<128x512xf32>, vector<8x512xf32> -> vector<8x512xf32>
    %229 = arith.addf %225, %228 : vector<8x512xf32>
    %230 = vector.extract_strided_slice %229 {offsets = [0, 0], sizes = [8, 384], strides = [1, 1]} : vector<8x512xf32> to vector<8x384xf32>
    %231 = arith.negf %230 : vector<8x384xf32>
    %232 = math.exp %231 : vector<8x384xf32>
    %cst_134 = arith.constant 1.000000e+00 : f32
    %233 = vector.broadcast %cst_134 : f32 to vector<8x384xf32>
    %234 = arith.addf %233, %232 : vector<8x384xf32>
    %235 = arith.divf %233, %234 : vector<8x384xf32>
    %236 = vector.extract_strided_slice %235 {offsets = [0, 0], sizes = [8, 128], strides = [1, 1]} : vector<8x384xf32> to vector<8x128xf32>
    %237 = vector.extract_strided_slice %235 {offsets = [0, 128], sizes = [8, 128], strides = [1, 1]} : vector<8x384xf32> to vector<8x128xf32>
    %238 = vector.extract_strided_slice %235 {offsets = [0, 256], sizes = [8, 128], strides = [1, 1]} : vector<8x384xf32> to vector<8x128xf32>
    %239 = vector.extract_strided_slice %229 {offsets = [0, 384], sizes = [8, 128], strides = [1, 1]} : vector<8x512xf32> to vector<8x128xf32>
    %240 = math.tanh %239 : vector<8x128xf32>
    %c0_135 = arith.constant 0 : index
    %c0_136 = arith.constant 0 : index
    %241 = vector.load %arg14[%c0_135, %c0_136] : memref<8x128xf32, #tpu.memory_space<vmem>>, vector<8x128xf32>
    %242 = arith.mulf %237, %241 : vector<8x128xf32>
    %243 = arith.mulf %236, %240 : vector<8x128xf32>
    %244 = arith.addf %242, %243 : vector<8x128xf32>
    %245 = math.tanh %244 : vector<8x128xf32>
    %246 = arith.mulf %238, %245 : vector<8x128xf32>
    %c0_137 = arith.constant 0 : index
    %c0_138 = arith.constant 0 : index
    %247 = vector.load %arg14[%c0_137, %c0_138] : memref<8x128xf32, #tpu.memory_space<vmem>>, vector<8x128xf32>
    tpu.vector_store %arg14[%c0_137, %c0_138], %244 {strides = array<i32>} : memref<8x128xf32, #tpu.memory_space<vmem>>, vector<8x128xf32>,
    %c0_139 = arith.constant 0 : index
    %c0_140 = arith.constant 0 : index
    %248 = vector.load %arg13[%c0_139, %c0_140] : memref<8x128xf32, #tpu.memory_space<vmem>>, vector<8x128xf32>
    tpu.vector_store %arg13[%c0_139, %c0_140], %246 {strides = array<i32>} : memref<8x128xf32, #tpu.memory_space<vmem>>, vector<8x128xf32>,
    %249 = arith.index_cast %c7_i32 : i32 to index
    %c0_141 = arith.constant 0 : index
    %c0_142 = arith.constant 0 : index
    %250 = vector.load %arg11[%249, %c0_141, %c0_142] : memref<8x8x128xf32, #tpu.memory_space<vmem>>, vector<1x8x128xf32>
    %251 = vector.shape_cast %250 : vector<1x8x128xf32> to vector<8x128xf32>
    %252 = vector.shape_cast %246 : vector<8x128xf32> to vector<1x8x128xf32>
    tpu.vector_store %arg11[%249, %c0_141, %c0_142], %252 {strides = array<i32>} : memref<8x8x128xf32, #tpu.memory_space<vmem>>, vector<1x8x128xf32>,
    %c8_i32 = arith.constant 8 : i32
    %c0_143 = arith.constant 0 : index
    %c0_144 = arith.constant 0 : index
    %c0_145 = arith.constant 0 : index
    %253 = vector.load %arg11[%c0_143, %c0_144, %c0_145] : memref<8x8x128xf32, #tpu.memory_space<vmem>>, vector<8x8x128xf32>
    %254 = vector.shape_cast %253 : vector<8x8x128xf32> to vector<64x128xf32>
    %c0_146 = arith.constant 0 : index
    %c0_147 = arith.constant 0 : index
    %255 = vector.load %arg5[%c0_146, %c0_147] : memref<128x512xf32, #tpu.memory_space<vmem>>, vector<128x512xf32>
    %cst_148 = arith.constant dense<0.000000e+00> : vector<64x512xf32>
    %256 = tpu.matmul %254, %255, %cst_148 {dimension_numbers = #tpu.dot_dimension_numbers<[1], [0], [0], [1], [0, 0, 1, 1], [], []>} : vector<64x128xf32>, vector<128x512xf32>, vector<64x512xf32> -> vector<64x512xf32>
    %c0_149 = arith.constant 0 : index
    %c0_150 = arith.constant 0 : index
    %257 = vector.load %arg7[%c0_149, %c0_150] : memref<1x512xf32, #tpu.memory_space<vmem>>, vector<1x512xf32>
    %258 = vector.broadcast %257 : vector<1x512xf32> to vector<64x512xf32>
    %259 = arith.addf %256, %258 : vector<64x512xf32>
    %260 = vector.shape_cast %259 : vector<64x512xf32> to vector<8x8x512xf32>
    %c0_151 = arith.constant 0 : index
    %c0_152 = arith.constant 0 : index
    %c0_153 = arith.constant 0 : index
    %261 = vector.load %arg12[%c0_151, %c0_152, %c0_153] : memref<8x8x512xf32, #tpu.memory_space<vmem>>, vector<8x8x512xf32>
    tpu.vector_store %arg12[%c0_151, %c0_152, %c0_153], %260 {strides = array<i32>} : memref<8x8x512xf32, #tpu.memory_space<vmem>>, vector<8x8x512xf32>,
    %cst_154 = arith.constant 0.000000e+00 : f32
    %262 = vector.broadcast %cst_154 : f32 to vector<8x128xf32>
    %c0_155 = arith.constant 0 : index
    %c0_156 = arith.constant 0 : index
    %263 = vector.load %arg13[%c0_155, %c0_156] : memref<8x128xf32, #tpu.memory_space<vmem>>, vector<8x128xf32>
    tpu.vector_store %arg13[%c0_155, %c0_156], %262 {strides = array<i32>} : memref<8x128xf32, #tpu.memory_space<vmem>>, vector<8x128xf32>,
    %cst_157 = arith.constant 0.000000e+00 : f32
    %264 = vector.broadcast %cst_157 : f32 to vector<8x128xf32>
    %c0_158 = arith.constant 0 : index
    %c0_159 = arith.constant 0 : index
    %265 = vector.load %arg14[%c0_158, %c0_159] : memref<8x128xf32, #tpu.memory_space<vmem>>, vector<8x128xf32>
    tpu.vector_store %arg14[%c0_158, %c0_159], %264 {strides = array<i32>} : memref<8x128xf32, #tpu.memory_space<vmem>>, vector<8x128xf32>,
    %c0_i32_160 = arith.constant 0 : i32
    %266 = arith.index_cast %c0_i32_160 : i32 to index
    %c0_161 = arith.constant 0 : index
    %c0_162 = arith.constant 0 : index
    %267 = vector.load %arg12[%266, %c0_161, %c0_162] : memref<8x8x512xf32, #tpu.memory_space<vmem>>, vector<1x8x512xf32>
    %268 = vector.shape_cast %267 : vector<1x8x512xf32> to vector<8x512xf32>
    %c0_163 = arith.constant 0 : index
    %c0_164 = arith.constant 0 : index
    %269 = vector.load %arg13[%c0_163, %c0_164] : memref<8x128xf32, #tpu.memory_space<vmem>>, vector<8x128xf32>
    %c0_165 = arith.constant 0 : index
    %c0_166 = arith.constant 0 : index
    %270 = vector.load %arg6[%c0_165, %c0_166] : memref<128x512xf32, #tpu.memory_space<vmem>>, vector<128x512xf32>
    %cst_167 = arith.constant dense<0.000000e+00> : vector<8x512xf32>
    %271 = tpu.matmul %269, %270, %cst_167 {dimension_numbers = #tpu.dot_dimension_numbers<[1], [0], [0], [1], [0, 0, 1, 1], [], []>} : vector<8x128xf32>, vector<128x512xf32>, vector<8x512xf32> -> vector<8x512xf32>
    %272 = arith.addf %268, %271 : vector<8x512xf32>
    %273 = vector.extract_strided_slice %272 {offsets = [0, 0], sizes = [8, 384], strides = [1, 1]} : vector<8x512xf32> to vector<8x384xf32>
    %274 = arith.negf %273 : vector<8x384xf32>
    %275 = math.exp %274 : vector<8x384xf32>
    %cst_168 = arith.constant 1.000000e+00 : f32
    %276 = vector.broadcast %cst_168 : f32 to vector<8x384xf32>
    %277 = arith.addf %276, %275 : vector<8x384xf32>
    %278 = arith.divf %276, %277 : vector<8x384xf32>
    %279 = vector.extract_strided_slice %278 {offsets = [0, 0], sizes = [8, 128], strides = [1, 1]} : vector<8x384xf32> to vector<8x128xf32>
    %280 = vector.extract_strided_slice %278 {offsets = [0, 128], sizes = [8, 128], strides = [1, 1]} : vector<8x384xf32> to vector<8x128xf32>
    %281 = vector.extract_strided_slice %278 {offsets = [0, 256], sizes = [8, 128], strides = [1, 1]} : vector<8x384xf32> to vector<8x128xf32>
    %282 = vector.extract_strided_slice %272 {offsets = [0, 384], sizes = [8, 128], strides = [1, 1]} : vector<8x512xf32> to vector<8x128xf32>
    %283 = math.tanh %282 : vector<8x128xf32>
    %c0_169 = arith.constant 0 : index
    %c0_170 = arith.constant 0 : index
    %284 = vector.load %arg14[%c0_169, %c0_170] : memref<8x128xf32, #tpu.memory_space<vmem>>, vector<8x128xf32>
    %285 = arith.mulf %280, %284 : vector<8x128xf32>
    %286 = arith.mulf %279, %283 : vector<8x128xf32>
    %287 = arith.addf %285, %286 : vector<8x128xf32>
    %288 = math.tanh %287 : vector<8x128xf32>
    %289 = arith.mulf %281, %288 : vector<8x128xf32>
    %c0_171 = arith.constant 0 : index
    %c0_172 = arith.constant 0 : index
    %290 = vector.load %arg14[%c0_171, %c0_172] : memref<8x128xf32, #tpu.memory_space<vmem>>, vector<8x128xf32>
    tpu.vector_store %arg14[%c0_171, %c0_172], %287 {strides = array<i32>} : memref<8x128xf32, #tpu.memory_space<vmem>>, vector<8x128xf32>,
    %c0_173 = arith.constant 0 : index
    %c0_174 = arith.constant 0 : index
    %291 = vector.load %arg13[%c0_173, %c0_174] : memref<8x128xf32, #tpu.memory_space<vmem>>, vector<8x128xf32>
    tpu.vector_store %arg13[%c0_173, %c0_174], %289 {strides = array<i32>} : memref<8x128xf32, #tpu.memory_space<vmem>>, vector<8x128xf32>,
    %c1_i32_175 = arith.constant 1 : i32
    %292 = arith.index_cast %c1_i32_175 : i32 to index
    %c0_176 = arith.constant 0 : index
    %c0_177 = arith.constant 0 : index
    %293 = vector.load %arg12[%292, %c0_176, %c0_177] : memref<8x8x512xf32, #tpu.memory_space<vmem>>, vector<1x8x512xf32>
    %294 = vector.shape_cast %293 : vector<1x8x512xf32> to vector<8x512xf32>
    %c0_178 = arith.constant 0 : index
    %c0_179 = arith.constant 0 : index
    %295 = vector.load %arg13[%c0_178, %c0_179] : memref<8x128xf32, #tpu.memory_space<vmem>>, vector<8x128xf32>
    %c0_180 = arith.constant 0 : index
    %c0_181 = arith.constant 0 : index
    %296 = vector.load %arg6[%c0_180, %c0_181] : memref<128x512xf32, #tpu.memory_space<vmem>>, vector<128x512xf32>
    %cst_182 = arith.constant dense<0.000000e+00> : vector<8x512xf32>
    %297 = tpu.matmul %295, %296, %cst_182 {dimension_numbers = #tpu.dot_dimension_numbers<[1], [0], [0], [1], [0, 0, 1, 1], [], []>} : vector<8x128xf32>, vector<128x512xf32>, vector<8x512xf32> -> vector<8x512xf32>
    %298 = arith.addf %294, %297 : vector<8x512xf32>
    %299 = vector.extract_strided_slice %298 {offsets = [0, 0], sizes = [8, 384], strides = [1, 1]} : vector<8x512xf32> to vector<8x384xf32>
    %300 = arith.negf %299 : vector<8x384xf32>
    %301 = math.exp %300 : vector<8x384xf32>
    %cst_183 = arith.constant 1.000000e+00 : f32
    %302 = vector.broadcast %cst_183 : f32 to vector<8x384xf32>
    %303 = arith.addf %302, %301 : vector<8x384xf32>
    %304 = arith.divf %302, %303 : vector<8x384xf32>
    %305 = vector.extract_strided_slice %304 {offsets = [0, 0], sizes = [8, 128], strides = [1, 1]} : vector<8x384xf32> to vector<8x128xf32>
    %306 = vector.extract_strided_slice %304 {offsets = [0, 128], sizes = [8, 128], strides = [1, 1]} : vector<8x384xf32> to vector<8x128xf32>
    %307 = vector.extract_strided_slice %304 {offsets = [0, 256], sizes = [8, 128], strides = [1, 1]} : vector<8x384xf32> to vector<8x128xf32>
    %308 = vector.extract_strided_slice %298 {offsets = [0, 384], sizes = [8, 128], strides = [1, 1]} : vector<8x512xf32> to vector<8x128xf32>
    %309 = math.tanh %308 : vector<8x128xf32>
    %c0_184 = arith.constant 0 : index
    %c0_185 = arith.constant 0 : index
    %310 = vector.load %arg14[%c0_184, %c0_185] : memref<8x128xf32, #tpu.memory_space<vmem>>, vector<8x128xf32>
    %311 = arith.mulf %306, %310 : vector<8x128xf32>
    %312 = arith.mulf %305, %309 : vector<8x128xf32>
    %313 = arith.addf %311, %312 : vector<8x128xf32>
    %314 = math.tanh %313 : vector<8x128xf32>
    %315 = arith.mulf %307, %314 : vector<8x128xf32>
    %c0_186 = arith.constant 0 : index
    %c0_187 = arith.constant 0 : index
    %316 = vector.load %arg14[%c0_186, %c0_187] : memref<8x128xf32, #tpu.memory_space<vmem>>, vector<8x128xf32>
    tpu.vector_store %arg14[%c0_186, %c0_187], %313 {strides = array<i32>} : memref<8x128xf32, #tpu.memory_space<vmem>>, vector<8x128xf32>,
    %c0_188 = arith.constant 0 : index
    %c0_189 = arith.constant 0 : index
    %317 = vector.load %arg13[%c0_188, %c0_189] : memref<8x128xf32, #tpu.memory_space<vmem>>, vector<8x128xf32>
    tpu.vector_store %arg13[%c0_188, %c0_189], %315 {strides = array<i32>} : memref<8x128xf32, #tpu.memory_space<vmem>>, vector<8x128xf32>,
    %c2_i32_190 = arith.constant 2 : i32
    %318 = arith.index_cast %c2_i32_190 : i32 to index
    %c0_191 = arith.constant 0 : index
    %c0_192 = arith.constant 0 : index
    %319 = vector.load %arg12[%318, %c0_191, %c0_192] : memref<8x8x512xf32, #tpu.memory_space<vmem>>, vector<1x8x512xf32>
    %320 = vector.shape_cast %319 : vector<1x8x512xf32> to vector<8x512xf32>
    %c0_193 = arith.constant 0 : index
    %c0_194 = arith.constant 0 : index
    %321 = vector.load %arg13[%c0_193, %c0_194] : memref<8x128xf32, #tpu.memory_space<vmem>>, vector<8x128xf32>
    %c0_195 = arith.constant 0 : index
    %c0_196 = arith.constant 0 : index
    %322 = vector.load %arg6[%c0_195, %c0_196] : memref<128x512xf32, #tpu.memory_space<vmem>>, vector<128x512xf32>
    %cst_197 = arith.constant dense<0.000000e+00> : vector<8x512xf32>
    %323 = tpu.matmul %321, %322, %cst_197 {dimension_numbers = #tpu.dot_dimension_numbers<[1], [0], [0], [1], [0, 0, 1, 1], [], []>} : vector<8x128xf32>, vector<128x512xf32>, vector<8x512xf32> -> vector<8x512xf32>
    %324 = arith.addf %320, %323 : vector<8x512xf32>
    %325 = vector.extract_strided_slice %324 {offsets = [0, 0], sizes = [8, 384], strides = [1, 1]} : vector<8x512xf32> to vector<8x384xf32>
    %326 = arith.negf %325 : vector<8x384xf32>
    %327 = math.exp %326 : vector<8x384xf32>
    %cst_198 = arith.constant 1.000000e+00 : f32
    %328 = vector.broadcast %cst_198 : f32 to vector<8x384xf32>
    %329 = arith.addf %328, %327 : vector<8x384xf32>
    %330 = arith.divf %328, %329 : vector<8x384xf32>
    %331 = vector.extract_strided_slice %330 {offsets = [0, 0], sizes = [8, 128], strides = [1, 1]} : vector<8x384xf32> to vector<8x128xf32>
    %332 = vector.extract_strided_slice %330 {offsets = [0, 128], sizes = [8, 128], strides = [1, 1]} : vector<8x384xf32> to vector<8x128xf32>
    %333 = vector.extract_strided_slice %330 {offsets = [0, 256], sizes = [8, 128], strides = [1, 1]} : vector<8x384xf32> to vector<8x128xf32>
    %334 = vector.extract_strided_slice %324 {offsets = [0, 384], sizes = [8, 128], strides = [1, 1]} : vector<8x512xf32> to vector<8x128xf32>
    %335 = math.tanh %334 : vector<8x128xf32>
    %c0_199 = arith.constant 0 : index
    %c0_200 = arith.constant 0 : index
    %336 = vector.load %arg14[%c0_199, %c0_200] : memref<8x128xf32, #tpu.memory_space<vmem>>, vector<8x128xf32>
    %337 = arith.mulf %332, %336 : vector<8x128xf32>
    %338 = arith.mulf %331, %335 : vector<8x128xf32>
    %339 = arith.addf %337, %338 : vector<8x128xf32>
    %340 = math.tanh %339 : vector<8x128xf32>
    %341 = arith.mulf %333, %340 : vector<8x128xf32>
    %c0_201 = arith.constant 0 : index
    %c0_202 = arith.constant 0 : index
    %342 = vector.load %arg14[%c0_201, %c0_202] : memref<8x128xf32, #tpu.memory_space<vmem>>, vector<8x128xf32>
    tpu.vector_store %arg14[%c0_201, %c0_202], %339 {strides = array<i32>} : memref<8x128xf32, #tpu.memory_space<vmem>>, vector<8x128xf32>,
    %c0_203 = arith.constant 0 : index
    %c0_204 = arith.constant 0 : index
    %343 = vector.load %arg13[%c0_203, %c0_204] : memref<8x128xf32, #tpu.memory_space<vmem>>, vector<8x128xf32>
    tpu.vector_store %arg13[%c0_203, %c0_204], %341 {strides = array<i32>} : memref<8x128xf32, #tpu.memory_space<vmem>>, vector<8x128xf32>,
    %c3_i32_205 = arith.constant 3 : i32
    %344 = arith.index_cast %c3_i32_205 : i32 to index
    %c0_206 = arith.constant 0 : index
    %c0_207 = arith.constant 0 : index
    %345 = vector.load %arg12[%344, %c0_206, %c0_207] : memref<8x8x512xf32, #tpu.memory_space<vmem>>, vector<1x8x512xf32>
    %346 = vector.shape_cast %345 : vector<1x8x512xf32> to vector<8x512xf32>
    %c0_208 = arith.constant 0 : index
    %c0_209 = arith.constant 0 : index
    %347 = vector.load %arg13[%c0_208, %c0_209] : memref<8x128xf32, #tpu.memory_space<vmem>>, vector<8x128xf32>
    %c0_210 = arith.constant 0 : index
    %c0_211 = arith.constant 0 : index
    %348 = vector.load %arg6[%c0_210, %c0_211] : memref<128x512xf32, #tpu.memory_space<vmem>>, vector<128x512xf32>
    %cst_212 = arith.constant dense<0.000000e+00> : vector<8x512xf32>
    %349 = tpu.matmul %347, %348, %cst_212 {dimension_numbers = #tpu.dot_dimension_numbers<[1], [0], [0], [1], [0, 0, 1, 1], [], []>} : vector<8x128xf32>, vector<128x512xf32>, vector<8x512xf32> -> vector<8x512xf32>
    %350 = arith.addf %346, %349 : vector<8x512xf32>
    %351 = vector.extract_strided_slice %350 {offsets = [0, 0], sizes = [8, 384], strides = [1, 1]} : vector<8x512xf32> to vector<8x384xf32>
    %352 = arith.negf %351 : vector<8x384xf32>
    %353 = math.exp %352 : vector<8x384xf32>
    %cst_213 = arith.constant 1.000000e+00 : f32
    %354 = vector.broadcast %cst_213 : f32 to vector<8x384xf32>
    %355 = arith.addf %354, %353 : vector<8x384xf32>
    %356 = arith.divf %354, %355 : vector<8x384xf32>
    %357 = vector.extract_strided_slice %356 {offsets = [0, 0], sizes = [8, 128], strides = [1, 1]} : vector<8x384xf32> to vector<8x128xf32>
    %358 = vector.extract_strided_slice %356 {offsets = [0, 128], sizes = [8, 128], strides = [1, 1]} : vector<8x384xf32> to vector<8x128xf32>
    %359 = vector.extract_strided_slice %356 {offsets = [0, 256], sizes = [8, 128], strides = [1, 1]} : vector<8x384xf32> to vector<8x128xf32>
    %360 = vector.extract_strided_slice %350 {offsets = [0, 384], sizes = [8, 128], strides = [1, 1]} : vector<8x512xf32> to vector<8x128xf32>
    %361 = math.tanh %360 : vector<8x128xf32>
    %c0_214 = arith.constant 0 : index
    %c0_215 = arith.constant 0 : index
    %362 = vector.load %arg14[%c0_214, %c0_215] : memref<8x128xf32, #tpu.memory_space<vmem>>, vector<8x128xf32>
    %363 = arith.mulf %358, %362 : vector<8x128xf32>
    %364 = arith.mulf %357, %361 : vector<8x128xf32>
    %365 = arith.addf %363, %364 : vector<8x128xf32>
    %366 = math.tanh %365 : vector<8x128xf32>
    %367 = arith.mulf %359, %366 : vector<8x128xf32>
    %c0_216 = arith.constant 0 : index
    %c0_217 = arith.constant 0 : index
    %368 = vector.load %arg14[%c0_216, %c0_217] : memref<8x128xf32, #tpu.memory_space<vmem>>, vector<8x128xf32>
    tpu.vector_store %arg14[%c0_216, %c0_217], %365 {strides = array<i32>} : memref<8x128xf32, #tpu.memory_space<vmem>>, vector<8x128xf32>,
    %c0_218 = arith.constant 0 : index
    %c0_219 = arith.constant 0 : index
    %369 = vector.load %arg13[%c0_218, %c0_219] : memref<8x128xf32, #tpu.memory_space<vmem>>, vector<8x128xf32>
    tpu.vector_store %arg13[%c0_218, %c0_219], %367 {strides = array<i32>} : memref<8x128xf32, #tpu.memory_space<vmem>>, vector<8x128xf32>,
    %c4_i32_220 = arith.constant 4 : i32
    %370 = arith.index_cast %c4_i32_220 : i32 to index
    %c0_221 = arith.constant 0 : index
    %c0_222 = arith.constant 0 : index
    %371 = vector.load %arg12[%370, %c0_221, %c0_222] : memref<8x8x512xf32, #tpu.memory_space<vmem>>, vector<1x8x512xf32>
    %372 = vector.shape_cast %371 : vector<1x8x512xf32> to vector<8x512xf32>
    %c0_223 = arith.constant 0 : index
    %c0_224 = arith.constant 0 : index
    %373 = vector.load %arg13[%c0_223, %c0_224] : memref<8x128xf32, #tpu.memory_space<vmem>>, vector<8x128xf32>
    %c0_225 = arith.constant 0 : index
    %c0_226 = arith.constant 0 : index
    %374 = vector.load %arg6[%c0_225, %c0_226] : memref<128x512xf32, #tpu.memory_space<vmem>>, vector<128x512xf32>
    %cst_227 = arith.constant dense<0.000000e+00> : vector<8x512xf32>
    %375 = tpu.matmul %373, %374, %cst_227 {dimension_numbers = #tpu.dot_dimension_numbers<[1], [0], [0], [1], [0, 0, 1, 1], [], []>} : vector<8x128xf32>, vector<128x512xf32>, vector<8x512xf32> -> vector<8x512xf32>
    %376 = arith.addf %372, %375 : vector<8x512xf32>
    %377 = vector.extract_strided_slice %376 {offsets = [0, 0], sizes = [8, 384], strides = [1, 1]} : vector<8x512xf32> to vector<8x384xf32>
    %378 = arith.negf %377 : vector<8x384xf32>
    %379 = math.exp %378 : vector<8x384xf32>
    %cst_228 = arith.constant 1.000000e+00 : f32
    %380 = vector.broadcast %cst_228 : f32 to vector<8x384xf32>
    %381 = arith.addf %380, %379 : vector<8x384xf32>
    %382 = arith.divf %380, %381 : vector<8x384xf32>
    %383 = vector.extract_strided_slice %382 {offsets = [0, 0], sizes = [8, 128], strides = [1, 1]} : vector<8x384xf32> to vector<8x128xf32>
    %384 = vector.extract_strided_slice %382 {offsets = [0, 128], sizes = [8, 128], strides = [1, 1]} : vector<8x384xf32> to vector<8x128xf32>
    %385 = vector.extract_strided_slice %382 {offsets = [0, 256], sizes = [8, 128], strides = [1, 1]} : vector<8x384xf32> to vector<8x128xf32>
    %386 = vector.extract_strided_slice %376 {offsets = [0, 384], sizes = [8, 128], strides = [1, 1]} : vector<8x512xf32> to vector<8x128xf32>
    %387 = math.tanh %386 : vector<8x128xf32>
    %c0_229 = arith.constant 0 : index
    %c0_230 = arith.constant 0 : index
    %388 = vector.load %arg14[%c0_229, %c0_230] : memref<8x128xf32, #tpu.memory_space<vmem>>, vector<8x128xf32>
    %389 = arith.mulf %384, %388 : vector<8x128xf32>
    %390 = arith.mulf %383, %387 : vector<8x128xf32>
    %391 = arith.addf %389, %390 : vector<8x128xf32>
    %392 = math.tanh %391 : vector<8x128xf32>
    %393 = arith.mulf %385, %392 : vector<8x128xf32>
    %c0_231 = arith.constant 0 : index
    %c0_232 = arith.constant 0 : index
    %394 = vector.load %arg14[%c0_231, %c0_232] : memref<8x128xf32, #tpu.memory_space<vmem>>, vector<8x128xf32>
    tpu.vector_store %arg14[%c0_231, %c0_232], %391 {strides = array<i32>} : memref<8x128xf32, #tpu.memory_space<vmem>>, vector<8x128xf32>,
    %c0_233 = arith.constant 0 : index
    %c0_234 = arith.constant 0 : index
    %395 = vector.load %arg13[%c0_233, %c0_234] : memref<8x128xf32, #tpu.memory_space<vmem>>, vector<8x128xf32>
    tpu.vector_store %arg13[%c0_233, %c0_234], %393 {strides = array<i32>} : memref<8x128xf32, #tpu.memory_space<vmem>>, vector<8x128xf32>,
    %c5_i32_235 = arith.constant 5 : i32
    %396 = arith.index_cast %c5_i32_235 : i32 to index
    %c0_236 = arith.constant 0 : index
    %c0_237 = arith.constant 0 : index
    %397 = vector.load %arg12[%396, %c0_236, %c0_237] : memref<8x8x512xf32, #tpu.memory_space<vmem>>, vector<1x8x512xf32>
    %398 = vector.shape_cast %397 : vector<1x8x512xf32> to vector<8x512xf32>
    %c0_238 = arith.constant 0 : index
    %c0_239 = arith.constant 0 : index
    %399 = vector.load %arg13[%c0_238, %c0_239] : memref<8x128xf32, #tpu.memory_space<vmem>>, vector<8x128xf32>
    %c0_240 = arith.constant 0 : index
    %c0_241 = arith.constant 0 : index
    %400 = vector.load %arg6[%c0_240, %c0_241] : memref<128x512xf32, #tpu.memory_space<vmem>>, vector<128x512xf32>
    %cst_242 = arith.constant dense<0.000000e+00> : vector<8x512xf32>
    %401 = tpu.matmul %399, %400, %cst_242 {dimension_numbers = #tpu.dot_dimension_numbers<[1], [0], [0], [1], [0, 0, 1, 1], [], []>} : vector<8x128xf32>, vector<128x512xf32>, vector<8x512xf32> -> vector<8x512xf32>
    %402 = arith.addf %398, %401 : vector<8x512xf32>
    %403 = vector.extract_strided_slice %402 {offsets = [0, 0], sizes = [8, 384], strides = [1, 1]} : vector<8x512xf32> to vector<8x384xf32>
    %404 = arith.negf %403 : vector<8x384xf32>
    %405 = math.exp %404 : vector<8x384xf32>
    %cst_243 = arith.constant 1.000000e+00 : f32
    %406 = vector.broadcast %cst_243 : f32 to vector<8x384xf32>
    %407 = arith.addf %406, %405 : vector<8x384xf32>
    %408 = arith.divf %406, %407 : vector<8x384xf32>
    %409 = vector.extract_strided_slice %408 {offsets = [0, 0], sizes = [8, 128], strides = [1, 1]} : vector<8x384xf32> to vector<8x128xf32>
    %410 = vector.extract_strided_slice %408 {offsets = [0, 128], sizes = [8, 128], strides = [1, 1]} : vector<8x384xf32> to vector<8x128xf32>
    %411 = vector.extract_strided_slice %408 {offsets = [0, 256], sizes = [8, 128], strides = [1, 1]} : vector<8x384xf32> to vector<8x128xf32>
    %412 = vector.extract_strided_slice %402 {offsets = [0, 384], sizes = [8, 128], strides = [1, 1]} : vector<8x512xf32> to vector<8x128xf32>
    %413 = math.tanh %412 : vector<8x128xf32>
    %c0_244 = arith.constant 0 : index
    %c0_245 = arith.constant 0 : index
    %414 = vector.load %arg14[%c0_244, %c0_245] : memref<8x128xf32, #tpu.memory_space<vmem>>, vector<8x128xf32>
    %415 = arith.mulf %410, %414 : vector<8x128xf32>
    %416 = arith.mulf %409, %413 : vector<8x128xf32>
    %417 = arith.addf %415, %416 : vector<8x128xf32>
    %418 = math.tanh %417 : vector<8x128xf32>
    %419 = arith.mulf %411, %418 : vector<8x128xf32>
    %c0_246 = arith.constant 0 : index
    %c0_247 = arith.constant 0 : index
    %420 = vector.load %arg14[%c0_246, %c0_247] : memref<8x128xf32, #tpu.memory_space<vmem>>, vector<8x128xf32>
    tpu.vector_store %arg14[%c0_246, %c0_247], %417 {strides = array<i32>} : memref<8x128xf32, #tpu.memory_space<vmem>>, vector<8x128xf32>,
    %c0_248 = arith.constant 0 : index
    %c0_249 = arith.constant 0 : index
    %421 = vector.load %arg13[%c0_248, %c0_249] : memref<8x128xf32, #tpu.memory_space<vmem>>, vector<8x128xf32>
    tpu.vector_store %arg13[%c0_248, %c0_249], %419 {strides = array<i32>} : memref<8x128xf32, #tpu.memory_space<vmem>>, vector<8x128xf32>,
    %c6_i32_250 = arith.constant 6 : i32
    %422 = arith.index_cast %c6_i32_250 : i32 to index
    %c0_251 = arith.constant 0 : index
    %c0_252 = arith.constant 0 : index
    %423 = vector.load %arg12[%422, %c0_251, %c0_252] : memref<8x8x512xf32, #tpu.memory_space<vmem>>, vector<1x8x512xf32>
    %424 = vector.shape_cast %423 : vector<1x8x512xf32> to vector<8x512xf32>
    %c0_253 = arith.constant 0 : index
    %c0_254 = arith.constant 0 : index
    %425 = vector.load %arg13[%c0_253, %c0_254] : memref<8x128xf32, #tpu.memory_space<vmem>>, vector<8x128xf32>
    %c0_255 = arith.constant 0 : index
    %c0_256 = arith.constant 0 : index
    %426 = vector.load %arg6[%c0_255, %c0_256] : memref<128x512xf32, #tpu.memory_space<vmem>>, vector<128x512xf32>
    %cst_257 = arith.constant dense<0.000000e+00> : vector<8x512xf32>
    %427 = tpu.matmul %425, %426, %cst_257 {dimension_numbers = #tpu.dot_dimension_numbers<[1], [0], [0], [1], [0, 0, 1, 1], [], []>} : vector<8x128xf32>, vector<128x512xf32>, vector<8x512xf32> -> vector<8x512xf32>
    %428 = arith.addf %424, %427 : vector<8x512xf32>
    %429 = vector.extract_strided_slice %428 {offsets = [0, 0], sizes = [8, 384], strides = [1, 1]} : vector<8x512xf32> to vector<8x384xf32>
    %430 = arith.negf %429 : vector<8x384xf32>
    %431 = math.exp %430 : vector<8x384xf32>
    %cst_258 = arith.constant 1.000000e+00 : f32
    %432 = vector.broadcast %cst_258 : f32 to vector<8x384xf32>
    %433 = arith.addf %432, %431 : vector<8x384xf32>
    %434 = arith.divf %432, %433 : vector<8x384xf32>
    %435 = vector.extract_strided_slice %434 {offsets = [0, 0], sizes = [8, 128], strides = [1, 1]} : vector<8x384xf32> to vector<8x128xf32>
    %436 = vector.extract_strided_slice %434 {offsets = [0, 128], sizes = [8, 128], strides = [1, 1]} : vector<8x384xf32> to vector<8x128xf32>
    %437 = vector.extract_strided_slice %434 {offsets = [0, 256], sizes = [8, 128], strides = [1, 1]} : vector<8x384xf32> to vector<8x128xf32>
    %438 = vector.extract_strided_slice %428 {offsets = [0, 384], sizes = [8, 128], strides = [1, 1]} : vector<8x512xf32> to vector<8x128xf32>
    %439 = math.tanh %438 : vector<8x128xf32>
    %c0_259 = arith.constant 0 : index
    %c0_260 = arith.constant 0 : index
    %440 = vector.load %arg14[%c0_259, %c0_260] : memref<8x128xf32, #tpu.memory_space<vmem>>, vector<8x128xf32>
    %441 = arith.mulf %436, %440 : vector<8x128xf32>
    %442 = arith.mulf %435, %439 : vector<8x128xf32>
    %443 = arith.addf %441, %442 : vector<8x128xf32>
    %444 = math.tanh %443 : vector<8x128xf32>
    %445 = arith.mulf %437, %444 : vector<8x128xf32>
    %c0_261 = arith.constant 0 : index
    %c0_262 = arith.constant 0 : index
    %446 = vector.load %arg14[%c0_261, %c0_262] : memref<8x128xf32, #tpu.memory_space<vmem>>, vector<8x128xf32>
    tpu.vector_store %arg14[%c0_261, %c0_262], %443 {strides = array<i32>} : memref<8x128xf32, #tpu.memory_space<vmem>>, vector<8x128xf32>,
    %c0_263 = arith.constant 0 : index
    %c0_264 = arith.constant 0 : index
    %447 = vector.load %arg13[%c0_263, %c0_264] : memref<8x128xf32, #tpu.memory_space<vmem>>, vector<8x128xf32>
    tpu.vector_store %arg13[%c0_263, %c0_264], %445 {strides = array<i32>} : memref<8x128xf32, #tpu.memory_space<vmem>>, vector<8x128xf32>,
    %c7_i32_265 = arith.constant 7 : i32
    %448 = arith.index_cast %c7_i32_265 : i32 to index
    %c0_266 = arith.constant 0 : index
    %c0_267 = arith.constant 0 : index
    %449 = vector.load %arg12[%448, %c0_266, %c0_267] : memref<8x8x512xf32, #tpu.memory_space<vmem>>, vector<1x8x512xf32>
    %450 = vector.shape_cast %449 : vector<1x8x512xf32> to vector<8x512xf32>
    %c0_268 = arith.constant 0 : index
    %c0_269 = arith.constant 0 : index
    %451 = vector.load %arg13[%c0_268, %c0_269] : memref<8x128xf32, #tpu.memory_space<vmem>>, vector<8x128xf32>
    %c0_270 = arith.constant 0 : index
    %c0_271 = arith.constant 0 : index
    %452 = vector.load %arg6[%c0_270, %c0_271] : memref<128x512xf32, #tpu.memory_space<vmem>>, vector<128x512xf32>
    %cst_272 = arith.constant dense<0.000000e+00> : vector<8x512xf32>
    %453 = tpu.matmul %451, %452, %cst_272 {dimension_numbers = #tpu.dot_dimension_numbers<[1], [0], [0], [1], [0, 0, 1, 1], [], []>} : vector<8x128xf32>, vector<128x512xf32>, vector<8x512xf32> -> vector<8x512xf32>
    %454 = arith.addf %450, %453 : vector<8x512xf32>
    %455 = vector.extract_strided_slice %454 {offsets = [0, 0], sizes = [8, 384], strides = [1, 1]} : vector<8x512xf32> to vector<8x384xf32>
    %456 = arith.negf %455 : vector<8x384xf32>
    %457 = math.exp %456 : vector<8x384xf32>
    %cst_273 = arith.constant 1.000000e+00 : f32
    %458 = vector.broadcast %cst_273 : f32 to vector<8x384xf32>
    %459 = arith.addf %458, %457 : vector<8x384xf32>
    %460 = arith.divf %458, %459 : vector<8x384xf32>
    %461 = vector.extract_strided_slice %460 {offsets = [0, 0], sizes = [8, 128], strides = [1, 1]} : vector<8x384xf32> to vector<8x128xf32>
    %462 = vector.extract_strided_slice %460 {offsets = [0, 128], sizes = [8, 128], strides = [1, 1]} : vector<8x384xf32> to vector<8x128xf32>
    %463 = vector.extract_strided_slice %460 {offsets = [0, 256], sizes = [8, 128], strides = [1, 1]} : vector<8x384xf32> to vector<8x128xf32>
    %464 = vector.extract_strided_slice %454 {offsets = [0, 384], sizes = [8, 128], strides = [1, 1]} : vector<8x512xf32> to vector<8x128xf32>
    %465 = math.tanh %464 : vector<8x128xf32>
    %c0_274 = arith.constant 0 : index
    %c0_275 = arith.constant 0 : index
    %466 = vector.load %arg14[%c0_274, %c0_275] : memref<8x128xf32, #tpu.memory_space<vmem>>, vector<8x128xf32>
    %467 = arith.mulf %462, %466 : vector<8x128xf32>
    %468 = arith.mulf %461, %465 : vector<8x128xf32>
    %469 = arith.addf %467, %468 : vector<8x128xf32>
    %470 = math.tanh %469 : vector<8x128xf32>
    %471 = arith.mulf %463, %470 : vector<8x128xf32>
    %c0_276 = arith.constant 0 : index
    %c0_277 = arith.constant 0 : index
    %472 = vector.load %arg14[%c0_276, %c0_277] : memref<8x128xf32, #tpu.memory_space<vmem>>, vector<8x128xf32>
    tpu.vector_store %arg14[%c0_276, %c0_277], %469 {strides = array<i32>} : memref<8x128xf32, #tpu.memory_space<vmem>>, vector<8x128xf32>,
    %c0_278 = arith.constant 0 : index
    %c0_279 = arith.constant 0 : index
    %473 = vector.load %arg13[%c0_278, %c0_279] : memref<8x128xf32, #tpu.memory_space<vmem>>, vector<8x128xf32>
    tpu.vector_store %arg13[%c0_278, %c0_279], %471 {strides = array<i32>} : memref<8x128xf32, #tpu.memory_space<vmem>>, vector<8x128xf32>,
    %c8_i32_280 = arith.constant 8 : i32
    %c0_281 = arith.constant 0 : index
    %c0_282 = arith.constant 0 : index
    %474 = vector.load %arg13[%c0_281, %c0_282] : memref<8x128xf32, #tpu.memory_space<vmem>>, vector<8x128xf32>
    %c0_283 = arith.constant 0 : index
    %c0_284 = arith.constant 0 : index
    %475 = vector.load %arg8[%c0_283, %c0_284] : memref<128x128xf32, #tpu.memory_space<vmem>>, vector<128x128xf32>
    %cst_285 = arith.constant dense<0.000000e+00> : vector<8x128xf32>
    %476 = tpu.matmul %474, %475, %cst_285 {dimension_numbers = #tpu.dot_dimension_numbers<[1], [0], [0], [1], [0, 0, 1, 1], [], []>} : vector<8x128xf32>, vector<128x128xf32>, vector<8x128xf32> -> vector<8x128xf32>
    %c0_286 = arith.constant 0 : index
    %c0_287 = arith.constant 0 : index
    %477 = vector.load %arg9[%c0_286, %c0_287] : memref<1x128xf32, #tpu.memory_space<vmem>>, vector<1x128xf32>
    %478 = vector.broadcast %477 : vector<1x128xf32> to vector<8x128xf32>
    %479 = arith.addf %476, %478 : vector<8x128xf32>
    %c0_288 = arith.constant 0 : index
    %c0_289 = arith.constant 0 : index
    %480 = vector.load %arg10[%c0_288, %c0_289] : memref<8x128xf32, #tpu.memory_space<vmem>>, vector<8x128xf32>
    tpu.vector_store %arg10[%c0_288, %c0_289], %479 {strides = array<i32>} : memref<8x128xf32, #tpu.memory_space<vmem>>, vector<8x128xf32>,
    return
  }
  func.func @transform_0(%arg0: i32) -> (i32, i32, i32) {
    %c0_i32 = arith.constant 0 : i32
    %c0_i32_0 = arith.constant 0 : i32
    %c0_i32_1 = arith.constant 0 : i32
    return %c0_i32, %arg0, %c0_i32_0 : i32, i32, i32
  }
  func.func @transform_1(%arg0: i32) -> (i32, i32) {
    %c0_i32 = arith.constant 0 : i32
    %c0_i32_0 = arith.constant 0 : i32
    %c0_i32_1 = arith.constant 0 : i32
    return %c0_i32, %c0_i32_0 : i32, i32
  }
  func.func @transform_2(%arg0: i32) -> (i32, i32) {
    %c0_i32 = arith.constant 0 : i32
    %c0_i32_0 = arith.constant 0 : i32
    %c0_i32_1 = arith.constant 0 : i32
    return %c0_i32, %c0_i32_0 : i32, i32
  }
  func.func @transform_3(%arg0: i32) -> (i32, i32) {
    %c0_i32 = arith.constant 0 : i32
    %c0_i32_0 = arith.constant 0 : i32
    %c0_i32_1 = arith.constant 0 : i32
    return %c0_i32, %c0_i32_0 : i32, i32
  }
  func.func @transform_4(%arg0: i32) -> (i32, i32) {
    %c0_i32 = arith.constant 0 : i32
    %c0_i32_0 = arith.constant 0 : i32
    %c0_i32_1 = arith.constant 0 : i32
    return %c0_i32, %c0_i32_0 : i32, i32
  }
  func.func @transform_5(%arg0: i32) -> (i32, i32) {
    %c0_i32 = arith.constant 0 : i32
    %c0_i32_0 = arith.constant 0 : i32
    %c0_i32_1 = arith.constant 0 : i32
    return %c0_i32, %c0_i32_0 : i32, i32
  }
  func.func @transform_6(%arg0: i32) -> (i32, i32) {
    %c0_i32 = arith.constant 0 : i32
    %c0_i32_0 = arith.constant 0 : i32
    %c0_i32_1 = arith.constant 0 : i32
    return %c0_i32, %c0_i32_0 : i32, i32
  }
  func.func @transform_7(%arg0: i32) -> (i32, i32) {
    %c0_i32 = arith.constant 0 : i32
    %c0_i32_0 = arith.constant 0 : i32
    %c0_i32_1 = arith.constant 0 : i32
    return %c0_i32, %c0_i32_0 : i32, i32
  }
  func.func @transform_8(%arg0: i32) -> (i32, i32) {
    %c0_i32 = arith.constant 0 : i32
    %c0_i32_0 = arith.constant 0 : i32
    %c0_i32_1 = arith.constant 0 : i32
    return %c0_i32, %c0_i32_0 : i32, i32
  }
  func.func @transform_9(%arg0: i32) -> (i32, i32) {
    %c0_i32 = arith.constant 0 : i32
    %c0_i32_0 = arith.constant 0 : i32
    return %arg0, %c0_i32 : i32, i32
  }
}

</mosaic_0001>

<bundles_post_ra>
// kernel: tpu_custom_call.1
= control target key start
LH: loop header
LB: loop body
LE: loop exit
PB: predicated region body
PF: predicated region fallthrough
CT: control target
= control target key end

     0   :  { %14 = vsyncpa [#allocation7], 0  ;;  %s7241_s0 = inlined_call_operand.hbm [shape: f32[8,8,128], index: 0, kind: input, shape index: {}]   ;;  %s7242_s1 = inlined_call_operand.hbm [shape: f32[128,512], index: 1, kind: input, shape index: {}]   ;;  %s7243_s2 = inlined_call_operand.hbm [shape: f32[128,512], index: 2, kind: input, shape index: {}]   ;;  %s7244_s3 = inlined_call_operand.hbm [shape: f32[1,512], index: 3, kind: input, shape index: {}]   ;;  %s7245_s4 = inlined_call_operand.hbm [shape: f32[128,512], index: 4, kind: input, shape index: {}]   ;;  %s7246_s5 = inlined_call_operand.hbm [shape: f32[128,512], index: 5, kind: input, shape index: {}]   ;;  %s7247_s6 = inlined_call_operand.vmem [shape: f32[1,512], index: 6, kind: input, shape index: {}]   ;;  %s7248_s7 = inlined_call_operand.hbm [shape: f32[128,128], index: 7, kind: input, shape index: {}]   ;;  %s7249_s8 = inlined_call_operand.vmem [shape: f32[1,128], index: 8, kind: input, shape index: {}]   ;;  %s7250_s9 = inlined_call_operand.hbm [shape: f32[8,128], index: 9, kind: output, shape index: {}]  }
   0x1   :  { %15 = vsyncpa [#allocation10], 0 }
   0x2   :  { %16 = vsyncpa [#allocation13], 0 }
   0x3   :  { %17 = vsyncpa [#allocation16], 0  ;;  %s36_s11 = sshll.u32 %s7242_s1, 4  ;;  %s37_s11 = int_to_ptr.hbm [resolvable:$true] %s36_s11 }
   0x4   :  { %18 = vsyncpa [#allocation8], 0  ;;  %s4808_s12 = smov [#allocation9]   ;;  %s63_s16 = sshll.u32 %s7244_s3, 4  ;;  %s64_s16 = int_to_ptr.hbm [resolvable:$true] %s63_s16 }
   0x5   :  { %s38_s13 = sshll.u32 %s4808_s12, 4  ;;  %s4809_s17 = smov 512   ;;  %s39_s13 = int_to_ptr.vmem [resolvable:$true] %s38_s13 }
   0x6   :  { %s4810_s18 = smov 32   ;;  %s4811_s19 = smov [#allocation12]  }
   0x7   :  { %44 = dma.hbm_to_vmem [thread:$0]  %s37_s11, 8192, %s39_s13, [#allocation10], %s4809_s17, %s4809_s17, %s4810_s18  }
   0x8   :  { %s65_s20 = sshll.u32 %s4811_s19, 4  ;;  %s86_s22 = sshll.u32 %s7246_s5, 4  ;;  %s66_s20 = int_to_ptr.vmem [resolvable:$true] %s65_s20  ;;  %s87_s22 = int_to_ptr.hbm [resolvable:$true] %s86_s22 }
   0x9   :  { %68 = dma.hbm_to_vmem [thread:$0]  %s64_s16, 64, %s66_s20, [#allocation13]  }
   0xa   :  { %s23_s3 = sshll.u32 %s7241_s0, 4  ;;  %s4812_s25 = smov [#allocation15]   ;;  %s24_s3 = int_to_ptr.hbm [resolvable:$true] %s23_s3 }
   0xb   :  { %s88_s26 = sshll.u32 %s4812_s25, 4  ;;  %s4813_s27 = smov [#allocation6]   ;;  %s89_s26 = int_to_ptr.vmem [resolvable:$true] %s88_s26 }
   0xc   :  { %94 = dma.hbm_to_vmem [thread:$0]  %s87_s22, 8192, %s89_s26, [#allocation16], %s4809_s17, %s4809_s17, %s4810_s18  }
   0xd   :  { %s25_s28 = sshll.u32 %s4813_s27, 4  ;;  %s4814_s29 = smov 128   ;;  %s26_s28 = int_to_ptr.vmem [resolvable:$true] %s25_s28 }
   0xe   :  { %s4815_s5 = smov 8   ;;  %s49_s11 = sshll.u32 %s7243_s2, 4  ;;  %s50_s11 = int_to_ptr.hbm [resolvable:$true] %s49_s11 }
   0xf   :  { %31 = dma.hbm_to_vmem [thread:$0]  %s24_s3, 1024, %s26_s28, [#allocation7], %s4814_s29, %s4814_s29, %s4815_s5  }
  0x10   :  { %s4816_s0 = smov [#allocation11]   ;;  %s73_s15 = sshll.u32 %s7245_s4, 4  ;;  %s74_s15 = int_to_ptr.hbm [resolvable:$true] %s73_s15 }
  0x11   :  { %s51_s12 = sshll.u32 %s4816_s0, 4  ;;  %s4817_s16 = smov [#allocation14]   ;;  %s52_s12 = int_to_ptr.vmem [resolvable:$true] %s51_s12 }
  0x12   :  { %57 = dma.hbm_to_vmem [thread:$0]  %s50_s11, 8192, %s52_s12, [#allocation10], %s4809_s17, %s4809_s17, %s4810_s18  }
  0x13   :  { %s75_s19 = sshll.u32 %s4817_s16, 4  ;;  %s101_s1 = sshll.u32 %s7248_s7, 4  ;;  %s76_s19 = int_to_ptr.vmem [resolvable:$true] %s75_s19  ;;  %s102_s1 = int_to_ptr.hbm [resolvable:$true] %s101_s1 }
  0x14   :  { %81 = dma.hbm_to_vmem [thread:$0]  %s74_s15, 8192, %s76_s19, [#allocation13], %s4809_s17, %s4809_s17, %s4810_s18  }
  0x15   :  { %s4818_s2 = smov [#allocation17]  }
  0x16   :  { %s103_s22 = sshll.u32 %s4818_s2, 4  ;;  %s104_s22 = int_to_ptr.vmem [resolvable:$true] %s103_s22 }
  0x17   :  { %109 = dma.hbm_to_vmem [thread:$0]  %s102_s1, 2048, %s104_s22, [#allocation16], %s4814_s29, %s4814_s29, %s4815_s5  }
  0x18   :  { %4798 = dma.done.wait [#allocation7], 1024  }
  0x19   :  { %4799 = vsyncadd [#allocation7], 4294966272 }
  0x1a   :  { %4800 = dma.done.wait [#allocation10], 16384  }
  0x1b   :  { %4801 = vsyncadd [#allocation10], 4294950912 }
  0x1c   :  { %4802 = dma.done.wait [#allocation13], 8256  }
  0x1d   :  { %4803 = vsyncadd [#allocation13], 4294959040 }
  0x1e   :  { %4804 = dma.done.wait [#allocation16], 10240  }
  0x1f   :  { %4805 = vsyncadd [#allocation16], 4294957056  ;;  %v208_v0 = vld [vmem:[#allocation9 + $0x1e0] sm:$0xff]  ;;  %v209_v1 = vld [vmem:[#allocation9 + $0x1e8] sm:$0xff]  ;;  %s4820_s18 = smov [#allocation18]   ;;  %s4275_s25 = sshll.u32 %s7250_s9, 4  ;;  %s4276_s25 = int_to_ptr.hbm [resolvable:$true] %s4275_s25 }
  0x20   :  { %v210_v2 = vld [vmem:[#allocation9 + $0x1f0] sm:$0xff]  ;;  %222 = vmatpush.msra.mxu0 %v208_v0  ;;  %263 = vmatpush.msra.mxu1 %v209_v1  ;;  %v211_v3 = vld [vmem:[#allocation9 + $0x1f8] sm:$0xff]  ;;  %v204_v4 = vld [vmem:[#allocation9 + $0x1c0] sm:$0xff]  ;;  %s4273_s23 = sshll.u32 %s4820_s18, 4  ;;  %s4274_s23 = int_to_ptr.vmem [resolvable:$true] %s4273_s23 }
  0x21   :  { %v205_v5 = vld [vmem:[#allocation9 + $0x1c8] sm:$0xff]  ;;  %304 = vmatpush.msra.mxu2 %v210_v2  ;;  %345 = vmatpush.msra.mxu3 %v211_v3  ;;  %v206_v6 = vld [vmem:[#allocation9 + $0x1d0] sm:$0xff]  ;;  %v207_v7 = vld [vmem:[#allocation9 + $0x1d8] sm:$0xff] }
  0x22   :  { %v200_v8 = vld [vmem:[#allocation9 + $0x1a0] sm:$0xff]  ;;  %223 = vmatpush.msra.mxu0 %v204_v4  ;;  %264 = vmatpush.msra.mxu1 %v205_v5  ;;  %v201_v9 = vld [vmem:[#allocation9 + $0x1a8] sm:$0xff]  ;;  %v202_v10 = vld [vmem:[#allocation9 + $0x1b0] sm:$0xff] }
  0x23   :  { %v203_v11 = vld [vmem:[#allocation9 + $0x1b8] sm:$0xff]  ;;  %305 = vmatpush.msra.mxu2 %v206_v6  ;;  %346 = vmatpush.msra.mxu3 %v207_v7  ;;  %v196_v12 = vld [vmem:[#allocation9 + $0x180] sm:$0xff]  ;;  %v197_v13 = vld [vmem:[#allocation9 + $0x188] sm:$0xff] }
  0x24   :  { %224 = vmatpush.msra.mxu0 %v200_v8  ;;  %265 = vmatpush.msra.mxu1 %v201_v9  ;;  %v198_v14 = vld [vmem:[#allocation9 + $0x190] sm:$0xff]  ;;  %v199_v15 = vld [vmem:[#allocation9 + $0x198] sm:$0xff]  ;;  %v192_v16 = vld [vmem:[#allocation9 + $0x160] sm:$0xff] }
  0x25   :  { %306 = vmatpush.msra.mxu2 %v202_v10  ;;  %347 = vmatpush.msra.mxu3 %v203_v11  ;;  %v193_v17 = vld [vmem:[#allocation9 + $0x168] sm:$0xff]  ;;  %v194_v18 = vld [vmem:[#allocation9 + $0x170] sm:$0xff]  ;;  %v195_v19 = vld [vmem:[#allocation9 + $0x178] sm:$0xff] }
  0x26   :  { %225 = vmatpush.msra.mxu0 %v196_v12  ;;  %266 = vmatpush.msra.mxu1 %v197_v13  ;;  %v188_v20 = vld [vmem:[#allocation9 + $0x140] sm:$0xff]  ;;  %v189_v21 = vld [vmem:[#allocation9 + $0x148] sm:$0xff]  ;;  %v190_v22 = vld [vmem:[#allocation9 + $0x150] sm:$0xff] }
  0x27   :  { %307 = vmatpush.msra.mxu2 %v198_v14  ;;  %348 = vmatpush.msra.mxu3 %v199_v15  ;;  %v191_v23 = vld [vmem:[#allocation9 + $0x158] sm:$0xff]  ;;  %v184_v24 = vld [vmem:[#allocation9 + $0x120] sm:$0xff]  ;;  %v185_v25 = vld [vmem:[#allocation9 + $0x128] sm:$0xff] }
  0x28   :  { %226 = vmatpush.msra.mxu0 %v192_v16  ;;  %267 = vmatpush.msra.mxu1 %v193_v17  ;;  %v186_v26 = vld [vmem:[#allocation9 + $0x130] sm:$0xff]  ;;  %v187_v27 = vld [vmem:[#allocation9 + $0x138] sm:$0xff]  ;;  %v180_v28 = vld [vmem:[#allocation9 + $0x100] sm:$0xff] }
  0x29   :  { %308 = vmatpush.msra.mxu2 %v194_v18  ;;  %349 = vmatpush.msra.mxu3 %v195_v19  ;;  %v181_v29 = vld [vmem:[#allocation9 + $0x108] sm:$0xff]  ;;  %v182_v30 = vld [vmem:[#allocation9 + $0x110] sm:$0xff]  ;;  %v183_v31 = vld [vmem:[#allocation9 + $0x118] sm:$0xff] }
  0x2a   :  { %227 = vmatpush.msra.mxu0 %v188_v20  ;;  %268 = vmatpush.msra.mxu1 %v189_v21  ;;  %v176_v32 = vld [vmem:[#allocation9 + $0xe0] sm:$0xff]  ;;  %v177_v33 = vld [vmem:[#allocation9 + $0xe8] sm:$0xff]  ;;  %v178_v34 = vld [vmem:[#allocation9 + $0xf0] sm:$0xff] }
  0x2b   :  { %309 = vmatpush.msra.mxu2 %v190_v22  ;;  %350 = vmatpush.msra.mxu3 %v191_v23  ;;  %v179_v35 = vld [vmem:[#allocation9 + $0xf8] sm:$0xff]  ;;  %v172_v36 = vld [vmem:[#allocation9 + $0xc0] sm:$0xff]  ;;  %v173_v37 = vld [vmem:[#allocation9 + $0xc8] sm:$0xff] }
  0x2c   :  { %228 = vmatpush.msra.mxu0 %v184_v24  ;;  %269 = vmatpush.msra.mxu1 %v185_v25  ;;  %v174_v38 = vld [vmem:[#allocation9 + $0xd0] sm:$0xff]  ;;  %v175_v39 = vld [vmem:[#allocation9 + $0xd8] sm:$0xff]  ;;  %v168_v40 = vld [vmem:[#allocation9 + $0xa0] sm:$0xff] }
  0x2d   :  { %310 = vmatpush.msra.mxu2 %v186_v26  ;;  %351 = vmatpush.msra.mxu3 %v187_v27  ;;  %v169_v41 = vld [vmem:[#allocation9 + $0xa8] sm:$0xff]  ;;  %v170_v42 = vld [vmem:[#allocation9 + $0xb0] sm:$0xff]  ;;  %v171_v43 = vld [vmem:[#allocation9 + $0xb8] sm:$0xff] }
  0x2e   :  { %229 = vmatpush.msra.mxu0 %v180_v28  ;;  %270 = vmatpush.msra.mxu1 %v181_v29  ;;  %v164_v44 = vld [vmem:[#allocation9 + $0x80] sm:$0xff]  ;;  %v165_v45 = vld [vmem:[#allocation9 + $0x88] sm:$0xff]  ;;  %v166_v46 = vld [vmem:[#allocation9 + $0x90] sm:$0xff] }
  0x2f   :  { %311 = vmatpush.msra.mxu2 %v182_v30  ;;  %352 = vmatpush.msra.mxu3 %v183_v31  ;;  %v167_v47 = vld [vmem:[#allocation9 + $0x98] sm:$0xff]  ;;  %v160_v48 = vld [vmem:[#allocation9 + $0x60] sm:$0xff]  ;;  %v161_v49 = vld [vmem:[#allocation9 + $0x68] sm:$0xff] }
  0x30   :  { %230 = vmatpush.msra.mxu0 %v176_v32  ;;  %271 = vmatpush.msra.mxu1 %v177_v33  ;;  %v162_v50 = vld [vmem:[#allocation9 + $0x70] sm:$0xff]  ;;  %v163_v51 = vld [vmem:[#allocation9 + $0x78] sm:$0xff]  ;;  %v156_v52 = vld [vmem:[#allocation9 + $0x40] sm:$0xff] }
  0x31   :  { %312 = vmatpush.msra.mxu2 %v178_v34  ;;  %353 = vmatpush.msra.mxu3 %v179_v35  ;;  %v157_v53 = vld [vmem:[#allocation9 + $0x48] sm:$0xff]  ;;  %v158_v54 = vld [vmem:[#allocation9 + $0x50] sm:$0xff]  ;;  %v159_v55 = vld [vmem:[#allocation9 + $0x58] sm:$0xff] }
  0x32   :  { %231 = vmatpush.msra.mxu0 %v172_v36  ;;  %272 = vmatpush.msra.mxu1 %v173_v37  ;;  %v152_v56 = vld [vmem:[#allocation9 + $0x20] sm:$0xff]  ;;  %v153_v57 = vld [vmem:[#allocation9 + $0x28] sm:$0xff]  ;;  %v154_v58 = vld [vmem:[#allocation9 + $0x30] sm:$0xff] }
  0x33   :  { %313 = vmatpush.msra.mxu2 %v174_v38  ;;  %354 = vmatpush.msra.mxu3 %v175_v39  ;;  %v155_v59 = vld [vmem:[#allocation9 + $0x38] sm:$0xff]  ;;  %v148_v60 = vld [vmem:[#allocation9] sm:$0xff]  ;;  %v149_v61 = vld [vmem:[#allocation9 + $0x8] sm:$0xff] }
  0x34   :  { %232 = vmatpush.msra.mxu0 %v168_v40  ;;  %273 = vmatpush.msra.mxu1 %v169_v41  ;;  %v150_v62 = vld [vmem:[#allocation9 + $0x10] sm:$0xff]  ;;  %v151_v63 = vld [vmem:[#allocation9 + $0x18] sm:$0xff]  ;;  %v140_v0 = vld [vmem:[#allocation6] sm:$0xff] }
  0x35   :  { %314 = vmatpush.msra.mxu2 %v170_v42  ;;  %355 = vmatpush.msra.mxu3 %v171_v43  ;;  %v4904_v1 = vld [vmem:[#allocation11 + $0x1e0] sm:$0xff]  ;;  %v4906_v2 = vld [vmem:[#allocation11 + $0x1e8] sm:$0xff]  ;;  %v4908_v3 = vld [vmem:[#allocation11 + $0x1f0] sm:$0xff] }
  0x36   :  { %233 = vmatpush.msra.mxu0 %v164_v44  ;;  %274 = vmatpush.msra.mxu1 %v165_v45  ;;  %v4910_v4 = vld [vmem:[#allocation11 + $0x1f8] sm:$0xff]  ;;  %v4912_v5 = vld [vmem:[#allocation11 + $0x1c0] sm:$0xff]  ;;  %v4914_v6 = vld [vmem:[#allocation11 + $0x1c8] sm:$0xff] }
  0x37   :  { %315 = vmatpush.msra.mxu2 %v166_v46  ;;  %356 = vmatpush.msra.mxu3 %v167_v47  ;;  %v4918_v7 = vld [vmem:[#allocation11 + $0x1d0] sm:$0xff]  ;;  %v4920_v8 = vld [vmem:[#allocation11 + $0x1d8] sm:$0xff]  ;;  %v4923_v9 = vld [vmem:[#allocation11 + $0x1a0] sm:$0xff] }
  0x38   :  { %234 = vmatpush.msra.mxu0 %v160_v48  ;;  %275 = vmatpush.msra.mxu1 %v161_v49  ;;  %v4925_v10 = vld [vmem:[#allocation11 + $0x1a8] sm:$0xff]  ;;  %v4930_v11 = vld [vmem:[#allocation11 + $0x1b0] sm:$0xff]  ;;  %v4932_v12 = vld [vmem:[#allocation11 + $0x1b8] sm:$0xff] }
  0x39   :  { %316 = vmatpush.msra.mxu2 %v162_v50  ;;  %357 = vmatpush.msra.mxu3 %v163_v51  ;;  %v141_v13 = vld [vmem:[#allocation6 + $0x8] sm:$0xff]  ;;  %v4938_v14 = vld [vmem:[#allocation11 + $0x180] sm:$0xff]  ;;  %v4944_v16 = vld [vmem:[#allocation11 + $0x190] sm:$0xff] }
  0x3a   :  { %235 = vmatpush.msra.mxu0 %v156_v52  ;;  %276 = vmatpush.msra.mxu1 %v157_v53  ;;  %v4940_v15 = vld [vmem:[#allocation11 + $0x188] sm:$0xff]  ;;  %v4946_v17 = vld [vmem:[#allocation11 + $0x198] sm:$0xff]  ;;  %v4948_v18 = vld [vmem:[#allocation11 + $0x160] sm:$0xff] }
  0x3b   :  { %317 = vmatpush.msra.mxu2 %v158_v54  ;;  %358 = vmatpush.msra.mxu3 %v159_v55  ;;  %v4950_v19 = vld [vmem:[#allocation11 + $0x168] sm:$0xff]  ;;  %v4954_v20 = vld [vmem:[#allocation11 + $0x170] sm:$0xff]  ;;  %v4956_v21 = vld [vmem:[#allocation11 + $0x178] sm:$0xff] }
  0x3c   :  { %236 = vmatpush.msra.mxu0 %v152_v56  ;;  %277 = vmatpush.msra.mxu1 %v153_v57  ;;  %v4959_v22 = vld [vmem:[#allocation11 + $0x140] sm:$0xff]  ;;  %v4961_v23 = vld [vmem:[#allocation11 + $0x148] sm:$0xff]  ;;  %v4966_v24 = vld [vmem:[#allocation11 + $0x150] sm:$0xff] }
  0x3d   :  { %318 = vmatpush.msra.mxu2 %v154_v58  ;;  %359 = vmatpush.msra.mxu3 %v155_v59  ;;  %v4968_v25 = vld [vmem:[#allocation11 + $0x158] sm:$0xff]  ;;  %v142_v26 = vld [vmem:[#allocation6 + $0x10] sm:$0xff]  ;;  %v4974_v27 = vld [vmem:[#allocation11 + $0x120] sm:$0xff] }
  0x3e   :  { %237 = vmatpush.msra.mxu0 %v148_v60  ;;  %278 = vmatpush.msra.mxu1 %v149_v61  ;;  %v4976_v28 = vld [vmem:[#allocation11 + $0x128] sm:$0xff]  ;;  %v4980_v29 = vld [vmem:[#allocation11 + $0x130] sm:$0xff]  ;;  %v4982_v30 = vld [vmem:[#allocation11 + $0x138] sm:$0xff] }
  0x3f   :  { %319 = vmatpush.msra.mxu2 %v150_v62  ;;  %360 = vmatpush.msra.mxu3 %v151_v63  ;;  %v4984_v31 = vld [vmem:[#allocation11 + $0x100] sm:$0xff]  ;;  %v4986_v32 = vld [vmem:[#allocation11 + $0x108] sm:$0xff]  ;;  %v4990_v33 = vld [vmem:[#allocation11 + $0x110] sm:$0xff] }
  0x40   :  { %238 = vmatmul.f32.vlgmr.msra.gmra.mxu0 %v140_v0  ;;  %279 = vmatmul.f32.vlgmr.msra.gmra.mxu1 %v140_v0  ;;  %v4992_v34 = vld [vmem:[#allocation11 + $0x118] sm:$0xff]  ;;  %v4995_v35 = vld [vmem:[#allocation11 + $0xe0] sm:$0xff]  ;;  %v4997_v36 = vld [vmem:[#allocation11 + $0xe8] sm:$0xff] }
  0x41   :  { %320 = vmatmul.f32.vlgmr.msra.gmra.mxu2 %v140_v0  ;;  %361 = vmatmul.f32.vlgmr.msra.gmra.mxu3 %v140_v0  ;;  %v5002_v37 = vld [vmem:[#allocation11 + $0xf0] sm:$0xff]  ;;  %v5004_v38 = vld [vmem:[#allocation11 + $0xf8] sm:$0xff]  ;;  %v5010_v40 = vld [vmem:[#allocation11 + $0xc0] sm:$0xff] }
  0x42   :  { %489 = vmatpush.msrb.mxu0 %v4904_v1  ;;  %509 = vmatpush.msrb.mxu1 %v4906_v2  ;;  %v143_v39 = vld [vmem:[#allocation6 + $0x18] sm:$0xff]  ;;  %v5012_v41 = vld [vmem:[#allocation11 + $0xc8] sm:$0xff]  ;;  %v5016_v42 = vld [vmem:[#allocation11 + $0xd0] sm:$0xff] }
  0x43   :  { %529 = vmatpush.msrb.mxu2 %v4908_v3  ;;  %549 = vmatpush.msrb.mxu3 %v4910_v4  ;;  %v5018_v43 = vld [vmem:[#allocation11 + $0xd8] sm:$0xff]  ;;  %v5020_v44 = vld [vmem:[#allocation11 + $0xa0] sm:$0xff]  ;;  %v5022_v45 = vld [vmem:[#allocation11 + $0xa8] sm:$0xff] }
  0x44   :  { %490 = vmatpush.msrb.mxu0 %v4912_v5  ;;  %510 = vmatpush.msrb.mxu1 %v4914_v6  ;;  %v5026_v46 = vld [vmem:[#allocation11 + $0xb0] sm:$0xff]  ;;  %v5028_v47 = vld [vmem:[#allocation11 + $0xb8] sm:$0xff]  ;;  %v5031_v48 = vld [vmem:[#allocation11 + $0x80] sm:$0xff] }
  0x45   :  { %530 = vmatpush.msrb.mxu2 %v4918_v7  ;;  %550 = vmatpush.msrb.mxu3 %v4920_v8  ;;  %v5033_v49 = vld [vmem:[#allocation11 + $0x88] sm:$0xff]  ;;  %v5038_v50 = vld [vmem:[#allocation11 + $0x90] sm:$0xff]  ;;  %v5040_v51 = vld [vmem:[#allocation11 + $0x98] sm:$0xff] }
  0x46   :  { %491 = vmatpush.msrb.mxu0 %v4923_v9  ;;  %511 = vmatpush.msrb.mxu1 %v4925_v10  ;;  %v144_v52 = vld [vmem:[#allocation6 + $0x20] sm:$0xff]  ;;  %v5048_v54 = vld [vmem:[#allocation11 + $0x68] sm:$0xff]  ;;  %v5052_v55 = vld [vmem:[#allocation11 + $0x70] sm:$0xff] }
  0x47   :  { %531 = vmatpush.msrb.mxu2 %v4930_v11  ;;  %551 = vmatpush.msrb.mxu3 %v4932_v12  ;;  %v5046_v53 = vld [vmem:[#allocation11 + $0x60] sm:$0xff]  ;;  %v5054_v56 = vld [vmem:[#allocation11 + $0x78] sm:$0xff]  ;;  %v5058_v58 = vld [vmem:[#allocation11 + $0x48] sm:$0xff] }
  0x48   :  { %241 = vmatmul.f32.gmra.mxu0 %v141_v13  ;;  %282 = vmatmul.f32.gmra.mxu1 %v141_v13  ;;  %v5056_v57 = vld [vmem:[#allocation11 + $0x40] sm:$0xff]  ;;  %7384 = vst [vmem:[#allocation24_spill] sm:$0xff] %v5058_v58  ;;  %v5062_v59 = vld [vmem:[#allocation11 + $0x50] sm:$0xff]  ;;  %v5064_v60 = vld [vmem:[#allocation11 + $0x58] sm:$0xff] }
  0x49   :  { %323 = vmatmul.f32.gmra.mxu2 %v141_v13  ;;  %364 = vmatmul.f32.gmra.mxu3 %v141_v13  ;;  %v5067_v61 = vld [vmem:[#allocation11 + $0x20] sm:$0xff]  ;;  %v5069_v62 = vld [vmem:[#allocation11 + $0x28] sm:$0xff]  ;;  %v5074_v63 = vld [vmem:[#allocation11 + $0x30] sm:$0xff] }
  0x4a   :  { %492 = vmatpush.msrb.mxu0 %v4938_v14  ;;  %512 = vmatpush.msrb.mxu1 %v4940_v15  ;;  %v5076_v0 = vld [vmem:[#allocation11 + $0x38] sm:$0xff]  ;;  %v145_v13 = vld [vmem:[#allocation6 + $0x28] sm:$0xff] }
  0x4b   :  { %532 = vmatpush.msrb.mxu2 %v4944_v16  ;;  %552 = vmatpush.msrb.mxu3 %v4946_v17  ;;  %7385 = vst [vmem:[#allocation25_spill] sm:$0xff] %v5076_v0 }
  0x4c   :  { %493 = vmatpush.msrb.mxu0 %v4948_v18  ;;  %513 = vmatpush.msrb.mxu1 %v4950_v19 }
  0x4d   :  { %533 = vmatpush.msrb.mxu2 %v4954_v20  ;;  %553 = vmatpush.msrb.mxu3 %v4956_v21 }
  0x4e   :  { %494 = vmatpush.msrb.mxu0 %v4959_v22  ;;  %514 = vmatpush.msrb.mxu1 %v4961_v23 }
  0x4f   :  { %534 = vmatpush.msrb.mxu2 %v4966_v24  ;;  %554 = vmatpush.msrb.mxu3 %v4968_v25 }
  0x50   :  { %244 = vmatmul.f32.gmra.mxu0 %v142_v26  ;;  %285 = vmatmul.f32.gmra.mxu1 %v142_v26 }
  0x51   :  { %326 = vmatmul.f32.gmra.mxu2 %v142_v26  ;;  %367 = vmatmul.f32.gmra.mxu3 %v142_v26  ;;  %v5082_v26 = vld [vmem:[#allocation11] sm:$0xff] }
  0x52   :  { %495 = vmatpush.msrb.mxu0 %v4974_v27  ;;  %515 = vmatpush.msrb.mxu1 %v4976_v28 }
  0x53   :  { %535 = vmatpush.msrb.mxu2 %v4980_v29  ;;  %555 = vmatpush.msrb.mxu3 %v4982_v30 }
  0x54   :  { %496 = vmatpush.msrb.mxu0 %v4984_v31  ;;  %516 = vmatpush.msrb.mxu1 %v4986_v32 }
  0x55   :  { %536 = vmatpush.msrb.mxu2 %v4990_v33  ;;  %556 = vmatpush.msrb.mxu3 %v4992_v34 }
  0x56   :  { %497 = vmatpush.msrb.mxu0 %v4995_v35  ;;  %517 = vmatpush.msrb.mxu1 %v4997_v36 }
  0x57   :  { %537 = vmatpush.msrb.mxu2 %v5002_v37  ;;  %557 = vmatpush.msrb.mxu3 %v5004_v38 }
  0x58   :  { %247 = vmatmul.f32.gmra.mxu0 %v143_v39  ;;  %288 = vmatmul.f32.gmra.mxu1 %v143_v39 }
  0x59   :  { %329 = vmatmul.f32.gmra.mxu2 %v143_v39  ;;  %370 = vmatmul.f32.gmra.mxu3 %v143_v39  ;;  %v5084_v39 = vld [vmem:[#allocation11 + $0x8] sm:$0xff] }
  0x5a   :  { %498 = vmatpush.msrb.mxu0 %v5010_v40  ;;  %518 = vmatpush.msrb.mxu1 %v5012_v41 }
  0x5b   :  { %538 = vmatpush.msrb.mxu2 %v5016_v42  ;;  %558 = vmatpush.msrb.mxu3 %v5018_v43 }
  0x5c   :  { %499 = vmatpush.msrb.mxu0 %v5020_v44  ;;  %519 = vmatpush.msrb.mxu1 %v5022_v45 }
  0x5d   :  { %539 = vmatpush.msrb.mxu2 %v5026_v46  ;;  %559 = vmatpush.msrb.mxu3 %v5028_v47 }
  0x5e   :  { %500 = vmatpush.msrb.mxu0 %v5031_v48  ;;  %520 = vmatpush.msrb.mxu1 %v5033_v49 }
  0x5f   :  { %540 = vmatpush.msrb.mxu2 %v5038_v50  ;;  %560 = vmatpush.msrb.mxu3 %v5040_v51 }
  0x60   :  { %250 = vmatmul.f32.gmra.mxu0 %v144_v52  ;;  %291 = vmatmul.f32.gmra.mxu1 %v144_v52 }
  0x61   :  { %332 = vmatmul.f32.gmra.mxu2 %v144_v52  ;;  %373 = vmatmul.f32.gmra.mxu3 %v144_v52  ;;  %v5088_v52 = vld [vmem:[#allocation11 + $0x10] sm:$0xff] }
  0x62   :  { %501 = vmatpush.msrb.mxu0 %v5046_v53  ;;  %521 = vmatpush.msrb.mxu1 %v5048_v54 }
  0x63   :  { %541 = vmatpush.msrb.mxu2 %v5052_v55  ;;  %561 = vmatpush.msrb.mxu3 %v5054_v56 }
  0x64   :  { %502 = vmatpush.msrb.mxu0 %v5056_v57  ;;  %522 = vmatpush.msrb.mxu1 %v5058_v58  ;;  %v5090_v58 = vld [vmem:[#allocation11 + $0x18] sm:$0xff] }
  0x65   :  { %542 = vmatpush.msrb.mxu2 %v5062_v59  ;;  %562 = vmatpush.msrb.mxu3 %v5064_v60 }
  0x66   :  { %503 = vmatpush.msrb.mxu0 %v5067_v61  ;;  %523 = vmatpush.msrb.mxu1 %v5069_v62 }
  0x67   :  { %543 = vmatpush.msrb.mxu2 %v5074_v63  ;;  %563 = vmatpush.msrb.mxu3 %v5076_v0  ;;  %v146_v0 = vld [vmem:[#allocation6 + $0x30] sm:$0xff] }
  0x68   :  { %253 = vmatmul.f32.gmra.mxu0 %v145_v13  ;;  %294 = vmatmul.f32.gmra.mxu1 %v145_v13 }
  0x69   :  { %335 = vmatmul.f32.gmra.mxu2 %v145_v13  ;;  %376 = vmatmul.f32.gmra.mxu3 %v145_v13  ;;  %v147_v13 = vld [vmem:[#allocation6 + $0x38] sm:$0xff] }
  0x6a   :  { %504 = vmatpush.msrb.mxu0 %v5082_v26  ;;  %524 = vmatpush.msrb.mxu1 %v5084_v39 }
  0x6b   :  { %544 = vmatpush.msrb.mxu2 %v5088_v52  ;;  %564 = vmatpush.msrb.mxu3 %v5090_v58 }
  0x6c   :  { %710 = vmatpush.msra.mxu0 %v4904_v1  ;;  %730 = vmatpush.msra.mxu1 %v4906_v2 }
  0x6d   :  { %750 = vmatpush.msra.mxu2 %v4908_v3  ;;  %770 = vmatpush.msra.mxu3 %v4910_v4 }
  0x6e   :  { %711 = vmatpush.msra.mxu0 %v4912_v5  ;;  %731 = vmatpush.msra.mxu1 %v4914_v6 }
  0x6f   :  { %751 = vmatpush.msra.mxu2 %v4918_v7  ;;  %771 = vmatpush.msra.mxu3 %v4920_v8 }
  0x70   :  { %256 = vmatmul.f32.gmra.mxu0 %v146_v0  ;;  %297 = vmatmul.f32.gmra.mxu1 %v146_v0 }
  0x71   :  { %338 = vmatmul.f32.gmra.mxu2 %v146_v0  ;;  %379 = vmatmul.f32.gmra.mxu3 %v146_v0  ;;  %v7255_v0 = vmov 0.0  }
  0x72   :  { %712 = vmatpush.msra.mxu0 %v4923_v9  ;;  %732 = vmatpush.msra.mxu1 %v4925_v10 }
  0x73   :  { %752 = vmatpush.msra.mxu2 %v4930_v11  ;;  %772 = vmatpush.msra.mxu3 %v4932_v12 }
  0x74   :  { %713 = vmatpush.msra.mxu0 %v4938_v14  ;;  %733 = vmatpush.msra.mxu1 %v4940_v15 }
  0x75   :  { %753 = vmatpush.msra.mxu2 %v4944_v16  ;;  %773 = vmatpush.msra.mxu3 %v4946_v17 }
  0x76   :  { %714 = vmatpush.msra.mxu0 %v4948_v18  ;;  %734 = vmatpush.msra.mxu1 %v4950_v19 }
  0x77   :  { %754 = vmatpush.msra.mxu2 %v4954_v20  ;;  %774 = vmatpush.msra.mxu3 %v4956_v21 }
  0x78   :  { %259 = vmatmul.f32.gmra.mxu0 %v147_v13  ;;  %300 = vmatmul.f32.gmra.mxu1 %v147_v13 }
  0x79   :  { %341 = vmatmul.f32.gmra.mxu2 %v147_v13  ;;  %382 = vmatmul.f32.gmra.mxu3 %v147_v13  ;;  %v7386_v13 = vld [vmem:[#allocation24_spill] sm:$0xff] }
  0x7a   :  { %715 = vmatpush.msra.mxu0 %v4959_v22  ;;  %735 = vmatpush.msra.mxu1 %v4961_v23 }
  0x7b   :  { %755 = vmatpush.msra.mxu2 %v4966_v24  ;;  %775 = vmatpush.msra.mxu3 %v4968_v25 }
  0x7c   :  { %716 = vmatpush.msra.mxu0 %v4974_v27  ;;  %736 = vmatpush.msra.mxu1 %v4976_v28 }
  0x7d   :  { %756 = vmatpush.msra.mxu2 %v4980_v29  ;;  %776 = vmatpush.msra.mxu3 %v4982_v30 }
  0x7e   :  { %717 = vmatpush.msra.mxu0 %v4984_v31  ;;  %737 = vmatpush.msra.mxu1 %v4986_v32 }
  0x7f   :  { %757 = vmatpush.msra.mxu2 %v4990_v33  ;;  %777 = vmatpush.msra.mxu3 %v4992_v34 }
  0x80   :  { %505 = vmatmul.f32.vlgmr.msrb.gmra.mxu0 %v7255_v0  ;;  %525 = vmatmul.f32.vlgmr.msrb.gmra.mxu1 %v7255_v0 }
  0x81   :  { %545 = vmatmul.f32.vlgmr.msrb.gmra.mxu2 %v7255_v0  ;;  %565 = vmatmul.f32.vlgmr.msrb.gmra.mxu3 %v7255_v0  ;;  %v7387_v0 = vld [vmem:[#allocation25_spill] sm:$0xff] }
  0x82   :  { %718 = vmatpush.msra.mxu0 %v4995_v35  ;;  %738 = vmatpush.msra.mxu1 %v4997_v36 }
  0x83   :  { %758 = vmatpush.msra.mxu2 %v5002_v37  ;;  %778 = vmatpush.msra.mxu3 %v5004_v38 }
  0x84   :  { %719 = vmatpush.msra.mxu0 %v5010_v40  ;;  %739 = vmatpush.msra.mxu1 %v5012_v41 }
  0x85   :  { %759 = vmatpush.msra.mxu2 %v5016_v42  ;;  %779 = vmatpush.msra.mxu3 %v5018_v43 }
  0x86   :  { %720 = vmatpush.msra.mxu0 %v5020_v44  ;;  %740 = vmatpush.msra.mxu1 %v5022_v45 }
  0x87   :  { %760 = vmatpush.msra.mxu2 %v5026_v46  ;;  %780 = vmatpush.msra.mxu3 %v5028_v47 }
  0x88   :  { %721 = vmatpush.msra.mxu0 %v5031_v48  ;;  %741 = vmatpush.msra.mxu1 %v5033_v49 }
  0x89   :  { %761 = vmatpush.msra.mxu2 %v5038_v50  ;;  %781 = vmatpush.msra.mxu3 %v5040_v51 }
  0x8a   :  { %722 = vmatpush.msra.mxu0 %v5046_v53  ;;  %742 = vmatpush.msra.mxu1 %v5048_v54 }
  0x8b   :  { %762 = vmatpush.msra.mxu2 %v5052_v55  ;;  %782 = vmatpush.msra.mxu3 %v5054_v56 }
  0x8c   :  { %723 = vmatpush.msra.mxu0 %v5056_v57  ;;  %743 = vmatpush.msra.mxu1 %v7386_v13 }
  0x8d   :  { %763 = vmatpush.msra.mxu2 %v5062_v59  ;;  %783 = vmatpush.msra.mxu3 %v5064_v60 }
  0x8e   :  { %724 = vmatpush.msra.mxu0 %v5067_v61  ;;  %744 = vmatpush.msra.mxu1 %v5069_v62 }
  0x8f   :  { %764 = vmatpush.msra.mxu2 %v5074_v63  ;;  %784 = vmatpush.msra.mxu3 %v7387_v0 }
  0x90   :  { %725 = vmatpush.msra.mxu0 %v5082_v26  ;;  %745 = vmatpush.msra.mxu1 %v5084_v39 }
  0x91   :  { %765 = vmatpush.msra.mxu2 %v5088_v52  ;;  %785 = vmatpush.msra.mxu3 %v5090_v58 }
  0x92   :  { %932 = vmatpush.msrb.mxu0 %v4904_v1  ;;  %952 = vmatpush.msrb.mxu1 %v4906_v2 }
  0x93   :  { %972 = vmatpush.msrb.mxu2 %v4908_v3  ;;  %992 = vmatpush.msrb.mxu3 %v4910_v4 }
  0x94   :  { %933 = vmatpush.msrb.mxu0 %v4912_v5  ;;  %953 = vmatpush.msrb.mxu1 %v4914_v6 }
  0x95   :  { %973 = vmatpush.msrb.mxu2 %v4918_v7  ;;  %993 = vmatpush.msrb.mxu3 %v4920_v8 }
  0x96   :  { %934 = vmatpush.msrb.mxu0 %v4923_v9  ;;  %954 = vmatpush.msrb.mxu1 %v4925_v10 }
  0x97   :  { %974 = vmatpush.msrb.mxu2 %v4930_v11  ;;  %994 = vmatpush.msrb.mxu3 %v4932_v12 }
  0x98   :  { %935 = vmatpush.msrb.mxu0 %v4938_v14  ;;  %955 = vmatpush.msrb.mxu1 %v4940_v15 }
  0x99   :  { %975 = vmatpush.msrb.mxu2 %v4944_v16  ;;  %995 = vmatpush.msrb.mxu3 %v4946_v17 }
  0x9a   :  { %936 = vmatpush.msrb.mxu0 %v4948_v18  ;;  %956 = vmatpush.msrb.mxu1 %v4950_v19 }
  0x9b   :  { %976 = vmatpush.msrb.mxu2 %v4954_v20  ;;  %996 = vmatpush.msrb.mxu3 %v4956_v21 }
  0x9c   :  { %937 = vmatpush.msrb.mxu0 %v4959_v22  ;;  %957 = vmatpush.msrb.mxu1 %v4961_v23 }
  0x9d   :  { %977 = vmatpush.msrb.mxu2 %v4966_v24  ;;  %997 = vmatpush.msrb.mxu3 %v4968_v25 }
  0x9e   :  { %938 = vmatpush.msrb.mxu0 %v4974_v27  ;;  %958 = vmatpush.msrb.mxu1 %v4976_v28 }
  0x9f   :  { %978 = vmatpush.msrb.mxu2 %v4980_v29  ;;  %998 = vmatpush.msrb.mxu3 %v4982_v30  ;;  %v212_v30 = vld [vmem:[#allocation12] sm:$0xf] }
  0xa0   :  { %939 = vmatpush.msrb.mxu0 %v4984_v31  ;;  %959 = vmatpush.msrb.mxu1 %v4986_v32 }
  0xa1   :  { %979 = vmatpush.msrb.mxu2 %v4990_v33  ;;  %999 = vmatpush.msrb.mxu3 %v4992_v34  ;;  %v5278_v33 = vperm.slane %v212_v30, 0  ;;  %v5280_v34 = vperm.slane %v212_v30, 1 }
  0xa2   :  { %940 = vmatpush.msrb.mxu0 %v4995_v35  ;;  %960 = vmatpush.msrb.mxu1 %v4997_v36 }
  0xa3   :  { %980 = vmatpush.msrb.mxu2 %v5002_v37  ;;  %1000 = vmatpush.msrb.mxu3 %v5004_v38  ;;  %7405 = vst [vmem:[#allocation41_spill] sm:$0xff] %v5278_v33 }
  0xa4   :  { %941 = vmatpush.msrb.mxu0 %v5010_v40  ;;  %961 = vmatpush.msrb.mxu1 %v5012_v41  ;;  %7406 = vst [vmem:[#allocation42_spill] sm:$0xff] %v5280_v34 }
  0xa5   :  { %981 = vmatpush.msrb.mxu2 %v5016_v42  ;;  %1001 = vmatpush.msrb.mxu3 %v5018_v43 }
  0xa6   :  { %942 = vmatpush.msrb.mxu0 %v5020_v44  ;;  %962 = vmatpush.msrb.mxu1 %v5022_v45  ;;  %v5288_v44 = vperm.slane %v212_v30, 2 }
  0xa7   :  { %982 = vmatpush.msrb.mxu2 %v5026_v46  ;;  %1002 = vmatpush.msrb.mxu3 %v5028_v47 }
  0xa8   :  { %943 = vmatpush.msrb.mxu0 %v5031_v48  ;;  %963 = vmatpush.msrb.mxu1 %v5033_v49  ;;  %7409 = vst [vmem:[#allocation45_spill] sm:$0xff] %v5288_v44 }
  0xa9   :  { %983 = vmatpush.msrb.mxu2 %v5038_v50  ;;  %1003 = vmatpush.msrb.mxu3 %v5040_v51 }
  0xaa   :  { %944 = vmatpush.msrb.mxu0 %v5046_v53  ;;  %964 = vmatpush.msrb.mxu1 %v5048_v54 }
  0xab   :  { %984 = vmatpush.msrb.mxu2 %v5052_v55  ;;  %1004 = vmatpush.msrb.mxu3 %v5054_v56 }
  0xac   :  { %945 = vmatpush.msrb.mxu0 %v5056_v57  ;;  %965 = vmatpush.msrb.mxu1 %v7386_v13  ;;  %v5293_v57 = vperm.slane %v212_v30, 3 }
  0xad   :  { %985 = vmatpush.msrb.mxu2 %v5062_v59  ;;  %1005 = vmatpush.msrb.mxu3 %v5064_v60 }
  0xae   :  { %946 = vmatpush.msrb.mxu0 %v5067_v61  ;;  %966 = vmatpush.msrb.mxu1 %v5069_v62  ;;  %7411 = vst [vmem:[#allocation47_spill] sm:$0xff] %v5293_v57 }
  0xaf   :  { %986 = vmatpush.msrb.mxu2 %v5074_v63  ;;  %1006 = vmatpush.msrb.mxu3 %v7387_v0 }
  0xb0   :  { %947 = vmatpush.msrb.mxu0 %v5082_v26  ;;  %967 = vmatpush.msrb.mxu1 %v5084_v39 }
  0xb1   :  { %987 = vmatpush.msrb.mxu2 %v5088_v52  ;;  %1007 = vmatpush.msrb.mxu3 %v5090_v58 }
  0xbd   :  { %v239_v1 = vpop.f32.mrf.mxu0  ;;  %v280_v2 = vpop.f32.mrf.mxu1 }
  0xbe   :  { %v240_v36 = vadd.f32 %v239_v1, %v5278_v33  ;;  %v281_v37 = vadd.f32 %v280_v2, %v5280_v34 }
  0xc4   :  { %v321_v3 = vpop.f32.mrf.mxu2  ;;  %v362_v4 = vpop.f32.mrf.mxu3 }
  0xc5   :  { %v5228_v5 = vpop.f32.mrf.mxu0  ;;  %v5230_v6 = vpop.f32.mrf.mxu1  ;;  %v322_v47 = vadd.f32 %v321_v3, %v5288_v44  ;;  %v363_v60 = vadd.f32 %v362_v4, %v5293_v57 }
  0xcc   :  { %v5232_v7 = vpop.f32.mrf.mxu2  ;;  %v5234_v8 = vpop.f32.mrf.mxu3 }
  0xcd   :  { %v5236_v9 = vpop.f32.mrf.mxu0  ;;  %v5238_v10 = vpop.f32.mrf.mxu1 }
  0xd4   :  { %v5240_v11 = vpop.f32.mrf.mxu2  ;;  %v5242_v12 = vpop.f32.mrf.mxu3 }
  0xd5   :  { %v5244_v14 = vpop.f32.mrf.mxu0  ;;  %v5246_v15 = vpop.f32.mrf.mxu1 }
  0xd6   :  { %7388 = vst [vmem:[#allocation24_spill] sm:$0xff] %v5244_v14 }
  0xd7   :  { %7389 = vst [vmem:[#allocation25_spill] sm:$0xff] %v5246_v15 }
  0xdc   :  { %v5248_v16 = vpop.f32.mrf.mxu2  ;;  %v5250_v17 = vpop.f32.mrf.mxu3 }
  0xdd   :  { %7390 = vst [vmem:[#allocation26_spill] sm:$0xff] %v5248_v16  ;;  %v5252_v18 = vpop.f32.mrf.mxu0  ;;  %v5254_v19 = vpop.f32.mrf.mxu1  ;;  %v5481_v16 = vld [vmem:[#allocation11 + $0x78] sm:$0xff] }
  0xde   :  { %7391 = vst [vmem:[#allocation27_spill] sm:$0xff] %v5250_v17  ;;  %v5477_v17 = vld [vmem:[#allocation11 + $0x70] sm:$0xff] }
  0xdf   :  { %7392 = vst [vmem:[#allocation28_spill] sm:$0xff] %v5252_v18  ;;  %v5475_v18 = vld [vmem:[#allocation11 + $0x68] sm:$0xff] }
  0xe0   :  { %7393 = vst [vmem:[#allocation29_spill] sm:$0xff] %v5254_v19  ;;  %v5473_v19 = vld [vmem:[#allocation11 + $0x60] sm:$0xff] }
  0xe1   :  { %7426 = vst [vmem:[#allocation62_spill] sm:$0xff] %v5475_v18 }
  0xe2   :  { %7427 = vst [vmem:[#allocation63_spill] sm:$0xff] %v5477_v17 }
  0xe3   :  { %7428 = vst [vmem:[#allocation64_spill] sm:$0xff] %v5481_v16 }
  0xe4   :  { %v5256_v20 = vpop.f32.mrf.mxu2  ;;  %v5262_v23 = vpop.f32.mrf.mxu3 }
  0xe5   :  { %7394 = vst [vmem:[#allocation30_spill] sm:$0xff] %v5256_v20  ;;  %v5258_v21 = vpop.f32.mrf.mxu0  ;;  %v5260_v22 = vpop.f32.mrf.mxu1 }
  0xe6   :  { %7395 = vst [vmem:[#allocation31_spill] sm:$0xff] %v5258_v21  ;;  %v5451_v21 = vld [vmem:[#allocation11 + $0xb0] sm:$0xff] }
  0xe7   :  { %7396 = vst [vmem:[#allocation32_spill] sm:$0xff] %v5260_v22  ;;  %v5449_v22 = vld [vmem:[#allocation11 + $0xa8] sm:$0xff] }
  0xe8   :  { %7397 = vst [vmem:[#allocation33_spill] sm:$0xff] %v5262_v23 }
  0xec   :  { %v5264_v24 = vpop.f32.mrf.mxu2  ;;  %v5270_v28 = vpop.f32.mrf.mxu3 }
  0xed   :  { %7398 = vst [vmem:[#allocation34_spill] sm:$0xff] %v5264_v24  ;;  %v5266_v25 = vpop.f32.mrf.mxu0  ;;  %v5268_v27 = vpop.f32.mrf.mxu1  ;;  %v5447_v24 = vld [vmem:[#allocation11 + $0xa0] sm:$0xff] }
  0xee   :  { %7399 = vst [vmem:[#allocation35_spill] sm:$0xff] %v5266_v25 }
  0xef   :  { %7400 = vst [vmem:[#allocation36_spill] sm:$0xff] %v5268_v27  ;;  %v5437_v27 = vld [vmem:[#allocation11 + $0xc8] sm:$0xff] }
  0xf0   :  { %7401 = vst [vmem:[#allocation37_spill] sm:$0xff] %v5270_v28  ;;  %v5443_v28 = vld [vmem:[#allocation11 + $0xd8] sm:$0xff] }
  0xf4   :  { %v5272_v29 = vpop.f32.mrf.mxu2  ;;  %v5282_v35 = vpop.f32.mrf.mxu3 }
  0xf5   :  { %7402 = vst [vmem:[#allocation38_spill] sm:$0xff] %v5272_v29  ;;  %v5274_v31 = vpop.f32.mrf.mxu0  ;;  %v5276_v32 = vpop.f32.mrf.mxu1  ;;  %v5435_v29 = vld [vmem:[#allocation11 + $0xc0] sm:$0xff] }
  0xf6   :  { %7403 = vst [vmem:[#allocation39_spill] sm:$0xff] %v5274_v31  ;;  %v287_v31 = vadd.f32 %v5238_v10, %v5280_v34 }
  0xf7   :  { %7404 = vst [vmem:[#allocation40_spill] sm:$0xff] %v5276_v32  ;;  %v246_v32 = vadd.f32 %v5236_v9, %v5278_v33  ;;  %v5439_v9 = vld [vmem:[#allocation11 + $0xd0] sm:$0xff] }
  0xf8   :  { %7407 = vst [vmem:[#allocation43_spill] sm:$0xff] %v5282_v35 }
  0xfc   :  { %v5286_v38 = vpop.f32.mrf.mxu2  ;;  %v5291_v48 = vpop.f32.mrf.mxu3 }
  0xfd   :  { %7408 = vst [vmem:[#allocation44_spill] sm:$0xff] %v5286_v38  ;;  %v506_v40 = vpop.f32.mrf.mxu0  ;;  %v526_v41 = vpop.f32.mrf.mxu1  ;;  %v5423_v38 = vld [vmem:[#allocation11 + $0xf0] sm:$0xff] }
  0xfe   :  { %v569_v42 = vadd.f32 %v506_v40, %v240_v36  ;;  %v570_v43 = vadd.f32 %v526_v41, %v281_v37  ;;  %7410 = vst [vmem:[#allocation46_spill] sm:$0xff] %v5291_v48  ;;  %v5421_v48 = vld [vmem:[#allocation11 + $0xe8] sm:$0xff] }
 0x100   :  { %v4288_v45 = vmul.f32 -1.442695, %v569_v42  ;;  %v4289_v46 = vmul.f32 -1.442695, %v570_v43 }
 0x102   :  { %4350 = vpow2.f32 %v4288_v45 }
 0x103   :  { %4352 = vpow2.f32 %v4289_v46 }
 0x104   :  { %v546_v49 = vpop.f32.mrf.mxu2  ;;  %v566_v58 = vpop.f32.mrf.mxu3 }
 0x105   :  { %v571_v50 = vadd.f32 %v546_v49, %v322_v47  ;;  %v572_v63 = vadd.f32 %v566_v58, %v363_v60 }
 0x107   :  { %v4290_v51 = vmul.f32 -1.442695, %v571_v50 }
 0x108   :  { %v4351_v53 = vpop.eup %4350 }
 0x109   :  { %v4353_v54 = vpop.eup %4352  ;;  %v582_v55 = vadd.f32 1.0, %v4351_v53  ;;  %4354 = vpow2.f32 %v4290_v51 }
 0x10a   :  { %v583_v56 = vadd.f32 1.0, %v4353_v54 }
 0x10b   :  { %4356 = vrcp.f32 %v582_v55  ;;  %v596_v1 = vand.u32 2147483648, %v582_v55  ;;  %v594_v30 = vand.u32 2147483647, %v582_v55  ;;  %vm590_vm2 = vweird.f32 %v582_v55 }
 0x10c   :  { %4358 = vrcp.f32 %v583_v56  ;;  %v611_v2 = vand.u32 2147483648, %v583_v56  ;;  %v609_v37 = vand.u32 2147483647, %v583_v56  ;;  %vm605_vm3 = vweird.f32 %v583_v56 }
 0x10d   :  { %v597_v42 = vor.u32 1.1754944e-38, %v596_v1  ;;  %vm595_vm5 = vcmp.eq.f32.partialorder %v594_v30, 8.507059e+37 }
 0x10e   :  { %v612_v45 = vor.u32 1.1754944e-38, %v611_v2  ;;  %vm610_vm7 = vcmp.eq.f32.partialorder %v609_v37, 8.507059e+37 }
 0x10f   :  { %v4355_v59 = vpop.eup %4354 }
 0x110   :  { %v584_v61 = vadd.f32 1.0, %v4355_v59 }
 0x111   :  { %v4357_v62 = vpop.eup %4356 }
 0x112   :  { %v4359_v26 = vpop.eup %4358  ;;  %v586_v39 = vmul.f32 %v4357_v62, %v582_v55  ;;  %4360 = vrcp.f32 %v584_v61  ;;  %vm591_vm0 = vweird.f32 %v4357_v62  ;;  %vm620_vm9 = vweird.f32 %v584_v61 }
 0x113   :  { %v601_v52 = vmul.f32 %v4359_v26, %v583_v56  ;;  %4362 = vtanh.f32 %v572_v63  ;;  %vm606_vm1 = vweird.f32 %v4359_v26  ;;  %vm592_vm4 = vmor %vm590_vm2, %vm591_vm0  ;;  %v626_v56 = vand.u32 2147483648, %v584_v61 }
 0x114   :  { %v587_v0 = vsub.f32 1.0, %v586_v39  ;;  %vm607_vm6 = vmor %vm605_vm3, %vm606_vm1 }
 0x115   :  { %v602_v13 = vsub.f32 1.0, %v601_v52  ;;  %v627_v39 = vor.u32 1.1754944e-38, %v626_v56 }
 0x116   :  { %v588_v3 = vmul.f32 %v4357_v62, %v587_v0 }
 0x117   :  { %v603_v36 = vmul.f32 %v4359_v26, %v602_v13  ;;  %v243_v13 = vadd.f32 %v5228_v5, %v5278_v33  ;;  %v5501_v33 = vld [vmem:[#allocation11 + $0x30] sm:$0xff] }
 0x118   :  { %v4361_v40 = vpop.eup %4360  ;;  %v589_v4 = vadd.f32 %v4357_v62, %v588_v3 }
 0x119   :  { %v616_v41 = vmul.f32 %v4361_v40, %v584_v61  ;;  %v604_v43 = vadd.f32 %v4359_v26, %v603_v36  ;;  %v4363_v47 = vpop.eup %4362  ;;  %vm621_vm8 = vweird.f32 %v4361_v40 }
 0x11a   :  { %v593_v46 = vsel %vm592_vm4, %v4357_v62, %v589_v4  ;;  %v624_v62 = vand.u32 2147483647, %v584_v61  ;;  %vm622_vm10 = vmor %vm620_vm9, %vm621_vm8  ;;  %v284_v61 = vadd.f32 %v5230_v6, %v5280_v34  ;;  %v5493_v34 = vld [vmem:[#allocation11 + $0x58] sm:$0xff] }
 0x11b   :  { %v617_v49 = vsub.f32 1.0, %v616_v41  ;;  %v598_v50 = vsel %vm595_vm5, %v597_v42, %v593_v46  ;;  %v608_v51 = vsel %vm607_vm6, %v4359_v26, %v604_v43  ;;  %7432 = vst [vmem:[#allocation68_spill] sm:$0xff] %v5493_v34 }
 0x11c   :  { %v613_v53 = vsel %vm610_vm7, %v612_v45, %v608_v51  ;;  %v633_v54 = vmul.f32 %v4363_v47, %v598_v50  ;;  %vm625_vm11 = vcmp.eq.f32.partialorder %v624_v62, 8.507059e+37 }
 0x11d   :  { %v618_v58 = vmul.f32 %v4361_v40, %v617_v49  ;;  %v632_v59 = vmul.f32 0.0, %v613_v53  ;;  %v366_v49 = vadd.f32 %v5234_v8, %v5293_v57 }
 0x11f   :  { %v5296_v60 = vadd.f32 %v633_v54, %v632_v59  ;;  %v619_v55 = vadd.f32 %v4361_v40, %v618_v58 }
 0x121   :  { %4364 = vtanh.f32 %v5296_v60  ;;  %v623_v63 = vsel %vm622_vm10, %v4361_v40, %v619_v55  ;;  %v325_v40 = vadd.f32 %v5232_v7, %v5288_v44 }
 0x122   :  { %v628_v26 = vsel %vm625_vm11, %v627_v39, %v623_v63 }
 0x127   :  { %v4365_v52 = vpop.eup %4364 }
 0x128   :  { %v5299_v0 = vmul.f32 %v4365_v52, %v628_v26 }
 0x12a   :  { %7412 = vst [vmem:[#allocation48_spill] sm:$0xff] %v5299_v0  ;;  %726 = vmatmul.f32.vlgmr.msra.gmra.mxu0 %v5299_v0  ;;  %746 = vmatmul.f32.vlgmr.msra.gmra.mxu1 %v5299_v0 }
 0x12b   :  { %766 = vmatmul.f32.vlgmr.msra.gmra.mxu2 %v5299_v0  ;;  %786 = vmatmul.f32.vlgmr.msra.gmra.mxu3 %v5299_v0 }
 0x1a7   :  { %v727_v1 = vpop.f32.mrf.mxu0  ;;  %v747_v2 = vpop.f32.mrf.mxu1 }
 0x1a8   :  { %v790_v3 = vadd.f32 %v727_v1, %v243_v13  ;;  %v791_v30 = vadd.f32 %v747_v2, %v284_v61 }
 0x1aa   :  { %v4291_v36 = vmul.f32 -1.442695, %v790_v3  ;;  %v4292_v37 = vmul.f32 -1.442695, %v791_v30 }
 0x1ac   :  { %4366 = vpow2.f32 %v4291_v36 }
 0x1ad   :  { %4368 = vpow2.f32 %v4292_v37 }
 0x1ae   :  { %v767_v4 = vpop.f32.mrf.mxu2  ;;  %v787_v6 = vpop.f32.mrf.mxu3 }
 0x1af   :  { %v792_v41 = vadd.f32 %v767_v4, %v325_v40  ;;  %v793_v53 = vadd.f32 %v787_v6, %v366_v49 }
 0x1b1   :  { %v4293_v42 = vmul.f32 -1.442695, %v792_v41 }
 0x1b2   :  { %v4367_v43 = vpop.eup %4366 }
 0x1b3   :  { %v4369_v45 = vpop.eup %4368  ;;  %v803_v5 = vadd.f32 1.0, %v4367_v43  ;;  %4370 = vpow2.f32 %v4293_v42 }
 0x1b4   :  { %v804_v46 = vadd.f32 1.0, %v4369_v45 }
 0x1b5   :  { %4372 = vrcp.f32 %v803_v5  ;;  %v817_v56 = vand.u32 2147483648, %v803_v5  ;;  %v815_v39 = vand.u32 2147483647, %v803_v5  ;;  %vm811_vm14 = vweird.f32 %v803_v5 }
 0x1b6   :  { %4374 = vrcp.f32 %v804_v46  ;;  %v832_v62 = vand.u32 2147483648, %v804_v46  ;;  %v830_v26 = vand.u32 2147483647, %v804_v46  ;;  %vm826_vm15 = vweird.f32 %v804_v46 }
 0x1b7   :  { %v818_v1 = vor.u32 1.1754944e-38, %v817_v56  ;;  %vm816_vm2 = vcmp.eq.f32.partialorder %v815_v39, 8.507059e+37  ;;  %v5337_v56 = vld [vmem:[#allocation11 + $0x1c8] sm:$0xff]  ;;  %v5347_v39 = vld [vmem:[#allocation11 + $0x1a0] sm:$0xff] }
 0x1b8   :  { %v833_v3 = vor.u32 1.1754944e-38, %v832_v62  ;;  %vm831_vm3 = vcmp.eq.f32.partialorder %v830_v26, 8.507059e+37  ;;  %7418 = vst [vmem:[#allocation54_spill] sm:$0xff] %v5337_v56  ;;  %v5339_v62 = vld [vmem:[#allocation11 + $0x1d0] sm:$0xff] }
 0x1b9   :  { %v4371_v47 = vpop.eup %4370  ;;  %v5351_v26 = vld [vmem:[#allocation11 + $0x1b0] sm:$0xff] }
 0x1ba   :  { %v805_v50 = vadd.f32 1.0, %v4371_v47 }
 0x1bb   :  { %v4373_v51 = vpop.eup %4372 }
 0x1bc   :  { %v4375_v7 = vpop.eup %4374  ;;  %v807_v54 = vmul.f32 %v4373_v51, %v803_v5  ;;  %4376 = vrcp.f32 %v805_v50  ;;  %vm812_vm12 = vweird.f32 %v4373_v51  ;;  %v847_v6 = vand.u32 2147483648, %v805_v50 }
 0x1bd   :  { %v822_v58 = vmul.f32 %v4375_v7, %v804_v46  ;;  %4378 = vtanh.f32 %v793_v53  ;;  %vm827_vm13 = vweird.f32 %v4375_v7  ;;  %vm813_vm0 = vmor %vm811_vm14, %vm812_vm12  ;;  %vm841_vm5 = vweird.f32 %v805_v50 }
 0x1be   :  { %v808_v59 = vsub.f32 1.0, %v807_v54  ;;  %vm828_vm1 = vmor %vm826_vm15, %vm827_vm13  ;;  %v845_v47 = vand.u32 2147483647, %v805_v50 }
 0x1bf   :  { %v823_v55 = vsub.f32 1.0, %v822_v58  ;;  %v5325_v58 = vld [vmem:[#allocation11 + $0x1e8] sm:$0xff] }
 0x1c0   :  { %v809_v63 = vmul.f32 %v4373_v51, %v808_v59  ;;  %vm846_vm7 = vcmp.eq.f32.partialorder %v845_v47, 8.507059e+37  ;;  %1174 = vmatpush.msra.mxu1 %v5325_v58  ;;  %v5331_v59 = vld [vmem:[#allocation11 + $0x1f8] sm:$0xff]  ;;  %v5407_v47 = vld [vmem:[#allocation11 + $0x100] sm:$0xff] }
 0x1c1   :  { %v824_v52 = vmul.f32 %v4375_v7, %v823_v55  ;;  %7416 = vst [vmem:[#allocation52_spill] sm:$0xff] %v5331_v59  ;;  %1214 = vmatpush.msra.mxu3 %v5331_v59  ;;  %v5335_v55 = vld [vmem:[#allocation11 + $0x1c0] sm:$0xff] }
 0x1c2   :  { %v4377_v13 = vpop.eup %4376  ;;  %v810_v8 = vadd.f32 %v4373_v51, %v809_v63  ;;  %7417 = vst [vmem:[#allocation53_spill] sm:$0xff] %v5335_v55  ;;  %1175 = vmatpush.msra.mxu1 %v5337_v56  ;;  %v5343_v63 = vld [vmem:[#allocation11 + $0x1d8] sm:$0xff] }
 0x1c3   :  { %v837_v61 = vmul.f32 %v4377_v13, %v805_v50  ;;  %v825_v2 = vadd.f32 %v4375_v7, %v824_v52  ;;  %v4379_v36 = vpop.eup %4378  ;;  %vm842_vm4 = vweird.f32 %v4377_v13  ;;  %v5327_v50 = vld [vmem:[#allocation11 + $0x1f0] sm:$0xff]  ;;  %1215 = vmatpush.msra.mxu3 %v5343_v63  ;;  %v5349_v52 = vld [vmem:[#allocation11 + $0x1a8] sm:$0xff] }
 0x1c4   :  { %v814_v30 = vsel %vm813_vm0, %v4373_v51, %v810_v8  ;;  %vm843_vm6 = vmor %vm841_vm5, %vm842_vm4  ;;  %v848_v51 = vor.u32 1.1754944e-38, %v847_v6  ;;  %7415 = vst [vmem:[#allocation51_spill] sm:$0xff] %v5327_v50  ;;  %1194 = vmatpush.msra.mxu2 %v5327_v50  ;;  %1176 = vmatpush.msra.mxu1 %v5349_v52  ;;  %v5359_v8 = vld [vmem:[#allocation11 + $0x180] sm:$0xff]  ;;  %v5403_v6 = vld [vmem:[#allocation11 + $0x138] sm:$0xff] }
 0x1c5   :  { %v838_v37 = vsub.f32 1.0, %v837_v61  ;;  %v819_v40 = vsel %vm816_vm2, %v818_v1, %v814_v30  ;;  %v829_v4 = vsel %vm828_vm1, %v4375_v7, %v825_v2  ;;  %v5361_v61 = vld [vmem:[#allocation11 + $0x188] sm:$0xff]  ;;  %v5363_v1 = vld [vmem:[#allocation11 + $0x190] sm:$0xff]  ;;  %v5367_v2 = vld [vmem:[#allocation11 + $0x198] sm:$0xff] }
 0x1c6   :  { %v834_v41 = vsel %vm831_vm3, %v833_v3, %v829_v4  ;;  %v854_v42 = vmul.f32 %v4379_v36, %v819_v40  ;;  %1195 = vmatpush.msra.mxu2 %v5339_v62  ;;  %7419 = vst [vmem:[#allocation55_spill] sm:$0xff] %v5361_v61  ;;  %1177 = vmatpush.msra.mxu1 %v5361_v61  ;;  %v5371_v3 = vld [vmem:[#allocation11 + $0x160] sm:$0xff]  ;;  %v5373_v30 = vld [vmem:[#allocation11 + $0x168] sm:$0xff]  ;;  %v5375_v36 = vld [vmem:[#allocation11 + $0x170] sm:$0xff] }
 0x1c7   :  { %v839_v43 = vmul.f32 %v4377_v13, %v838_v37  ;;  %v853_v45 = vmul.f32 %v834_v41, %v5296_v60  ;;  %v5323_v60 = vld [vmem:[#allocation11 + $0x1e0] sm:$0xff]  ;;  %7420 = vst [vmem:[#allocation56_spill] sm:$0xff] %v5363_v1  ;;  %v5379_v37 = vld [vmem:[#allocation11 + $0x178] sm:$0xff]  ;;  %v5385_v4 = vld [vmem:[#allocation11 + $0x148] sm:$0xff] }
 0x1c8   :  { %7414 = vst [vmem:[#allocation50_spill] sm:$0xff] %v5323_v60  ;;  %1154 = vmatpush.msra.mxu0 %v5323_v60  ;;  %1196 = vmatpush.msra.mxu2 %v5351_v26  ;;  %v5383_v40 = vld [vmem:[#allocation11 + $0x140] sm:$0xff]  ;;  %v5387_v41 = vld [vmem:[#allocation11 + $0x150] sm:$0xff] }
 0x1c9   :  { %v5314_v5 = vadd.f32 %v854_v42, %v853_v45  ;;  %v840_v46 = vadd.f32 %v4377_v13, %v839_v43  ;;  %1178 = vmatpush.msra.mxu1 %v5373_v30  ;;  %7421 = vst [vmem:[#allocation57_spill] sm:$0xff] %v5379_v37  ;;  %v5391_v42 = vld [vmem:[#allocation11 + $0x158] sm:$0xff]  ;;  %v5395_v43 = vld [vmem:[#allocation11 + $0x120] sm:$0xff]  ;;  %v5397_v45 = vld [vmem:[#allocation11 + $0x128] sm:$0xff] }
 0x1ca   :  { %1155 = vmatpush.msra.mxu0 %v5335_v55  ;;  %1197 = vmatpush.msra.mxu2 %v5363_v1  ;;  %7422 = vst [vmem:[#allocation58_spill] sm:$0xff] %v5387_v41 }
 0x1cb   :  { %4380 = vtanh.f32 %v5314_v5  ;;  %v844_v49 = vsel %vm843_vm6, %v4377_v13, %v840_v46  ;;  %v5355_v13 = vld [vmem:[#allocation11 + $0x1b8] sm:$0xff]  ;;  %1179 = vmatpush.msra.mxu1 %v5385_v4  ;;  %7423 = vst [vmem:[#allocation59_spill] sm:$0xff] %v5391_v42  ;;  %v5399_v46 = vld [vmem:[#allocation11 + $0x130] sm:$0xff] }
 0x1cc   :  { %v849_v7 = vsel %vm846_vm7, %v848_v51, %v844_v49  ;;  %1156 = vmatpush.msra.mxu0 %v5347_v39  ;;  %1216 = vmatpush.msra.mxu3 %v5355_v13  ;;  %7424 = vst [vmem:[#allocation60_spill] sm:$0xff] %v5395_v43  ;;  %v5409_v49 = vld [vmem:[#allocation11 + $0x108] sm:$0xff]  ;;  %v5411_v51 = vld [vmem:[#allocation11 + $0x110] sm:$0xff] }
 0x1cd   :  { %1198 = vmatpush.msra.mxu2 %v5375_v36  ;;  %7425 = vst [vmem:[#allocation61_spill] sm:$0xff] %v5397_v45  ;;  %1180 = vmatpush.msra.mxu1 %v5397_v45 }
 0x1ce   :  { %1157 = vmatpush.msra.mxu0 %v5359_v8  ;;  %1217 = vmatpush.msra.mxu3 %v5367_v2 }
 0x1cf   :  { %1199 = vmatpush.msra.mxu2 %v5387_v41  ;;  %1181 = vmatpush.msra.mxu1 %v5409_v49 }
 0x1d0   :  { %1158 = vmatpush.msra.mxu0 %v5371_v3  ;;  %1218 = vmatpush.msra.mxu3 %v5379_v37 }
 0x1d1   :  { %v4381_v53 = vpop.eup %4380  ;;  %1200 = vmatpush.msra.mxu2 %v5399_v46  ;;  %1182 = vmatpush.msra.mxu1 %v5421_v48 }
 0x1d2   :  { %v5317_v54 = vmul.f32 %v4381_v53, %v849_v7  ;;  %1159 = vmatpush.msra.mxu0 %v5383_v40  ;;  %1219 = vmatpush.msra.mxu3 %v5391_v42  ;;  %v5415_v53 = vld [vmem:[#allocation11 + $0x118] sm:$0xff]  ;;  %v5419_v7 = vld [vmem:[#allocation11 + $0xe0] sm:$0xff] }
 0x1d3   :  { %1201 = vmatpush.msra.mxu2 %v5411_v51  ;;  %1183 = vmatpush.msra.mxu1 %v5437_v27 }
 0x1d4   :  { %7413 = vst [vmem:[#allocation49_spill] sm:$0xff] %v5317_v54  ;;  %948 = vmatmul.f32.vlgmr.msrb.gmra.mxu0 %v5317_v54  ;;  %968 = vmatmul.f32.vlgmr.msrb.gmra.mxu1 %v5317_v54 }
 0x1d5   :  { %988 = vmatmul.f32.vlgmr.msrb.gmra.mxu2 %v5317_v54  ;;  %1008 = vmatmul.f32.vlgmr.msrb.gmra.mxu3 %v5317_v54  ;;  %v5431_v54 = vld [vmem:[#allocation11 + $0xf8] sm:$0xff] }
 0x1d6   :  { %1160 = vmatpush.msra.mxu0 %v5395_v43  ;;  %1220 = vmatpush.msra.mxu3 %v5403_v6 }
 0x1d7   :  { %1202 = vmatpush.msra.mxu2 %v5423_v38  ;;  %1184 = vmatpush.msra.mxu1 %v5449_v22 }
 0x1d8   :  { %1161 = vmatpush.msra.mxu0 %v5407_v47  ;;  %1221 = vmatpush.msra.mxu3 %v5415_v53 }
 0x1d9   :  { %1203 = vmatpush.msra.mxu2 %v5439_v9 }
 0x1da   :  { %1162 = vmatpush.msra.mxu0 %v5419_v7  ;;  %1222 = vmatpush.msra.mxu3 %v5431_v54 }
 0x1db   :  { %1204 = vmatpush.msra.mxu2 %v5451_v21 }
 0x1dc   :  { %1163 = vmatpush.msra.mxu0 %v5435_v29  ;;  %1223 = vmatpush.msra.mxu3 %v5443_v28 }
 0x1de   :  { %1164 = vmatpush.msra.mxu0 %v5447_v24 }
 0x251   :  { %v949_v0 = vpop.f32.mrf.mxu0  ;;  %v969_v35 = vpop.f32.mrf.mxu1 }
 0x252   :  { %v1012_v25 = vadd.f32 %v949_v0, %v246_v32  ;;  %v1013_v10 = vadd.f32 %v969_v35, %v287_v31  ;;  %v5455_v31 = vld [vmem:[#allocation11 + $0xb8] sm:$0xff]  ;;  %v5459_v32 = vld [vmem:[#allocation11 + $0x80] sm:$0xff]  ;;  %v5461_v35 = vld [vmem:[#allocation11 + $0x88] sm:$0xff] }
 0x253   :  { %1224 = vmatpush.msra.mxu3 %v5455_v31  ;;  %v5463_v0 = vld [vmem:[#allocation11 + $0x90] sm:$0xff]  ;;  %1165 = vmatpush.msra.mxu0 %v5459_v32 }
 0x254   :  { %v4294_v23 = vmul.f32 -1.442695, %v1012_v25  ;;  %v4295_v20 = vmul.f32 -1.442695, %v1013_v10  ;;  %1185 = vmatpush.msra.mxu1 %v5461_v35  ;;  %v5467_v25 = vld [vmem:[#allocation11 + $0x98] sm:$0xff]  ;;  %v328_v10 = vadd.f32 %v5240_v11, %v5288_v44  ;;  %1205 = vmatpush.msra.mxu2 %v5463_v0  ;;  %v5485_v11 = vld [vmem:[#allocation11 + $0x40] sm:$0xff] }
 0x255   :  { %1225 = vmatpush.msra.mxu3 %v5467_v25  ;;  %1166 = vmatpush.msra.mxu0 %v5473_v19  ;;  %7429 = vst [vmem:[#allocation65_spill] sm:$0xff] %v5485_v11  ;;  %v5489_v44 = vld [vmem:[#allocation11 + $0x50] sm:$0xff] }
 0x256   :  { %4382 = vpow2.f32 %v4294_v23  ;;  %1186 = vmatpush.msra.mxu1 %v5475_v18  ;;  %1206 = vmatpush.msra.mxu2 %v5477_v17  ;;  %7431 = vst [vmem:[#allocation67_spill] sm:$0xff] %v5489_v44  ;;  %v5517_v18 = vld [vmem:[#allocation11 + $0x18] sm:$0xff] }
 0x257   :  { %4384 = vpow2.f32 %v4295_v20  ;;  %1226 = vmatpush.msra.mxu3 %v5481_v16  ;;  %v5487_v20 = vld [vmem:[#allocation11 + $0x48] sm:$0xff]  ;;  %1167 = vmatpush.msra.mxu0 %v5485_v11  ;;  %v5505_v11 = vld [vmem:[#allocation11 + $0x38] sm:$0xff] }
 0x258   :  { %v989_v23 = vpop.f32.mrf.mxu2  ;;  %7430 = vst [vmem:[#allocation66_spill] sm:$0xff] %v5487_v20  ;;  %1187 = vmatpush.msra.mxu1 %v5487_v20  ;;  %1207 = vmatpush.msra.mxu2 %v5489_v44  ;;  %v5507_v20 = vld [vmem:[#allocation11] sm:$0xff] }
 0x259   :  { %v1014_v15 = vadd.f32 %v989_v23, %v328_v10  ;;  %1227 = vmatpush.msra.mxu3 %v5493_v34  ;;  %v5497_v10 = vld [vmem:[#allocation11 + $0x20] sm:$0xff]  ;;  %v5499_v23 = vld [vmem:[#allocation11 + $0x28] sm:$0xff]  ;;  %v5515_v34 = vld [vmem:[#allocation11 + $0x10] sm:$0xff] }
 0x25a   :  { %7433 = vst [vmem:[#allocation69_spill] sm:$0xff] %v5497_v10  ;;  %1168 = vmatpush.msra.mxu0 %v5497_v10  ;;  %1188 = vmatpush.msra.mxu1 %v5499_v23 }
 0x25b   :  { %v4296_v14 = vmul.f32 -1.442695, %v1014_v15  ;;  %v5509_v15 = vld [vmem:[#allocation11 + $0x8] sm:$0xff]  ;;  %1208 = vmatpush.msra.mxu2 %v5501_v33  ;;  %1228 = vmatpush.msra.mxu3 %v5505_v11 }
 0x25c   :  { %v4383_v16 = vpop.eup %4382  ;;  %1169 = vmatpush.msra.mxu0 %v5507_v20  ;;  %1189 = vmatpush.msra.mxu1 %v5509_v15 }
 0x25d   :  { %v4385_v44 = vpop.eup %4384  ;;  %v5511_v17 = vadd.f32 1.0, %v4383_v16  ;;  %4386 = vpow2.f32 %v4296_v14  ;;  %1209 = vmatpush.msra.mxu2 %v5515_v34  ;;  %1229 = vmatpush.msra.mxu3 %v5517_v18  ;;  %v1009_v14 = vpop.f32.mrf.mxu3 }
 0x25e   :  { %v5519_v10 = vadd.f32 1.0, %v4385_v44  ;;  %1376 = vmatpush.msrb.mxu0 %v5323_v60  ;;  %1396 = vmatpush.msrb.mxu1 %v5325_v58  ;;  %v369_v44 = vadd.f32 %v5242_v12, %v5293_v57 }
 0x25f   :  { %4388 = vrcp.f32 %v5511_v17  ;;  %1416 = vmatpush.msrb.mxu2 %v5327_v50  ;;  %1436 = vmatpush.msrb.mxu3 %v5331_v59  ;;  %vm1033_vm10 = vweird.f32 %v5511_v17 }
 0x260   :  { %4390 = vrcp.f32 %v5519_v10  ;;  %1377 = vmatpush.msrb.mxu0 %v5335_v55  ;;  %1397 = vmatpush.msrb.mxu1 %v5337_v56  ;;  %v1015_v50 = vadd.f32 %v1009_v14, %v369_v44  ;;  %v1039_v44 = vand.u32 2147483648, %v5511_v17  ;;  %v1054_v57 = vand.u32 2147483648, %v5519_v10 }
 0x261   :  { %1417 = vmatpush.msrb.mxu2 %v5339_v62  ;;  %1437 = vmatpush.msrb.mxu3 %v5343_v63  ;;  %vm1048_vm11 = vweird.f32 %v5519_v10 }
 0x262   :  { %1378 = vmatpush.msrb.mxu0 %v5347_v39  ;;  %1398 = vmatpush.msrb.mxu1 %v5349_v52 }
 0x263   :  { %v4387_v16 = vpop.eup %4386  ;;  %1418 = vmatpush.msrb.mxu2 %v5351_v26  ;;  %1438 = vmatpush.msrb.mxu3 %v5355_v13 }
 0x264   :  { %v5537_v60 = vadd.f32 1.0, %v4387_v16  ;;  %1379 = vmatpush.msrb.mxu0 %v5359_v8  ;;  %1399 = vmatpush.msrb.mxu1 %v5361_v61 }
 0x265   :  { %v4389_v59 = vpop.eup %4388  ;;  %1419 = vmatpush.msrb.mxu2 %v5363_v1  ;;  %1439 = vmatpush.msrb.mxu3 %v5367_v2  ;;  %v1037_v1 = vand.u32 2147483647, %v5511_v17 }
 0x266   :  { %v4391_v56 = vpop.eup %4390  ;;  %v1029_v55 = vmul.f32 %v4389_v59, %v5511_v17  ;;  %4392 = vrcp.f32 %v5537_v60  ;;  %1380 = vmatpush.msrb.mxu0 %v5371_v3  ;;  %1400 = vmatpush.msrb.mxu1 %v5373_v30  ;;  %vm1034_vm8 = vweird.f32 %v4389_v59  ;;  %v1055_v17 = vor.u32 1.1754944e-38, %v1054_v57 }
 0x267   :  { %v1044_v12 = vmul.f32 %v4391_v56, %v5519_v10  ;;  %4394 = vtanh.f32 %v1015_v50  ;;  %1420 = vmatpush.msrb.mxu2 %v5375_v36  ;;  %1440 = vmatpush.msrb.mxu3 %v5379_v37  ;;  %vm1049_vm9 = vweird.f32 %v4391_v56  ;;  %vm1035_vm12 = vmor %vm1033_vm10, %vm1034_vm8  ;;  %vm1038_vm14 = vcmp.eq.f32.partialorder %v1037_v1, 8.507059e+37 }
 0x268   :  { %v1030_v14 = vsub.f32 1.0, %v1029_v55  ;;  %1381 = vmatpush.msrb.mxu0 %v5383_v40  ;;  %1401 = vmatpush.msrb.mxu1 %v5385_v4  ;;  %vm1050_vm13 = vmor %vm1048_vm11, %vm1049_vm9  ;;  %vm1063_vm1 = vweird.f32 %v5537_v60 }
 0x269   :  { %v1045_v16 = vsub.f32 1.0, %v1044_v12  ;;  %v1052_v12 = vand.u32 2147483647, %v5519_v10  ;;  %1421 = vmatpush.msrb.mxu2 %v5387_v41  ;;  %1441 = vmatpush.msrb.mxu3 %v5391_v42 }
 0x26a   :  { %v1031_v61 = vmul.f32 %v4389_v59, %v1030_v14  ;;  %1382 = vmatpush.msrb.mxu0 %v5395_v43  ;;  %1402 = vmatpush.msrb.mxu1 %v5397_v45 }
 0x26b   :  { %v1046_v55 = vmul.f32 %v4391_v56, %v1045_v16  ;;  %v1040_v16 = vor.u32 1.1754944e-38, %v1039_v44  ;;  %1422 = vmatpush.msrb.mxu2 %v5399_v46  ;;  %1442 = vmatpush.msrb.mxu3 %v5403_v6  ;;  %vm1053_vm15 = vcmp.eq.f32.partialorder %v1052_v12, 8.507059e+37  ;;  %v7436_v12 = vld [vmem:[#allocation64_spill] sm:$0xff] }
 0x26c   :  { %v5562_v50 = vpop.eup %4392  ;;  %v1032_v37 = vadd.f32 %v4389_v59, %v1031_v61  ;;  %1383 = vmatpush.msrb.mxu0 %v5407_v47  ;;  %1403 = vmatpush.msrb.mxu1 %v5409_v49 }
 0x26d   :  { %v1059_v14 = vmul.f32 %v5562_v50, %v5537_v60  ;;  %v1047_v41 = vadd.f32 %v4391_v56, %v1046_v55  ;;  %v4395_v10 = vpop.eup %4394  ;;  %1423 = vmatpush.msrb.mxu2 %v5411_v51  ;;  %1443 = vmatpush.msrb.mxu3 %v5415_v53  ;;  %vm1064_vm0 = vweird.f32 %v5562_v50 }
 0x26e   :  { %v1036_v61 = vsel %vm1035_vm12, %v4389_v59, %v1032_v37  ;;  %1384 = vmatpush.msrb.mxu0 %v5419_v7  ;;  %1404 = vmatpush.msrb.mxu1 %v5421_v48  ;;  %v1067_v37 = vand.u32 2147483647, %v5537_v60  ;;  %vm1065_vm2 = vmor %vm1063_vm1, %vm1064_vm0 }
 0x26f   :  { %v1060_v45 = vsub.f32 1.0, %v1059_v14  ;;  %v1041_v43 = vsel %vm1038_vm14, %v1040_v16, %v1036_v61  ;;  %v1051_v42 = vsel %vm1050_vm13, %v4391_v56, %v1047_v41  ;;  %1424 = vmatpush.msrb.mxu2 %v5423_v38  ;;  %1444 = vmatpush.msrb.mxu3 %v5431_v54  ;;  %v7438_v14 = vld [vmem:[#allocation66_spill] sm:$0xff]  ;;  %v7439_v61 = vld [vmem:[#allocation67_spill] sm:$0xff] }
 0x270   :  { %v1056_v44 = vsel %vm1053_vm15, %v1055_v17, %v1051_v42  ;;  %v1076_v55 = vmul.f32 %v4395_v10, %v1041_v43  ;;  %1385 = vmatpush.msrb.mxu0 %v5435_v29  ;;  %1405 = vmatpush.msrb.mxu1 %v5437_v27  ;;  %v7434_v42 = vld [vmem:[#allocation62_spill] sm:$0xff]  ;;  %vm1068_vm3 = vcmp.eq.f32.partialorder %v1067_v37, 8.507059e+37  ;;  %v7440_v10 = vld [vmem:[#allocation68_spill] sm:$0xff] }
 0x271   :  { %v1061_v57 = vmul.f32 %v5562_v50, %v1060_v45  ;;  %v1075_v59 = vmul.f32 %v1056_v44, %v5314_v5  ;;  %1425 = vmatpush.msrb.mxu2 %v5439_v9  ;;  %1445 = vmatpush.msrb.mxu3 %v5443_v28  ;;  %v1069_v5 = vand.u32 2147483648, %v5537_v60  ;;  %v7435_v45 = vld [vmem:[#allocation63_spill] sm:$0xff]  ;;  %v7437_v60 = vld [vmem:[#allocation65_spill] sm:$0xff]  ;;  %v7449_v37 = vld [vmem:[#allocation56_spill] sm:$0xff] }
 0x272   :  { %1386 = vmatpush.msrb.mxu0 %v5447_v24  ;;  %1406 = vmatpush.msrb.mxu1 %v5449_v22  ;;  %v7442_v44 = vld [vmem:[#allocation69_spill] sm:$0xff] }
 0x273   :  { %v5586_v56 = vadd.f32 %v1076_v55, %v1075_v59  ;;  %v1062_v1 = vadd.f32 %v5562_v50, %v1061_v57  ;;  %1426 = vmatpush.msrb.mxu2 %v5451_v21  ;;  %1446 = vmatpush.msrb.mxu3 %v5455_v31  ;;  %v1070_v43 = vor.u32 1.1754944e-38, %v1069_v5  ;;  %v7443_v55 = vld [vmem:[#allocation50_spill] sm:$0xff]  ;;  %v7444_v57 = vld [vmem:[#allocation51_spill] sm:$0xff]  ;;  %v7445_v59 = vld [vmem:[#allocation52_spill] sm:$0xff] }
 0x274   :  { %1387 = vmatpush.msrb.mxu0 %v5459_v32  ;;  %1407 = vmatpush.msrb.mxu1 %v5461_v35  ;;  %v7447_v5 = vld [vmem:[#allocation54_spill] sm:$0xff] }
 0x275   :  { %4396 = vtanh.f32 %v5586_v56  ;;  %1427 = vmatpush.msrb.mxu2 %v5463_v0  ;;  %1447 = vmatpush.msrb.mxu3 %v5467_v25  ;;  %v1066_v41 = vsel %vm1065_vm2, %v5562_v50, %v1062_v1  ;;  %v7446_v1 = vld [vmem:[#allocation53_spill] sm:$0xff] }
 0x276   :  { %1388 = vmatpush.msrb.mxu0 %v5473_v19  ;;  %1408 = vmatpush.msrb.mxu1 %v7434_v42  ;;  %v1071_v17 = vsel %vm1068_vm3, %v1070_v43, %v1066_v41 }
 0x277   :  { %1428 = vmatpush.msrb.mxu2 %v7435_v45  ;;  %1448 = vmatpush.msrb.mxu3 %v7436_v12 }
 0x278   :  { %1389 = vmatpush.msrb.mxu0 %v7437_v60  ;;  %1409 = vmatpush.msrb.mxu1 %v7438_v14 }
 0x279   :  { %1429 = vmatpush.msrb.mxu2 %v7439_v61  ;;  %1449 = vmatpush.msrb.mxu3 %v7440_v10 }
 0x27a   :  { %1390 = vmatpush.msrb.mxu0 %v7442_v44  ;;  %1410 = vmatpush.msrb.mxu1 %v5499_v23 }
 0x27b   :  { %v4397_v16 = vpop.eup %4396  ;;  %1430 = vmatpush.msrb.mxu2 %v5501_v33  ;;  %1450 = vmatpush.msrb.mxu3 %v5505_v11 }
 0x27c   :  { %v5613_v50 = vmul.f32 %v4397_v16, %v1071_v17  ;;  %1391 = vmatpush.msrb.mxu0 %v5507_v20  ;;  %1411 = vmatpush.msrb.mxu1 %v5509_v15 }
 0x27d   :  { %1431 = vmatpush.msrb.mxu2 %v5515_v34  ;;  %1451 = vmatpush.msrb.mxu3 %v5517_v18 }
 0x27e   :  { %7441 = vst [vmem:[#allocation62_spill] sm:$0xff] %v5613_v50  ;;  %1170 = vmatmul.f32.vlgmr.msra.gmra.mxu0 %v5613_v50  ;;  %1190 = vmatmul.f32.vlgmr.msra.gmra.mxu1 %v5613_v50 }
 0x27f   :  { %1210 = vmatmul.f32.vlgmr.msra.gmra.mxu2 %v5613_v50  ;;  %1230 = vmatmul.f32.vlgmr.msra.gmra.mxu3 %v5613_v50  ;;  %v5897_v50 = vld [vmem:[#allocation11 + $0x58] sm:$0xff] }
 0x280   :  { %1598 = vmatpush.msra.mxu0 %v7443_v55  ;;  %1618 = vmatpush.msra.mxu1 %v5325_v58  ;;  %v7448_v58 = vld [vmem:[#allocation55_spill] sm:$0xff]  ;;  %7477 = vst [vmem:[#allocation50_spill] sm:$0xff] %v5897_v50 }
 0x281   :  { %1638 = vmatpush.msra.mxu2 %v7444_v57  ;;  %1658 = vmatpush.msra.mxu3 %v7445_v59 }
 0x282   :  { %1599 = vmatpush.msra.mxu0 %v7446_v1  ;;  %1619 = vmatpush.msra.mxu1 %v7447_v5 }
 0x283   :  { %1639 = vmatpush.msra.mxu2 %v5339_v62  ;;  %1659 = vmatpush.msra.mxu3 %v5343_v63  ;;  %v7450_v62 = vld [vmem:[#allocation57_spill] sm:$0xff]  ;;  %v7451_v63 = vld [vmem:[#allocation58_spill] sm:$0xff] }
 0x284   :  { %1600 = vmatpush.msra.mxu0 %v5347_v39  ;;  %1620 = vmatpush.msra.mxu1 %v5349_v52  ;;  %v7452_v39 = vld [vmem:[#allocation59_spill] sm:$0xff]  ;;  %v7453_v52 = vld [vmem:[#allocation60_spill] sm:$0xff] }
 0x285   :  { %1640 = vmatpush.msra.mxu2 %v5351_v26  ;;  %1660 = vmatpush.msra.mxu3 %v5355_v13  ;;  %v7454_v26 = vld [vmem:[#allocation61_spill] sm:$0xff] }
 0x286   :  { %1601 = vmatpush.msra.mxu0 %v5359_v8  ;;  %1621 = vmatpush.msra.mxu1 %v7448_v58  ;;  %v7459_v8 = vld [vmem:[#allocation45_spill] sm:$0xff] }
 0x287   :  { %1641 = vmatpush.msra.mxu2 %v7449_v37  ;;  %1661 = vmatpush.msra.mxu3 %v5367_v2  ;;  %v7460_v2 = vld [vmem:[#allocation26_spill] sm:$0xff] }
 0x288   :  { %1602 = vmatpush.msra.mxu0 %v5371_v3  ;;  %1622 = vmatpush.msra.mxu1 %v5373_v30  ;;  %v331_v3 = vadd.f32 %v7460_v2, %v7459_v8 }
 0x289   :  { %1642 = vmatpush.msra.mxu2 %v5375_v36  ;;  %1662 = vmatpush.msra.mxu3 %v7450_v62 }
 0x28a   :  { %1603 = vmatpush.msra.mxu0 %v5383_v40  ;;  %1623 = vmatpush.msra.mxu1 %v5385_v4 }
 0x28b   :  { %1643 = vmatpush.msra.mxu2 %v7451_v63  ;;  %1663 = vmatpush.msra.mxu3 %v7452_v39 }
 0x28c   :  { %1604 = vmatpush.msra.mxu0 %v7453_v52  ;;  %1624 = vmatpush.msra.mxu1 %v7454_v26 }
 0x28d   :  { %1644 = vmatpush.msra.mxu2 %v5399_v46  ;;  %1664 = vmatpush.msra.mxu3 %v5403_v6 }
 0x28e   :  { %1605 = vmatpush.msra.mxu0 %v5407_v47  ;;  %1625 = vmatpush.msra.mxu1 %v5409_v49  ;;  %v7461_v49 = vld [vmem:[#allocation47_spill] sm:$0xff] }
 0x28f   :  { %1645 = vmatpush.msra.mxu2 %v5411_v51  ;;  %1665 = vmatpush.msra.mxu3 %v5415_v53  ;;  %v7462_v51 = vld [vmem:[#allocation27_spill] sm:$0xff] }
 0x290   :  { %1606 = vmatpush.msra.mxu0 %v5419_v7  ;;  %1626 = vmatpush.msra.mxu1 %v5421_v48  ;;  %v372_v53 = vadd.f32 %v7462_v51, %v7461_v49 }
 0x291   :  { %1646 = vmatpush.msra.mxu2 %v5423_v38  ;;  %1666 = vmatpush.msra.mxu3 %v5431_v54 }
 0x292   :  { %1607 = vmatpush.msra.mxu0 %v5435_v29  ;;  %1627 = vmatpush.msra.mxu1 %v5437_v27  ;;  %v7458_v27 = vld [vmem:[#allocation25_spill] sm:$0xff] }
 0x293   :  { %1647 = vmatpush.msra.mxu2 %v5439_v9  ;;  %1667 = vmatpush.msra.mxu3 %v5443_v28 }
 0x294   :  { %1608 = vmatpush.msra.mxu0 %v5447_v24  ;;  %1628 = vmatpush.msra.mxu1 %v5449_v22  ;;  %v7457_v24 = vld [vmem:[#allocation42_spill] sm:$0xff] }
 0x295   :  { %1648 = vmatpush.msra.mxu2 %v5451_v21  ;;  %1668 = vmatpush.msra.mxu3 %v5455_v31  ;;  %v7456_v21 = vld [vmem:[#allocation24_spill] sm:$0xff]  ;;  %v290_v28 = vadd.f32 %v7458_v27, %v7457_v24 }
 0x296   :  { %1609 = vmatpush.msra.mxu0 %v5459_v32  ;;  %1629 = vmatpush.msra.mxu1 %v5461_v35 }
 0x297   :  { %1649 = vmatpush.msra.mxu2 %v5463_v0  ;;  %1669 = vmatpush.msra.mxu3 %v5467_v25 }
 0x298   :  { %1610 = vmatpush.msra.mxu0 %v5473_v19  ;;  %1630 = vmatpush.msra.mxu1 %v7434_v42  ;;  %v7455_v19 = vld [vmem:[#allocation41_spill] sm:$0xff] }
 0x299   :  { %1650 = vmatpush.msra.mxu2 %v7435_v45  ;;  %1670 = vmatpush.msra.mxu3 %v7436_v12  ;;  %v249_v22 = vadd.f32 %v7456_v21, %v7455_v19 }
 0x29a   :  { %1611 = vmatpush.msra.mxu0 %v7437_v60  ;;  %1631 = vmatpush.msra.mxu1 %v7438_v14 }
 0x29b   :  { %1651 = vmatpush.msra.mxu2 %v7439_v61  ;;  %1671 = vmatpush.msra.mxu3 %v7440_v10 }
 0x29c   :  { %1612 = vmatpush.msra.mxu0 %v7442_v44  ;;  %1632 = vmatpush.msra.mxu1 %v5499_v23 }
 0x29d   :  { %1652 = vmatpush.msra.mxu2 %v5501_v33  ;;  %1672 = vmatpush.msra.mxu3 %v5505_v11 }
 0x29e   :  { %1613 = vmatpush.msra.mxu0 %v5507_v20  ;;  %1633 = vmatpush.msra.mxu1 %v5509_v15 }
 0x29f   :  { %1653 = vmatpush.msra.mxu2 %v5515_v34  ;;  %1673 = vmatpush.msra.mxu3 %v5517_v18 }
 0x2fb   :  { %v1171_v29 = vpop.f32.mrf.mxu0  ;;  %v1191_v38 = vpop.f32.mrf.mxu1 }
 0x2fc   :  { %v1234_v48 = vadd.f32 %v1171_v29, %v249_v22  ;;  %v1235_v33 = vadd.f32 %v1191_v38, %v290_v28  ;;  %v7465_v29 = vld [vmem:[#allocation29_spill] sm:$0xff] }
 0x2fd   :  { %v293_v38 = vadd.f32 %v7465_v29, %v7457_v24 }
 0x2fe   :  { %v4297_v54 = vmul.f32 -1.442695, %v1234_v48  ;;  %v4298_v13 = vmul.f32 -1.442695, %v1235_v33 }
 0x300   :  { %4398 = vpow2.f32 %v4297_v54 }
 0x301   :  { %4400 = vpow2.f32 %v4298_v13 }
 0x302   :  { %v1211_v34 = vpop.f32.mrf.mxu2  ;;  %v1231_v6 = vpop.f32.mrf.mxu3 }
 0x303   :  { %v1236_v30 = vadd.f32 %v1211_v34, %v331_v3  ;;  %v1237_v31 = vadd.f32 %v1231_v6, %v372_v53  ;;  %v7466_v34 = vld [vmem:[#allocation30_spill] sm:$0xff] }
 0x305   :  { %v4299_v18 = vmul.f32 -1.442695, %v1236_v30  ;;  %v334_v30 = vadd.f32 %v7466_v34, %v7459_v8  ;;  %v5747_v34 = vld [vmem:[#allocation11 + $0x1d8] sm:$0xff] }
 0x306   :  { %v4399_v36 = vpop.eup %4398 }
 0x307   :  { %v4401_v40 = vpop.eup %4400  ;;  %v1247_v4 = vadd.f32 1.0, %v4399_v36  ;;  %4402 = vpow2.f32 %v4299_v18 }
 0x308   :  { %v1248_v46 = vadd.f32 1.0, %v4401_v40 }
 0x309   :  { %4404 = vrcp.f32 %v1247_v4  ;;  %v1261_v20 = vand.u32 2147483648, %v1247_v4  ;;  %v1259_v41 = vand.u32 2147483647, %v1247_v4  ;;  %vm1255_vm6 = vweird.f32 %v1247_v4 }
 0x30a   :  { %4406 = vrcp.f32 %v1248_v46  ;;  %v1276_v23 = vand.u32 2147483648, %v1248_v46  ;;  %v1274_v43 = vand.u32 2147483647, %v1248_v46  ;;  %vm1270_vm7 = vweird.f32 %v1248_v46 }
 0x30b   :  { %v1262_v14 = vor.u32 1.1754944e-38, %v1261_v20  ;;  %vm1260_vm10 = vcmp.eq.f32.partialorder %v1259_v41, 8.507059e+37 }
 0x30c   :  { %v1277_v17 = vor.u32 1.1754944e-38, %v1276_v23  ;;  %vm1275_vm11 = vcmp.eq.f32.partialorder %v1274_v43, 8.507059e+37 }
 0x30d   :  { %v4403_v47 = vpop.eup %4402 }
 0x30e   :  { %v1249_v7 = vadd.f32 1.0, %v4403_v47 }
 0x30f   :  { %v4405_v9 = vpop.eup %4404 }
 0x310   :  { %v4407_v32 = vpop.eup %4406  ;;  %v1251_v35 = vmul.f32 %v4405_v9, %v1247_v4  ;;  %4408 = vrcp.f32 %v1249_v7  ;;  %vm1256_vm4 = vweird.f32 %v4405_v9  ;;  %v1291_v63 = vand.u32 2147483648, %v1249_v7 }
 0x311   :  { %v1266_v0 = vmul.f32 %v4407_v32, %v1248_v46  ;;  %4410 = vtanh.f32 %v1237_v31  ;;  %vm1271_vm5 = vweird.f32 %v4407_v32  ;;  %vm1257_vm8 = vmor %vm1255_vm6, %vm1256_vm4  ;;  %vm1285_vm13 = vweird.f32 %v1249_v7 }
 0x312   :  { %v1252_v25 = vsub.f32 1.0, %v1251_v35  ;;  %vm1272_vm9 = vmor %vm1270_vm7, %vm1271_vm5  ;;  %v1289_v39 = vand.u32 2147483647, %v1249_v7  ;;  %v1292_v26 = vor.u32 1.1754944e-38, %v1291_v63 }
 0x313   :  { %v1267_v11 = vsub.f32 1.0, %v1266_v0 }
 0x314   :  { %v1253_v15 = vmul.f32 %v4405_v9, %v1252_v25  ;;  %vm1290_vm15 = vcmp.eq.f32.partialorder %v1289_v39, 8.507059e+37 }
 0x315   :  { %v1268_v42 = vmul.f32 %v4407_v32, %v1267_v11 }
 0x316   :  { %v4409_v45 = vpop.eup %4408  ;;  %v1254_v12 = vadd.f32 %v4405_v9, %v1253_v15 }
 0x317   :  { %v1281_v60 = vmul.f32 %v4409_v45, %v1249_v7  ;;  %v1269_v16 = vadd.f32 %v4407_v32, %v1268_v42  ;;  %v4411_v10 = vpop.eup %4410  ;;  %vm1286_vm12 = vweird.f32 %v4409_v45  ;;  %v7467_v7 = vld [vmem:[#allocation33_spill] sm:$0xff] }
 0x318   :  { %v1258_v61 = vsel %vm1257_vm8, %v4405_v9, %v1254_v12  ;;  %vm1287_vm14 = vmor %vm1285_vm13, %vm1286_vm12  ;;  %v375_v9 = vadd.f32 %v7467_v7, %v7461_v49  ;;  %v5779_v7 = vld [vmem:[#allocation11 + $0x170] sm:$0xff] }
 0x319   :  { %v1282_v44 = vsub.f32 1.0, %v1281_v60  ;;  %v1263_v55 = vsel %vm1260_vm10, %v1262_v14, %v1258_v61  ;;  %v1273_v57 = vsel %vm1272_vm9, %v4407_v32, %v1269_v16 }
 0x31a   :  { %v1278_v59 = vsel %vm1275_vm11, %v1277_v17, %v1273_v57  ;;  %v1298_v1 = vmul.f32 %v4411_v10, %v1263_v55 }
 0x31b   :  { %v1283_v5 = vmul.f32 %v4409_v45, %v1282_v44  ;;  %v1297_v58 = vmul.f32 %v1278_v59, %v5586_v56  ;;  %v7464_v56 = vld [vmem:[#allocation28_spill] sm:$0xff] }
 0x31c   :  { %v252_v28 = vadd.f32 %v7464_v56, %v7455_v19 }
 0x31d   :  { %v5700_v37 = vadd.f32 %v1298_v1, %v1297_v58  ;;  %v1284_v62 = vadd.f32 %v4409_v45, %v1283_v5 }
 0x31f   :  { %4412 = vtanh.f32 %v5700_v37  ;;  %v1288_v52 = vsel %vm1287_vm14, %v4409_v45, %v1284_v62 }
 0x320   :  { %v1293_v22 = vsel %vm1290_vm15, %v1292_v26, %v1288_v52 }
 0x325   :  { %v4413_v21 = vpop.eup %4412 }
 0x326   :  { %v5703_v27 = vmul.f32 %v4413_v21, %v1293_v22 }
 0x328   :  { %7463 = vst [vmem:[#allocation63_spill] sm:$0xff] %v5703_v27  ;;  %1392 = vmatmul.f32.vlgmr.msrb.gmra.mxu0 %v5703_v27  ;;  %1412 = vmatmul.f32.vlgmr.msrb.gmra.mxu1 %v5703_v27 }
 0x329   :  { %1432 = vmatmul.f32.vlgmr.msrb.gmra.mxu2 %v5703_v27  ;;  %1452 = vmatmul.f32.vlgmr.msrb.gmra.mxu3 %v5703_v27  ;;  %v5893_v27 = vld [vmem:[#allocation11 + $0x50] sm:$0xff] }
 0x32a   :  { %7476 = vst [vmem:[#allocation69_spill] sm:$0xff] %v5893_v27 }
 0x3a5   :  { %v1393_v48 = vpop.f32.mrf.mxu0  ;;  %v1413_v33 = vpop.f32.mrf.mxu1 }
 0x3a6   :  { %v1456_v54 = vadd.f32 %v1393_v48, %v252_v28  ;;  %v1457_v13 = vadd.f32 %v1413_v33, %v293_v38  ;;  %v5729_v48 = vld [vmem:[#allocation11 + $0x1e8] sm:$0xff]  ;;  %v5731_v33 = vld [vmem:[#allocation11 + $0x1f0] sm:$0xff] }
 0x3a7   :  { %1840 = vmatpush.msrb.mxu1 %v5729_v48  ;;  %1860 = vmatpush.msrb.mxu2 %v5731_v33 }
 0x3a8   :  { %v4300_v2 = vmul.f32 -1.442695, %v1456_v54  ;;  %v4301_v3 = vmul.f32 -1.442695, %v1457_v13  ;;  %v5735_v54 = vld [vmem:[#allocation11 + $0x1f8] sm:$0xff]  ;;  %v5739_v13 = vld [vmem:[#allocation11 + $0x1c0] sm:$0xff] }
 0x3a9   :  { %1880 = vmatpush.msrb.mxu3 %v5735_v54 }
 0x3aa   :  { %4414 = vpow2.f32 %v4300_v2  ;;  %v5741_v2 = vld [vmem:[#allocation11 + $0x1c8] sm:$0xff] }
 0x3ab   :  { %4416 = vpow2.f32 %v4301_v3  ;;  %v5743_v3 = vld [vmem:[#allocation11 + $0x1d0] sm:$0xff]  ;;  %1841 = vmatpush.msrb.mxu1 %v5741_v2  ;;  %1881 = vmatpush.msrb.mxu3 %v5747_v34 }
 0x3ac   :  { %v1433_v18 = vpop.f32.mrf.mxu2  ;;  %v1453_v51 = vpop.f32.mrf.mxu3  ;;  %1861 = vmatpush.msrb.mxu2 %v5743_v3 }
 0x3ad   :  { %v1458_v36 = vadd.f32 %v1433_v18, %v334_v30  ;;  %v1459_v35 = vadd.f32 %v1453_v51, %v375_v9  ;;  %v5751_v30 = vld [vmem:[#allocation11 + $0x1a0] sm:$0xff]  ;;  %v5753_v18 = vld [vmem:[#allocation11 + $0x1a8] sm:$0xff]  ;;  %v5783_v9 = vld [vmem:[#allocation11 + $0x178] sm:$0xff] }
 0x3ae   :  { %1842 = vmatpush.msrb.mxu1 %v5753_v18  ;;  %v5775_v51 = vld [vmem:[#allocation11 + $0x160] sm:$0xff] }
 0x3af   :  { %v4302_v40 = vmul.f32 -1.442695, %v1458_v36  ;;  %v5755_v36 = vld [vmem:[#allocation11 + $0x1b0] sm:$0xff] }
 0x3b0   :  { %v4415_v4 = vpop.eup %4414  ;;  %1862 = vmatpush.msrb.mxu2 %v5755_v36 }
 0x3b1   :  { %v4417_v46 = vpop.eup %4416  ;;  %v1469_v6 = vadd.f32 1.0, %v4415_v4  ;;  %4418 = vpow2.f32 %v4302_v40  ;;  %v5759_v40 = vld [vmem:[#allocation11 + $0x1b8] sm:$0xff]  ;;  %v5763_v4 = vld [vmem:[#allocation11 + $0x180] sm:$0xff] }
 0x3b2   :  { %v1470_v47 = vadd.f32 1.0, %v4417_v46  ;;  %1882 = vmatpush.msrb.mxu3 %v5759_v40  ;;  %v5765_v46 = vld [vmem:[#allocation11 + $0x188] sm:$0xff] }
 0x3b3   :  { %4420 = vrcp.f32 %v1469_v6  ;;  %v1483_v15 = vand.u32 2147483648, %v1469_v6  ;;  %v1481_v43 = vand.u32 2147483647, %v1469_v6  ;;  %vm1477_vm2 = vweird.f32 %v1469_v6  ;;  %1843 = vmatpush.msrb.mxu1 %v5765_v46 }
 0x3b4   :  { %4422 = vrcp.f32 %v1470_v47  ;;  %v1498_v41 = vand.u32 2147483648, %v1470_v47  ;;  %v1496_v12 = vand.u32 2147483647, %v1470_v47  ;;  %vm1492_vm3 = vweird.f32 %v1470_v47 }
 0x3b5   :  { %v1484_v17 = vor.u32 1.1754944e-38, %v1483_v15  ;;  %vm1482_vm6 = vcmp.eq.f32.partialorder %v1481_v43, 8.507059e+37  ;;  %v5811_v15 = vld [vmem:[#allocation11 + $0x100] sm:$0xff]  ;;  %v5819_v43 = vld [vmem:[#allocation11 + $0x118] sm:$0xff] }
 0x3b6   :  { %v1499_v10 = vor.u32 1.1754944e-38, %v1498_v41  ;;  %vm1497_vm7 = vcmp.eq.f32.partialorder %v1496_v12, 8.507059e+37  ;;  %v5813_v41 = vld [vmem:[#allocation11 + $0x108] sm:$0xff] }
 0x3b7   :  { %v4419_v53 = vpop.eup %4418  ;;  %v5825_v12 = vld [vmem:[#allocation11 + $0xe8] sm:$0xff] }
 0x3b8   :  { %v1471_v31 = vadd.f32 1.0, %v4419_v53  ;;  %v5777_v53 = vld [vmem:[#allocation11 + $0x168] sm:$0xff] }
 0x3b9   :  { %v4421_v32 = vpop.eup %4420  ;;  %1844 = vmatpush.msrb.mxu1 %v5777_v53 }
 0x3ba   :  { %v4423_v0 = vpop.eup %4422  ;;  %v1473_v25 = vmul.f32 %v4421_v32, %v1469_v6  ;;  %4424 = vrcp.f32 %v1471_v31  ;;  %vm1478_vm0 = vweird.f32 %v4421_v32  ;;  %v1513_v26 = vand.u32 2147483648, %v1471_v31  ;;  %v5767_v6 = vld [vmem:[#allocation11 + $0x190] sm:$0xff] }
 0x3bb   :  { %v1488_v11 = vmul.f32 %v4423_v0, %v1470_v47  ;;  %4426 = vtanh.f32 %v1459_v35  ;;  %vm1493_vm1 = vweird.f32 %v4423_v0  ;;  %vm1479_vm4 = vmor %vm1477_vm2, %vm1478_vm0  ;;  %vm1507_vm9 = vweird.f32 %v1471_v31  ;;  %v5771_v47 = vld [vmem:[#allocation11 + $0x198] sm:$0xff]  ;;  %1863 = vmatpush.msrb.mxu2 %v5767_v6  ;;  %v5791_v35 = vld [vmem:[#allocation11 + $0x150] sm:$0xff] }
 0x3bc   :  { %v1474_v20 = vsub.f32 1.0, %v1473_v25  ;;  %vm1494_vm5 = vmor %vm1492_vm3, %vm1493_vm1  ;;  %v1511_v21 = vand.u32 2147483647, %v1471_v31  ;;  %v1514_v56 = vor.u32 1.1754944e-38, %v1513_v26  ;;  %1883 = vmatpush.msrb.mxu3 %v5771_v47  ;;  %v5799_v25 = vld [vmem:[#allocation11 + $0x120] sm:$0xff]  ;;  %v5855_v26 = vld [vmem:[#allocation11 + $0xb0] sm:$0xff] }
 0x3bd   :  { %v1489_v23 = vsub.f32 1.0, %v1488_v11  ;;  %1864 = vmatpush.msrb.mxu2 %v5779_v7  ;;  %v5801_v11 = vld [vmem:[#allocation11 + $0x128] sm:$0xff] }
 0x3be   :  { %v1475_v42 = vmul.f32 %v4421_v32, %v1474_v20  ;;  %vm1512_vm11 = vcmp.eq.f32.partialorder %v1511_v21, 8.507059e+37  ;;  %1884 = vmatpush.msrb.mxu3 %v5783_v9  ;;  %v5803_v20 = vld [vmem:[#allocation11 + $0x130] sm:$0xff] }
 0x3bf   :  { %v1490_v45 = vmul.f32 %v4423_v0, %v1489_v23  ;;  %1865 = vmatpush.msrb.mxu2 %v5791_v35  ;;  %v5807_v23 = vld [vmem:[#allocation11 + $0x138] sm:$0xff] }
 0x3c0   :  { %v4425_v60 = vpop.eup %4424  ;;  %v1476_v14 = vadd.f32 %v4421_v32, %v1475_v42  ;;  %v5815_v42 = vld [vmem:[#allocation11 + $0x110] sm:$0xff] }
 0x3c1   :  { %v1503_v16 = vmul.f32 %v4425_v60, %v1471_v31  ;;  %v1491_v61 = vadd.f32 %v4423_v0, %v1490_v45  ;;  %v4427_v55 = vpop.eup %4426  ;;  %vm1508_vm8 = vweird.f32 %v4425_v60  ;;  %v5787_v31 = vld [vmem:[#allocation11 + $0x140] sm:$0xff]  ;;  %1866 = vmatpush.msrb.mxu2 %v5803_v20 }
 0x3c2   :  { %v1480_v44 = vsel %vm1479_vm4, %v4421_v32, %v1476_v14  ;;  %vm1509_vm10 = vmor %vm1507_vm9, %vm1508_vm8  ;;  %v5789_v32 = vld [vmem:[#allocation11 + $0x148] sm:$0xff]  ;;  %v5823_v45 = vld [vmem:[#allocation11 + $0xe0] sm:$0xff] }
 0x3c3   :  { %v1504_v57 = vsub.f32 1.0, %v1503_v16  ;;  %v1485_v59 = vsel %vm1482_vm6, %v1484_v17, %v1480_v44  ;;  %v1495_v1 = vsel %vm1494_vm5, %v4423_v0, %v1491_v61  ;;  %1845 = vmatpush.msrb.mxu1 %v5789_v32  ;;  %v5795_v0 = vld [vmem:[#allocation11 + $0x158] sm:$0xff]  ;;  %1867 = vmatpush.msrb.mxu2 %v5815_v42  ;;  %v7469_v14 = vld [vmem:[#allocation31_spill] sm:$0xff]  ;;  %v7470_v17 = vld [vmem:[#allocation32_spill] sm:$0xff] }
 0x3c4   :  { %v1500_v5 = vsel %vm1497_vm7, %v1499_v10, %v1495_v1  ;;  %v1520_v58 = vmul.f32 %v4427_v55, %v1485_v59  ;;  %1885 = vmatpush.msrb.mxu3 %v5795_v0  ;;  %v255_v16 = vadd.f32 %v7469_v14, %v7455_v19  ;;  %v296_v61 = vadd.f32 %v7470_v17, %v7457_v24  ;;  %v5835_v10 = vld [vmem:[#allocation11 + $0xf8] sm:$0xff]  ;;  %v5841_v59 = vld [vmem:[#allocation11 + $0xc8] sm:$0xff]  ;;  %v5843_v1 = vld [vmem:[#allocation11 + $0xd0] sm:$0xff] }
 0x3c5   :  { %v1505_v62 = vmul.f32 %v4425_v60, %v1504_v57  ;;  %v1519_v63 = vmul.f32 %v1500_v5, %v5700_v37  ;;  %v5727_v37 = vld [vmem:[#allocation11 + $0x1e0] sm:$0xff]  ;;  %1846 = vmatpush.msrb.mxu1 %v5801_v11  ;;  %v5867_v14 = vld [vmem:[#allocation11 + $0x90] sm:$0xff] }
 0x3c6   :  { %1820 = vmatpush.msrb.mxu0 %v5727_v37  ;;  %1886 = vmatpush.msrb.mxu3 %v5807_v23  ;;  %v5839_v57 = vld [vmem:[#allocation11 + $0xc0] sm:$0xff]  ;;  %v5905_v24 = vld [vmem:[#allocation11 + $0x30] sm:$0xff] }
 0x3c7   :  { %v5718_v39 = vadd.f32 %v1520_v58, %v1519_v63  ;;  %v1506_v52 = vadd.f32 %v4425_v60, %v1505_v62  ;;  %1847 = vmatpush.msrb.mxu1 %v5813_v41  ;;  %v5847_v62 = vld [vmem:[#allocation11 + $0xd8] sm:$0xff]  ;;  %v5851_v63 = vld [vmem:[#allocation11 + $0xa0] sm:$0xff] }
 0x3c8   :  { %1821 = vmatpush.msrb.mxu0 %v5739_v13  ;;  %1887 = vmatpush.msrb.mxu3 %v5819_v43  ;;  %v7471_v17 = vld [vmem:[#allocation34_spill] sm:$0xff] }
 0x3c9   :  { %4428 = vtanh.f32 %v5718_v39  ;;  %v1510_v22 = vsel %vm1509_vm10, %v4425_v60, %v1506_v52  ;;  %v5827_v60 = vld [vmem:[#allocation11 + $0xf0] sm:$0xff]  ;;  %1848 = vmatpush.msrb.mxu1 %v5825_v12  ;;  %v5853_v52 = vld [vmem:[#allocation11 + $0xa8] sm:$0xff] }
 0x3ca   :  { %v1515_v29 = vsel %vm1512_vm11, %v1514_v56, %v1510_v22  ;;  %1822 = vmatpush.msrb.mxu0 %v5751_v30  ;;  %1868 = vmatpush.msrb.mxu2 %v5827_v60  ;;  %v5859_v56 = vld [vmem:[#allocation11 + $0xb8] sm:$0xff] }
 0x3cb   :  { %1888 = vmatpush.msrb.mxu3 %v5835_v10  ;;  %1849 = vmatpush.msrb.mxu1 %v5841_v59 }
 0x3cc   :  { %1823 = vmatpush.msrb.mxu0 %v5763_v4  ;;  %1869 = vmatpush.msrb.mxu2 %v5843_v1 }
 0x3cd   :  { %1889 = vmatpush.msrb.mxu3 %v5847_v62  ;;  %1850 = vmatpush.msrb.mxu1 %v5853_v52 }
 0x3ce   :  { %1824 = vmatpush.msrb.mxu0 %v5775_v51  ;;  %1870 = vmatpush.msrb.mxu2 %v5855_v26 }
 0x3cf   :  { %v4429_v28 = vpop.eup %4428  ;;  %1890 = vmatpush.msrb.mxu3 %v5859_v56 }
 0x3d0   :  { %v5721_v38 = vmul.f32 %v4429_v28, %v1515_v29  ;;  %1825 = vmatpush.msrb.mxu0 %v5787_v31  ;;  %v5863_v28 = vld [vmem:[#allocation11 + $0x80] sm:$0xff]  ;;  %v5865_v29 = vld [vmem:[#allocation11 + $0x88] sm:$0xff]  ;;  %1871 = vmatpush.msrb.mxu2 %v5867_v14 }
 0x3d1   :  { %1851 = vmatpush.msrb.mxu1 %v5865_v29 }
 0x3d2   :  { %7468 = vst [vmem:[#allocation64_spill] sm:$0xff] %v5721_v38  ;;  %1614 = vmatmul.f32.vlgmr.msra.gmra.mxu0 %v5721_v38  ;;  %1634 = vmatmul.f32.vlgmr.msra.gmra.mxu1 %v5721_v38 }
 0x3d3   :  { %1654 = vmatmul.f32.vlgmr.msra.gmra.mxu2 %v5721_v38  ;;  %1674 = vmatmul.f32.vlgmr.msra.gmra.mxu3 %v5721_v38 }
 0x3d4   :  { %1826 = vmatpush.msrb.mxu0 %v5799_v25 }
 0x3d6   :  { %1827 = vmatpush.msrb.mxu0 %v5811_v15 }
 0x3d8   :  { %1828 = vmatpush.msrb.mxu0 %v5823_v45 }
 0x3da   :  { %1829 = vmatpush.msrb.mxu0 %v5839_v57 }
 0x3dc   :  { %1830 = vmatpush.msrb.mxu0 %v5851_v63 }
 0x3de   :  { %1831 = vmatpush.msrb.mxu0 %v5863_v28 }
 0x44f   :  { %v1615_v44 = vpop.f32.mrf.mxu0  ;;  %v1635_v55 = vpop.f32.mrf.mxu1 }
 0x450   :  { %v1678_v5 = vadd.f32 %v1615_v44, %v255_v16  ;;  %v1679_v58 = vadd.f32 %v1635_v55, %v296_v61  ;;  %v5871_v16 = vld [vmem:[#allocation11 + $0x98] sm:$0xff]  ;;  %v337_v61 = vadd.f32 %v7471_v17, %v7459_v8  ;;  %v5877_v44 = vld [vmem:[#allocation11 + $0x60] sm:$0xff]  ;;  %v5879_v55 = vld [vmem:[#allocation11 + $0x68] sm:$0xff] }
 0x451   :  { %1891 = vmatpush.msrb.mxu3 %v5871_v16  ;;  %1832 = vmatpush.msrb.mxu0 %v5877_v44  ;;  %v5891_v17 = vld [vmem:[#allocation11 + $0x48] sm:$0xff] }
 0x452   :  { %v4303_v21 = vmul.f32 -1.442695, %v1678_v5  ;;  %v4304_v22 = vmul.f32 -1.442695, %v1679_v58  ;;  %v5881_v5 = vld [vmem:[#allocation11 + $0x70] sm:$0xff]  ;;  %1852 = vmatpush.msrb.mxu1 %v5879_v55  ;;  %7475 = vst [vmem:[#allocation68_spill] sm:$0xff] %v5891_v17 }
 0x453   :  { %7472 = vst [vmem:[#allocation65_spill] sm:$0xff] %v5881_v5  ;;  %1872 = vmatpush.msrb.mxu2 %v5881_v5  ;;  %v5921_v5 = vld [vmem:[#allocation11 + $0x18] sm:$0xff] }
 0x454   :  { %4430 = vpow2.f32 %v4303_v21  ;;  %v5885_v21 = vld [vmem:[#allocation11 + $0x78] sm:$0xff]  ;;  %1853 = vmatpush.msrb.mxu1 %v5891_v17  ;;  %v5911_v17 = vld [vmem:[#allocation11] sm:$0xff] }
 0x455   :  { %4432 = vpow2.f32 %v4304_v22  ;;  %7473 = vst [vmem:[#allocation66_spill] sm:$0xff] %v5885_v21  ;;  %1892 = vmatpush.msrb.mxu3 %v5885_v21  ;;  %v5889_v22 = vld [vmem:[#allocation11 + $0x40] sm:$0xff]  ;;  %1873 = vmatpush.msrb.mxu2 %v5893_v27 }
 0x456   :  { %v1655_v58 = vpop.f32.mrf.mxu2  ;;  %7474 = vst [vmem:[#allocation67_spill] sm:$0xff] %v5889_v22  ;;  %1833 = vmatpush.msrb.mxu0 %v5889_v22  ;;  %v5909_v22 = vld [vmem:[#allocation11 + $0x38] sm:$0xff] }
 0x457   :  { %v1680_v38 = vadd.f32 %v1655_v58, %v337_v61  ;;  %1893 = vmatpush.msrb.mxu3 %v5897_v50  ;;  %v5901_v61 = vld [vmem:[#allocation11 + $0x20] sm:$0xff]  ;;  %v5903_v58 = vld [vmem:[#allocation11 + $0x28] sm:$0xff]  ;;  %1874 = vmatpush.msrb.mxu2 %v5905_v24  ;;  %v5919_v50 = vld [vmem:[#allocation11 + $0x10] sm:$0xff] }
 0x458   :  { %7478 = vst [vmem:[#allocation51_spill] sm:$0xff] %v5901_v61  ;;  %1834 = vmatpush.msrb.mxu0 %v5901_v61  ;;  %1854 = vmatpush.msrb.mxu1 %v5903_v58 }
 0x459   :  { %v4305_v8 = vmul.f32 -1.442695, %v1680_v38  ;;  %v5913_v38 = vld [vmem:[#allocation11 + $0x8] sm:$0xff]  ;;  %1894 = vmatpush.msrb.mxu3 %v5909_v22  ;;  %7479 = vst [vmem:[#allocation52_spill] sm:$0xff] %v5919_v50  ;;  %1875 = vmatpush.msrb.mxu2 %v5919_v50 }
 0x45a   :  { %v4431_v19 = vpop.eup %4430  ;;  %1835 = vmatpush.msrb.mxu0 %v5911_v17  ;;  %1855 = vmatpush.msrb.mxu1 %v5913_v38 }
 0x45b   :  { %v4433_v27 = vpop.eup %4432  ;;  %v5915_v21 = vadd.f32 1.0, %v4431_v19  ;;  %4434 = vpow2.f32 %v4305_v8  ;;  %1895 = vmatpush.msrb.mxu3 %v5921_v5  ;;  %2082 = vmatpush.msra.mxu2 %v5731_v33  ;;  %v1675_v19 = vpop.f32.mrf.mxu3 }
 0x45c   :  { %v5923_v61 = vadd.f32 1.0, %v4433_v27  ;;  %2042 = vmatpush.msra.mxu0 %v5727_v37  ;;  %2062 = vmatpush.msra.mxu1 %v5729_v48  ;;  %v7480_v27 = vld [vmem:[#allocation37_spill] sm:$0xff] }
 0x45d   :  { %4436 = vrcp.f32 %v5915_v21  ;;  %2102 = vmatpush.msra.mxu3 %v5735_v54  ;;  %v378_v50 = vadd.f32 %v7480_v27, %v7461_v49  ;;  %2083 = vmatpush.msra.mxu2 %v5743_v3  ;;  %vm1699_vm14 = vweird.f32 %v5915_v21  ;;  %v2246_v27 = vld [vmem:[#allocation14 + $0x160] sm:$0xff] }
 0x45e   :  { %4438 = vrcp.f32 %v5923_v61  ;;  %2043 = vmatpush.msra.mxu0 %v5739_v13  ;;  %2063 = vmatpush.msra.mxu1 %v5741_v2  ;;  %vm1714_vm15 = vweird.f32 %v5923_v61 }
 0x45f   :  { %2103 = vmatpush.msra.mxu3 %v5747_v34  ;;  %v1681_v33 = vadd.f32 %v1675_v19, %v378_v50  ;;  %2084 = vmatpush.msra.mxu2 %v5755_v36  ;;  %v1705_v34 = vand.u32 2147483648, %v5915_v21  ;;  %v1703_v36 = vand.u32 2147483647, %v5915_v21  ;;  %v2252_v19 = vld [vmem:[#allocation14 + $0x190] sm:$0xff] }
 0x460   :  { %2044 = vmatpush.msra.mxu0 %v5751_v30  ;;  %2064 = vmatpush.msra.mxu1 %v5753_v18  ;;  %v1720_v30 = vand.u32 2147483648, %v5923_v61 }
 0x461   :  { %v4435_v8 = vpop.eup %4434  ;;  %2104 = vmatpush.msra.mxu3 %v5759_v40  ;;  %2085 = vmatpush.msra.mxu2 %v5767_v6  ;;  %vm1704_vm2 = vcmp.eq.f32.partialorder %v1703_v36, 8.507059e+37  ;;  %v2242_v36 = vld [vmem:[#allocation14 + $0x140] sm:$0xff] }
 0x462   :  { %v5941_v37 = vadd.f32 1.0, %v4435_v8  ;;  %2045 = vmatpush.msra.mxu0 %v5763_v4  ;;  %2065 = vmatpush.msra.mxu1 %v5765_v46  ;;  %v1718_v4 = vand.u32 2147483647, %v5923_v61  ;;  %v2253_v8 = vld [vmem:[#allocation14 + $0x198] sm:$0xff] }
 0x463   :  { %v4437_v48 = vpop.eup %4436  ;;  %2105 = vmatpush.msra.mxu3 %v5771_v47  ;;  %2086 = vmatpush.msra.mxu2 %v5779_v7  ;;  %v1721_v7 = vor.u32 1.1754944e-38, %v1720_v30 }
 0x464   :  { %v4439_v54 = vpop.eup %4438  ;;  %v1695_v13 = vmul.f32 %v4437_v48, %v5915_v21  ;;  %4440 = vrcp.f32 %v5941_v37  ;;  %2046 = vmatpush.msra.mxu0 %v5775_v51  ;;  %2066 = vmatpush.msra.mxu1 %v5777_v53  ;;  %vm1700_vm12 = vweird.f32 %v4437_v48  ;;  %v1706_v51 = vor.u32 1.1754944e-38, %v1705_v34  ;;  %v2261_v21 = vld [vmem:[#allocation14 + $0x1d8] sm:$0xff] }
 0x465   :  { %v1710_v2 = vmul.f32 %v4439_v54, %v5923_v61  ;;  %4442 = vtanh.f32 %v1681_v33  ;;  %2106 = vmatpush.msra.mxu3 %v5783_v9  ;;  %vm1715_vm13 = vweird.f32 %v4439_v54  ;;  %2087 = vmatpush.msra.mxu2 %v5791_v35  ;;  %vm1701_vm0 = vmor %vm1699_vm14, %vm1700_vm12  ;;  %vm1719_vm3 = vcmp.eq.f32.partialorder %v1718_v4, 8.507059e+37  ;;  %v2256_v61 = vld [vmem:[#allocation14 + $0x1b0] sm:$0xff]  ;;  %v2249_v34 = vld [vmem:[#allocation14 + $0x178] sm:$0xff] }
 0x466   :  { %v1696_v50 = vsub.f32 1.0, %v1695_v13  ;;  %2047 = vmatpush.msra.mxu0 %v5787_v31  ;;  %2067 = vmatpush.msra.mxu1 %v5789_v32  ;;  %vm1716_vm1 = vmor %vm1714_vm15, %vm1715_vm13  ;;  %vm1729_vm5 = vweird.f32 %v5941_v37  ;;  %v7489_v33 = vld [vmem:[#allocation41_spill] sm:$0xff] }
 0x467   :  { %v1711_v3 = vsub.f32 1.0, %v1710_v2  ;;  %2107 = vmatpush.msra.mxu3 %v5795_v0  ;;  %2088 = vmatpush.msra.mxu2 %v5803_v20  ;;  %v7491_v2 = vld [vmem:[#allocation42_spill] sm:$0xff]  ;;  %v2244_v4 = vld [vmem:[#allocation14 + $0x150] sm:$0xff] }
 0x468   :  { %v1697_v18 = vmul.f32 %v4437_v48, %v1696_v50  ;;  %2048 = vmatpush.msra.mxu0 %v5799_v25  ;;  %2068 = vmatpush.msra.mxu1 %v5801_v11  ;;  %v7492_v50 = vld [vmem:[#allocation36_spill] sm:$0xff] }
 0x469   :  { %v1712_v40 = vmul.f32 %v4439_v54, %v1711_v3  ;;  %2108 = vmatpush.msra.mxu3 %v5807_v23  ;;  %2089 = vmatpush.msra.mxu2 %v5815_v42  ;;  %v1733_v42 = vand.u32 2147483647, %v5941_v37  ;;  %v299_v3 = vadd.f32 %v7492_v50, %v7491_v2  ;;  %v2209_v50 = vld [vmem:[#allocation14 + $0x38] sm:$0xff] }
 0x46a   :  { %v5966_v46 = vpop.eup %4440  ;;  %v1698_v6 = vadd.f32 %v4437_v48, %v1697_v18  ;;  %2049 = vmatpush.msra.mxu0 %v5811_v15  ;;  %2069 = vmatpush.msra.mxu1 %v5813_v41 }
 0x46b   :  { %v1725_v47 = vmul.f32 %v5966_v46, %v5941_v37  ;;  %v1713_v53 = vadd.f32 %v4439_v54, %v1712_v40  ;;  %v4443_v31 = vpop.eup %4442  ;;  %2109 = vmatpush.msra.mxu3 %v5819_v43  ;;  %2090 = vmatpush.msra.mxu2 %v5827_v60  ;;  %vm1730_vm4 = vweird.f32 %v5966_v46  ;;  %v7482_v60 = vld [vmem:[#allocation66_spill] sm:$0xff]  ;;  %vm1734_vm7 = vcmp.eq.f32.partialorder %v1733_v42, 8.507059e+37  ;;  %v2243_v40 = vld [vmem:[#allocation14 + $0x148] sm:$0xff] }
 0x46c   :  { %v1702_v9 = vsel %vm1701_vm0, %v4437_v48, %v1698_v6  ;;  %2050 = vmatpush.msra.mxu0 %v5823_v45  ;;  %2070 = vmatpush.msra.mxu1 %v5825_v12  ;;  %vm1731_vm6 = vmor %vm1729_vm5, %vm1730_vm4  ;;  %v7481_v12 = vld [vmem:[#allocation65_spill] sm:$0xff]  ;;  %v2231_v42 = vld [vmem:[#allocation14 + $0xe8] sm:$0xff] }
 0x46d   :  { %v1726_v32 = vsub.f32 1.0, %v1725_v47  ;;  %v1707_v35 = vsel %vm1704_vm2, %v1706_v51, %v1702_v9  ;;  %v1717_v0 = vsel %vm1716_vm1, %v4439_v54, %v1713_v53  ;;  %2110 = vmatpush.msra.mxu3 %v5835_v10  ;;  %2091 = vmatpush.msra.mxu2 %v5843_v1  ;;  %v7483_v10 = vld [vmem:[#allocation67_spill] sm:$0xff]  ;;  %v2248_v48 = vld [vmem:[#allocation14 + $0x170] sm:$0xff]  ;;  %v2245_v47 = vld [vmem:[#allocation14 + $0x158] sm:$0xff] }
 0x46e   :  { %v1722_v25 = vsel %vm1719_vm3, %v1721_v7, %v1717_v0  ;;  %v1742_v11 = vmul.f32 %v4443_v31, %v1707_v35  ;;  %2051 = vmatpush.msra.mxu0 %v5839_v57  ;;  %2071 = vmatpush.msra.mxu1 %v5841_v59  ;;  %v7484_v57 = vld [vmem:[#allocation68_spill] sm:$0xff]  ;;  %v7490_v54 = vld [vmem:[#allocation35_spill] sm:$0xff]  ;;  %v2240_v7 = vld [vmem:[#allocation14 + $0x130] sm:$0xff] }
 0x46f   :  { %v1727_v20 = vmul.f32 %v5966_v46, %v1726_v32  ;;  %v1741_v23 = vmul.f32 %v1722_v25, %v5718_v39  ;;  %2111 = vmatpush.msra.mxu3 %v5847_v62  ;;  %v1735_v39 = vand.u32 2147483648, %v5941_v37  ;;  %2092 = vmatpush.msra.mxu2 %v5855_v26  ;;  %v7485_v62 = vld [vmem:[#allocation69_spill] sm:$0xff]  ;;  %v7487_v26 = vld [vmem:[#allocation51_spill] sm:$0xff]  ;;  %v2247_v37 = vld [vmem:[#allocation14 + $0x168] sm:$0xff]  ;;  %v258_v13 = vadd.f32 %v7490_v54, %v7489_v33 }
 0x470   :  { %2052 = vmatpush.msra.mxu0 %v5851_v63  ;;  %2072 = vmatpush.msra.mxu1 %v5853_v52  ;;  %v7486_v63 = vld [vmem:[#allocation50_spill] sm:$0xff]  ;;  %v2238_v51 = vld [vmem:[#allocation14 + $0x120] sm:$0xff]  ;;  %v2239_v53 = vld [vmem:[#allocation14 + $0x128] sm:$0xff] }
 0x471   :  { %v5990_v15 = vadd.f32 %v1742_v11, %v1741_v23  ;;  %v1728_v41 = vadd.f32 %v5966_v46, %v1727_v20  ;;  %2112 = vmatpush.msra.mxu3 %v5859_v56  ;;  %2093 = vmatpush.msra.mxu2 %v5867_v14  ;;  %v1736_v45 = vor.u32 1.1754944e-38, %v1735_v39  ;;  %v7488_v56 = vld [vmem:[#allocation52_spill] sm:$0xff]  ;;  %v2265_v14 = vld [vmem:[#allocation14 + $0x1f8] sm:$0xff]  ;;  %v2234_v35 = vld [vmem:[#allocation14 + $0x100] sm:$0xff] }
 0x472   :  { %2053 = vmatpush.msra.mxu0 %v5863_v28  ;;  %2073 = vmatpush.msra.mxu1 %v5865_v29  ;;  %v2262_v28 = vld [vmem:[#allocation14 + $0x1e0] sm:$0xff]  ;;  %v2264_v29 = vld [vmem:[#allocation14 + $0x1f0] sm:$0xff]  ;;  %v2241_v32 = vld [vmem:[#allocation14 + $0x138] sm:$0xff] }
 0x473   :  { %4444 = vtanh.f32 %v5990_v15  ;;  %2113 = vmatpush.msra.mxu3 %v5871_v16  ;;  %v1732_v43 = vsel %vm1731_vm6, %v5966_v46, %v1728_v41  ;;  %2094 = vmatpush.msra.mxu2 %v7481_v12  ;;  %v2258_v16 = vld [vmem:[#allocation14 + $0x1c0] sm:$0xff]  ;;  %v2235_v0 = vld [vmem:[#allocation14 + $0x108] sm:$0xff]  ;;  %v2236_v25 = vld [vmem:[#allocation14 + $0x110] sm:$0xff] }
 0x474   :  { %2054 = vmatpush.msra.mxu0 %v5877_v44  ;;  %2074 = vmatpush.msra.mxu1 %v5879_v55  ;;  %v1737_v1 = vsel %vm1734_vm7, %v1736_v45, %v1732_v43  ;;  %v2259_v44 = vld [vmem:[#allocation14 + $0x1c8] sm:$0xff]  ;;  %v2260_v55 = vld [vmem:[#allocation14 + $0x1d0] sm:$0xff]  ;;  %v2237_v11 = vld [vmem:[#allocation14 + $0x118] sm:$0xff] }
 0x475   :  { %2114 = vmatpush.msra.mxu3 %v7482_v60  ;;  %2095 = vmatpush.msra.mxu2 %v7485_v62  ;;  %v7493_v20 = vld [vmem:[#allocation45_spill] sm:$0xff]  ;;  %v7494_v23 = vld [vmem:[#allocation38_spill] sm:$0xff]  ;;  %v2230_v39 = vld [vmem:[#allocation14 + $0xe0] sm:$0xff] }
 0x476   :  { %2055 = vmatpush.msra.mxu0 %v7483_v10  ;;  %2075 = vmatpush.msra.mxu1 %v7484_v57  ;;  %v340_v41 = vadd.f32 %v7494_v23, %v7493_v20  ;;  %v2232_v43 = vld [vmem:[#allocation14 + $0xf0] sm:$0xff]  ;;  %v2233_v12 = vld [vmem:[#allocation14 + $0xf8] sm:$0xff]  ;;  %v2226_v10 = vld [vmem:[#allocation14 + $0xc0] sm:$0xff] }
 0x477   :  { %2115 = vmatpush.msra.mxu3 %v7486_v63  ;;  %2096 = vmatpush.msra.mxu2 %v5905_v24  ;;  %v2263_v24 = vld [vmem:[#allocation14 + $0x1e8] sm:$0xff]  ;;  %v2222_v63 = vld [vmem:[#allocation14 + $0xa0] sm:$0xff] }
 0x478   :  { %2056 = vmatpush.msra.mxu0 %v7487_v26  ;;  %2076 = vmatpush.msra.mxu1 %v5903_v58  ;;  %v2250_v58 = vld [vmem:[#allocation14 + $0x180] sm:$0xff]  ;;  %v2227_v57 = vld [vmem:[#allocation14 + $0xc8] sm:$0xff] }
 0x479   :  { %v4445_v59 = vpop.eup %4444  ;;  %2116 = vmatpush.msra.mxu3 %v5909_v22  ;;  %2097 = vmatpush.msra.mxu2 %v7488_v56  ;;  %v2254_v22 = vld [vmem:[#allocation14 + $0x1a0] sm:$0xff]  ;;  %v2223_v26 = vld [vmem:[#allocation14 + $0xa8] sm:$0xff]  ;;  %v2224_v56 = vld [vmem:[#allocation14 + $0xb0] sm:$0xff] }
 0x47a   :  { %v6017_v52 = vmul.f32 %v4445_v59, %v1737_v1  ;;  %2057 = vmatpush.msra.mxu0 %v5911_v17  ;;  %2077 = vmatpush.msra.mxu1 %v5913_v38  ;;  %v2255_v17 = vld [vmem:[#allocation14 + $0x1a8] sm:$0xff]  ;;  %v2228_v59 = vld [vmem:[#allocation14 + $0xd0] sm:$0xff]  ;;  %v2229_v1 = vld [vmem:[#allocation14 + $0xd8] sm:$0xff] }
 0x47b   :  { %2117 = vmatpush.msra.mxu3 %v5921_v5  ;;  %v2257_v5 = vld [vmem:[#allocation14 + $0x1b8] sm:$0xff]  ;;  %v2251_v38 = vld [vmem:[#allocation14 + $0x188] sm:$0xff] }
 0x47c   :  { %1836 = vmatmul.f32.vlgmr.msrb.gmra.mxu0 %v6017_v52  ;;  %1856 = vmatmul.f32.vlgmr.msrb.gmra.mxu1 %v6017_v52  ;;  %v2207_v54 = vld [vmem:[#allocation14 + $0x28] sm:$0xff] }
 0x47d   :  { %1876 = vmatmul.f32.vlgmr.msrb.gmra.mxu2 %v6017_v52  ;;  %1896 = vmatmul.f32.vlgmr.msrb.gmra.mxu3 %v6017_v52 }
 0x47e   :  { %2276 = vmatpush.msrb.mxu0 %v2262_v28  ;;  %2317 = vmatpush.msrb.mxu1 %v2263_v24  ;;  %v2225_v24 = vld [vmem:[#allocation14 + $0xb8] sm:$0xff] }
 0x47f   :  { %2358 = vmatpush.msrb.mxu2 %v2264_v29  ;;  %2399 = vmatpush.msrb.mxu3 %v2265_v14  ;;  %v2218_v29 = vld [vmem:[#allocation14 + $0x80] sm:$0xff]  ;;  %v2219_v14 = vld [vmem:[#allocation14 + $0x88] sm:$0xff] }
 0x480   :  { %2277 = vmatpush.msrb.mxu0 %v2258_v16  ;;  %2318 = vmatpush.msrb.mxu1 %v2259_v44 }
 0x481   :  { %2359 = vmatpush.msrb.mxu2 %v2260_v55  ;;  %2400 = vmatpush.msrb.mxu3 %v2261_v21  ;;  %v2220_v55 = vld [vmem:[#allocation14 + $0x90] sm:$0xff]  ;;  %v2221_v21 = vld [vmem:[#allocation14 + $0x98] sm:$0xff] }
 0x482   :  { %2278 = vmatpush.msrb.mxu0 %v2254_v22  ;;  %2319 = vmatpush.msrb.mxu1 %v2255_v17  ;;  %v2214_v17 = vld [vmem:[#allocation14 + $0x60] sm:$0xff] }
 0x483   :  { %2360 = vmatpush.msrb.mxu2 %v2256_v61  ;;  %2401 = vmatpush.msrb.mxu3 %v2257_v5  ;;  %v2215_v61 = vld [vmem:[#allocation14 + $0x68] sm:$0xff]  ;;  %v2216_v5 = vld [vmem:[#allocation14 + $0x70] sm:$0xff] }
 0x484   :  { %2279 = vmatpush.msrb.mxu0 %v2250_v58  ;;  %2320 = vmatpush.msrb.mxu1 %v2251_v38  ;;  %v2217_v58 = vld [vmem:[#allocation14 + $0x78] sm:$0xff]  ;;  %v2210_v38 = vld [vmem:[#allocation14 + $0x40] sm:$0xff] }
 0x485   :  { %2361 = vmatpush.msrb.mxu2 %v2252_v19  ;;  %2402 = vmatpush.msrb.mxu3 %v2253_v8  ;;  %v2211_v19 = vld [vmem:[#allocation14 + $0x48] sm:$0xff]  ;;  %v2212_v8 = vld [vmem:[#allocation14 + $0x50] sm:$0xff] }
 0x486   :  { %2280 = vmatpush.msrb.mxu0 %v2246_v27  ;;  %2321 = vmatpush.msrb.mxu1 %v2247_v37  ;;  %v2213_v27 = vld [vmem:[#allocation14 + $0x58] sm:$0xff]  ;;  %v2206_v37 = vld [vmem:[#allocation14 + $0x20] sm:$0xff] }
 0x487   :  { %2362 = vmatpush.msrb.mxu2 %v2248_v48  ;;  %2403 = vmatpush.msrb.mxu3 %v2249_v34  ;;  %v7495_v34 = vld [vmem:[#allocation43_spill] sm:$0xff] }
 0x488   :  { %2281 = vmatpush.msrb.mxu0 %v2242_v36  ;;  %2322 = vmatpush.msrb.mxu1 %v2243_v40  ;;  %v2203_v36 = vld [vmem:[#allocation14 + $0x8] sm:$0xff] }
 0x489   :  { %2363 = vmatpush.msrb.mxu2 %v2244_v4  ;;  %2404 = vmatpush.msrb.mxu3 %v2245_v47  ;;  %v2204_v4 = vld [vmem:[#allocation14 + $0x10] sm:$0xff] }
 0x48a   :  { %2282 = vmatpush.msrb.mxu0 %v2238_v51  ;;  %2323 = vmatpush.msrb.mxu1 %v2239_v53 }
 0x48b   :  { %2364 = vmatpush.msrb.mxu2 %v2240_v7  ;;  %2405 = vmatpush.msrb.mxu3 %v2241_v32 }
 0x48c   :  { %2283 = vmatpush.msrb.mxu0 %v2234_v35  ;;  %2324 = vmatpush.msrb.mxu1 %v2235_v0 }
 0x48d   :  { %2365 = vmatpush.msrb.mxu2 %v2236_v25  ;;  %2406 = vmatpush.msrb.mxu3 %v2237_v11 }
 0x48e   :  { %2284 = vmatpush.msrb.mxu0 %v2230_v39  ;;  %2325 = vmatpush.msrb.mxu1 %v2231_v42 }
 0x48f   :  { %2366 = vmatpush.msrb.mxu2 %v2232_v43  ;;  %2407 = vmatpush.msrb.mxu3 %v2233_v12 }
 0x490   :  { %2285 = vmatpush.msrb.mxu0 %v2226_v10  ;;  %2326 = vmatpush.msrb.mxu1 %v2227_v57 }
 0x491   :  { %2367 = vmatpush.msrb.mxu2 %v2228_v59  ;;  %2408 = vmatpush.msrb.mxu3 %v2229_v1 }
 0x492   :  { %2286 = vmatpush.msrb.mxu0 %v2222_v63  ;;  %2327 = vmatpush.msrb.mxu1 %v2223_v26 }
 0x493   :  { %2368 = vmatpush.msrb.mxu2 %v2224_v56  ;;  %2409 = vmatpush.msrb.mxu3 %v2225_v24 }
 0x494   :  { %2287 = vmatpush.msrb.mxu0 %v2218_v29  ;;  %2328 = vmatpush.msrb.mxu1 %v2219_v14 }
 0x495   :  { %2369 = vmatpush.msrb.mxu2 %v2220_v55  ;;  %2410 = vmatpush.msrb.mxu3 %v2221_v21 }
 0x496   :  { %2288 = vmatpush.msrb.mxu0 %v2214_v17  ;;  %2329 = vmatpush.msrb.mxu1 %v2215_v61  ;;  %v7497_v17 = vld [vmem:[#allocation49_spill] sm:$0xff]  ;;  %v7498_v61 = vld [vmem:[#allocation62_spill] sm:$0xff] }
 0x497   :  { %2370 = vmatpush.msrb.mxu2 %v2216_v5  ;;  %2411 = vmatpush.msrb.mxu3 %v2217_v58  ;;  %v6069_v5 = vld [vmem:[#allocation15 + $0x1e0] sm:$0xff]  ;;  %v6071_v58 = vld [vmem:[#allocation15 + $0x1e8] sm:$0xff] }
 0x498   :  { %2289 = vmatpush.msrb.mxu0 %v2210_v38  ;;  %2330 = vmatpush.msrb.mxu1 %v2211_v19  ;;  %v6073_v38 = vld [vmem:[#allocation15 + $0x1c0] sm:$0xff]  ;;  %v6077_v19 = vld [vmem:[#allocation15 + $0x1c8] sm:$0xff] }
 0x499   :  { %2371 = vmatpush.msrb.mxu2 %v2212_v8  ;;  %2412 = vmatpush.msrb.mxu3 %v2213_v27  ;;  %v6079_v8 = vld [vmem:[#allocation15 + $0x1f0] sm:$0xff]  ;;  %v6082_v27 = vld [vmem:[#allocation15 + $0x1a0] sm:$0xff] }
 0x49a   :  { %2290 = vmatpush.msrb.mxu0 %v2206_v37  ;;  %2331 = vmatpush.msrb.mxu1 %v2207_v54  ;;  %v6084_v37 = vld [vmem:[#allocation15 + $0x1a8] sm:$0xff]  ;;  %v7499_v54 = vld [vmem:[#allocation63_spill] sm:$0xff] }
 0x49b   :  { %2413 = vmatpush.msrb.mxu3 %v2209_v50  ;;  %v6105_v50 = vld [vmem:[#allocation15 + $0x1f8] sm:$0xff] }
 0x49c   :  { %2332 = vmatpush.msrb.mxu1 %v2203_v36  ;;  %v6117_v36 = vld [vmem:[#allocation15 + $0x188] sm:$0xff] }
 0x4f9   :  { %v1837_v30 = vpop.f32.mrf.mxu0  ;;  %v1857_v18 = vpop.f32.mrf.mxu1 }
 0x4fa   :  { %v1900_v46 = vadd.f32 %v1837_v30, %v258_v13  ;;  %v1901_v6 = vadd.f32 %v1857_v18, %v299_v3  ;;  %v2208_v13 = vld [vmem:[#allocation14 + $0x30] sm:$0xff]  ;;  %v381_v30 = vadd.f32 %v7495_v34, %v7461_v49  ;;  %v2202_v18 = vld [vmem:[#allocation14] sm:$0xff] }
 0x4fb   :  { %2372 = vmatpush.msrb.mxu2 %v2208_v13  ;;  %2291 = vmatpush.msrb.mxu0 %v2202_v18  ;;  %v7500_v13 = vld [vmem:[#allocation64_spill] sm:$0xff]  ;;  %v6111_v34 = vld [vmem:[#allocation15 + $0x1b0] sm:$0xff]  ;;  %v6115_v18 = vld [vmem:[#allocation15 + $0x180] sm:$0xff] }
 0x4fc   :  { %v4306_v9 = vmul.f32 -1.442695, %v1900_v46  ;;  %v4307_v31 = vmul.f32 -1.442695, %v1901_v6  ;;  %v2205_v46 = vld [vmem:[#allocation14 + $0x18] sm:$0xff] }
 0x4fd   :  { %2373 = vmatpush.msrb.mxu2 %v2204_v4  ;;  %2414 = vmatpush.msrb.mxu3 %v2205_v46  ;;  %v6127_v4 = vld [vmem:[#allocation15 + $0x190] sm:$0xff]  ;;  %v6129_v46 = vld [vmem:[#allocation15 + $0x198] sm:$0xff] }
 0x4fe   :  { %4446 = vpow2.f32 %v4306_v9 }
 0x4ff   :  { %4448 = vpow2.f32 %v4307_v31 }
 0x500   :  { %v1877_v45 = vpop.f32.mrf.mxu2  ;;  %v1897_v48 = vpop.f32.mrf.mxu3 }
 0x501   :  { %v1902_v60 = vadd.f32 %v1877_v45, %v340_v41  ;;  %v1903_v47 = vadd.f32 %v1897_v48, %v381_v30  ;;  %v6086_v48 = vld [vmem:[#allocation15 + $0x1d0] sm:$0xff]  ;;  %v6113_v30 = vld [vmem:[#allocation15 + $0x1b8] sm:$0xff] }
 0x503   :  { %v4308_v62 = vmul.f32 -1.442695, %v1902_v60 }
 0x504   :  { %v4447_v28 = vpop.eup %4446 }
 0x505   :  { %v4449_v16 = vpop.eup %4448  ;;  %v6037_v44 = vadd.f32 1.0, %v4447_v28  ;;  %4450 = vpow2.f32 %v4308_v62 }
 0x506   :  { %v6039_v22 = vadd.f32 1.0, %v4449_v16 }
 0x507   :  { %4452 = vrcp.f32 %v6037_v44  ;;  %v1927_v32 = vand.u32 2147483648, %v6037_v44  ;;  %v1925_v25 = vand.u32 2147483647, %v6037_v44  ;;  %vm1921_vm10 = vweird.f32 %v6037_v44 }
 0x508   :  { %4454 = vrcp.f32 %v6039_v22  ;;  %v1942_v35 = vand.u32 2147483648, %v6039_v22  ;;  %v1940_v23 = vand.u32 2147483647, %v6039_v22  ;;  %vm1936_vm11 = vweird.f32 %v6039_v22 }
 0x509   :  { %v1928_v43 = vor.u32 1.1754944e-38, %v1927_v32  ;;  %vm1926_vm14 = vcmp.eq.f32.partialorder %v1925_v25, 8.507059e+37  ;;  %v6147_v32 = vld [vmem:[#allocation15 + $0x148] sm:$0xff] }
 0x50a   :  { %v1943_v12 = vor.u32 1.1754944e-38, %v1942_v35  ;;  %vm1941_vm15 = vcmp.eq.f32.partialorder %v1940_v23, 8.507059e+37  ;;  %v6149_v35 = vld [vmem:[#allocation15 + $0x150] sm:$0xff] }
 0x50b   :  { %v4451_v3 = vpop.eup %4450 }
 0x50c   :  { %v1915_v40 = vadd.f32 1.0, %v4451_v3  ;;  %v6108_v3 = vld [vmem:[#allocation15 + $0x1d8] sm:$0xff] }
 0x50d   :  { %v4453_v6 = vpop.eup %4452 }
 0x50e   :  { %v4455_v51 = vpop.eup %4454  ;;  %v1917_v53 = vmul.f32 %v4453_v6, %v6037_v44  ;;  %4456 = vrcp.f32 %v1915_v40  ;;  %vm1922_vm8 = vweird.f32 %v4453_v6  ;;  %v1957_v29 = vand.u32 2147483648, %v1915_v40 }
 0x50f   :  { %v1932_v7 = vmul.f32 %v4455_v51, %v6039_v22  ;;  %4458 = vtanh.f32 %v1903_v47  ;;  %vm1937_vm9 = vweird.f32 %v4455_v51  ;;  %vm1923_vm12 = vmor %vm1921_vm10, %vm1922_vm8  ;;  %vm1951_vm1 = vweird.f32 %v1915_v40  ;;  %v6137_v47 = vld [vmem:[#allocation15 + $0x178] sm:$0xff] }
 0x510   :  { %v1918_v9 = vsub.f32 1.0, %v1917_v53  ;;  %vm1938_vm13 = vmor %vm1936_vm11, %vm1937_vm9  ;;  %v1955_v14 = vand.u32 2147483647, %v1915_v40  ;;  %v1958_v44 = vor.u32 1.1754944e-38, %v1957_v29 }
 0x511   :  { %v1933_v31 = vsub.f32 1.0, %v1932_v7  ;;  %v7502_v7 = vld [vmem:[#allocation40_spill] sm:$0xff] }
 0x512   :  { %v1919_v0 = vmul.f32 %v4453_v6, %v1918_v9  ;;  %vm1956_vm3 = vcmp.eq.f32.partialorder %v1955_v14, 8.507059e+37  ;;  %v302_v9 = vadd.f32 %v7502_v7, %v7491_v2  ;;  %v6160_v2 = vld [vmem:[#allocation15 + $0x130] sm:$0xff]  ;;  %v6195_v14 = vld [vmem:[#allocation15 + $0xa0] sm:$0xff] }
 0x513   :  { %v1934_v11 = vmul.f32 %v4455_v51, %v1933_v31  ;;  %v6145_v31 = vld [vmem:[#allocation15 + $0x140] sm:$0xff] }
 0x514   :  { %v4457_v41 = vpop.eup %4456  ;;  %v1920_v39 = vadd.f32 %v4453_v6, %v1919_v0 }
 0x515   :  { %v1947_v42 = vmul.f32 %v4457_v41, %v1915_v40  ;;  %v1935_v45 = vadd.f32 %v4455_v51, %v1934_v11  ;;  %v4459_v10 = vpop.eup %4458  ;;  %vm1952_vm0 = vweird.f32 %v4457_v41  ;;  %v6125_v40 = vld [vmem:[#allocation15 + $0x168] sm:$0xff]  ;;  %v6153_v11 = vld [vmem:[#allocation15 + $0x158] sm:$0xff] }
 0x516   :  { %v1924_v60 = vsel %vm1923_vm12, %v4453_v6, %v1920_v39  ;;  %vm1953_vm2 = vmor %vm1951_vm1, %vm1952_vm0  ;;  %v6135_v6 = vld [vmem:[#allocation15 + $0x170] sm:$0xff]  ;;  %v6157_v39 = vld [vmem:[#allocation15 + $0x128] sm:$0xff] }
 0x517   :  { %v1948_v57 = vsub.f32 1.0, %v1947_v42  ;;  %v1929_v59 = vsel %vm1926_vm14, %v1928_v43, %v1924_v60  ;;  %v1939_v1 = vsel %vm1938_vm13, %v4455_v51, %v1935_v45  ;;  %v7501_v51 = vld [vmem:[#allocation39_spill] sm:$0xff]  ;;  %v6165_v42 = vld [vmem:[#allocation15 + $0x138] sm:$0xff]  ;;  %v6169_v60 = vld [vmem:[#allocation15 + $0x108] sm:$0xff] }
 0x518   :  { %v1944_v62 = vsel %vm1941_vm15, %v1943_v12, %v1939_v1  ;;  %v1964_v63 = vmul.f32 %v4459_v10, %v1929_v59  ;;  %v261_v53 = vadd.f32 %v7501_v51, %v7489_v33  ;;  %v6155_v33 = vld [vmem:[#allocation15 + $0x120] sm:$0xff]  ;;  %v6179_v59 = vld [vmem:[#allocation15 + $0x110] sm:$0xff] }
 0x519   :  { %v1949_v26 = vmul.f32 %v4457_v41, %v1948_v57  ;;  %v1963_v56 = vmul.f32 %v1944_v62, %v5990_v15  ;;  %v7496_v15 = vld [vmem:[#allocation48_spill] sm:$0xff]  ;;  %v6167_v12 = vld [vmem:[#allocation15 + $0x100] sm:$0xff] }
 0x51a   :  { %v6175_v10 = vld [vmem:[#allocation15 + $0xe0] sm:$0xff]  ;;  %v6177_v57 = vld [vmem:[#allocation15 + $0xe8] sm:$0xff] }
 0x51b   :  { %v6054_v28 = vadd.f32 %v1964_v63, %v1963_v56  ;;  %v1950_v24 = vadd.f32 %v4457_v41, %v1949_v26  ;;  %v6182_v1 = vld [vmem:[#allocation15 + $0xc0] sm:$0xff]  ;;  %v6184_v62 = vld [vmem:[#allocation15 + $0xc8] sm:$0xff]  ;;  %v6186_v63 = vld [vmem:[#allocation15 + $0xf0] sm:$0xff] }
 0x51c   :  { %v7503_v26 = vld [vmem:[#allocation44_spill] sm:$0xff]  ;;  %v6221_v51 = vld [vmem:[#allocation15 + $0x60] sm:$0xff] }
 0x51d   :  { %4460 = vtanh.f32 %v6054_v28  ;;  %v1954_v16 = vsel %vm1953_vm2, %v4457_v41, %v1950_v24  ;;  %v343_v56 = vadd.f32 %v7503_v26, %v7493_v20  ;;  %v6192_v24 = vld [vmem:[#allocation15 + $0xd0] sm:$0xff]  ;;  %7506 = vst [vmem:[#allocation55_spill] sm:$0xff] %v6221_v51 }
 0x51e   :  { %v1959_v21 = vsel %vm1956_vm3, %v1958_v44, %v1954_v16  ;;  %v6197_v16 = vld [vmem:[#allocation15 + $0xa8] sm:$0xff]  ;;  %v6199_v44 = vld [vmem:[#allocation15 + $0x118] sm:$0xff]  ;;  %v6203_v20 = vld [vmem:[#allocation15 + $0xb0] sm:$0xff] }
 0x51f   :  { %v6246_v26 = vld [vmem:[#allocation15 + $0x50] sm:$0xff] }
 0x520   :  { %7512 = vst [vmem:[#allocation61_spill] sm:$0xff] %v6246_v26 }
 0x523   :  { %v4461_v55 = vpop.eup %4460 }
 0x524   :  { %v1967_v22 = vmul.f32 %v4461_v55, %v1959_v21  ;;  %v6205_v21 = vld [vmem:[#allocation15 + $0xf8] sm:$0xff] }
 0x526   :  { %2058 = vmatmul.f32.vlgmr.msra.gmra.mxu0 %v1967_v22  ;;  %2078 = vmatmul.f32.vlgmr.msra.gmra.mxu1 %v1967_v22 }
 0x527   :  { %2098 = vmatmul.f32.vlgmr.msra.gmra.mxu2 %v1967_v22  ;;  %2118 = vmatmul.f32.vlgmr.msra.gmra.mxu3 %v1967_v22 }
 0x528   :  { %2543 = vmatpush.msra.mxu0 %v6069_v5  ;;  %2563 = vmatpush.msra.mxu1 %v6071_v58 }
 0x529   :  { %2583 = vmatpush.msra.mxu2 %v6079_v8  ;;  %2603 = vmatpush.msra.mxu3 %v6105_v50 }
 0x52a   :  { %2544 = vmatpush.msra.mxu0 %v6073_v38  ;;  %2564 = vmatpush.msra.mxu1 %v6077_v19 }
 0x52b   :  { %2584 = vmatpush.msra.mxu2 %v6086_v48  ;;  %2604 = vmatpush.msra.mxu3 %v6108_v3 }
 0x52c   :  { %2545 = vmatpush.msra.mxu0 %v6082_v27  ;;  %2565 = vmatpush.msra.mxu1 %v6084_v37 }
 0x52d   :  { %2585 = vmatpush.msra.mxu2 %v6111_v34  ;;  %2605 = vmatpush.msra.mxu3 %v6113_v30 }
 0x52e   :  { %2292 = vmatmul.f32.vlgmr.msrb.gmra.mxu0 %v7496_v15  ;;  %2333 = vmatmul.f32.vlgmr.msrb.gmra.mxu1 %v7496_v15 }
 0x52f   :  { %2374 = vmatmul.f32.vlgmr.msrb.gmra.mxu2 %v7496_v15  ;;  %2415 = vmatmul.f32.vlgmr.msrb.gmra.mxu3 %v7496_v15  ;;  %v6211_v15 = vld [vmem:[#allocation15 + $0x88] sm:$0xff] }
 0x530   :  { %2546 = vmatpush.msra.mxu0 %v6115_v18  ;;  %2566 = vmatpush.msra.mxu1 %v6117_v36  ;;  %7504 = vst [vmem:[#allocation53_spill] sm:$0xff] %v6211_v15 }
 0x531   :  { %2586 = vmatpush.msra.mxu2 %v6127_v4  ;;  %2606 = vmatpush.msra.mxu3 %v6129_v46 }
 0x532   :  { %2567 = vmatpush.msra.mxu1 %v6125_v40 }
 0x533   :  { %2587 = vmatpush.msra.mxu2 %v6135_v6  ;;  %2607 = vmatpush.msra.mxu3 %v6137_v47 }
 0x534   :  { %2568 = vmatpush.msra.mxu1 %v6147_v32 }
 0x535   :  { %2588 = vmatpush.msra.mxu2 %v6149_v35  ;;  %2608 = vmatpush.msra.mxu3 %v6153_v11 }
 0x536   :  { %2295 = vmatmul.f32.gmra.mxu0 %v7497_v17  ;;  %2336 = vmatmul.f32.gmra.mxu1 %v7497_v17 }
 0x537   :  { %2377 = vmatmul.f32.gmra.mxu2 %v7497_v17  ;;  %2418 = vmatmul.f32.gmra.mxu3 %v7497_v17 }
 0x538   :  { %2569 = vmatpush.msra.mxu1 %v6157_v39  ;;  %2589 = vmatpush.msra.mxu2 %v6160_v2 }
 0x539   :  { %2609 = vmatpush.msra.mxu3 %v6165_v42 }
 0x53a   :  { %2570 = vmatpush.msra.mxu1 %v6169_v60  ;;  %2590 = vmatpush.msra.mxu2 %v6179_v59 }
 0x53b   :  { %2610 = vmatpush.msra.mxu3 %v6199_v44 }
 0x53c   :  { %2571 = vmatpush.msra.mxu1 %v6177_v57  ;;  %2591 = vmatpush.msra.mxu2 %v6186_v63 }
 0x53d   :  { %2611 = vmatpush.msra.mxu3 %v6205_v21 }
 0x53e   :  { %2298 = vmatmul.f32.gmra.mxu0 %v7498_v61  ;;  %2339 = vmatmul.f32.gmra.mxu1 %v7498_v61 }
 0x53f   :  { %2380 = vmatmul.f32.gmra.mxu2 %v7498_v61  ;;  %2421 = vmatmul.f32.gmra.mxu3 %v7498_v61  ;;  %v6215_v61 = vld [vmem:[#allocation15 + $0x90] sm:$0xff] }
 0x540   :  { %2572 = vmatpush.msra.mxu1 %v6184_v62  ;;  %2592 = vmatpush.msra.mxu2 %v6192_v24  ;;  %7505 = vst [vmem:[#allocation54_spill] sm:$0xff] %v6215_v61 }
 0x542   :  { %2573 = vmatpush.msra.mxu1 %v6197_v16  ;;  %2593 = vmatpush.msra.mxu2 %v6203_v20 }
 0x544   :  { %2574 = vmatpush.msra.mxu1 %v6211_v15  ;;  %2594 = vmatpush.msra.mxu2 %v6215_v61 }
 0x546   :  { %2301 = vmatmul.f32.gmra.mxu0 %v7499_v54  ;;  %2342 = vmatmul.f32.gmra.mxu1 %v7499_v54 }
 0x547   :  { %2383 = vmatmul.f32.gmra.mxu2 %v7499_v54  ;;  %2424 = vmatmul.f32.gmra.mxu3 %v7499_v54  ;;  %v6217_v54 = vld [vmem:[#allocation15 + $0xd8] sm:$0xff] }
 0x548   :  { %2612 = vmatpush.msra.mxu3 %v6217_v54 }
 0x54e   :  { %2304 = vmatmul.f32.gmra.mxu0 %v7500_v13  ;;  %2345 = vmatmul.f32.gmra.mxu1 %v7500_v13 }
 0x54f   :  { %2386 = vmatmul.f32.gmra.mxu2 %v7500_v13  ;;  %2427 = vmatmul.f32.gmra.mxu3 %v7500_v13 }
 0x556   :  { %2307 = vmatmul.f32.gmra.mxu0 %v6017_v52  ;;  %2348 = vmatmul.f32.gmra.mxu1 %v6017_v52 }
 0x557   :  { %2389 = vmatmul.f32.gmra.mxu2 %v6017_v52  ;;  %2430 = vmatmul.f32.gmra.mxu3 %v6017_v52  ;;  %v6120_v52 = vld [vmem:[#allocation15 + $0x160] sm:$0xff] }
 0x558   :  { %2547 = vmatpush.msra.mxu0 %v6120_v52 }
 0x55a   :  { %2548 = vmatpush.msra.mxu0 %v6145_v31 }
 0x55c   :  { %2549 = vmatpush.msra.mxu0 %v6155_v33 }
 0x55e   :  { %2310 = vmatmul.f32.gmra.mxu0 %v1967_v22  ;;  %2351 = vmatmul.f32.gmra.mxu1 %v1967_v22 }
 0x55f   :  { %2392 = vmatmul.f32.gmra.mxu2 %v1967_v22  ;;  %2433 = vmatmul.f32.gmra.mxu3 %v1967_v22  ;;  %v6209_v22 = vld [vmem:[#allocation15 + $0x80] sm:$0xff] }
 0x560   :  { %2550 = vmatpush.msra.mxu0 %v6167_v12 }
 0x562   :  { %2551 = vmatpush.msra.mxu0 %v6175_v10 }
 0x564   :  { %2552 = vmatpush.msra.mxu0 %v6182_v1 }
 0x566   :  { %2553 = vmatpush.msra.mxu0 %v6195_v14 }
 0x568   :  { %2554 = vmatpush.msra.mxu0 %v6209_v22 }
 0x56a   :  { %2555 = vmatpush.msra.mxu0 %v6221_v51  ;;  %v7518_v51 = vld [vmem:[#allocation46_spill] sm:$0xff] }
 0x56b   :  { %v384_v61 = vadd.f32 %v7518_v51, %v7461_v49  ;;  %v6281_v49 = vld [vmem:[#allocation15 + $0x38] sm:$0xff] }
 0x5a3   :  { %v2059_v0 = vpop.f32.mrf.mxu0  ;;  %v2079_v25 = vpop.f32.mrf.mxu1 }
 0x5a4   :  { %v2122_v23 = vadd.f32 %v2059_v0, %v261_v53  ;;  %v2123_v41 = vadd.f32 %v2079_v25, %v302_v9  ;;  %v6223_v53 = vld [vmem:[#allocation15 + $0x68] sm:$0xff]  ;;  %v6229_v0 = vld [vmem:[#allocation15 + $0x70] sm:$0xff]  ;;  %v6231_v25 = vld [vmem:[#allocation15 + $0xb8] sm:$0xff] }
 0x5a5   :  { %7507 = vst [vmem:[#allocation56_spill] sm:$0xff] %v6223_v53  ;;  %2575 = vmatpush.msra.mxu1 %v6223_v53  ;;  %2595 = vmatpush.msra.mxu2 %v6229_v0 }
 0x5a6   :  { %v4309_v43 = vmul.f32 -1.442695, %v2122_v23  ;;  %v4310_v45 = vmul.f32 -1.442695, %v2123_v41  ;;  %7508 = vst [vmem:[#allocation57_spill] sm:$0xff] %v6229_v0  ;;  %v6237_v41 = vld [vmem:[#allocation15 + $0x40] sm:$0xff]  ;;  %2613 = vmatpush.msra.mxu3 %v6231_v25 }
 0x5a7   :  { %7509 = vst [vmem:[#allocation58_spill] sm:$0xff] %v6237_v41  ;;  %2556 = vmatpush.msra.mxu0 %v6237_v41  ;;  %2596 = vmatpush.msra.mxu2 %v6246_v26  ;;  %v6265_v0 = vld [vmem:[#allocation15 + $0x30] sm:$0xff] }
 0x5a8   :  { %4462 = vpow2.f32 %v4309_v43  ;;  %v6239_v43 = vld [vmem:[#allocation15 + $0x48] sm:$0xff]  ;;  %7517 = vst [vmem:[#allocation27_spill] sm:$0xff] %v6265_v0  ;;  %v6273_v41 = vld [vmem:[#allocation15 + $0x10] sm:$0xff] }
 0x5a9   :  { %4464 = vpow2.f32 %v4310_v45  ;;  %7510 = vst [vmem:[#allocation59_spill] sm:$0xff] %v6239_v43  ;;  %v6244_v45 = vld [vmem:[#allocation15 + $0x98] sm:$0xff]  ;;  %2576 = vmatpush.msra.mxu1 %v6239_v43  ;;  %2597 = vmatpush.msra.mxu2 %v6265_v0 }
 0x5aa   :  { %v2099_v29 = vpop.f32.mrf.mxu2  ;;  %7511 = vst [vmem:[#allocation60_spill] sm:$0xff] %v6244_v45  ;;  %2614 = vmatpush.msra.mxu3 %v6244_v45  ;;  %v6271_v43 = vld [vmem:[#allocation15 + $0x58] sm:$0xff] }
 0x5ab   :  { %v2124_v55 = vadd.f32 %v2099_v29, %v343_v56  ;;  %v6251_v56 = vld [vmem:[#allocation15 + $0x20] sm:$0xff]  ;;  %v6253_v29 = vld [vmem:[#allocation15 + $0x28] sm:$0xff]  ;;  %7519 = vst [vmem:[#allocation28_spill] sm:$0xff] %v6273_v41  ;;  %2598 = vmatpush.msra.mxu2 %v6273_v41  ;;  %v6288_v0 = vld [vmem:[#allocation15 + $0x18] sm:$0xff] }
 0x5ac   :  { %7513 = vst [vmem:[#allocation24_spill] sm:$0xff] %v6251_v56  ;;  %2557 = vmatpush.msra.mxu0 %v6251_v56  ;;  %2577 = vmatpush.msra.mxu1 %v6253_v29 }
 0x5ad   :  { %v4311_v17 = vmul.f32 -1.442695, %v2124_v55  ;;  %7514 = vst [vmem:[#allocation25_spill] sm:$0xff] %v6253_v29  ;;  %v6257_v55 = vld [vmem:[#allocation15 + $0x78] sm:$0xff]  ;;  %2802 = vmatpush.msrb.mxu2 %v6079_v8 }
 0x5ae   :  { %v4463_v13 = vpop.eup %4462  ;;  %2615 = vmatpush.msra.mxu3 %v6257_v55 }
 0x5af   :  { %v4465_v7 = vpop.eup %4464  ;;  %v6225_v9 = vadd.f32 1.0, %v4463_v13  ;;  %4466 = vpow2.f32 %v4311_v17  ;;  %v2119_v17 = vpop.f32.mrf.mxu3  ;;  %v6261_v13 = vld [vmem:[#allocation15] sm:$0xff]  ;;  %2803 = vmatpush.msrb.mxu2 %v6086_v48 }
 0x5b0   :  { %v6233_v23 = vadd.f32 1.0, %v4465_v7  ;;  %7515 = vst [vmem:[#allocation26_spill] sm:$0xff] %v6261_v13  ;;  %v6263_v7 = vld [vmem:[#allocation15 + $0x8] sm:$0xff]  ;;  %v2125_v15 = vadd.f32 %v2119_v17, %v384_v61  ;;  %2558 = vmatpush.msra.mxu0 %v6261_v13  ;;  %2616 = vmatpush.msra.mxu3 %v6271_v43 }
 0x5b1   :  { %4468 = vrcp.f32 %v6225_v9  ;;  %7516 = vst [vmem:[#allocation47_spill] sm:$0xff] %v6263_v7  ;;  %2578 = vmatpush.msra.mxu1 %v6263_v7  ;;  %v2149_v7 = vand.u32 2147483648, %v6225_v9  ;;  %vm2143_vm6 = vweird.f32 %v6225_v9  ;;  %2804 = vmatpush.msrb.mxu2 %v6111_v34 }
 0x5b2   :  { %4470 = vrcp.f32 %v6233_v23  ;;  %2762 = vmatpush.msrb.mxu0 %v6069_v5  ;;  %2617 = vmatpush.msra.mxu3 %v6281_v49  ;;  %v2164_v41 = vand.u32 2147483648, %v6233_v23  ;;  %v2147_v5 = vand.u32 2147483647, %v6225_v9  ;;  %v2162_v8 = vand.u32 2147483647, %v6233_v23 }
 0x5b3   :  { %2782 = vmatpush.msrb.mxu1 %v6071_v58  ;;  %vm2158_vm7 = vweird.f32 %v6233_v23  ;;  %2805 = vmatpush.msrb.mxu2 %v6127_v4 }
 0x5b4   :  { %2763 = vmatpush.msrb.mxu0 %v6073_v38  ;;  %2618 = vmatpush.msra.mxu3 %v6288_v0  ;;  %vm2148_vm10 = vcmp.eq.f32.partialorder %v2147_v5, 8.507059e+37  ;;  %vm2163_vm11 = vcmp.eq.f32.partialorder %v2162_v8, 8.507059e+37 }
 0x5b5   :  { %v4467_v53 = vpop.eup %4466  ;;  %2783 = vmatpush.msrb.mxu1 %v6077_v19  ;;  %2806 = vmatpush.msrb.mxu2 %v6135_v6 }
 0x5b6   :  { %v6275_v45 = vadd.f32 1.0, %v4467_v53  ;;  %2822 = vmatpush.msrb.mxu3 %v6105_v50  ;;  %2764 = vmatpush.msrb.mxu0 %v6082_v27  ;;  %v2165_v27 = vor.u32 1.1754944e-38, %v2164_v41 }
 0x5b7   :  { %v4469_v26 = vpop.eup %4468  ;;  %2784 = vmatpush.msrb.mxu1 %v6084_v37  ;;  %2807 = vmatpush.msrb.mxu2 %v6149_v35 }
 0x5b8   :  { %v4471_v51 = vpop.eup %4470  ;;  %v2139_v29 = vmul.f32 %v4469_v26, %v6225_v9  ;;  %4472 = vrcp.f32 %v6275_v45  ;;  %vm2144_vm4 = vweird.f32 %v4469_v26  ;;  %2823 = vmatpush.msrb.mxu3 %v6108_v3  ;;  %2765 = vmatpush.msrb.mxu0 %v6115_v18  ;;  %vm2173_vm13 = vweird.f32 %v6275_v45 }
 0x5b9   :  { %v2154_v53 = vmul.f32 %v4471_v51, %v6233_v23  ;;  %4474 = vtanh.f32 %v2125_v15  ;;  %vm2159_vm5 = vweird.f32 %v4471_v51  ;;  %vm2145_vm8 = vmor %vm2143_vm6, %vm2144_vm4  ;;  %v2150_v15 = vor.u32 1.1754944e-38, %v2149_v7  ;;  %2785 = vmatpush.msrb.mxu1 %v6117_v36  ;;  %2808 = vmatpush.msrb.mxu2 %v6160_v2 }
 0x5ba   :  { %v2140_v61 = vsub.f32 1.0, %v2139_v29  ;;  %vm2160_vm9 = vmor %vm2158_vm7, %vm2159_vm5  ;;  %2824 = vmatpush.msrb.mxu3 %v6113_v30  ;;  %2766 = vmatpush.msrb.mxu0 %v6120_v52  ;;  %v2177_v5 = vand.u32 2147483647, %v6275_v45 }
 0x5bb   :  { %v2155_v17 = vsub.f32 1.0, %v2154_v53  ;;  %2786 = vmatpush.msrb.mxu1 %v6125_v40  ;;  %2809 = vmatpush.msrb.mxu2 %v6179_v59 }
 0x5bc   :  { %v2141_v13 = vmul.f32 %v4469_v26, %v2140_v61  ;;  %2825 = vmatpush.msrb.mxu3 %v6129_v46  ;;  %2767 = vmatpush.msrb.mxu0 %v6145_v31  ;;  %vm2178_vm15 = vcmp.eq.f32.partialorder %v2177_v5, 8.507059e+37 }
 0x5bd   :  { %v2156_v58 = vmul.f32 %v4471_v51, %v2155_v17  ;;  %2787 = vmatpush.msrb.mxu1 %v6147_v32  ;;  %2810 = vmatpush.msrb.mxu2 %v6186_v63 }
 0x5be   :  { %v6304_v38 = vpop.eup %4472  ;;  %v2142_v19 = vadd.f32 %v4469_v26, %v2141_v13  ;;  %2826 = vmatpush.msrb.mxu3 %v6137_v47  ;;  %2768 = vmatpush.msrb.mxu0 %v6155_v33 }
 0x5bf   :  { %v2169_v48 = vmul.f32 %v6304_v38, %v6275_v45  ;;  %v2157_v29 = vadd.f32 %v4471_v51, %v2156_v58  ;;  %v4475_v37 = vpop.eup %4474  ;;  %vm2174_vm12 = vweird.f32 %v6304_v38  ;;  %2788 = vmatpush.msrb.mxu1 %v6157_v39  ;;  %2811 = vmatpush.msrb.mxu2 %v6192_v24 }
 0x5c0   :  { %v2146_v9 = vsel %vm2145_vm8, %v4469_v26, %v2142_v19  ;;  %2827 = vmatpush.msrb.mxu3 %v6153_v11  ;;  %2769 = vmatpush.msrb.mxu0 %v6167_v12  ;;  %vm2175_vm14 = vmor %vm2173_vm13, %vm2174_vm12 }
 0x5c1   :  { %v2170_v23 = vsub.f32 1.0, %v2169_v48  ;;  %v2151_v13 = vsel %vm2148_vm10, %v2150_v15, %v2146_v9  ;;  %v2161_v53 = vsel %vm2160_vm9, %v4471_v51, %v2157_v29  ;;  %2789 = vmatpush.msrb.mxu1 %v6169_v60  ;;  %2812 = vmatpush.msrb.mxu2 %v6203_v20  ;;  %v7520_v48 = vld [vmem:[#allocation53_spill] sm:$0xff]  ;;  %v7521_v15 = vld [vmem:[#allocation54_spill] sm:$0xff]  ;;  %v7522_v29 = vld [vmem:[#allocation60_spill] sm:$0xff] }
 0x5c2   :  { %v2166_v7 = vsel %vm2163_vm11, %v2165_v27, %v2161_v53  ;;  %v2186_v61 = vmul.f32 %v4475_v37, %v2151_v13  ;;  %2828 = vmatpush.msrb.mxu3 %v6165_v42  ;;  %2770 = vmatpush.msrb.mxu0 %v6175_v10  ;;  %v7523_v27 = vld [vmem:[#allocation55_spill] sm:$0xff]  ;;  %v7524_v9 = vld [vmem:[#allocation56_spill] sm:$0xff]  ;;  %v7525_v37 = vld [vmem:[#allocation57_spill] sm:$0xff] }
 0x5c3   :  { %v2185_v41 = vmul.f32 %v2166_v7, %v6054_v28  ;;  %v2171_v26 = vmul.f32 %v6304_v38, %v2170_v23  ;;  %v2179_v28 = vand.u32 2147483648, %v6275_v45  ;;  %2790 = vmatpush.msrb.mxu1 %v6177_v57  ;;  %2813 = vmatpush.msrb.mxu2 %v7521_v15  ;;  %v7526_v23 = vld [vmem:[#allocation58_spill] sm:$0xff]  ;;  %v7527_v13 = vld [vmem:[#allocation59_spill] sm:$0xff]  ;;  %v7528_v53 = vld [vmem:[#allocation61_spill] sm:$0xff]  ;;  %v7529_v7 = vmov 0.0  }
 0x5c4   :  { %2829 = vmatpush.msrb.mxu3 %v6199_v44  ;;  %2771 = vmatpush.msrb.mxu0 %v6182_v1 }
 0x5c5   :  { %v2187_v51 = vadd.f32 %v2186_v61, %v2185_v41  ;;  %v2172_v17 = vadd.f32 %v6304_v38, %v2171_v26  ;;  %v2180_v8 = vor.u32 1.1754944e-38, %v2179_v28  ;;  %2791 = vmatpush.msrb.mxu1 %v6184_v62  ;;  %2814 = vmatpush.msrb.mxu2 %v7525_v37  ;;  %v7530_v61 = vld [vmem:[#allocation25_spill] sm:$0xff]  ;;  %v7531_v41 = vld [vmem:[#allocation27_spill] sm:$0xff]  ;;  %v7532_v26 = vld [vmem:[#allocation26_spill] sm:$0xff] }
 0x5c6   :  { %2830 = vmatpush.msrb.mxu3 %v6205_v21  ;;  %2772 = vmatpush.msrb.mxu0 %v6195_v14 }
 0x5c7   :  { %4476 = vtanh.f32 %v2187_v51  ;;  %v2176_v58 = vsel %vm2175_vm14, %v6304_v38, %v2172_v17  ;;  %2792 = vmatpush.msrb.mxu1 %v6197_v16  ;;  %2815 = vmatpush.msrb.mxu2 %v7528_v53  ;;  %v7533_v51 = vld [vmem:[#allocation47_spill] sm:$0xff]  ;;  %v7534_v17 = vld [vmem:[#allocation28_spill] sm:$0xff] }
 0x5c8   :  { %v2181_v19 = vsel %vm2178_vm15, %v2180_v8, %v2176_v58  ;;  %2831 = vmatpush.msrb.mxu3 %v6217_v54  ;;  %2773 = vmatpush.msrb.mxu0 %v6209_v22 }
 0x5c9   :  { %2793 = vmatpush.msrb.mxu1 %v7520_v48  ;;  %2816 = vmatpush.msrb.mxu2 %v7531_v41 }
 0x5ca   :  { %2832 = vmatpush.msrb.mxu3 %v6231_v25  ;;  %2774 = vmatpush.msrb.mxu0 %v7523_v27 }
 0x5cb   :  { %2794 = vmatpush.msrb.mxu1 %v7524_v9  ;;  %2817 = vmatpush.msrb.mxu2 %v7534_v17 }
 0x5cc   :  { %2833 = vmatpush.msrb.mxu3 %v7522_v29  ;;  %2775 = vmatpush.msrb.mxu0 %v7526_v23 }
 0x5cd   :  { %v4477_v45 = vpop.eup %4476  ;;  %2795 = vmatpush.msrb.mxu1 %v7527_v13 }
 0x5ce   :  { %v2189_v38 = vmul.f32 %v4477_v45, %v2181_v19  ;;  %2834 = vmatpush.msrb.mxu3 %v6257_v55  ;;  %2776 = vmatpush.msrb.mxu0 %v6251_v56 }
 0x5cf   :  { %2796 = vmatpush.msrb.mxu1 %v7530_v61 }
 0x5d0   :  { %2313 = vmatmul.f32.gmra.mxu0 %v2189_v38  ;;  %2354 = vmatmul.f32.gmra.mxu1 %v2189_v38 }
 0x5d1   :  { %2395 = vmatmul.f32.gmra.mxu2 %v2189_v38  ;;  %2436 = vmatmul.f32.gmra.mxu3 %v2189_v38 }
 0x5d2   :  { %2835 = vmatpush.msrb.mxu3 %v6271_v43  ;;  %2777 = vmatpush.msrb.mxu0 %v7532_v26 }
 0x5d3   :  { %2797 = vmatpush.msrb.mxu1 %v7533_v51 }
 0x5d4   :  { %2836 = vmatpush.msrb.mxu3 %v6281_v49 }
 0x5d6   :  { %2837 = vmatpush.msrb.mxu3 %v6288_v0 }
 0x5d8   :  { %2559 = vmatmul.f32.vlgmr.msra.gmra.mxu0 %v7529_v7  ;;  %2579 = vmatmul.f32.vlgmr.msra.gmra.mxu1 %v7529_v7 }
 0x5d9   :  { %2599 = vmatmul.f32.vlgmr.msra.gmra.mxu2 %v7529_v7  ;;  %2619 = vmatmul.f32.vlgmr.msra.gmra.mxu3 %v7529_v7 }
 0x5da   :  { %3041 = vmatpush.msra.mxu3 %v6105_v50  ;;  %v2293_v50 = vpop.f32.mrf.mxu0 }
 0x5dc   :  { %3042 = vmatpush.msra.mxu3 %v6108_v3  ;;  %v2334_v3 = vpop.f32.mrf.mxu1 }
 0x5de   :  { %3043 = vmatpush.msra.mxu3 %v6113_v30  ;;  %v2375_v30 = vpop.f32.mrf.mxu2 }
 0x5e0   :  { %3044 = vmatpush.msra.mxu3 %v6129_v46 }
 0x5e2   :  { %3045 = vmatpush.msra.mxu3 %v6137_v47  ;;  %v6396_v46 = vpop.f32.mrf.mxu0 }
 0x5e4   :  { %3046 = vmatpush.msra.mxu3 %v6153_v11  ;;  %v6398_v47 = vpop.f32.mrf.mxu1  ;;  %v2416_v11 = vpop.f32.mrf.mxu3 }
 0x5e6   :  { %3047 = vmatpush.msra.mxu3 %v6165_v42  ;;  %v6400_v42 = vpop.f32.mrf.mxu2 }
 0x5e8   :  { %3048 = vmatpush.msra.mxu3 %v6199_v44 }
 0x5ea   :  { %3049 = vmatpush.msra.mxu3 %v6205_v21  ;;  %v6402_v44 = vpop.f32.mrf.mxu0 }
 0x5eb   :  { %7535 = vst [vmem:[#allocation29_spill] sm:$0xff] %v6402_v44 }
 0x5ec   :  { %3050 = vmatpush.msra.mxu3 %v6217_v54  ;;  %v6404_v21 = vpop.f32.mrf.mxu1  ;;  %v6406_v54 = vpop.f32.mrf.mxu3 }
 0x5ed   :  { %7536 = vst [vmem:[#allocation30_spill] sm:$0xff] %v6404_v21 }
 0x5ee   :  { %3051 = vmatpush.msra.mxu3 %v6231_v25  ;;  %7537 = vst [vmem:[#allocation33_spill] sm:$0xff] %v6406_v54  ;;  %v6408_v25 = vpop.f32.mrf.mxu2 }
 0x5ef   :  { %7538 = vst [vmem:[#allocation31_spill] sm:$0xff] %v6408_v25 }
 0x5f0   :  { %3052 = vmatpush.msra.mxu3 %v7522_v29 }
 0x5f2   :  { %3053 = vmatpush.msra.mxu3 %v6257_v55 }
 0x5f4   :  { %3054 = vmatpush.msra.mxu3 %v6271_v43  ;;  %v6410_v43 = vpop.f32.mrf.mxu0  ;;  %v6414_v55 = vpop.f32.mrf.mxu3 }
 0x5f5   :  { %7539 = vst [vmem:[#allocation32_spill] sm:$0xff] %v6410_v43 }
 0x5f6   :  { %3055 = vmatpush.msra.mxu3 %v6281_v49  ;;  %7541 = vst [vmem:[#allocation37_spill] sm:$0xff] %v6414_v55  ;;  %v6416_v49 = vpop.f32.mrf.mxu2 }
 0x5f7   :  { %7542 = vst [vmem:[#allocation65_spill] sm:$0xff] %v6416_v49 }
 0x5f8   :  { %3056 = vmatpush.msra.mxu3 %v6288_v0  ;;  %v6412_v0 = vpop.f32.mrf.mxu1 }
 0x5f9   :  { %7540 = vst [vmem:[#allocation34_spill] sm:$0xff] %v6412_v0 }
 0x5fc   :  { %v6418_v28 = vpop.f32.mrf.mxu0  ;;  %v6422_v58 = vpop.f32.mrf.mxu3 }
 0x5fd   :  { %7543 = vst [vmem:[#allocation66_spill] sm:$0xff] %v6418_v28 }
 0x5fe   :  { %7545 = vst [vmem:[#allocation68_spill] sm:$0xff] %v6422_v58  ;;  %v6424_v8 = vpop.f32.mrf.mxu2 }
 0x5ff   :  { %7546 = vst [vmem:[#allocation69_spill] sm:$0xff] %v6424_v8  ;;  %v2266_v8 = vld [vmem:[%s7247_s6] sm:$0xf] }
 0x600   :  { %v6420_v5 = vpop.f32.mrf.mxu1  ;;  %v6459_v25 = vperm.slane %v2266_v8, 2 }
 0x601   :  { %7544 = vst [vmem:[#allocation67_spill] sm:$0xff] %v6420_v5 }
 0x602   :  { %7561 = vst [vmem:[#allocation64_spill] sm:$0xff] %v6459_v25  ;;  %v2376_v21 = vadd.f32 %v2375_v30, %v6459_v25 }
 0x604   :  { %v6426_v45 = vpop.f32.mrf.mxu0  ;;  %v6430_v38 = vpop.f32.mrf.mxu3 }
 0x605   :  { %7547 = vst [vmem:[#allocation50_spill] sm:$0xff] %v6426_v45 }
 0x606   :  { %7549 = vst [vmem:[#allocation52_spill] sm:$0xff] %v6430_v38  ;;  %v6432_v29 = vpop.f32.mrf.mxu2  ;;  %v6451_v38 = vperm.slane %v2266_v8, 1 }
 0x607   :  { %7550 = vst [vmem:[#allocation41_spill] sm:$0xff] %v6432_v29 }
 0x608   :  { %v6428_v19 = vpop.f32.mrf.mxu1  ;;  %7558 = vst [vmem:[#allocation49_spill] sm:$0xff] %v6451_v38 }
 0x609   :  { %7548 = vst [vmem:[#allocation51_spill] sm:$0xff] %v6428_v19  ;;  %v6449_v19 = vperm.slane %v2266_v8, 0 }
 0x60b   :  { %7557 = vst [vmem:[#allocation48_spill] sm:$0xff] %v6449_v19 }
 0x60c   :  { %v6434_v7 = vpop.f32.mrf.mxu0  ;;  %v6438_v49 = vpop.f32.mrf.mxu3 }
 0x60d   :  { %7551 = vst [vmem:[#allocation35_spill] sm:$0xff] %v6434_v7  ;;  %v2294_v7 = vadd.f32 %v2293_v50, %v6449_v19 }
 0x60e   :  { %7553 = vst [vmem:[#allocation36_spill] sm:$0xff] %v6438_v49  ;;  %v6440_v28 = vpop.f32.mrf.mxu2 }
 0x60f   :  { %7554 = vst [vmem:[#allocation45_spill] sm:$0xff] %v6440_v28 }
 0x610   :  { %v6436_v0 = vpop.f32.mrf.mxu1 }
 0x611   :  { %7552 = vst [vmem:[#allocation42_spill] sm:$0xff] %v6436_v0  ;;  %v2335_v0 = vadd.f32 %v2334_v3, %v6451_v38 }
 0x614   :  { %v6455_v29 = vpop.f32.mrf.mxu3 }
 0x615   :  { %7559 = vst [vmem:[#allocation62_spill] sm:$0xff] %v6455_v29 }
 0x64d   :  { %v6445_v5 = vpop.f32.mrf.mxu0  ;;  %v6447_v45 = vpop.f32.mrf.mxu1 }
 0x64e   :  { %7555 = vst [vmem:[#allocation38_spill] sm:$0xff] %v6445_v5 }
 0x64f   :  { %7556 = vst [vmem:[#allocation43_spill] sm:$0xff] %v6447_v45 }
 0x654   :  { %v6457_v49 = vpop.f32.mrf.mxu2  ;;  %v6462_v44 = vpop.f32.mrf.mxu3 }
 0x655   :  { %7560 = vst [vmem:[#allocation63_spill] sm:$0xff] %v6457_v49  ;;  %v2560_v28 = vpop.f32.mrf.mxu0  ;;  %v2580_v58 = vpop.f32.mrf.mxu1 }
 0x656   :  { %v2623_v43 = vadd.f32 %v2560_v28, %v2294_v7  ;;  %v2624_v55 = vadd.f32 %v2580_v58, %v2335_v0  ;;  %7562 = vst [vmem:[#allocation39_spill] sm:$0xff] %v6462_v44  ;;  %v6464_v28 = vperm.slane %v2266_v8, 3 }
 0x658   :  { %v4312_v5 = vmul.f32 -1.442695, %v2623_v43  ;;  %v4313_v45 = vmul.f32 -1.442695, %v2624_v55  ;;  %7563 = vst [vmem:[#allocation40_spill] sm:$0xff] %v6464_v28  ;;  %v2417_v55 = vadd.f32 %v2416_v11, %v6464_v28 }
 0x65a   :  { %4478 = vpow2.f32 %v4312_v5 }
 0x65b   :  { %4480 = vpow2.f32 %v4313_v45 }
 0x65c   :  { %v2600_v50 = vpop.f32.mrf.mxu2  ;;  %v2620_v43 = vpop.f32.mrf.mxu3 }
 0x65d   :  { %v2625_v3 = vadd.f32 %v2600_v50, %v2376_v21  ;;  %v2626_v58 = vadd.f32 %v2620_v43, %v2417_v55 }
 0x65f   :  { %v4314_v54 = vmul.f32 -1.442695, %v2625_v3 }
 0x660   :  { %v4479_v29 = vpop.eup %4478 }
 0x661   :  { %v4481_v17 = vpop.eup %4480  ;;  %v2636_v49 = vadd.f32 1.0, %v4479_v29  ;;  %4482 = vpow2.f32 %v4314_v54 }
 0x662   :  { %v2637_v51 = vadd.f32 1.0, %v4481_v17 }
 0x663   :  { %4484 = vrcp.f32 %v2636_v49  ;;  %v2650_v29 = vand.u32 2147483648, %v2636_v49  ;;  %v2648_v8 = vand.u32 2147483647, %v2636_v49  ;;  %vm2644_vm2 = vweird.f32 %v2636_v49 }
 0x664   :  { %4486 = vrcp.f32 %v2637_v51  ;;  %v2665_v17 = vand.u32 2147483648, %v2637_v51  ;;  %v2663_v26 = vand.u32 2147483647, %v2637_v51  ;;  %vm2659_vm3 = vweird.f32 %v2637_v51 }
 0x665   :  { %vm2649_vm5 = vcmp.eq.f32.partialorder %v2648_v8, 8.507059e+37  ;;  %v6490_v8 = vld [vmem:[#allocation15 + $0x1a8] sm:$0xff] }
 0x666   :  { %v2666_v28 = vor.u32 1.1754944e-38, %v2665_v17  ;;  %vm2664_vm7 = vcmp.eq.f32.partialorder %v2663_v26, 8.507059e+37 }
 0x667   :  { %v4483_v0 = vpop.eup %4482 }
 0x668   :  { %v2638_v30 = vadd.f32 1.0, %v4483_v0  ;;  %v2651_v0 = vor.u32 1.1754944e-38, %v2650_v29 }
 0x669   :  { %v4485_v5 = vpop.eup %4484 }
 0x66a   :  { %v4487_v45 = vpop.eup %4486  ;;  %v2640_v7 = vmul.f32 %v4485_v5, %v2636_v49  ;;  %4488 = vrcp.f32 %v2638_v30  ;;  %vm2645_vm0 = vweird.f32 %v4485_v5  ;;  %v2680_v49 = vand.u32 2147483648, %v2638_v30 }
 0x66b   :  { %v2655_v21 = vmul.f32 %v4487_v45, %v2637_v51  ;;  %4490 = vtanh.f32 %v2626_v58  ;;  %vm2660_vm1 = vweird.f32 %v4487_v45  ;;  %vm2646_vm4 = vmor %vm2644_vm2, %vm2645_vm0  ;;  %vm2674_vm9 = vweird.f32 %v2638_v30 }
 0x66c   :  { %v2641_v50 = vsub.f32 1.0, %v2640_v7  ;;  %vm2661_vm6 = vmor %vm2659_vm3, %vm2660_vm1  ;;  %v2681_v29 = vor.u32 1.1754944e-38, %v2680_v49 }
 0x66d   :  { %v2656_v3 = vsub.f32 1.0, %v2655_v21 }
 0x66e   :  { %v2642_v54 = vmul.f32 %v4485_v5, %v2641_v50 }
 0x66f   :  { %v2657_v44 = vmul.f32 %v4487_v45, %v2656_v3 }
 0x670   :  { %v4489_v41 = vpop.eup %4488  ;;  %v2643_v11 = vadd.f32 %v4485_v5, %v2642_v54 }
 0x671   :  { %v2670_v43 = vmul.f32 %v4489_v41, %v2638_v30  ;;  %v2658_v55 = vadd.f32 %v4487_v45, %v2657_v44  ;;  %v4491_v58 = vpop.eup %4490  ;;  %vm2675_vm8 = vweird.f32 %v4489_v41  ;;  %v2678_v44 = vand.u32 2147483647, %v2638_v30  ;;  %v6488_v30 = vld [vmem:[#allocation15 + $0x1a0] sm:$0xff] }
 0x672   :  { %v2647_v7 = vsel %vm2646_vm4, %v4485_v5, %v2643_v11  ;;  %vm2676_vm10 = vmor %vm2674_vm9, %vm2675_vm8 }
 0x673   :  { %v2671_v21 = vsub.f32 1.0, %v2670_v43  ;;  %v2652_v50 = vsel %vm2649_vm5, %v2651_v0, %v2647_v7  ;;  %v2662_v61 = vsel %vm2661_vm6, %v4487_v45, %v2658_v55  ;;  %vm2679_vm11 = vcmp.eq.f32.partialorder %v2678_v44, 8.507059e+37 }
 0x674   :  { %v2667_v3 = vsel %vm2664_vm7, %v2666_v28, %v2662_v61  ;;  %v2687_v56 = vmul.f32 %v4491_v58, %v2652_v50  ;;  %v6479_v61 = vld [vmem:[#allocation15 + $0x1c0] sm:$0xff]  ;;  %v6483_v28 = vld [vmem:[#allocation15 + $0x1d0] sm:$0xff] }
 0x675   :  { %v2672_v53 = vmul.f32 %v4489_v41, %v2671_v21  ;;  %v2686_v13 = vmul.f32 0.0, %v2667_v3 }
 0x677   :  { %v6467_v54 = vadd.f32 %v2687_v56, %v2686_v13  ;;  %v2673_v51 = vadd.f32 %v4489_v41, %v2672_v53  ;;  %v6470_v56 = vld [vmem:[#allocation15 + $0x1e0] sm:$0xff]  ;;  %v6472_v13 = vld [vmem:[#allocation15 + $0x1e8] sm:$0xff]  ;;  %v6474_v53 = vld [vmem:[#allocation15 + $0x1f0] sm:$0xff] }
 0x678   :  { %2981 = vmatpush.msra.mxu0 %v6470_v56  ;;  %3001 = vmatpush.msra.mxu1 %v6472_v13 }
 0x679   :  { %4492 = vtanh.f32 %v6467_v54  ;;  %v2677_v5 = vsel %vm2676_vm10, %v4489_v41, %v2673_v51  ;;  %3021 = vmatpush.msra.mxu2 %v6474_v53  ;;  %v6481_v41 = vld [vmem:[#allocation15 + $0x1c8] sm:$0xff] }
 0x67a   :  { %v2682_v45 = vsel %vm2679_vm11, %v2681_v29, %v2677_v5  ;;  %2982 = vmatpush.msra.mxu0 %v6479_v61  ;;  %3002 = vmatpush.msra.mxu1 %v6481_v41 }
 0x67b   :  { %3022 = vmatpush.msra.mxu2 %v6483_v28 }
 0x67c   :  { %2983 = vmatpush.msra.mxu0 %v6488_v30  ;;  %3003 = vmatpush.msra.mxu1 %v6490_v8 }
 0x67d   :  { %3023 = vmatpush.msra.mxu2 %v6111_v34  ;;  %v2297_v34 = vadd.f32 %v6396_v46, %v6449_v19 }
 0x67e   :  { %2984 = vmatpush.msra.mxu0 %v6115_v18  ;;  %3004 = vmatpush.msra.mxu1 %v6117_v36  ;;  %v2338_v18 = vadd.f32 %v6398_v47, %v6451_v38 }
 0x67f   :  { %v4493_v17 = vpop.eup %4492  ;;  %3024 = vmatpush.msra.mxu2 %v6127_v4 }
 0x680   :  { %v2690_v26 = vmul.f32 %v4493_v17, %v2682_v45  ;;  %2985 = vmatpush.msra.mxu0 %v6120_v52  ;;  %3005 = vmatpush.msra.mxu1 %v6125_v40 }
 0x681   :  { %3025 = vmatpush.msra.mxu2 %v6135_v6 }
 0x682   :  { %2778 = vmatmul.f32.vlgmr.msrb.gmra.mxu0 %v2690_v26  ;;  %2798 = vmatmul.f32.vlgmr.msrb.gmra.mxu1 %v2690_v26 }
 0x683   :  { %2818 = vmatmul.f32.vlgmr.msrb.gmra.mxu2 %v2690_v26  ;;  %2838 = vmatmul.f32.vlgmr.msrb.gmra.mxu3 %v2690_v26 }
 0x684   :  { %2986 = vmatpush.msra.mxu0 %v6145_v31  ;;  %3006 = vmatpush.msra.mxu1 %v6147_v32  ;;  %v2379_v32 = vadd.f32 %v6400_v42, %v6459_v25 }
 0x685   :  { %3026 = vmatpush.msra.mxu2 %v6149_v35 }
 0x686   :  { %2987 = vmatpush.msra.mxu0 %v6155_v33  ;;  %3007 = vmatpush.msra.mxu1 %v6157_v39  ;;  %v7564_v39 = vld [vmem:[#allocation59_spill] sm:$0xff] }
 0x687   :  { %3027 = vmatpush.msra.mxu2 %v6160_v2 }
 0x688   :  { %2988 = vmatpush.msra.mxu0 %v6167_v12  ;;  %3008 = vmatpush.msra.mxu1 %v6169_v60  ;;  %v7565_v12 = vld [vmem:[#allocation61_spill] sm:$0xff] }
 0x689   :  { %3028 = vmatpush.msra.mxu2 %v6179_v59 }
 0x68a   :  { %2989 = vmatpush.msra.mxu0 %v6175_v10  ;;  %3009 = vmatpush.msra.mxu1 %v6177_v57  ;;  %v7566_v10 = vld [vmem:[#allocation24_spill] sm:$0xff]  ;;  %v7567_v57 = vld [vmem:[#allocation25_spill] sm:$0xff] }
 0x68b   :  { %3029 = vmatpush.msra.mxu2 %v6186_v63 }
 0x68c   :  { %2990 = vmatpush.msra.mxu0 %v6182_v1  ;;  %3010 = vmatpush.msra.mxu1 %v6184_v62  ;;  %v7568_v62 = vld [vmem:[#allocation27_spill] sm:$0xff] }
 0x68d   :  { %3030 = vmatpush.msra.mxu2 %v6192_v24  ;;  %v7569_v24 = vld [vmem:[#allocation26_spill] sm:$0xff] }
 0x68e   :  { %2991 = vmatpush.msra.mxu0 %v6195_v14  ;;  %3011 = vmatpush.msra.mxu1 %v6197_v16  ;;  %v7570_v14 = vld [vmem:[#allocation47_spill] sm:$0xff]  ;;  %v7571_v16 = vld [vmem:[#allocation28_spill] sm:$0xff] }
 0x68f   :  { %3031 = vmatpush.msra.mxu2 %v6203_v20 }
 0x690   :  { %2992 = vmatpush.msra.mxu0 %v6209_v22  ;;  %3012 = vmatpush.msra.mxu1 %v7520_v48  ;;  %v7572_v48 = vld [vmem:[#allocation40_spill] sm:$0xff] }
 0x691   :  { %3032 = vmatpush.msra.mxu2 %v7521_v15  ;;  %v7573_v15 = vld [vmem:[#allocation33_spill] sm:$0xff] }
 0x692   :  { %2993 = vmatpush.msra.mxu0 %v7523_v27  ;;  %3013 = vmatpush.msra.mxu1 %v7524_v9  ;;  %v2420_v27 = vadd.f32 %v7573_v15, %v7572_v48  ;;  %v6590_v15 = vld [vmem:[#allocation15 + $0x140] sm:$0xff] }
 0x693   :  { %3033 = vmatpush.msra.mxu2 %v7525_v37 }
 0x694   :  { %2994 = vmatpush.msra.mxu0 %v7526_v23  ;;  %3014 = vmatpush.msra.mxu1 %v7564_v39 }
 0x695   :  { %3034 = vmatpush.msra.mxu2 %v7565_v12 }
 0x696   :  { %2995 = vmatpush.msra.mxu0 %v7566_v10  ;;  %3015 = vmatpush.msra.mxu1 %v7567_v57  ;;  %v6557_v10 = vld [vmem:[#allocation15 + $0x1d8] sm:$0xff]  ;;  %v6560_v57 = vld [vmem:[#allocation15 + $0x1b0] sm:$0xff] }
 0x697   :  { %3035 = vmatpush.msra.mxu2 %v7568_v62  ;;  %v6568_v62 = vld [vmem:[#allocation15 + $0x188] sm:$0xff] }
 0x698   :  { %2996 = vmatpush.msra.mxu0 %v7569_v24  ;;  %3016 = vmatpush.msra.mxu1 %v7570_v14  ;;  %v6574_v24 = vld [vmem:[#allocation15 + $0x198] sm:$0xff]  ;;  %v6578_v14 = vld [vmem:[#allocation15 + $0x160] sm:$0xff] }
 0x699   :  { %3036 = vmatpush.msra.mxu2 %v7571_v16  ;;  %v6580_v16 = vld [vmem:[#allocation15 + $0x168] sm:$0xff] }
 0x69a   :  { %3200 = vmatpush.msrb.mxu0 %v6470_v56  ;;  %3220 = vmatpush.msrb.mxu1 %v6472_v13 }
 0x69b   :  { %3240 = vmatpush.msrb.mxu2 %v6474_v53 }
 0x69c   :  { %3201 = vmatpush.msrb.mxu0 %v6479_v61  ;;  %3221 = vmatpush.msrb.mxu1 %v6481_v41 }
 0x69d   :  { %3241 = vmatpush.msrb.mxu2 %v6483_v28 }
 0x69e   :  { %3202 = vmatpush.msrb.mxu0 %v6488_v30  ;;  %3222 = vmatpush.msrb.mxu1 %v6490_v8 }
 0x69f   :  { %3242 = vmatpush.msrb.mxu2 %v6560_v57 }
 0x6a0   :  { %3223 = vmatpush.msrb.mxu1 %v6568_v62 }
 0x6a2   :  { %3224 = vmatpush.msrb.mxu1 %v6580_v16 }
 0x6ff   :  { %v2779_v36 = vpop.f32.mrf.mxu0  ;;  %v2799_v52 = vpop.f32.mrf.mxu1 }
 0x700   :  { %v2842_v40 = vadd.f32 %v2779_v36, %v2297_v34  ;;  %v2843_v4 = vadd.f32 %v2799_v52, %v2338_v18 }
 0x702   :  { %v4315_v6 = vmul.f32 -1.442695, %v2842_v40  ;;  %v4316_v31 = vmul.f32 -1.442695, %v2843_v4 }
 0x704   :  { %4494 = vpow2.f32 %v4315_v6 }
 0x705   :  { %4496 = vpow2.f32 %v4316_v31 }
 0x706   :  { %v2819_v35 = vpop.f32.mrf.mxu2  ;;  %v2839_v20 = vpop.f32.mrf.mxu3 }
 0x707   :  { %v2844_v33 = vadd.f32 %v2819_v35, %v2379_v32  ;;  %v2845_v23 = vadd.f32 %v2839_v20, %v2420_v27  ;;  %v6582_v20 = vld [vmem:[#allocation15 + $0x170] sm:$0xff]  ;;  %v6592_v27 = vld [vmem:[#allocation15 + $0x148] sm:$0xff] }
 0x708   :  { %7574 = vst [vmem:[#allocation44_spill] sm:$0xff] %v6582_v20  ;;  %3225 = vmatpush.msrb.mxu1 %v6592_v27 }
 0x709   :  { %v4317_v2 = vmul.f32 -1.442695, %v2844_v33  ;;  %7575 = vst [vmem:[#allocation46_spill] sm:$0xff] %v6592_v27 }
 0x70a   :  { %v4495_v60 = vpop.eup %4494 }
 0x70b   :  { %v4497_v59 = vpop.eup %4496  ;;  %v2855_v1 = vadd.f32 1.0, %v4495_v60  ;;  %4498 = vpow2.f32 %v4317_v2 }
 0x70c   :  { %v2856_v63 = vadd.f32 1.0, %v4497_v59  ;;  %v6562_v59 = vld [vmem:[#allocation15 + $0x1b8] sm:$0xff] }
 0x70d   :  { %4500 = vrcp.f32 %v2855_v1  ;;  %v2869_v0 = vand.u32 2147483648, %v2855_v1  ;;  %v2867_v58 = vand.u32 2147483647, %v2855_v1  ;;  %vm2863_vm14 = vweird.f32 %v2855_v1 }
 0x70e   :  { %4502 = vrcp.f32 %v2856_v63  ;;  %v2884_v55 = vand.u32 2147483648, %v2856_v63  ;;  %v2882_v50 = vand.u32 2147483647, %v2856_v63  ;;  %vm2878_vm15 = vweird.f32 %v2856_v63 }
 0x70f   :  { %v2870_v44 = vor.u32 1.1754944e-38, %v2869_v0  ;;  %vm2868_vm2 = vcmp.eq.f32.partialorder %v2867_v58, 8.507059e+37  ;;  %v6618_v0 = vld [vmem:[#allocation15 + $0x110] sm:$0xff]  ;;  %v6628_v58 = vld [vmem:[#allocation15 + $0xe8] sm:$0xff] }
 0x710   :  { %v2885_v29 = vor.u32 1.1754944e-38, %v2884_v55  ;;  %vm2883_vm3 = vcmp.eq.f32.partialorder %v2882_v50, 8.507059e+37  ;;  %v6622_v55 = vld [vmem:[#allocation15 + $0x118] sm:$0xff]  ;;  %v7579_v50 = vld [vmem:[#allocation29_spill] sm:$0xff] }
 0x711   :  { %v4499_v22 = vpop.eup %4498 }
 0x712   :  { %v2857_v9 = vadd.f32 1.0, %v4499_v22  ;;  %v6586_v22 = vld [vmem:[#allocation15 + $0x178] sm:$0xff] }
 0x713   :  { %v4501_v37 = vpop.eup %4500 }
 0x714   :  { %v4503_v46 = vpop.eup %4502  ;;  %v2859_v47 = vmul.f32 %v4501_v37, %v2855_v1  ;;  %4504 = vrcp.f32 %v2857_v9  ;;  %vm2864_vm12 = vweird.f32 %v4501_v37  ;;  %v2899_v32 = vand.u32 2147483648, %v2857_v9  ;;  %v6566_v1 = vld [vmem:[#allocation15 + $0x180] sm:$0xff] }
 0x715   :  { %v2874_v42 = vmul.f32 %v4503_v46, %v2856_v63  ;;  %4506 = vtanh.f32 %v2845_v23  ;;  %vm2879_vm13 = vweird.f32 %v4503_v46  ;;  %vm2865_vm0 = vmor %vm2863_vm14, %vm2864_vm12  ;;  %vm2893_vm5 = vweird.f32 %v2857_v9  ;;  %v6570_v63 = vld [vmem:[#allocation15 + $0x190] sm:$0xff]  ;;  %3203 = vmatpush.msrb.mxu0 %v6566_v1  ;;  %v6602_v23 = vld [vmem:[#allocation15 + $0x120] sm:$0xff] }
 0x716   :  { %v2860_v11 = vsub.f32 1.0, %v2859_v47  ;;  %vm2880_vm1 = vmor %vm2878_vm15, %vm2879_vm13  ;;  %v2897_v35 = vand.u32 2147483647, %v2857_v9  ;;  %v2900_v39 = vor.u32 1.1754944e-38, %v2899_v32  ;;  %3243 = vmatpush.msrb.mxu2 %v6570_v63  ;;  %7577 = vst [vmem:[#allocation54_spill] sm:$0xff] %v6602_v23  ;;  %v6606_v47 = vld [vmem:[#allocation15 + $0x130] sm:$0xff] }
 0x717   :  { %v2875_v43 = vsub.f32 1.0, %v2874_v42  ;;  %3204 = vmatpush.msrb.mxu0 %v6578_v14  ;;  %v6610_v42 = vld [vmem:[#allocation15 + $0x138] sm:$0xff] }
 0x718   :  { %v2861_v7 = vmul.f32 %v4501_v37, %v2860_v11  ;;  %vm2898_vm7 = vcmp.eq.f32.partialorder %v2897_v35, 8.507059e+37  ;;  %3244 = vmatpush.msrb.mxu2 %v6582_v20  ;;  %v6614_v11 = vld [vmem:[#allocation15 + $0x100] sm:$0xff]  ;;  %v6662_v35 = vld [vmem:[#allocation15 + $0xb8] sm:$0xff] }
 0x719   :  { %v2876_v21 = vmul.f32 %v4503_v46, %v2875_v43  ;;  %3205 = vmatpush.msrb.mxu0 %v6590_v15  ;;  %v6616_v43 = vld [vmem:[#allocation15 + $0x108] sm:$0xff] }
 0x71a   :  { %v4505_v3 = vpop.eup %4504  ;;  %v2862_v51 = vadd.f32 %v4501_v37, %v2861_v7  ;;  %v6626_v7 = vld [vmem:[#allocation15 + $0xe0] sm:$0xff] }
 0x71b   :  { %v2889_v49 = vmul.f32 %v4505_v3, %v2857_v9  ;;  %v2877_v5 = vadd.f32 %v4503_v46, %v2876_v21  ;;  %v4507_v45 = vpop.eup %4506  ;;  %vm2894_vm4 = vweird.f32 %v4505_v3  ;;  %v6594_v9 = vld [vmem:[#allocation15 + $0x150] sm:$0xff]  ;;  %3206 = vmatpush.msrb.mxu0 %v6602_v23 }
 0x71c   :  { %v2866_v17 = vsel %vm2865_vm0, %v4501_v37, %v2862_v51  ;;  %vm2895_vm6 = vmor %vm2893_vm5, %vm2894_vm4  ;;  %7576 = vst [vmem:[#allocation53_spill] sm:$0xff] %v6594_v9  ;;  %v6598_v37 = vld [vmem:[#allocation15 + $0x158] sm:$0xff]  ;;  %3245 = vmatpush.msrb.mxu2 %v6594_v9  ;;  %v6630_v21 = vld [vmem:[#allocation15 + $0xf0] sm:$0xff] }
 0x71d   :  { %v2890_v26 = vsub.f32 1.0, %v2889_v49  ;;  %v2871_v34 = vsel %vm2868_vm2, %v2870_v44, %v2866_v17  ;;  %v2881_v18 = vsel %vm2880_vm1, %v4503_v46, %v2877_v5  ;;  %v6604_v46 = vld [vmem:[#allocation15 + $0x128] sm:$0xff]  ;;  %3207 = vmatpush.msrb.mxu0 %v6614_v11  ;;  %v7580_v51 = vld [vmem:[#allocation30_spill] sm:$0xff]  ;;  %v6642_v17 = vld [vmem:[#allocation15 + $0xc0] sm:$0xff] }
 0x71e   :  { %v2886_v36 = vsel %vm2883_vm3, %v2885_v29, %v2881_v18  ;;  %v2906_v52 = vmul.f32 %v4507_v45, %v2871_v34  ;;  %7578 = vst [vmem:[#allocation60_spill] sm:$0xff] %v6604_v46  ;;  %3226 = vmatpush.msrb.mxu1 %v6604_v46  ;;  %3246 = vmatpush.msrb.mxu2 %v6606_v47  ;;  %v6638_v44 = vld [vmem:[#allocation15 + $0xf8] sm:$0xff]  ;;  %v6644_v45 = vld [vmem:[#allocation15 + $0xc8] sm:$0xff] }
 0x71f   :  { %v2891_v40 = vmul.f32 %v4505_v3, %v2890_v26  ;;  %v2905_v4 = vmul.f32 %v2886_v36, %v6467_v54  ;;  %v6554_v54 = vld [vmem:[#allocation15 + $0x1f8] sm:$0xff]  ;;  %v2341_v49 = vadd.f32 %v7580_v51, %v6451_v38  ;;  %3208 = vmatpush.msrb.mxu0 %v6626_v7  ;;  %v6646_v26 = vld [vmem:[#allocation15 + $0xd0] sm:$0xff]  ;;  %v6702_v38 = vld [vmem:[#allocation15 + $0x28] sm:$0xff] }
 0x720   :  { %3260 = vmatpush.msrb.mxu3 %v6554_v54  ;;  %3227 = vmatpush.msrb.mxu1 %v6616_v43  ;;  %v6650_v36 = vld [vmem:[#allocation15 + $0xd8] sm:$0xff] }
 0x721   :  { %v6551_v6 = vadd.f32 %v2906_v52, %v2905_v4  ;;  %v2892_v31 = vadd.f32 %v4505_v3, %v2891_v40  ;;  %3247 = vmatpush.msrb.mxu2 %v6618_v0  ;;  %3209 = vmatpush.msrb.mxu0 %v6642_v17  ;;  %v6654_v52 = vld [vmem:[#allocation15 + $0xa0] sm:$0xff]  ;;  %v6656_v40 = vld [vmem:[#allocation15 + $0xa8] sm:$0xff]  ;;  %v6658_v4 = vld [vmem:[#allocation15 + $0xb0] sm:$0xff] }
 0x722   :  { %3261 = vmatpush.msrb.mxu3 %v6557_v10  ;;  %3228 = vmatpush.msrb.mxu1 %v6628_v58 }
 0x723   :  { %4508 = vtanh.f32 %v6551_v6  ;;  %v2896_v33 = vsel %vm2895_vm6, %v4505_v3, %v2892_v31  ;;  %v2300_v3 = vadd.f32 %v7579_v50, %v6449_v19  ;;  %3248 = vmatpush.msrb.mxu2 %v6630_v21  ;;  %3210 = vmatpush.msrb.mxu0 %v6654_v52  ;;  %v6678_v50 = vld [vmem:[#allocation15 + $0x68] sm:$0xff]  ;;  %v6706_v19 = vld [vmem:[#allocation15 + $0x30] sm:$0xff] }
 0x724   :  { %v2901_v12 = vsel %vm2898_vm7, %v2900_v39, %v2896_v33  ;;  %3262 = vmatpush.msrb.mxu3 %v6562_v59  ;;  %3229 = vmatpush.msrb.mxu1 %v6644_v45  ;;  %v6666_v33 = vld [vmem:[#allocation15 + $0x80] sm:$0xff]  ;;  %v6668_v39 = vld [vmem:[#allocation15 + $0x88] sm:$0xff]  ;;  %7583 = vst [vmem:[#allocation57_spill] sm:$0xff] %v6678_v50 }
 0x725   :  { %3249 = vmatpush.msrb.mxu2 %v6646_v26  ;;  %3211 = vmatpush.msrb.mxu0 %v6666_v33 }
 0x726   :  { %3263 = vmatpush.msrb.mxu3 %v6574_v24  ;;  %3230 = vmatpush.msrb.mxu1 %v6656_v40 }
 0x727   :  { %3250 = vmatpush.msrb.mxu2 %v6658_v4 }
 0x728   :  { %3264 = vmatpush.msrb.mxu3 %v6586_v22  ;;  %3231 = vmatpush.msrb.mxu1 %v6668_v39 }
 0x729   :  { %v4509_v2 = vpop.eup %4508 }
 0x72a   :  { %v2909_v60 = vmul.f32 %v4509_v2, %v2901_v12  ;;  %3265 = vmatpush.msrb.mxu3 %v6598_v37  ;;  %v6670_v2 = vld [vmem:[#allocation15 + $0x90] sm:$0xff]  ;;  %v6674_v12 = vld [vmem:[#allocation15 + $0x98] sm:$0xff]  ;;  %3232 = vmatpush.msrb.mxu1 %v6678_v50 }
 0x72b   :  { %7581 = vst [vmem:[#allocation55_spill] sm:$0xff] %v6674_v12  ;;  %3251 = vmatpush.msrb.mxu2 %v6670_v2  ;;  %v6708_v50 = vld [vmem:[#allocation15 + $0x38] sm:$0xff] }
 0x72c   :  { %2997 = vmatmul.f32.vlgmr.msra.gmra.mxu0 %v2909_v60  ;;  %3017 = vmatmul.f32.vlgmr.msra.gmra.mxu1 %v2909_v60 }
 0x72d   :  { %3037 = vmatmul.f32.vlgmr.msra.gmra.mxu2 %v2909_v60  ;;  %3057 = vmatmul.f32.vlgmr.msra.gmra.mxu3 %v2909_v60  ;;  %v6676_v60 = vld [vmem:[#allocation15 + $0x60] sm:$0xff] }
 0x72e   :  { %3266 = vmatpush.msrb.mxu3 %v6610_v42  ;;  %7582 = vst [vmem:[#allocation56_spill] sm:$0xff] %v6676_v60  ;;  %3212 = vmatpush.msrb.mxu0 %v6676_v60 }
 0x730   :  { %3267 = vmatpush.msrb.mxu3 %v6622_v55 }
 0x732   :  { %3268 = vmatpush.msrb.mxu3 %v6638_v44 }
 0x734   :  { %3269 = vmatpush.msrb.mxu3 %v6650_v36 }
 0x736   :  { %3270 = vmatpush.msrb.mxu3 %v6662_v35 }
 0x738   :  { %3271 = vmatpush.msrb.mxu3 %v6674_v12 }
 0x7a9   :  { %v2998_v5 = vpop.f32.mrf.mxu0  ;;  %v3018_v29 = vpop.f32.mrf.mxu1 }
 0x7aa   :  { %v3061_v34 = vadd.f32 %v2998_v5, %v2300_v3  ;;  %v3062_v18 = vadd.f32 %v3018_v29, %v2341_v49  ;;  %v7584_v3 = vld [vmem:[#allocation31_spill] sm:$0xff]  ;;  %v6684_v49 = vld [vmem:[#allocation15 + $0x70] sm:$0xff]  ;;  %v6686_v5 = vld [vmem:[#allocation15 + $0x78] sm:$0xff] }
 0x7ab   :  { %v2382_v51 = vadd.f32 %v7584_v3, %v6459_v25  ;;  %7585 = vst [vmem:[#allocation58_spill] sm:$0xff] %v6684_v49  ;;  %v6688_v29 = vld [vmem:[#allocation15 + $0x40] sm:$0xff]  ;;  %3252 = vmatpush.msrb.mxu2 %v6684_v49  ;;  %3272 = vmatpush.msrb.mxu3 %v6686_v5 }
 0x7ac   :  { %v4318_v31 = vmul.f32 -1.442695, %v3061_v34  ;;  %v4319_v32 = vmul.f32 -1.442695, %v3062_v18  ;;  %7586 = vst [vmem:[#allocation59_spill] sm:$0xff] %v6686_v5  ;;  %v6692_v18 = vld [vmem:[#allocation15 + $0x48] sm:$0xff]  ;;  %3213 = vmatpush.msrb.mxu0 %v6688_v29 }
 0x7ad   :  { %7587 = vst [vmem:[#allocation61_spill] sm:$0xff] %v6688_v29  ;;  %v6700_v25 = vld [vmem:[#allocation15 + $0x20] sm:$0xff]  ;;  %3233 = vmatpush.msrb.mxu1 %v6692_v18  ;;  %v6718_v29 = vld [vmem:[#allocation15 + $0x10] sm:$0xff] }
 0x7ae   :  { %4510 = vpow2.f32 %v4318_v31  ;;  %7588 = vst [vmem:[#allocation24_spill] sm:$0xff] %v6692_v18  ;;  %v6694_v31 = vld [vmem:[#allocation15 + $0x50] sm:$0xff]  ;;  %3214 = vmatpush.msrb.mxu0 %v6700_v25  ;;  %v6720_v18 = vld [vmem:[#allocation15 + $0x18] sm:$0xff] }
 0x7af   :  { %4512 = vpow2.f32 %v4319_v32  ;;  %v6696_v32 = vld [vmem:[#allocation15 + $0x58] sm:$0xff]  ;;  %3253 = vmatpush.msrb.mxu2 %v6694_v31  ;;  %3234 = vmatpush.msrb.mxu1 %v6702_v38  ;;  %7589 = vst [vmem:[#allocation25_spill] sm:$0xff] %v6718_v29 }
 0x7b0   :  { %v3038_v34 = vpop.f32.mrf.mxu2  ;;  %3273 = vmatpush.msrb.mxu3 %v6696_v32 }
 0x7b1   :  { %v3063_v3 = vadd.f32 %v3038_v34, %v2382_v51  ;;  %v6712_v51 = vld [vmem:[#allocation15] sm:$0xff]  ;;  %v6714_v34 = vld [vmem:[#allocation15 + $0x8] sm:$0xff]  ;;  %3254 = vmatpush.msrb.mxu2 %v6706_v19 }
 0x7b2   :  { %3274 = vmatpush.msrb.mxu3 %v6708_v50  ;;  %3215 = vmatpush.msrb.mxu0 %v6712_v51 }
 0x7b3   :  { %v4320_v60 = vmul.f32 -1.442695, %v3063_v3  ;;  %3235 = vmatpush.msrb.mxu1 %v6714_v34  ;;  %3255 = vmatpush.msrb.mxu2 %v6718_v29 }
 0x7b4   :  { %v4511_v5 = vpop.eup %4510  ;;  %3275 = vmatpush.msrb.mxu3 %v6720_v18  ;;  %3419 = vmatpush.msra.mxu0 %v6470_v56 }
 0x7b5   :  { %v4513_v49 = vpop.eup %4512  ;;  %v6722_v12 = vadd.f32 1.0, %v4511_v5  ;;  %4514 = vpow2.f32 %v4320_v60  ;;  %3439 = vmatpush.msra.mxu1 %v6472_v13  ;;  %3459 = vmatpush.msra.mxu2 %v6474_v53  ;;  %v3058_v60 = vpop.f32.mrf.mxu3  ;;  %v7590_v5 = vld [vmem:[#allocation37_spill] sm:$0xff] }
 0x7b6   :  { %v6726_v3 = vadd.f32 1.0, %v4513_v49  ;;  %3479 = vmatpush.msra.mxu3 %v6554_v54  ;;  %3420 = vmatpush.msra.mxu0 %v6479_v61  ;;  %v2423_v29 = vadd.f32 %v7590_v5, %v7572_v48 }
 0x7b7   :  { %4516 = vrcp.f32 %v6722_v12  ;;  %3440 = vmatpush.msra.mxu1 %v6481_v41  ;;  %3460 = vmatpush.msra.mxu2 %v6483_v28  ;;  %v3086_v5 = vand.u32 2147483647, %v6722_v12  ;;  %vm3082_vm10 = vweird.f32 %v6722_v12 }
 0x7b8   :  { %4518 = vrcp.f32 %v6726_v3  ;;  %3480 = vmatpush.msra.mxu3 %v6557_v10  ;;  %3421 = vmatpush.msra.mxu0 %v6488_v30  ;;  %v3064_v53 = vadd.f32 %v3058_v60, %v2423_v29  ;;  %v3088_v29 = vand.u32 2147483648, %v6722_v12  ;;  %v3103_v60 = vand.u32 2147483648, %v6726_v3 }
 0x7b9   :  { %3441 = vmatpush.msra.mxu1 %v6490_v8  ;;  %3461 = vmatpush.msra.mxu2 %v6560_v57  ;;  %vm3097_vm11 = vweird.f32 %v6726_v3  ;;  %vm3087_vm14 = vcmp.eq.f32.partialorder %v3086_v5, 8.507059e+37  ;;  %v7593_v5 = vld [vmem:[#allocation57_spill] sm:$0xff] }
 0x7ba   :  { %3481 = vmatpush.msra.mxu3 %v6562_v59  ;;  %3422 = vmatpush.msra.mxu0 %v6566_v1 }
 0x7bb   :  { %v4515_v49 = vpop.eup %4514  ;;  %3442 = vmatpush.msra.mxu1 %v6568_v62  ;;  %3462 = vmatpush.msra.mxu2 %v6570_v63 }
 0x7bc   :  { %v6744_v56 = vadd.f32 1.0, %v4515_v49  ;;  %3482 = vmatpush.msra.mxu3 %v6574_v24  ;;  %3423 = vmatpush.msra.mxu0 %v6578_v14 }
 0x7bd   :  { %v4517_v13 = vpop.eup %4516  ;;  %3443 = vmatpush.msra.mxu1 %v6580_v16  ;;  %3463 = vmatpush.msra.mxu2 %v6582_v20 }
 0x7be   :  { %v4519_v61 = vpop.eup %4518  ;;  %v3078_v41 = vmul.f32 %v4517_v13, %v6722_v12  ;;  %4520 = vrcp.f32 %v6744_v56  ;;  %3483 = vmatpush.msra.mxu3 %v6586_v22  ;;  %vm3083_vm8 = vweird.f32 %v4517_v13  ;;  %3424 = vmatpush.msra.mxu0 %v6590_v15  ;;  %v3104_v12 = vor.u32 1.1754944e-38, %v3103_v60  ;;  %v7592_v60 = vld [vmem:[#allocation56_spill] sm:$0xff] }
 0x7bf   :  { %v3093_v28 = vmul.f32 %v4519_v61, %v6726_v3  ;;  %4522 = vtanh.f32 %v3064_v53  ;;  %3444 = vmatpush.msra.mxu1 %v6592_v27  ;;  %vm3098_vm9 = vweird.f32 %v4519_v61  ;;  %3464 = vmatpush.msra.mxu2 %v6594_v9  ;;  %vm3084_vm12 = vmor %vm3082_vm10, %vm3083_vm8  ;;  %vm3112_vm1 = vweird.f32 %v6744_v56 }
 0x7c0   :  { %v3079_v30 = vsub.f32 1.0, %v3078_v41  ;;  %3484 = vmatpush.msra.mxu3 %v6598_v37  ;;  %3425 = vmatpush.msra.mxu0 %v6602_v23  ;;  %vm3099_vm13 = vmor %vm3097_vm11, %vm3098_vm9 }
 0x7c1   :  { %v3094_v8 = vsub.f32 1.0, %v3093_v28  ;;  %v3101_v28 = vand.u32 2147483647, %v6726_v3  ;;  %3445 = vmatpush.msra.mxu1 %v6604_v46  ;;  %3465 = vmatpush.msra.mxu2 %v6606_v47 }
 0x7c2   :  { %v3080_v49 = vmul.f32 %v4517_v13, %v3079_v30  ;;  %3485 = vmatpush.msra.mxu3 %v6610_v42  ;;  %3426 = vmatpush.msra.mxu0 %v6614_v11 }
 0x7c3   :  { %v3095_v41 = vmul.f32 %v4519_v61, %v3094_v8  ;;  %v3089_v8 = vor.u32 1.1754944e-38, %v3088_v29  ;;  %3446 = vmatpush.msra.mxu1 %v6616_v43  ;;  %vm3102_vm15 = vcmp.eq.f32.partialorder %v3101_v28, 8.507059e+37  ;;  %3466 = vmatpush.msra.mxu2 %v6618_v0 }
 0x7c4   :  { %v6769_v53 = vpop.eup %4520  ;;  %v3081_v20 = vadd.f32 %v4517_v13, %v3080_v49  ;;  %3486 = vmatpush.msra.mxu3 %v6622_v55  ;;  %3427 = vmatpush.msra.mxu0 %v6626_v7 }
 0x7c5   :  { %v3108_v30 = vmul.f32 %v6769_v53, %v6744_v56  ;;  %v3096_v9 = vadd.f32 %v4519_v61, %v3095_v41  ;;  %v4523_v3 = vpop.eup %4522  ;;  %3447 = vmatpush.msra.mxu1 %v6628_v58  ;;  %3467 = vmatpush.msra.mxu2 %v6630_v21  ;;  %vm3113_vm0 = vweird.f32 %v6769_v53 }
 0x7c6   :  { %v3085_v49 = vsel %vm3084_vm12, %v4517_v13, %v3081_v20  ;;  %3487 = vmatpush.msra.mxu3 %v6638_v44  ;;  %3428 = vmatpush.msra.mxu0 %v6642_v17  ;;  %vm3114_vm2 = vmor %vm3112_vm1, %vm3113_vm0 }
 0x7c7   :  { %v3109_v46 = vsub.f32 1.0, %v3108_v30  ;;  %v3090_v23 = vsel %vm3087_vm14, %v3089_v8, %v3085_v49  ;;  %v3100_v27 = vsel %vm3099_vm13, %v4519_v61, %v3096_v9  ;;  %3448 = vmatpush.msra.mxu1 %v6644_v45  ;;  %3468 = vmatpush.msra.mxu2 %v6646_v26  ;;  %v7594_v30 = vld [vmem:[#allocation58_spill] sm:$0xff]  ;;  %v7595_v8 = vld [vmem:[#allocation59_spill] sm:$0xff] }
 0x7c8   :  { %v3105_v29 = vsel %vm3102_vm15, %v3104_v12, %v3100_v27  ;;  %v3125_v41 = vmul.f32 %v4523_v3, %v3090_v23  ;;  %3488 = vmatpush.msra.mxu3 %v6650_v36  ;;  %3429 = vmatpush.msra.mxu0 %v6654_v52  ;;  %v3116_v23 = vand.u32 2147483647, %v6744_v56  ;;  %v7597_v12 = vld [vmem:[#allocation24_spill] sm:$0xff] }
 0x7c9   :  { %v3110_v20 = vmul.f32 %v6769_v53, %v3109_v46  ;;  %v3124_v13 = vmul.f32 %v3105_v29, %v6551_v6  ;;  %3449 = vmatpush.msra.mxu1 %v6656_v40  ;;  %v3118_v6 = vand.u32 2147483648, %v6744_v56  ;;  %3469 = vmatpush.msra.mxu2 %v6658_v4  ;;  %v7591_v46 = vld [vmem:[#allocation55_spill] sm:$0xff]  ;;  %v7596_v56 = vld [vmem:[#allocation61_spill] sm:$0xff] }
 0x7ca   :  { %3489 = vmatpush.msra.mxu3 %v6662_v35  ;;  %3430 = vmatpush.msra.mxu0 %v6666_v33  ;;  %vm3117_vm3 = vcmp.eq.f32.partialorder %v3116_v23, 8.507059e+37  ;;  %v7598_v29 = vld [vmem:[#allocation25_spill] sm:$0xff] }
 0x7cb   :  { %v6793_v9 = vadd.f32 %v3125_v41, %v3124_v13  ;;  %v3111_v27 = vadd.f32 %v6769_v53, %v3110_v20  ;;  %3450 = vmatpush.msra.mxu1 %v6668_v39  ;;  %3470 = vmatpush.msra.mxu2 %v6670_v2  ;;  %v3119_v28 = vor.u32 1.1754944e-38, %v3118_v6  ;;  %v7603_v20 = vld [vmem:[#allocation64_spill] sm:$0xff]  ;;  %v7604_v13 = vld [vmem:[#allocation65_spill] sm:$0xff] }
 0x7cc   :  { %3490 = vmatpush.msra.mxu3 %v7591_v46  ;;  %3431 = vmatpush.msra.mxu0 %v7592_v60 }
 0x7cd   :  { %4524 = vtanh.f32 %v6793_v9  ;;  %v3115_v61 = vsel %vm3114_vm2, %v6769_v53, %v3111_v27  ;;  %3451 = vmatpush.msra.mxu1 %v7593_v5  ;;  %3471 = vmatpush.msra.mxu2 %v7594_v30 }
 0x7ce   :  { %3491 = vmatpush.msra.mxu3 %v7595_v8  ;;  %3432 = vmatpush.msra.mxu0 %v7596_v56  ;;  %v3120_v3 = vsel %vm3117_vm3, %v3119_v28, %v3115_v61 }
 0x7cf   :  { %3452 = vmatpush.msra.mxu1 %v7597_v12  ;;  %3472 = vmatpush.msra.mxu2 %v6694_v31 }
 0x7d0   :  { %3492 = vmatpush.msra.mxu3 %v6696_v32  ;;  %3433 = vmatpush.msra.mxu0 %v6700_v25 }
 0x7d1   :  { %3453 = vmatpush.msra.mxu1 %v6702_v38  ;;  %3473 = vmatpush.msra.mxu2 %v6706_v19 }
 0x7d2   :  { %3493 = vmatpush.msra.mxu3 %v6708_v50  ;;  %3434 = vmatpush.msra.mxu0 %v6712_v51 }
 0x7d3   :  { %v4525_v49 = vpop.eup %4524  ;;  %3454 = vmatpush.msra.mxu1 %v6714_v34  ;;  %3474 = vmatpush.msra.mxu2 %v7598_v29 }
 0x7d4   :  { %v3128_v53 = vmul.f32 %v4525_v49, %v3120_v3  ;;  %3494 = vmatpush.msra.mxu3 %v6720_v18  ;;  %v7605_v49 = vld [vmem:[#allocation68_spill] sm:$0xff] }
 0x7d5   :  { %v2426_v3 = vadd.f32 %v7605_v49, %v7572_v48 }
 0x7d6   :  { %3216 = vmatmul.f32.vlgmr.msrb.gmra.mxu0 %v3128_v53  ;;  %3236 = vmatmul.f32.vlgmr.msrb.gmra.mxu1 %v3128_v53 }
 0x7d7   :  { %3256 = vmatmul.f32.vlgmr.msrb.gmra.mxu2 %v3128_v53  ;;  %3276 = vmatmul.f32.vlgmr.msrb.gmra.mxu3 %v3128_v53 }
 0x7d8   :  { %3698 = vmatpush.msrb.mxu3 %v6554_v54  ;;  %v7599_v54 = vld [vmem:[#allocation48_spill] sm:$0xff] }
 0x7da   :  { %3699 = vmatpush.msrb.mxu3 %v6557_v10  ;;  %v7600_v10 = vld [vmem:[#allocation32_spill] sm:$0xff] }
 0x7dc   :  { %3700 = vmatpush.msrb.mxu3 %v6562_v59  ;;  %v2303_v59 = vadd.f32 %v7600_v10, %v7599_v54 }
 0x7de   :  { %3701 = vmatpush.msrb.mxu3 %v6574_v24  ;;  %v7601_v24 = vld [vmem:[#allocation49_spill] sm:$0xff] }
 0x7e0   :  { %3702 = vmatpush.msrb.mxu3 %v6586_v22  ;;  %v7602_v22 = vld [vmem:[#allocation34_spill] sm:$0xff] }
 0x7e2   :  { %3703 = vmatpush.msrb.mxu3 %v6598_v37  ;;  %v2344_v37 = vadd.f32 %v7602_v22, %v7601_v24 }
 0x7e4   :  { %3704 = vmatpush.msrb.mxu3 %v6610_v42 }
 0x7e6   :  { %3705 = vmatpush.msrb.mxu3 %v6622_v55 }
 0x7e8   :  { %3706 = vmatpush.msrb.mxu3 %v6638_v44 }
 0x7ea   :  { %3707 = vmatpush.msrb.mxu3 %v6650_v36 }
 0x7ec   :  { %3708 = vmatpush.msrb.mxu3 %v6662_v35 }
 0x7ee   :  { %3709 = vmatpush.msrb.mxu3 %v7591_v46 }
 0x7f0   :  { %3710 = vmatpush.msrb.mxu3 %v7595_v8 }
 0x7f2   :  { %3711 = vmatpush.msrb.mxu3 %v6696_v32  ;;  %v2385_v32 = vadd.f32 %v7604_v13, %v7603_v20 }
 0x7f4   :  { %3712 = vmatpush.msrb.mxu3 %v6708_v50 }
 0x7f6   :  { %3713 = vmatpush.msrb.mxu3 %v6720_v18 }
 0x853   :  { %v3217_v42 = vpop.f32.mrf.mxu0  ;;  %v3237_v55 = vpop.f32.mrf.mxu1 }
 0x854   :  { %v3280_v44 = vadd.f32 %v3217_v42, %v2303_v59  ;;  %v3281_v36 = vadd.f32 %v3237_v55, %v2344_v37 }
 0x856   :  { %v4321_v35 = vmul.f32 -1.442695, %v3280_v44  ;;  %v4322_v41 = vmul.f32 -1.442695, %v3281_v36 }
 0x858   :  { %4526 = vpow2.f32 %v4321_v35 }
 0x859   :  { %4528 = vpow2.f32 %v4322_v41 }
 0x85a   :  { %v3257_v50 = vpop.f32.mrf.mxu2  ;;  %v3277_v28 = vpop.f32.mrf.mxu3 }
 0x85b   :  { %v3282_v27 = vadd.f32 %v3257_v50, %v2385_v32  ;;  %v3283_v59 = vadd.f32 %v3277_v28, %v2426_v3 }
 0x85d   :  { %v4323_v18 = vmul.f32 -1.442695, %v3282_v27 }
 0x85e   :  { %v4527_v6 = vpop.eup %4526 }
 0x85f   :  { %v4529_v23 = vpop.eup %4528  ;;  %v3293_v46 = vadd.f32 1.0, %v4527_v6  ;;  %4530 = vpow2.f32 %v4323_v18 }
 0x860   :  { %v3294_v61 = vadd.f32 1.0, %v4529_v23 }
 0x861   :  { %4532 = vrcp.f32 %v3293_v46  ;;  %v3307_v36 = vand.u32 2147483648, %v3293_v46  ;;  %v3305_v13 = vand.u32 2147483647, %v3293_v46  ;;  %vm3301_vm6 = vweird.f32 %v3293_v46 }
 0x862   :  { %4534 = vrcp.f32 %v3294_v61  ;;  %v3322_v35 = vand.u32 2147483648, %v3294_v61  ;;  %v3320_v50 = vand.u32 2147483647, %v3294_v61  ;;  %vm3316_vm7 = vweird.f32 %v3294_v61 }
 0x863   :  { %v3308_v23 = vor.u32 1.1754944e-38, %v3307_v36  ;;  %vm3306_vm10 = vcmp.eq.f32.partialorder %v3305_v13, 8.507059e+37 }
 0x864   :  { %vm3321_vm11 = vcmp.eq.f32.partialorder %v3320_v50, 8.507059e+37 }
 0x865   :  { %v4531_v8 = vpop.eup %4530 }
 0x866   :  { %v3295_v53 = vadd.f32 1.0, %v4531_v8  ;;  %v3323_v8 = vor.u32 1.1754944e-38, %v3322_v35 }
 0x867   :  { %v4533_v10 = vpop.eup %4532 }
 0x868   :  { %v4535_v22 = vpop.eup %4534  ;;  %v3297_v37 = vmul.f32 %v4533_v10, %v3293_v46  ;;  %4536 = vrcp.f32 %v3295_v53  ;;  %vm3302_vm4 = vweird.f32 %v4533_v10  ;;  %v3337_v36 = vand.u32 2147483648, %v3295_v53 }
 0x869   :  { %v3312_v42 = vmul.f32 %v4535_v22, %v3294_v61  ;;  %4538 = vtanh.f32 %v3283_v59  ;;  %vm3317_vm5 = vweird.f32 %v4535_v22  ;;  %vm3303_vm8 = vmor %vm3301_vm6, %vm3302_vm4  ;;  %vm3331_vm13 = vweird.f32 %v3295_v53 }
 0x86a   :  { %v3298_v55 = vsub.f32 1.0, %v3297_v37  ;;  %vm3318_vm9 = vmor %vm3316_vm7, %vm3317_vm5  ;;  %v3338_v13 = vor.u32 1.1754944e-38, %v3337_v36 }
 0x86b   :  { %v3313_v44 = vsub.f32 1.0, %v3312_v42 }
 0x86c   :  { %v3299_v41 = vmul.f32 %v4533_v10, %v3298_v55 }
 0x86d   :  { %v3314_v32 = vmul.f32 %v4535_v22, %v3313_v44 }
 0x86e   :  { %v4537_v27 = vpop.eup %4536  ;;  %v3300_v18 = vadd.f32 %v4533_v10, %v3299_v41 }
 0x86f   :  { %v3327_v6 = vmul.f32 %v4537_v27, %v3295_v53  ;;  %v3315_v28 = vadd.f32 %v4535_v22, %v3314_v32  ;;  %v4539_v3 = vpop.eup %4538  ;;  %vm3332_vm12 = vweird.f32 %v4537_v27 }
 0x870   :  { %v3304_v49 = vsel %vm3303_vm8, %v4533_v10, %v3300_v18  ;;  %v3335_v10 = vand.u32 2147483647, %v3295_v53  ;;  %vm3333_vm14 = vmor %vm3331_vm13, %vm3332_vm12  ;;  %v6858_v18 = vld [vmem:[#allocation15 + $0x1e8] sm:$0xff]  ;;  %v6865_v53 = vld [vmem:[#allocation15 + $0x1c0] sm:$0xff] }
 0x871   :  { %v3328_v59 = vsub.f32 1.0, %v3327_v6  ;;  %v3309_v37 = vsel %vm3306_vm10, %v3308_v23, %v3304_v49  ;;  %v3319_v42 = vsel %vm3318_vm9, %v4535_v22, %v3315_v28  ;;  %3658 = vmatpush.msrb.mxu1 %v6858_v18  ;;  %v6869_v6 = vld [vmem:[#allocation15 + $0x1d0] sm:$0xff]  ;;  %v6874_v23 = vld [vmem:[#allocation15 + $0x1a0] sm:$0xff]  ;;  %v6876_v28 = vld [vmem:[#allocation15 + $0x1a8] sm:$0xff] }
 0x872   :  { %v3324_v55 = vsel %vm3321_vm11, %v3323_v8, %v3319_v42  ;;  %v3344_v44 = vmul.f32 %v4539_v3, %v3309_v37  ;;  %vm3336_vm15 = vcmp.eq.f32.partialorder %v3335_v10, 8.507059e+37  ;;  %v7606_v8 = vld [vmem:[#allocation44_spill] sm:$0xff]  ;;  %v7607_v49 = vld [vmem:[#allocation46_spill] sm:$0xff]  ;;  %v7608_v3 = vld [vmem:[#allocation53_spill] sm:$0xff] }
 0x873   :  { %v3329_v48 = vmul.f32 %v4537_v27, %v3328_v59  ;;  %v3343_v41 = vmul.f32 %v3324_v55, %v6793_v9  ;;  %v6856_v9 = vld [vmem:[#allocation15 + $0x1e0] sm:$0xff]  ;;  %v7609_v59 = vld [vmem:[#allocation54_spill] sm:$0xff] }
 0x874   :  { %3638 = vmatpush.msrb.mxu0 %v6856_v9 }
 0x875   :  { %v6853_v46 = vadd.f32 %v3344_v44, %v3343_v41  ;;  %v3330_v61 = vadd.f32 %v4537_v27, %v3329_v48  ;;  %v6860_v48 = vld [vmem:[#allocation15 + $0x1f0] sm:$0xff] }
 0x876   :  { %3678 = vmatpush.msrb.mxu2 %v6860_v48  ;;  %3639 = vmatpush.msrb.mxu0 %v6865_v53 }
 0x877   :  { %4540 = vtanh.f32 %v6853_v46  ;;  %v3334_v35 = vsel %vm3333_vm14, %v4537_v27, %v3330_v61  ;;  %v6867_v27 = vld [vmem:[#allocation15 + $0x1c8] sm:$0xff] }
 0x878   :  { %v3339_v32 = vsel %vm3336_vm15, %v3338_v13, %v3334_v35  ;;  %3659 = vmatpush.msrb.mxu1 %v6867_v27  ;;  %3679 = vmatpush.msrb.mxu2 %v6869_v6 }
 0x879   :  { %3640 = vmatpush.msrb.mxu0 %v6874_v23 }
 0x87a   :  { %3660 = vmatpush.msrb.mxu1 %v6876_v28  ;;  %3680 = vmatpush.msrb.mxu2 %v6560_v57  ;;  %v7610_v57 = vld [vmem:[#allocation60_spill] sm:$0xff] }
 0x87b   :  { %3641 = vmatpush.msrb.mxu0 %v6566_v1  ;;  %v7611_v1 = vld [vmem:[#allocation66_spill] sm:$0xff] }
 0x87c   :  { %3661 = vmatpush.msrb.mxu1 %v6568_v62  ;;  %3681 = vmatpush.msrb.mxu2 %v6570_v63  ;;  %v2306_v62 = vadd.f32 %v7611_v1, %v7599_v54  ;;  %v7612_v63 = vld [vmem:[#allocation67_spill] sm:$0xff] }
 0x87d   :  { %v4541_v22 = vpop.eup %4540  ;;  %3642 = vmatpush.msrb.mxu0 %v6578_v14  ;;  %v2347_v14 = vadd.f32 %v7612_v63, %v7601_v24 }
 0x87e   :  { %v3347_v50 = vmul.f32 %v4541_v22, %v3339_v32  ;;  %3662 = vmatpush.msrb.mxu1 %v6580_v16  ;;  %3682 = vmatpush.msrb.mxu2 %v7606_v8 }
 0x87f   :  { %3643 = vmatpush.msrb.mxu0 %v6590_v15 }
 0x880   :  { %3435 = vmatmul.f32.vlgmr.msra.gmra.mxu0 %v3347_v50  ;;  %3455 = vmatmul.f32.vlgmr.msra.gmra.mxu1 %v3347_v50 }
 0x881   :  { %3475 = vmatmul.f32.vlgmr.msra.gmra.mxu2 %v3347_v50  ;;  %3495 = vmatmul.f32.vlgmr.msra.gmra.mxu3 %v3347_v50 }
 0x882   :  { %3663 = vmatpush.msrb.mxu1 %v7607_v49  ;;  %3683 = vmatpush.msrb.mxu2 %v7608_v3 }
 0x883   :  { %3644 = vmatpush.msrb.mxu0 %v7609_v59 }
 0x884   :  { %3664 = vmatpush.msrb.mxu1 %v7610_v57  ;;  %3684 = vmatpush.msrb.mxu2 %v6606_v47 }
 0x885   :  { %3645 = vmatpush.msrb.mxu0 %v6614_v11 }
 0x886   :  { %3665 = vmatpush.msrb.mxu1 %v6616_v43  ;;  %3685 = vmatpush.msrb.mxu2 %v6618_v0 }
 0x887   :  { %3646 = vmatpush.msrb.mxu0 %v6626_v7  ;;  %v7613_v7 = vld [vmem:[#allocation69_spill] sm:$0xff] }
 0x888   :  { %3666 = vmatpush.msrb.mxu1 %v6628_v58  ;;  %3686 = vmatpush.msrb.mxu2 %v6630_v21  ;;  %v2388_v58 = vadd.f32 %v7613_v7, %v7603_v20  ;;  %v6943_v7 = vld [vmem:[#allocation15 + $0x1d8] sm:$0xff] }
 0x889   :  { %3647 = vmatpush.msrb.mxu0 %v6642_v17 }
 0x88a   :  { %3667 = vmatpush.msrb.mxu1 %v6644_v45  ;;  %3687 = vmatpush.msrb.mxu2 %v6646_v26 }
 0x88b   :  { %3648 = vmatpush.msrb.mxu0 %v6654_v52 }
 0x88c   :  { %3668 = vmatpush.msrb.mxu1 %v6656_v40  ;;  %3688 = vmatpush.msrb.mxu2 %v6658_v4 }
 0x88d   :  { %3649 = vmatpush.msrb.mxu0 %v6666_v33  ;;  %v7615_v33 = vld [vmem:[#allocation52_spill] sm:$0xff] }
 0x88e   :  { %3669 = vmatpush.msrb.mxu1 %v6668_v39  ;;  %3689 = vmatpush.msrb.mxu2 %v6670_v2 }
 0x88f   :  { %3650 = vmatpush.msrb.mxu0 %v7592_v60 }
 0x890   :  { %3670 = vmatpush.msrb.mxu1 %v7593_v5  ;;  %3690 = vmatpush.msrb.mxu2 %v7594_v30 }
 0x891   :  { %3651 = vmatpush.msrb.mxu0 %v7596_v56 }
 0x892   :  { %3671 = vmatpush.msrb.mxu1 %v7597_v12  ;;  %3691 = vmatpush.msrb.mxu2 %v6694_v31 }
 0x893   :  { %3652 = vmatpush.msrb.mxu0 %v6700_v25 }
 0x894   :  { %3672 = vmatpush.msrb.mxu1 %v6702_v38  ;;  %3692 = vmatpush.msrb.mxu2 %v6706_v19  ;;  %v7614_v38 = vld [vmem:[#allocation40_spill] sm:$0xff] }
 0x895   :  { %3653 = vmatpush.msrb.mxu0 %v6712_v51  ;;  %v2429_v39 = vadd.f32 %v7615_v33, %v7614_v38  ;;  %v6976_v33 = vld [vmem:[#allocation15 + $0x140] sm:$0xff] }
 0x896   :  { %3673 = vmatpush.msrb.mxu1 %v6714_v34  ;;  %3693 = vmatpush.msrb.mxu2 %v7598_v29 }
 0x897   :  { %3857 = vmatpush.msra.mxu0 %v6856_v9 }
 0x898   :  { %3877 = vmatpush.msra.mxu1 %v6858_v18  ;;  %3897 = vmatpush.msra.mxu2 %v6860_v48 }
 0x899   :  { %3858 = vmatpush.msra.mxu0 %v6865_v53 }
 0x89a   :  { %3878 = vmatpush.msra.mxu1 %v6867_v27  ;;  %3898 = vmatpush.msra.mxu2 %v6869_v6 }
 0x89b   :  { %3859 = vmatpush.msra.mxu0 %v6874_v23 }
 0x89c   :  { %3879 = vmatpush.msra.mxu1 %v6876_v28 }
 0x8fd   :  { %v3436_v16 = vpop.f32.mrf.mxu0  ;;  %v3456_v15 = vpop.f32.mrf.mxu1 }
 0x8fe   :  { %v3499_v47 = vadd.f32 %v3436_v16, %v2306_v62  ;;  %v3500_v11 = vadd.f32 %v3456_v15, %v2347_v14 }
 0x900   :  { %v4324_v43 = vmul.f32 -1.442695, %v3499_v47  ;;  %v4325_v0 = vmul.f32 -1.442695, %v3500_v11 }
 0x902   :  { %4542 = vpow2.f32 %v4324_v43 }
 0x903   :  { %4544 = vpow2.f32 %v4325_v0 }
 0x904   :  { %v3476_v21 = vpop.f32.mrf.mxu2  ;;  %v3496_v25 = vpop.f32.mrf.mxu3 }
 0x905   :  { %v3501_v17 = vadd.f32 %v3476_v21, %v2388_v58  ;;  %v3502_v51 = vadd.f32 %v3496_v25, %v2429_v39  ;;  %v6946_v58 = vld [vmem:[#allocation15 + $0x1b0] sm:$0xff]  ;;  %v6948_v21 = vld [vmem:[#allocation15 + $0x1b8] sm:$0xff]  ;;  %v6978_v39 = vld [vmem:[#allocation15 + $0x148] sm:$0xff] }
 0x906   :  { %3899 = vmatpush.msra.mxu2 %v6946_v58  ;;  %v6968_v25 = vld [vmem:[#allocation15 + $0x170] sm:$0xff] }
 0x907   :  { %v4326_v45 = vmul.f32 -1.442695, %v3501_v17  ;;  %v6952_v17 = vld [vmem:[#allocation15 + $0x180] sm:$0xff] }
 0x908   :  { %v4543_v26 = vpop.eup %4542  ;;  %3860 = vmatpush.msra.mxu0 %v6952_v17 }
 0x909   :  { %v4545_v52 = vpop.eup %4544  ;;  %v3512_v40 = vadd.f32 1.0, %v4543_v26  ;;  %4546 = vpow2.f32 %v4326_v45  ;;  %v6954_v45 = vld [vmem:[#allocation15 + $0x188] sm:$0xff]  ;;  %v6956_v26 = vld [vmem:[#allocation15 + $0x190] sm:$0xff] }
 0x90a   :  { %v3513_v4 = vadd.f32 1.0, %v4545_v52  ;;  %3880 = vmatpush.msra.mxu1 %v6954_v45  ;;  %v6960_v52 = vld [vmem:[#allocation15 + $0x198] sm:$0xff]  ;;  %3900 = vmatpush.msra.mxu2 %v6956_v26 }
 0x90b   :  { %4548 = vrcp.f32 %v3512_v40  ;;  %v3526_v12 = vand.u32 2147483648, %v3512_v40  ;;  %v3524_v42 = vand.u32 2147483647, %v3512_v40  ;;  %vm3520_vm2 = vweird.f32 %v3512_v40 }
 0x90c   :  { %4550 = vrcp.f32 %v3513_v4  ;;  %v3541_v29 = vand.u32 2147483648, %v3513_v4  ;;  %v3539_v44 = vand.u32 2147483647, %v3513_v4  ;;  %vm3535_vm3 = vweird.f32 %v3513_v4  ;;  %3901 = vmatpush.msra.mxu2 %v6968_v25 }
 0x90d   :  { %v3527_v10 = vor.u32 1.1754944e-38, %v3526_v12  ;;  %vm3525_vm6 = vcmp.eq.f32.partialorder %v3524_v42, 8.507059e+37  ;;  %v7004_v12 = vld [vmem:[#allocation15 + $0x110] sm:$0xff]  ;;  %v7014_v42 = vld [vmem:[#allocation15 + $0xe8] sm:$0xff] }
 0x90e   :  { %v3542_v13 = vor.u32 1.1754944e-38, %v3541_v29  ;;  %vm3540_vm7 = vcmp.eq.f32.partialorder %v3539_v44, 8.507059e+37  ;;  %v7008_v29 = vld [vmem:[#allocation15 + $0x118] sm:$0xff] }
 0x90f   :  { %v4547_v19 = vpop.eup %4546  ;;  %v7616_v44 = vld [vmem:[#allocation50_spill] sm:$0xff] }
 0x910   :  { %v3514_v2 = vadd.f32 1.0, %v4547_v19  ;;  %v6972_v19 = vld [vmem:[#allocation15 + $0x178] sm:$0xff] }
 0x911   :  { %v4549_v31 = vpop.eup %4548 }
 0x912   :  { %v4551_v34 = vpop.eup %4550  ;;  %v3516_v60 = vmul.f32 %v4549_v31, %v3512_v40  ;;  %4552 = vrcp.f32 %v3514_v2  ;;  %vm3521_vm0 = vweird.f32 %v4549_v31  ;;  %v3556_v14 = vand.u32 2147483648, %v3514_v2  ;;  %v6964_v40 = vld [vmem:[#allocation15 + $0x160] sm:$0xff] }
 0x913   :  { %v3531_v5 = vmul.f32 %v4551_v34, %v3513_v4  ;;  %4554 = vtanh.f32 %v3502_v51  ;;  %vm3536_vm1 = vweird.f32 %v4551_v34  ;;  %vm3522_vm4 = vmor %vm3520_vm2, %vm3521_vm0  ;;  %vm3550_vm9 = vweird.f32 %v3514_v2  ;;  %v6966_v4 = vld [vmem:[#allocation15 + $0x168] sm:$0xff]  ;;  %3861 = vmatpush.msra.mxu0 %v6964_v40  ;;  %v6988_v51 = vld [vmem:[#allocation15 + $0x120] sm:$0xff] }
 0x914   :  { %v3517_v30 = vsub.f32 1.0, %v3516_v60  ;;  %vm3537_vm5 = vmor %vm3535_vm3, %vm3536_vm1  ;;  %v3554_v16 = vand.u32 2147483647, %v3514_v2  ;;  %v3557_v47 = vor.u32 1.1754944e-38, %v3556_v14  ;;  %3881 = vmatpush.msra.mxu1 %v6966_v4  ;;  %v6992_v60 = vld [vmem:[#allocation15 + $0x130] sm:$0xff] }
 0x915   :  { %v3532_v56 = vsub.f32 1.0, %v3531_v5  ;;  %3862 = vmatpush.msra.mxu0 %v6976_v33  ;;  %v6996_v5 = vld [vmem:[#allocation15 + $0x138] sm:$0xff] }
 0x916   :  { %v3518_v37 = vmul.f32 %v4549_v31, %v3517_v30  ;;  %vm3555_vm11 = vcmp.eq.f32.partialorder %v3554_v16, 8.507059e+37  ;;  %3882 = vmatpush.msra.mxu1 %v6978_v39  ;;  %v7000_v30 = vld [vmem:[#allocation15 + $0x100] sm:$0xff]  ;;  %v7048_v16 = vld [vmem:[#allocation15 + $0xb8] sm:$0xff] }
 0x917   :  { %v3533_v55 = vmul.f32 %v4551_v34, %v3532_v56  ;;  %3863 = vmatpush.msra.mxu0 %v6988_v51  ;;  %v7002_v56 = vld [vmem:[#allocation15 + $0x108] sm:$0xff] }
 0x918   :  { %v4553_v41 = vpop.eup %4552  ;;  %v3519_v61 = vadd.f32 %v4549_v31, %v3518_v37  ;;  %v7012_v37 = vld [vmem:[#allocation15 + $0xe0] sm:$0xff] }
 0x919   :  { %v3546_v36 = vmul.f32 %v4553_v41, %v3514_v2  ;;  %v3534_v35 = vadd.f32 %v4551_v34, %v3533_v55  ;;  %v4555_v32 = vpop.eup %4554  ;;  %vm3551_vm8 = vweird.f32 %v4553_v41  ;;  %v6980_v2 = vld [vmem:[#allocation15 + $0x150] sm:$0xff]  ;;  %3864 = vmatpush.msra.mxu0 %v7000_v30 }
 0x91a   :  { %v3523_v22 = vsel %vm3522_vm4, %v4549_v31, %v3519_v61  ;;  %vm3552_vm10 = vmor %vm3550_vm9, %vm3551_vm8  ;;  %v6984_v31 = vld [vmem:[#allocation15 + $0x158] sm:$0xff]  ;;  %3902 = vmatpush.msra.mxu2 %v6980_v2  ;;  %v7016_v55 = vld [vmem:[#allocation15 + $0xf0] sm:$0xff] }
 0x91b   :  { %v3547_v50 = vsub.f32 1.0, %v3546_v36  ;;  %v3528_v8 = vsel %vm3525_vm6, %v3527_v10, %v3523_v22  ;;  %v3538_v49 = vsel %vm3537_vm5, %v4551_v34, %v3534_v35  ;;  %v6990_v34 = vld [vmem:[#allocation15 + $0x128] sm:$0xff]  ;;  %v7617_v61 = vld [vmem:[#allocation51_spill] sm:$0xff]  ;;  %3865 = vmatpush.msra.mxu0 %v7012_v37  ;;  %v7024_v10 = vld [vmem:[#allocation15 + $0xf8] sm:$0xff] }
 0x91c   :  { %v3543_v3 = vsel %vm3540_vm7, %v3542_v13, %v3538_v49  ;;  %v3563_v59 = vmul.f32 %v4555_v32, %v3528_v8  ;;  %3883 = vmatpush.msra.mxu1 %v6990_v34  ;;  %3903 = vmatpush.msra.mxu2 %v6992_v60  ;;  %v2350_v36 = vadd.f32 %v7617_v61, %v7601_v24  ;;  %v7028_v22 = vld [vmem:[#allocation15 + $0xc0] sm:$0xff]  ;;  %v7030_v32 = vld [vmem:[#allocation15 + $0xc8] sm:$0xff] }
 0x91d   :  { %v3548_v57 = vmul.f32 %v4553_v41, %v3547_v50  ;;  %v3562_v1 = vmul.f32 %v3543_v3, %v6853_v46  ;;  %v6940_v46 = vld [vmem:[#allocation15 + $0x1f8] sm:$0xff]  ;;  %v7032_v50 = vld [vmem:[#allocation15 + $0xd0] sm:$0xff]  ;;  %3866 = vmatpush.msra.mxu0 %v7028_v22  ;;  %v7088_v24 = vld [vmem:[#allocation15 + $0x28] sm:$0xff] }
 0x91e   :  { %3917 = vmatpush.msra.mxu3 %v6940_v46  ;;  %3884 = vmatpush.msra.mxu1 %v7002_v56  ;;  %v7036_v3 = vld [vmem:[#allocation15 + $0xd8] sm:$0xff] }
 0x91f   :  { %v6937_v62 = vadd.f32 %v3563_v59, %v3562_v1  ;;  %v3549_v63 = vadd.f32 %v4553_v41, %v3548_v57  ;;  %3904 = vmatpush.msra.mxu2 %v7004_v12  ;;  %v7040_v59 = vld [vmem:[#allocation15 + $0xa0] sm:$0xff]  ;;  %v7042_v57 = vld [vmem:[#allocation15 + $0xa8] sm:$0xff]  ;;  %v7044_v1 = vld [vmem:[#allocation15 + $0xb0] sm:$0xff] }
 0x920   :  { %3918 = vmatpush.msra.mxu3 %v6943_v7  ;;  %3885 = vmatpush.msra.mxu1 %v7014_v42 }
 0x921   :  { %4556 = vtanh.f32 %v6937_v62  ;;  %v3553_v15 = vsel %vm3552_vm10, %v4553_v41, %v3549_v63  ;;  %v2309_v41 = vadd.f32 %v7616_v44, %v7599_v54  ;;  %3905 = vmatpush.msra.mxu2 %v7016_v55  ;;  %3867 = vmatpush.msra.mxu0 %v7040_v59  ;;  %v7064_v44 = vld [vmem:[#allocation15 + $0x68] sm:$0xff]  ;;  %v7092_v54 = vld [vmem:[#allocation15 + $0x30] sm:$0xff] }
 0x922   :  { %v3558_v43 = vsel %vm3555_vm11, %v3557_v47, %v3553_v15  ;;  %3919 = vmatpush.msra.mxu3 %v6948_v21  ;;  %3886 = vmatpush.msra.mxu1 %v7030_v32  ;;  %v7052_v15 = vld [vmem:[#allocation15 + $0x80] sm:$0xff]  ;;  %v7054_v47 = vld [vmem:[#allocation15 + $0x88] sm:$0xff]  ;;  %7620 = vst [vmem:[#allocation47_spill] sm:$0xff] %v7064_v44 }
 0x923   :  { %3906 = vmatpush.msra.mxu2 %v7032_v50  ;;  %3868 = vmatpush.msra.mxu0 %v7052_v15 }
 0x924   :  { %3920 = vmatpush.msra.mxu3 %v6960_v52  ;;  %3887 = vmatpush.msra.mxu1 %v7042_v57 }
 0x925   :  { %3907 = vmatpush.msra.mxu2 %v7044_v1 }
 0x926   :  { %3921 = vmatpush.msra.mxu3 %v6972_v19  ;;  %3888 = vmatpush.msra.mxu1 %v7054_v47 }
 0x927   :  { %v4557_v11 = vpop.eup %4556 }
 0x928   :  { %v3566_v0 = vmul.f32 %v4557_v11, %v3558_v43  ;;  %3922 = vmatpush.msra.mxu3 %v6984_v31  ;;  %v7056_v11 = vld [vmem:[#allocation15 + $0x90] sm:$0xff]  ;;  %v7060_v43 = vld [vmem:[#allocation15 + $0x98] sm:$0xff]  ;;  %3889 = vmatpush.msra.mxu1 %v7064_v44 }
 0x929   :  { %7618 = vst [vmem:[#allocation27_spill] sm:$0xff] %v7060_v43  ;;  %3908 = vmatpush.msra.mxu2 %v7056_v11  ;;  %v7094_v44 = vld [vmem:[#allocation15 + $0x38] sm:$0xff] }
 0x92a   :  { %3654 = vmatmul.f32.vlgmr.msrb.gmra.mxu0 %v3566_v0  ;;  %3674 = vmatmul.f32.vlgmr.msrb.gmra.mxu1 %v3566_v0 }
 0x92b   :  { %3694 = vmatmul.f32.vlgmr.msrb.gmra.mxu2 %v3566_v0  ;;  %3714 = vmatmul.f32.vlgmr.msrb.gmra.mxu3 %v3566_v0  ;;  %v7062_v0 = vld [vmem:[#allocation15 + $0x60] sm:$0xff] }
 0x92c   :  { %3923 = vmatpush.msra.mxu3 %v6996_v5  ;;  %7619 = vst [vmem:[#allocation26_spill] sm:$0xff] %v7062_v0  ;;  %3869 = vmatpush.msra.mxu0 %v7062_v0 }
 0x92e   :  { %3924 = vmatpush.msra.mxu3 %v7008_v29 }
 0x930   :  { %3925 = vmatpush.msra.mxu3 %v7024_v10 }
 0x932   :  { %3926 = vmatpush.msra.mxu3 %v7036_v3 }
 0x934   :  { %3927 = vmatpush.msra.mxu3 %v7048_v16 }
 0x936   :  { %3928 = vmatpush.msra.mxu3 %v7060_v43 }
 0x9a7   :  { %v3655_v35 = vpop.f32.mrf.mxu0  ;;  %v3675_v13 = vpop.f32.mrf.mxu1 }
 0x9a8   :  { %v3718_v8 = vadd.f32 %v3655_v35, %v2309_v41  ;;  %v3719_v49 = vadd.f32 %v3675_v13, %v2350_v36  ;;  %v7621_v41 = vld [vmem:[#allocation41_spill] sm:$0xff]  ;;  %v7072_v35 = vld [vmem:[#allocation15 + $0x78] sm:$0xff]  ;;  %v7074_v13 = vld [vmem:[#allocation15 + $0x40] sm:$0xff] }
 0x9a9   :  { %v2391_v61 = vadd.f32 %v7621_v41, %v7603_v20  ;;  %v7070_v36 = vld [vmem:[#allocation15 + $0x70] sm:$0xff]  ;;  %7623 = vst [vmem:[#allocation33_spill] sm:$0xff] %v7072_v35  ;;  %3929 = vmatpush.msra.mxu3 %v7072_v35  ;;  %v7086_v20 = vld [vmem:[#allocation15 + $0x20] sm:$0xff]  ;;  %3870 = vmatpush.msra.mxu0 %v7074_v13 }
 0x9aa   :  { %v4327_v63 = vmul.f32 -1.442695, %v3718_v8  ;;  %v4328_v14 = vmul.f32 -1.442695, %v3719_v49  ;;  %7622 = vst [vmem:[#allocation28_spill] sm:$0xff] %v7070_v36  ;;  %v7078_v49 = vld [vmem:[#allocation15 + $0x48] sm:$0xff]  ;;  %3909 = vmatpush.msra.mxu2 %v7070_v36 }
 0x9ab   :  { %7624 = vst [vmem:[#allocation29_spill] sm:$0xff] %v7074_v13  ;;  %3890 = vmatpush.msra.mxu1 %v7078_v49  ;;  %3871 = vmatpush.msra.mxu0 %v7086_v20  ;;  %v7104_v13 = vld [vmem:[#allocation15 + $0x10] sm:$0xff] }
 0x9ac   :  { %4558 = vpow2.f32 %v4327_v63  ;;  %7625 = vst [vmem:[#allocation30_spill] sm:$0xff] %v7078_v49  ;;  %v7080_v63 = vld [vmem:[#allocation15 + $0x50] sm:$0xff]  ;;  %v7106_v49 = vld [vmem:[#allocation15 + $0x18] sm:$0xff] }
 0x9ad   :  { %4560 = vpow2.f32 %v4328_v14  ;;  %v7082_v14 = vld [vmem:[#allocation15 + $0x58] sm:$0xff]  ;;  %3910 = vmatpush.msra.mxu2 %v7080_v63  ;;  %3891 = vmatpush.msra.mxu1 %v7088_v24  ;;  %7626 = vst [vmem:[#allocation31_spill] sm:$0xff] %v7104_v13 }
 0x9ae   :  { %v3695_v8 = vpop.f32.mrf.mxu2  ;;  %3930 = vmatpush.msra.mxu3 %v7082_v14 }
 0x9af   :  { %v3720_v41 = vadd.f32 %v3695_v8, %v2391_v61  ;;  %v7098_v61 = vld [vmem:[#allocation15] sm:$0xff]  ;;  %v7100_v8 = vld [vmem:[#allocation15 + $0x8] sm:$0xff]  ;;  %3911 = vmatpush.msra.mxu2 %v7092_v54 }
 0x9b0   :  { %3931 = vmatpush.msra.mxu3 %v7094_v44  ;;  %3872 = vmatpush.msra.mxu0 %v7098_v61 }
 0x9b1   :  { %v4329_v0 = vmul.f32 -1.442695, %v3720_v41  ;;  %3892 = vmatpush.msra.mxu1 %v7100_v8  ;;  %3912 = vmatpush.msra.mxu2 %v7104_v13 }
 0x9b2   :  { %v4559_v35 = vpop.eup %4558  ;;  %3932 = vmatpush.msra.mxu3 %v7106_v49  ;;  %4076 = vmatpush.msrb.mxu0 %v6856_v9 }
 0x9b3   :  { %v4561_v36 = vpop.eup %4560  ;;  %v7108_v43 = vadd.f32 1.0, %v4559_v35  ;;  %4562 = vpow2.f32 %v4329_v0  ;;  %4096 = vmatpush.msrb.mxu1 %v6858_v18  ;;  %4116 = vmatpush.msrb.mxu2 %v6860_v48  ;;  %v3715_v0 = vpop.f32.mrf.mxu3  ;;  %v7627_v35 = vld [vmem:[#allocation36_spill] sm:$0xff] }
 0x9b4   :  { %v7112_v41 = vadd.f32 1.0, %v4561_v36  ;;  %4136 = vmatpush.msrb.mxu3 %v6940_v46  ;;  %4077 = vmatpush.msrb.mxu0 %v6865_v53  ;;  %v2432_v13 = vadd.f32 %v7627_v35, %v7614_v38 }
 0x9b5   :  { %4564 = vrcp.f32 %v7108_v43  ;;  %4097 = vmatpush.msrb.mxu1 %v6867_v27  ;;  %4117 = vmatpush.msrb.mxu2 %v6869_v6  ;;  %v3745_v46 = vand.u32 2147483648, %v7108_v43  ;;  %vm3739_vm14 = vweird.f32 %v7108_v43 }
 0x9b6   :  { %4566 = vrcp.f32 %v7112_v41  ;;  %4137 = vmatpush.msrb.mxu3 %v6943_v7  ;;  %4078 = vmatpush.msrb.mxu0 %v6874_v23  ;;  %v3721_v48 = vadd.f32 %v3715_v0, %v2432_v13  ;;  %v3760_v7 = vand.u32 2147483648, %v7112_v41  ;;  %vm3754_vm15 = vweird.f32 %v7112_v41 }
 0x9b7   :  { %4098 = vmatpush.msrb.mxu1 %v6876_v28  ;;  %4118 = vmatpush.msrb.mxu2 %v6946_v58 }
 0x9b8   :  { %4138 = vmatpush.msrb.mxu3 %v6948_v21  ;;  %4079 = vmatpush.msrb.mxu0 %v6952_v17  ;;  %v3743_v21 = vand.u32 2147483647, %v7108_v43 }
 0x9b9   :  { %v4563_v36 = vpop.eup %4562  ;;  %4099 = vmatpush.msrb.mxu1 %v6954_v45  ;;  %4119 = vmatpush.msrb.mxu2 %v6956_v26  ;;  %v3758_v45 = vand.u32 2147483647, %v7112_v41 }
 0x9ba   :  { %v7130_v9 = vadd.f32 1.0, %v4563_v36  ;;  %4139 = vmatpush.msrb.mxu3 %v6960_v52  ;;  %4080 = vmatpush.msrb.mxu0 %v6964_v40  ;;  %vm3744_vm2 = vcmp.eq.f32.partialorder %v3743_v21, 8.507059e+37  ;;  %v7641_v36 = vld [vmem:[#allocation45_spill] sm:$0xff] }
 0x9bb   :  { %v4565_v18 = vpop.eup %4564  ;;  %4100 = vmatpush.msrb.mxu1 %v6966_v4  ;;  %4120 = vmatpush.msrb.mxu2 %v6968_v25  ;;  %v3746_v4 = vor.u32 1.1754944e-38, %v3745_v46  ;;  %vm3759_vm3 = vcmp.eq.f32.partialorder %v3758_v45, 8.507059e+37 }
 0x9bc   :  { %v4567_v53 = vpop.eup %4566  ;;  %v3735_v27 = vmul.f32 %v4565_v18, %v7108_v43  ;;  %4568 = vrcp.f32 %v7130_v9  ;;  %4140 = vmatpush.msrb.mxu3 %v6972_v19  ;;  %vm3740_vm12 = vweird.f32 %v4565_v18  ;;  %4081 = vmatpush.msrb.mxu0 %v6976_v33  ;;  %v3761_v19 = vor.u32 1.1754944e-38, %v3760_v7  ;;  %v7639_v43 = vld [vmem:[#allocation42_spill] sm:$0xff] }
 0x9bd   :  { %v3750_v6 = vmul.f32 %v4567_v53, %v7112_v41  ;;  %4570 = vtanh.f32 %v3721_v48  ;;  %4101 = vmatpush.msrb.mxu1 %v6978_v39  ;;  %vm3755_vm13 = vweird.f32 %v4567_v53  ;;  %4121 = vmatpush.msrb.mxu2 %v6980_v2  ;;  %vm3741_vm0 = vmor %vm3739_vm14, %vm3740_vm12  ;;  %vm3769_vm5 = vweird.f32 %v7130_v9 }
 0x9be   :  { %v3736_v23 = vsub.f32 1.0, %v3735_v27  ;;  %4141 = vmatpush.msrb.mxu3 %v6984_v31  ;;  %4082 = vmatpush.msrb.mxu0 %v6988_v51  ;;  %vm3756_vm1 = vmor %vm3754_vm15, %vm3755_vm13 }
 0x9bf   :  { %v3751_v28 = vsub.f32 1.0, %v3750_v6  ;;  %4102 = vmatpush.msrb.mxu1 %v6990_v34  ;;  %4122 = vmatpush.msrb.mxu2 %v6992_v60 }
 0x9c0   :  { %v3737_v58 = vmul.f32 %v4565_v18, %v3736_v23  ;;  %4142 = vmatpush.msrb.mxu3 %v6996_v5  ;;  %4083 = vmatpush.msrb.mxu0 %v7000_v30 }
 0x9c1   :  { %v3752_v17 = vmul.f32 %v4567_v53, %v3751_v28  ;;  %4103 = vmatpush.msrb.mxu1 %v7002_v56  ;;  %4123 = vmatpush.msrb.mxu2 %v7004_v12  ;;  %v7642_v28 = vld [vmem:[#allocation62_spill] sm:$0xff] }
 0x9c2   :  { %v7155_v26 = vpop.eup %4568  ;;  %v3738_v52 = vadd.f32 %v4565_v18, %v3737_v58  ;;  %4143 = vmatpush.msrb.mxu3 %v7008_v29  ;;  %4084 = vmatpush.msrb.mxu0 %v7012_v37  ;;  %v3773_v29 = vand.u32 2147483647, %v7130_v9  ;;  %v7628_v37 = vld [vmem:[#allocation27_spill] sm:$0xff]  ;;  %v2435_v46 = vadd.f32 %v7642_v28, %v7614_v38 }
 0x9c3   :  { %v3765_v40 = vmul.f32 %v7155_v26, %v7130_v9  ;;  %v3753_v25 = vadd.f32 %v4567_v53, %v3752_v17  ;;  %v4571_v39 = vpop.eup %4570  ;;  %4104 = vmatpush.msrb.mxu1 %v7014_v42  ;;  %4124 = vmatpush.msrb.mxu2 %v7016_v55  ;;  %vm3770_vm4 = vweird.f32 %v7155_v26  ;;  %v7629_v55 = vld [vmem:[#allocation26_spill] sm:$0xff] }
 0x9c4   :  { %v3742_v33 = vsel %vm3741_vm0, %v4565_v18, %v3738_v52  ;;  %4144 = vmatpush.msrb.mxu3 %v7024_v10  ;;  %4085 = vmatpush.msrb.mxu0 %v7028_v22  ;;  %vm3771_vm6 = vmor %vm3769_vm5, %vm3770_vm4  ;;  %v7630_v10 = vld [vmem:[#allocation47_spill] sm:$0xff]  ;;  %vm3774_vm7 = vcmp.eq.f32.partialorder %v3773_v29, 8.507059e+37 }
 0x9c5   :  { %v3766_v2 = vsub.f32 1.0, %v3765_v40  ;;  %v3747_v31 = vsel %vm3744_vm2, %v3746_v4, %v3742_v33  ;;  %v3757_v51 = vsel %vm3756_vm1, %v4567_v53, %v3753_v25  ;;  %4105 = vmatpush.msrb.mxu1 %v7030_v32  ;;  %4125 = vmatpush.msrb.mxu2 %v7032_v50  ;;  %v7631_v32 = vld [vmem:[#allocation28_spill] sm:$0xff]  ;;  %v7632_v50 = vld [vmem:[#allocation33_spill] sm:$0xff] }
 0x9c6   :  { %v3762_v34 = vsel %vm3759_vm3, %v3761_v19, %v3757_v51  ;;  %v3782_v60 = vmul.f32 %v4571_v39, %v3747_v31  ;;  %4145 = vmatpush.msrb.mxu3 %v7036_v3  ;;  %4086 = vmatpush.msrb.mxu0 %v7040_v59  ;;  %v7633_v3 = vld [vmem:[#allocation29_spill] sm:$0xff]  ;;  %v7634_v59 = vld [vmem:[#allocation30_spill] sm:$0xff] }
 0x9c7   :  { %v3767_v5 = vmul.f32 %v7155_v26, %v3766_v2  ;;  %v3781_v30 = vmul.f32 %v3762_v34, %v6937_v62  ;;  %4106 = vmatpush.msrb.mxu1 %v7042_v57  ;;  %v3775_v62 = vand.u32 2147483648, %v7130_v9  ;;  %4126 = vmatpush.msrb.mxu2 %v7044_v1 }
 0x9c8   :  { %4146 = vmatpush.msrb.mxu3 %v7048_v16  ;;  %4087 = vmatpush.msrb.mxu0 %v7052_v15  ;;  %v7635_v15 = vld [vmem:[#allocation31_spill] sm:$0xff] }
 0x9c9   :  { %v7179_v56 = vadd.f32 %v3782_v60, %v3781_v30  ;;  %v3768_v12 = vadd.f32 %v7155_v26, %v3767_v5  ;;  %4107 = vmatpush.msrb.mxu1 %v7054_v47  ;;  %4127 = vmatpush.msrb.mxu2 %v7056_v11  ;;  %v3776_v22 = vor.u32 1.1754944e-38, %v3775_v62  ;;  %v7636_v47 = vld [vmem:[#allocation48_spill] sm:$0xff] }
 0x9ca   :  { %4147 = vmatpush.msrb.mxu3 %v7628_v37  ;;  %4088 = vmatpush.msrb.mxu0 %v7629_v55 }
 0x9cb   :  { %4572 = vtanh.f32 %v7179_v56  ;;  %v3772_v42 = vsel %vm3771_vm6, %v7155_v26, %v3768_v12  ;;  %4108 = vmatpush.msrb.mxu1 %v7630_v10  ;;  %4128 = vmatpush.msrb.mxu2 %v7631_v32 }
 0x9cc   :  { %4148 = vmatpush.msrb.mxu3 %v7632_v50  ;;  %4089 = vmatpush.msrb.mxu0 %v7633_v3  ;;  %v3777_v1 = vsel %vm3774_vm7, %v3776_v22, %v3772_v42 }
 0x9cd   :  { %4109 = vmatpush.msrb.mxu1 %v7634_v59  ;;  %4129 = vmatpush.msrb.mxu2 %v7080_v63 }
 0x9ce   :  { %4149 = vmatpush.msrb.mxu3 %v7082_v14  ;;  %4090 = vmatpush.msrb.mxu0 %v7086_v20  ;;  %v7637_v20 = vld [vmem:[#allocation35_spill] sm:$0xff] }
 0x9cf   :  { %4110 = vmatpush.msrb.mxu1 %v7088_v24  ;;  %4130 = vmatpush.msrb.mxu2 %v7092_v54  ;;  %v2312_v11 = vadd.f32 %v7637_v20, %v7636_v47  ;;  %v7638_v24 = vld [vmem:[#allocation49_spill] sm:$0xff] }
 0x9d0   :  { %4150 = vmatpush.msrb.mxu3 %v7094_v44  ;;  %4091 = vmatpush.msrb.mxu0 %v7098_v61  ;;  %v2353_v54 = vadd.f32 %v7639_v43, %v7638_v24  ;;  %v7640_v61 = vld [vmem:[#allocation64_spill] sm:$0xff]  ;;  %v4241_v43 = vld [vmem:[#allocation17 + $0x70] sm:$0xff] }
 0x9d1   :  { %v4573_v57 = vpop.eup %4572  ;;  %4111 = vmatpush.msrb.mxu1 %v7100_v8  ;;  %4131 = vmatpush.msrb.mxu2 %v7635_v15  ;;  %v2394_v8 = vadd.f32 %v7641_v36, %v7640_v61  ;;  %v7643_v36 = vld [vmem:[#allocation38_spill] sm:$0xff] }
 0x9d2   :  { %v3785_v16 = vmul.f32 %v4573_v57, %v3777_v1  ;;  %4151 = vmatpush.msrb.mxu3 %v7106_v49 }
 0x9d4   :  { %3873 = vmatmul.f32.vlgmr.msra.gmra.mxu0 %v3785_v16  ;;  %3893 = vmatmul.f32.vlgmr.msra.gmra.mxu1 %v3785_v16 }
 0x9d5   :  { %3913 = vmatmul.f32.vlgmr.msra.gmra.mxu2 %v3785_v16  ;;  %3933 = vmatmul.f32.vlgmr.msra.gmra.mxu3 %v3785_v16 }
 0xa51   :  { %v3874_v13 = vpop.f32.mrf.mxu0  ;;  %v3894_v44 = vpop.f32.mrf.mxu1 }
 0xa52   :  { %v3937_v63 = vadd.f32 %v3874_v13, %v2312_v11  ;;  %v3938_v14 = vadd.f32 %v3894_v44, %v2353_v54  ;;  %v4240_v54 = vld [vmem:[#allocation17 + $0x68] sm:$0xff]  ;;  %v4239_v13 = vld [vmem:[#allocation17 + $0x60] sm:$0xff]  ;;  %v4238_v44 = vld [vmem:[#allocation17 + $0x58] sm:$0xff] }
 0xa54   :  { %v4330_v41 = vmul.f32 -1.442695, %v3937_v63  ;;  %v4331_v0 = vmul.f32 -1.442695, %v3938_v14  ;;  %v4237_v63 = vld [vmem:[#allocation17 + $0x50] sm:$0xff]  ;;  %v4236_v14 = vld [vmem:[#allocation17 + $0x48] sm:$0xff] }
 0xa56   :  { %4574 = vpow2.f32 %v4330_v41  ;;  %v4235_v41 = vld [vmem:[#allocation17 + $0x40] sm:$0xff] }
 0xa57   :  { %4576 = vpow2.f32 %v4331_v0  ;;  %v4234_v0 = vld [vmem:[#allocation17 + $0x38] sm:$0xff] }
 0xa58   :  { %v3914_v35 = vpop.f32.mrf.mxu2  ;;  %v3934_v6 = vpop.f32.mrf.mxu3 }
 0xa59   :  { %v3939_v9 = vadd.f32 %v3914_v35, %v2394_v8  ;;  %v3940_v21 = vadd.f32 %v3934_v6, %v2435_v46  ;;  %v2315_v8 = vadd.f32 %v7643_v36, %v7636_v47  ;;  %v7644_v35 = vld [vmem:[#allocation43_spill] sm:$0xff]  ;;  %v4232_v6 = vld [vmem:[#allocation17 + $0x28] sm:$0xff] }
 0xa5a   :  { %v4231_v46 = vld [vmem:[#allocation17 + $0x20] sm:$0xff] }
 0xa5b   :  { %v4332_v49 = vmul.f32 -1.442695, %v3939_v9  ;;  %v2356_v9 = vadd.f32 %v7644_v35, %v7638_v24  ;;  %v7645_v47 = vld [vmem:[#allocation63_spill] sm:$0xff]  ;;  %v4229_v24 = vld [vmem:[#allocation17 + $0x10] sm:$0xff] }
 0xa5c   :  { %v4575_v18 = vpop.eup %4574 }
 0xa5d   :  { %v4577_v48 = vpop.eup %4576  ;;  %v3950_v53 = vadd.f32 1.0, %v4575_v18  ;;  %4578 = vpow2.f32 %v4332_v49 }
 0xa5e   :  { %v3951_v27 = vadd.f32 1.0, %v4577_v48  ;;  %v4233_v48 = vld [vmem:[#allocation17 + $0x30] sm:$0xff] }
 0xa5f   :  { %4580 = vrcp.f32 %v3950_v53  ;;  %v3964_v4 = vand.u32 2147483648, %v3950_v53  ;;  %v3962_v33 = vand.u32 2147483647, %v3950_v53  ;;  %vm3958_vm10 = vweird.f32 %v3950_v53 }
 0xa60   :  { %4582 = vrcp.f32 %v3951_v27  ;;  %v3979_v25 = vand.u32 2147483648, %v3951_v27  ;;  %v3977_v2 = vand.u32 2147483647, %v3951_v27  ;;  %vm3973_vm11 = vweird.f32 %v3951_v27 }
 0xa61   :  { %v3965_v60 = vor.u32 1.1754944e-38, %v3964_v4  ;;  %vm3963_vm14 = vcmp.eq.f32.partialorder %v3962_v33, 8.507059e+37 }
 0xa62   :  { %v3980_v30 = vor.u32 1.1754944e-38, %v3979_v25  ;;  %vm3978_vm15 = vcmp.eq.f32.partialorder %v3977_v2, 8.507059e+37 }
 0xa63   :  { %v4579_v23 = vpop.eup %4578 }
 0xa64   :  { %v3952_v7 = vadd.f32 1.0, %v4579_v23 }
 0xa65   :  { %v4581_v58 = vpop.eup %4580 }
 0xa66   :  { %v4583_v17 = vpop.eup %4582  ;;  %v3954_v45 = vmul.f32 %v4581_v58, %v3950_v53  ;;  %4584 = vrcp.f32 %v3952_v7  ;;  %vm3959_vm8 = vweird.f32 %v4581_v58  ;;  %v3994_v59 = vand.u32 2147483648, %v3952_v7 }
 0xa67   :  { %v3969_v26 = vmul.f32 %v4583_v17, %v3951_v27  ;;  %4586 = vtanh.f32 %v3940_v21  ;;  %vm3974_vm9 = vweird.f32 %v4583_v17  ;;  %vm3960_vm12 = vmor %vm3958_vm10, %vm3959_vm8  ;;  %vm3988_vm1 = vweird.f32 %v3952_v7 }
 0xa68   :  { %v3955_v52 = vsub.f32 1.0, %v3954_v45  ;;  %vm3975_vm13 = vmor %vm3973_vm11, %vm3974_vm9  ;;  %v3992_v57 = vand.u32 2147483647, %v3952_v7  ;;  %v3995_v16 = vor.u32 1.1754944e-38, %v3994_v59  ;;  %v4228_v45 = vld [vmem:[#allocation17 + $0x8] sm:$0xff] }
 0xa69   :  { %v3970_v40 = vsub.f32 1.0, %v3969_v26 }
 0xa6a   :  { %v3956_v19 = vmul.f32 %v4581_v58, %v3955_v52  ;;  %vm3993_vm3 = vcmp.eq.f32.partialorder %v3992_v57, 8.507059e+37  ;;  %v4227_v52 = vld [vmem:[#allocation17] sm:$0xff] }
 0xa6b   :  { %v3971_v39 = vmul.f32 %v4583_v17, %v3970_v40 }
 0xa6c   :  { %v4585_v31 = vpop.eup %4584  ;;  %v3957_v51 = vadd.f32 %v4581_v58, %v3956_v19 }
 0xa6d   :  { %v3984_v34 = vmul.f32 %v4585_v31, %v3952_v7  ;;  %v3972_v5 = vadd.f32 %v4583_v17, %v3971_v39  ;;  %v4587_v62 = vpop.eup %4586  ;;  %vm3989_vm0 = vweird.f32 %v4585_v31  ;;  %v4230_v7 = vld [vmem:[#allocation17 + $0x18] sm:$0xff]  ;;  %v7646_v39 = vld [vmem:[#allocation39_spill] sm:$0xff] }
 0xa6e   :  { %v3961_v12 = vsel %vm3960_vm12, %v4581_v58, %v3957_v51  ;;  %vm3990_vm2 = vmor %vm3988_vm1, %vm3989_vm0  ;;  %v2397_v58 = vadd.f32 %v7645_v47, %v7640_v61  ;;  %v2438_v2 = vadd.f32 %v7646_v39, %v7614_v38 }
 0xa6f   :  { %v3985_v29 = vsub.f32 1.0, %v3984_v34  ;;  %v3966_v37 = vsel %vm3963_vm14, %v3965_v60, %v3961_v12  ;;  %v3976_v42 = vsel %vm3975_vm13, %v4583_v17, %v3972_v5 }
 0xa70   :  { %v3981_v55 = vsel %vm3978_vm15, %v3980_v30, %v3976_v42  ;;  %v4001_v10 = vmul.f32 %v4587_v62, %v3966_v37 }
 0xa71   :  { %v3986_v22 = vmul.f32 %v4585_v31, %v3985_v29  ;;  %v4000_v32 = vmul.f32 %v3981_v55, %v7179_v56  ;;  %v4242_v56 = vld [vmem:[#allocation17 + $0x78] sm:$0xff] }
 0xa72   :  { %4247 = vmatpush.msra.mxu0 %v4242_v56 }
 0xa73   :  { %v7223_v50 = vadd.f32 %v4001_v10, %v4000_v32  ;;  %v3987_v3 = vadd.f32 %v4585_v31, %v3986_v22 }
 0xa74   :  { %4248 = vmatpush.msra.mxu0 %v4241_v43 }
 0xa75   :  { %4588 = vtanh.f32 %v7223_v50  ;;  %v3991_v1 = vsel %vm3990_vm2, %v4585_v31, %v3987_v3 }
 0xa76   :  { %v3996_v20 = vsel %vm3993_vm3, %v3995_v16, %v3991_v1  ;;  %4249 = vmatpush.msra.mxu0 %v4240_v54 }
 0xa78   :  { %4250 = vmatpush.msra.mxu0 %v4239_v13 }
 0xa7a   :  { %4251 = vmatpush.msra.mxu0 %v4238_v44 }
 0xa7b   :  { %v4589_v15 = vpop.eup %4588 }
 0xa7c   :  { %v4004_v11 = vmul.f32 %v4589_v15, %v3996_v20  ;;  %4252 = vmatpush.msra.mxu0 %v4237_v63 }
 0xa7e   :  { %4092 = vmatmul.f32.vlgmr.msrb.gmra.mxu0 %v4004_v11  ;;  %4112 = vmatmul.f32.vlgmr.msrb.gmra.mxu1 %v4004_v11 }
 0xa7f   :  { %4132 = vmatmul.f32.vlgmr.msrb.gmra.mxu2 %v4004_v11  ;;  %4152 = vmatmul.f32.vlgmr.msrb.gmra.mxu3 %v4004_v11 }
 0xa80   :  { %4253 = vmatpush.msra.mxu0 %v4236_v14 }
 0xa82   :  { %4254 = vmatpush.msra.mxu0 %v4235_v41 }
 0xa84   :  { %4255 = vmatpush.msra.mxu0 %v4234_v0 }
 0xa86   :  { %4256 = vmatpush.msra.mxu0 %v4233_v48 }
 0xa88   :  { %4257 = vmatpush.msra.mxu0 %v4232_v6 }
 0xa8a   :  { %4258 = vmatpush.msra.mxu0 %v4231_v46 }
 0xa8c   :  { %4259 = vmatpush.msra.mxu0 %v4230_v7 }
 0xa8e   :  { %4260 = vmatpush.msra.mxu0 %v4229_v24 }
 0xa90   :  { %4261 = vmatpush.msra.mxu0 %v4228_v45 }
 0xa92   :  { %4262 = vmatpush.msra.mxu0 %v4227_v52 }
 0xafb   :  { %v4093_v49 = vpop.f32.mrf.mxu0  ;;  %v4113_v18 = vpop.f32.mrf.mxu1 }
 0xafc   :  { %v4156_v53 = vadd.f32 %v4093_v49, %v2315_v8  ;;  %v4157_v27 = vadd.f32 %v4113_v18, %v2356_v9  ;;  %v4349_v18 = vld [vmem:[%s7249_s8] ss:$0 sm:$0xff] }
 0xafe   :  { %v4333_v23 = vmul.f32 -1.442695, %v4156_v53  ;;  %v4334_v28 = vmul.f32 -1.442695, %v4157_v27 }
 0xb00   :  { %4590 = vpow2.f32 %v4333_v23 }
 0xb01   :  { %4592 = vpow2.f32 %v4334_v28 }
 0xb02   :  { %v4133_v21 = vpop.f32.mrf.mxu2  ;;  %v4153_v33 = vpop.f32.mrf.mxu3 }
 0xb03   :  { %v4158_v17 = vadd.f32 %v4133_v21, %v2397_v58  ;;  %v4159_v34 = vadd.f32 %v4153_v33, %v2438_v2 }
 0xb05   :  { %v4335_v26 = vmul.f32 -1.442695, %v4158_v17 }
 0xb06   :  { %v4591_v40 = vpop.eup %4590 }
 0xb07   :  { %v4593_v4 = vpop.eup %4592  ;;  %v4169_v25 = vadd.f32 1.0, %v4591_v40  ;;  %4594 = vpow2.f32 %v4335_v26 }
 0xb08   :  { %v4170_v19 = vadd.f32 1.0, %v4593_v4 }
 0xb09   :  { %4596 = vrcp.f32 %v4169_v25  ;;  %v4183_v29 = vand.u32 2147483648, %v4169_v25  ;;  %v4181_v55 = vand.u32 2147483647, %v4169_v25  ;;  %vm4177_vm6 = vweird.f32 %v4169_v25 }
 0xb0a   :  { %4598 = vrcp.f32 %v4170_v19  ;;  %v4198_v37 = vand.u32 2147483648, %v4170_v19  ;;  %v4196_v22 = vand.u32 2147483647, %v4170_v19  ;;  %vm4192_vm7 = vweird.f32 %v4170_v19 }
 0xb0b   :  { %v4184_v59 = vor.u32 1.1754944e-38, %v4183_v29  ;;  %vm4182_vm10 = vcmp.eq.f32.partialorder %v4181_v55, 8.507059e+37 }
 0xb0c   :  { %v4199_v1 = vor.u32 1.1754944e-38, %v4198_v37  ;;  %vm4197_vm11 = vcmp.eq.f32.partialorder %v4196_v22, 8.507059e+37 }
 0xb0d   :  { %v4595_v61 = vpop.eup %4594 }
 0xb0e   :  { %v4171_v31 = vadd.f32 1.0, %v4595_v61 }
 0xb0f   :  { %v4597_v51 = vpop.eup %4596 }
 0xb10   :  { %v4599_v60 = vpop.eup %4598  ;;  %v4173_v5 = vmul.f32 %v4597_v51, %v4169_v25  ;;  %4600 = vrcp.f32 %v4171_v31  ;;  %vm4178_vm4 = vweird.f32 %v4597_v51  ;;  %v4213_v41 = vand.u32 2147483648, %v4171_v31 }
 0xb11   :  { %v4188_v30 = vmul.f32 %v4599_v60, %v4170_v19  ;;  %4602 = vtanh.f32 %v4159_v34  ;;  %vm4193_vm5 = vweird.f32 %v4599_v60  ;;  %vm4179_vm8 = vmor %vm4177_vm6, %vm4178_vm4  ;;  %vm4207_vm13 = vweird.f32 %v4171_v31 }
 0xb12   :  { %v4174_v12 = vsub.f32 1.0, %v4173_v5  ;;  %vm4194_vm9 = vmor %vm4192_vm7, %vm4193_vm5  ;;  %v4211_v0 = vand.u32 2147483647, %v4171_v31  ;;  %v4214_v8 = vor.u32 1.1754944e-38, %v4213_v41 }
 0xb13   :  { %v4189_v62 = vsub.f32 1.0, %v4188_v30 }
 0xb14   :  { %v4175_v42 = vmul.f32 %v4597_v51, %v4174_v12  ;;  %vm4212_vm15 = vcmp.eq.f32.partialorder %v4211_v0, 8.507059e+37 }
 0xb15   :  { %v4190_v10 = vmul.f32 %v4599_v60, %v4189_v62 }
 0xb16   :  { %v4601_v32 = vpop.eup %4600  ;;  %v4176_v38 = vadd.f32 %v4597_v51, %v4175_v42 }
 0xb17   :  { %v4203_v3 = vmul.f32 %v4601_v32, %v4171_v31  ;;  %v4191_v57 = vadd.f32 %v4599_v60, %v4190_v10  ;;  %v4603_v15 = vpop.eup %4602  ;;  %vm4208_vm12 = vweird.f32 %v4601_v32 }
 0xb18   :  { %v4180_v16 = vsel %vm4179_vm8, %v4597_v51, %v4176_v38  ;;  %vm4209_vm14 = vmor %vm4207_vm13, %vm4208_vm12 }
 0xb19   :  { %v4204_v20 = vsub.f32 1.0, %v4203_v3  ;;  %v4185_v11 = vsel %vm4182_vm10, %v4184_v59, %v4180_v16  ;;  %v4195_v56 = vsel %vm4194_vm9, %v4599_v60, %v4191_v57 }
 0xb1a   :  { %v4200_v43 = vsel %vm4197_vm11, %v4199_v1, %v4195_v56  ;;  %v4220_v54 = vmul.f32 %v4603_v15, %v4185_v11 }
 0xb1b   :  { %v4205_v13 = vmul.f32 %v4601_v32, %v4204_v20  ;;  %v4219_v44 = vmul.f32 %v4200_v43, %v7223_v50 }
 0xb1d   :  { %v4221_v63 = vadd.f32 %v4220_v54, %v4219_v44  ;;  %v4206_v14 = vadd.f32 %v4601_v32, %v4205_v13 }
 0xb1f   :  { %4604 = vtanh.f32 %v4221_v63  ;;  %v4210_v36 = vsel %vm4209_vm14, %v4601_v32, %v4206_v14 }
 0xb20   :  { %v4215_v9 = vsel %vm4212_vm15, %v4214_v8, %v4210_v36 }
 0xb25   :  { %v4605_v35 = vpop.eup %4604 }
 0xb26   :  { %v4223_v49 = vmul.f32 %v4605_v35, %v4215_v9 }
 0xb28   :  { %4263 = vmatmul.f32.vlgmr.msra.gmra.mxu0 %v4223_v49 }
 0xba5   :  { %v4264_v50 = vpop.f32.mrf.mxu0 }
 0xba6   :  { %v4265_v48 = vadd.f32 %v4349_v18, %v4264_v50 }
 0xba8   :  { %4267 = vst [vmem:[#allocation18] sm:$0xff] %v4265_v48 }
 0xba9   :  { %4278 = dma.vmem_to_hbm [thread:$0]  %s4274_s23, 128, %s4276_s25, [#allocation8]  }
 0xbaa   :  { %4806 = dma.done.wait [#allocation8], 128  }
 0xbab   :  { %4807 = vsyncadd [#allocation8], 4294967168 }
 0xbac   :  { %4283 = vsyncpa [#allocation7], 1 }
 0xbad   :  { %4284 = vsyncpa [#allocation10], 1 }
 0xbae   :  { %4285 = vsyncpa [#allocation13], 1 }
 0xbaf   :  { %4286 = vsyncpa [#allocation16], 1 }
 0xbb0   :  { %4287 = vsyncpa [#allocation8], 1 }

</bundles_post_ra>
